<compile_context>
chip_gen: v7x
topology: tpu7x:2x2x1
jax: 0.10.0
libtpu: 0.0.40
codegen_flags: <defaults>
</compile_context>

<pallas_src>
import jax
import jax.numpy as jnp
from jax.experimental import pallas as pl
from jax.experimental.pallas import tpu as pltpu


def _round_up(x, m):
    return ((x + m - 1) // m) * m


# ----------------------------------------------------------------------------
# fused TimeEmbedding kernel: matmul + bias + SiLU + matmul + bias, all in VMEM
# ----------------------------------------------------------------------------
def _time_embedding_kernel(x_ref, w1_ref, b1_ref, w2_ref, b2_ref, o_ref):
    # linear_1: (Mp, n_embd) @ (n_embd, 4n) + b1   -> MXU, f32 accumulation
    h = jnp.dot(x_ref[...], w1_ref[...], preferred_element_type=jnp.float32)
    h = h + b1_ref[...]
    # SiLU: sigmoid lowers to the EUP slot, the multiply to the VPU
    h = h * jax.nn.sigmoid(h)
    # linear_2: (Mp, 4n) @ (4n, 4n) + b2 -- the intermediate never leaves VMEM
    y = jnp.dot(h, w2_ref[...], preferred_element_type=jnp.float32)
    y = y + b2_ref[...]
    o_ref[...] = y.astype(o_ref.dtype)


def time_embedding(x, w1, b1, w2, b2):
    """Fused TimeEmbedding forward.  x: (B, n_embd) -> (B, 4*n_embd)."""
    M, K = x.shape
    K1, N1 = w1.shape
    K2, N2 = w2.shape
    assert K == K1 and N1 == K2, (x.shape, w1.shape, w2.shape)

    # Pad rows only to the f32 sublane minimum (8); never to a 128-row MXU tile.
    Mp = _round_up(max(M, 8), 8)
    xp = x if Mp == M else jnp.pad(x, ((0, Mp - M), (0, 0)))

    out = pl.pallas_call(
        _time_embedding_kernel,
        out_shape=jax.ShapeDtypeStruct((Mp, N2), x.dtype),
        grid=(1,),
        in_specs=[
            pl.BlockSpec((Mp, K), lambda i: (0, 0)),    # x      (full block)
            pl.BlockSpec((K1, N1), lambda i: (0, 0)),   # w1     ~1.6 MiB
            pl.BlockSpec((1, N1), lambda i: (0, 0)),    # b1     (full array)
            pl.BlockSpec((K2, N2), lambda i: (0, 0)),   # w2     ~6.5 MiB
            pl.BlockSpec((1, N2), lambda i: (0, 0)),    # b2     (full array)
        ],
        out_specs=pl.BlockSpec((Mp, N2), lambda i: (0, 0)),
        compiler_params=pltpu.CompilerParams(
            dimension_semantics=("arbitrary",),
            # Everything resident: ~8 MiB of weights; 32 MiB is safely within
            # physical VMEM on v5e/v6e (128 MiB) and v7x (64 MiB).
            vmem_limit_bytes=32 * 1024 * 1024,
        ),
    )(xp, w1, b1.reshape(1, N1), w2, b2.reshape(1, N2))
    return out[:M]


# ----------------------------------------------------------------------------
# deterministic synthetic parameters + pure-JAX reference
# ----------------------------------------------------------------------------
def init_time_embedding(key, n_embd=320, scale=0.02):
    k1, k2, k3, k4 = jax.random.split(key, 4)
    return {
        "w1": jax.random.normal(k1, (n_embd, 4 * n_embd), jnp.float32) * scale,
        "b1": jax.random.normal(k2, (4 * n_embd,), jnp.float32) * scale,
        "w2": jax.random.normal(k3, (4 * n_embd, 4 * n_embd), jnp.float32) * scale,
        "b2": jax.random.normal(k4, (4 * n_embd,), jnp.float32) * scale,
    }


def time_embedding_ref(x, p):
    h = x @ p["w1"] + p["b1"]
    h = h * jax.nn.sigmoid(h)
    return h @ p["w2"] + p["b2"]


# ----------------------------------------------------------------------------
if __name__ == "__main__":
    key = jax.random.PRNGKey(0)
    k_x, k_p = jax.random.split(key)

    n_embd = 320
    # Stable-Diffusion passes a (1, 320) time vector into TimeEmbedding.
    x = jax.random.normal(k_x, (1, n_embd), jnp.float32)
    params = init_time_embedding(k_p, n_embd)

    out = time_embedding(x, params["w1"], params["b1"], params["w2"], params["b2"])
    out = jax.block_until_ready(out)

    assert out.shape == (1, 4 * n_embd), out.shape
    assert bool(jnp.all(jnp.isfinite(out)))

    ref = time_embedding_ref(x, params)
    assert bool(jnp.allclose(out, ref, rtol=1e-2, atol=1e-2)), float(
        jnp.max(jnp.abs(out - ref)))

    print("KERNEL_OK")
</pallas_src>

<mosaic_0001>
module attributes {stable_mosaic.version = 11 : i64} {
  func.func @_time_embedding_kernel(%arg0: i32, %arg1: memref<8x320xf32, #tpu.memory_space<vmem>>, %arg2: memref<320x1280xf32, #tpu.memory_space<vmem>>, %arg3: memref<1x1280xf32, #tpu.memory_space<vmem>>, %arg4: memref<1280x1280xf32, #tpu.memory_space<vmem>>, %arg5: memref<1x1280xf32, #tpu.memory_space<vmem>>, %arg6: memref<8x1280xf32, #tpu.memory_space<vmem>>) attributes {dimension_semantics = [#tpu.dimension_semantics<arbitrary>], iteration_bounds = array<i64: 1>, scalar_prefetch = 0 : i64, scratch_operands = 0 : i64, tpu.core_type = #tpu.core_type<tc>, window_params = [{pipeline_mode = #tpu.pipeline_mode<synchronous>, transform_indices = @transform_0, window_bounds = array<i64: 8, 320>}, {pipeline_mode = #tpu.pipeline_mode<synchronous>, transform_indices = @transform_1, window_bounds = array<i64: 320, 1280>}, {pipeline_mode = #tpu.pipeline_mode<synchronous>, transform_indices = @transform_2, window_bounds = array<i64: 1, 1280>}, {pipeline_mode = #tpu.pipeline_mode<synchronous>, transform_indices = @transform_3, window_bounds = array<i64: 1280, 1280>}, {pipeline_mode = #tpu.pipeline_mode<synchronous>, transform_indices = @transform_4, window_bounds = array<i64: 1, 1280>}, {pipeline_mode = #tpu.pipeline_mode<synchronous>, transform_indices = @transform_5, window_bounds = array<i64: 8, 1280>}]} {
    %c0 = arith.constant 0 : index
    %c0_0 = arith.constant 0 : index
    %0 = vector.load %arg1[%c0, %c0_0] : memref<8x320xf32, #tpu.memory_space<vmem>>, vector<8x320xf32>
    %c0_1 = arith.constant 0 : index
    %c0_2 = arith.constant 0 : index
    %1 = vector.load %arg2[%c0_1, %c0_2] : memref<320x1280xf32, #tpu.memory_space<vmem>>, vector<320x1280xf32>
    %cst = arith.constant dense<0.000000e+00> : vector<8x1280xf32>
    %2 = tpu.matmul %0, %1, %cst {dimension_numbers = #tpu.dot_dimension_numbers<[1], [0], [0], [1], [0, 0, 1, 1], [], []>} : vector<8x320xf32>, vector<320x1280xf32>, vector<8x1280xf32> -> vector<8x1280xf32>
    %c0_3 = arith.constant 0 : index
    %c0_4 = arith.constant 0 : index
    %3 = vector.load %arg3[%c0_3, %c0_4] : memref<1x1280xf32, #tpu.memory_space<vmem>>, vector<1x1280xf32>
    %4 = vector.broadcast %3 : vector<1x1280xf32> to vector<8x1280xf32>
    %5 = arith.addf %2, %4 : vector<8x1280xf32>
    %6 = arith.negf %5 : vector<8x1280xf32>
    %7 = math.exp %6 : vector<8x1280xf32>
    %cst_5 = arith.constant 1.000000e+00 : f32
    %8 = vector.broadcast %cst_5 : f32 to vector<8x1280xf32>
    %9 = arith.addf %8, %7 : vector<8x1280xf32>
    %10 = arith.divf %8, %9 : vector<8x1280xf32>
    %11 = arith.mulf %5, %10 : vector<8x1280xf32>
    %c0_6 = arith.constant 0 : index
    %c0_7 = arith.constant 0 : index
    %12 = vector.load %arg4[%c0_6, %c0_7] : memref<1280x1280xf32, #tpu.memory_space<vmem>>, vector<1280x1280xf32>
    %cst_8 = arith.constant dense<0.000000e+00> : vector<8x1280xf32>
    %13 = tpu.matmul %11, %12, %cst_8 {dimension_numbers = #tpu.dot_dimension_numbers<[1], [0], [0], [1], [0, 0, 1, 1], [], []>} : vector<8x1280xf32>, vector<1280x1280xf32>, vector<8x1280xf32> -> vector<8x1280xf32>
    %c0_9 = arith.constant 0 : index
    %c0_10 = arith.constant 0 : index
    %14 = vector.load %arg5[%c0_9, %c0_10] : memref<1x1280xf32, #tpu.memory_space<vmem>>, vector<1x1280xf32>
    %15 = vector.broadcast %14 : vector<1x1280xf32> to vector<8x1280xf32>
    %16 = arith.addf %13, %15 : vector<8x1280xf32>
    %c0_11 = arith.constant 0 : index
    %c0_12 = arith.constant 0 : index
    %17 = vector.load %arg6[%c0_11, %c0_12] : memref<8x1280xf32, #tpu.memory_space<vmem>>, vector<8x1280xf32>
    tpu.vector_store %arg6[%c0_11, %c0_12], %16 {strides = array<i32>} : memref<8x1280xf32, #tpu.memory_space<vmem>>, vector<8x1280xf32>,
    return
  }
  func.func @transform_0(%arg0: i32) -> (i32, i32) {
    %c0_i32 = arith.constant 0 : i32
    %c0_i32_0 = arith.constant 0 : i32
    %c0_i32_1 = arith.constant 0 : i32
    return %c0_i32, %c0_i32_0 : i32, i32
  }
  func.func @transform_1(%arg0: i32) -> (i32, i32) {
    %c0_i32 = arith.constant 0 : i32
    %c0_i32_0 = arith.constant 0 : i32
    %c0_i32_1 = arith.constant 0 : i32
    return %c0_i32, %c0_i32_0 : i32, i32
  }
  func.func @transform_2(%arg0: i32) -> (i32, i32) {
    %c0_i32 = arith.constant 0 : i32
    %c0_i32_0 = arith.constant 0 : i32
    %c0_i32_1 = arith.constant 0 : i32
    return %c0_i32, %c0_i32_0 : i32, i32
  }
  func.func @transform_3(%arg0: i32) -> (i32, i32) {
    %c0_i32 = arith.constant 0 : i32
    %c0_i32_0 = arith.constant 0 : i32
    %c0_i32_1 = arith.constant 0 : i32
    return %c0_i32, %c0_i32_0 : i32, i32
  }
  func.func @transform_4(%arg0: i32) -> (i32, i32) {
    %c0_i32 = arith.constant 0 : i32
    %c0_i32_0 = arith.constant 0 : i32
    %c0_i32_1 = arith.constant 0 : i32
    return %c0_i32, %c0_i32_0 : i32, i32
  }
  func.func @transform_5(%arg0: i32) -> (i32, i32) {
    %c0_i32 = arith.constant 0 : i32
    %c0_i32_0 = arith.constant 0 : i32
    %c0_i32_1 = arith.constant 0 : i32
    return %c0_i32, %c0_i32_0 : i32, i32
  }
}

</mosaic_0001>

<bundles_post_ra>
// kernel: tpu_custom_call.1
= control target key start
LH: loop header
LB: loop body
LE: loop exit
PB: predicated region body
PF: predicated region fallthrough
CT: control target
= control target key end

     0   :  { %10 = vsyncpa [#allocation3], 0  ;;  %s7396_s0 = inlined_call_operand.hbm [shape: f32[8,320], index: 0, kind: input, shape index: {}]   ;;  %s7397_s1 = inlined_call_operand.hbm [shape: f32[320,1280], index: 1, kind: input, shape index: {}]   ;;  %s7398_s2 = inlined_call_operand.hbm [shape: f32[1,1280], index: 2, kind: input, shape index: {}]   ;;  %s7399_s3 = inlined_call_operand.hbm [shape: f32[1280,1280], index: 3, kind: input, shape index: {}]   ;;  %s7400_s4 = inlined_call_operand.hbm [shape: f32[1,1280], index: 4, kind: input, shape index: {}]   ;;  %s7401_s5 = inlined_call_operand.hbm [shape: f32[8,1280], index: 5, kind: output, shape index: {}]  }
   0x1   :  { %11 = vsyncpa [#allocation6], 0 }
   0x2   :  { %12 = vsyncpa [#allocation9], 0 }
   0x3   :  { %13 = vsyncpa [#allocation4], 0  ;;  %s7059_s18 = smov [#allocation5]   ;;  %s6919_s22 = scalar_lea.hbm %s7397_s1, 51200 }
   0x4   :  { %s29_s19 = sshll.u32 %s7059_s18, 4  ;;  %p6920_p0 = scmp.ne.s32.totalorder %s7397_s1, %s6919_s22  ;;  %s30_s19 = int_to_ptr.vmem [resolvable:$true] %s29_s19 }
   0x5   :  { %p6923_p1 = scmp.lt.u32.totalorder %s6919_s22, %s7397_s1 }
   0x7   :  { %p6925_p2 = pnand %p6923_p1, %p6920_p0 }
   0x9   :  { %6928 = shalt.err (!%p6925_p2)
}
   0xa   :  { %s6929_s27 = scalar_lea.vmem %s30_s19, 51200  ;;  %p6934_p4 = scmp.lt.s32.totalorder %s30_s19, %s30_s19 }
   0xb   :  { %p6930_p3 = scmp.ne.s32.totalorder %s30_s19, %s6929_s27  ;;  %p6935_p5 = scmp.lt.s32.totalorder %s6929_s27, %s6929_s27 }
   0xd   :  { %p6936_p6 = por %p6935_p5, %p6934_p4 }
   0xf   :  { %p6937_p7 = pnand %p6936_p6, %p6930_p3 }
  0x11   :  { %6940 = shalt.err (!%p6937_p7)
}
  0x12   :  { %s7060_s28 = smov 1280   ;;  %s7061_s29 = smov 80  }
  0x13   :  { %35 = dma.hbm_to_vmem [thread:$0]  %s7397_s1, 51200, %s30_s19, [#allocation6], %s7060_s28, %s7060_s28, %s7061_s29  }
  0x14   :  { %s7062_s7 = smov [#allocation8]   ;;  %s7063_s9 = smov [#allocation2]  }
  0x15   :  { %s51_s8 = sshll.u32 %s7062_s7, 4  ;;  %s20_s10 = sshll.u32 %s7063_s9, 4  ;;  %s52_s8 = int_to_ptr.vmem [resolvable:$true] %s51_s8  ;;  %s21_s10 = int_to_ptr.vmem [resolvable:$true] %s20_s10 }
  0x16   :  { %s6941_s13 = scalar_lea.hbm %s7399_s3, 204800 }
  0x17   :  { %p6942_p8 = scmp.ne.s32.totalorder %s7399_s3, %s6941_s13  ;;  %p6945_p9 = scmp.lt.u32.totalorder %s6941_s13, %s7399_s3 }
  0x19   :  { %p6947_p10 = pnand %p6945_p9, %p6942_p8 }
  0x1b   :  { %6950 = shalt.err (!%p6947_p10)
}
  0x1c   :  { %s6951_s1 = scalar_lea.vmem %s52_s8, 204800  ;;  %p6956_p12 = scmp.lt.s32.totalorder %s52_s8, %s52_s8 }
  0x1d   :  { %p6952_p11 = scmp.ne.s32.totalorder %s52_s8, %s6951_s1  ;;  %p6957_p13 = scmp.lt.s32.totalorder %s6951_s1, %s6951_s1 }
  0x1f   :  { %p6958_p0 = por %p6957_p13, %p6956_p12 }
  0x21   :  { %p6959_p1 = pnand %p6958_p0, %p6952_p11 }
  0x23   :  { %6962 = shalt.err (!%p6959_p1)
}
  0x24   :  { %57 = dma.hbm_to_vmem [thread:$0]  %s7399_s3, 204800, %s52_s8, [#allocation9], %s7060_s28, %s7060_s28, %s7061_s29  }
  0x25   :  { %s6963_s22 = scalar_lea.hbm %s7396_s0, 384 }
  0x26   :  { %p6964_p2 = scmp.ne.s32.totalorder %s7396_s0, %s6963_s22  ;;  %p6967_p3 = scmp.lt.u32.totalorder %s6963_s22, %s7396_s0 }
  0x28   :  { %p6969_p4 = pnand %p6967_p3, %p6964_p2 }
  0x2a   :  { %6972 = shalt.err (!%p6969_p4)
}
  0x2b   :  { %s6973_s27 = scalar_lea.vmem %s21_s10, 384  ;;  %p6978_p6 = scmp.lt.s32.totalorder %s21_s10, %s21_s10 }
  0x2c   :  { %p6974_p5 = scmp.ne.s32.totalorder %s21_s10, %s6973_s27  ;;  %p6979_p7 = scmp.lt.s32.totalorder %s6973_s27, %s6973_s27 }
  0x2e   :  { %p6980_p8 = por %p6979_p7, %p6978_p6 }
  0x30   :  { %p6981_p9 = pnand %p6980_p8, %p6974_p5 }
  0x32   :  { %6984 = shalt.err (!%p6981_p9)
}
  0x33   :  { %23 = dma.hbm_to_vmem [thread:$0]  %s7396_s0, 384, %s21_s10, [#allocation3]  }
  0x34   :  { %s7064_s29 = smov [#allocation7]   ;;  %s7065_s6 = smov [#allocation10]  }
  0x35   :  { %s42_s30 = sshll.u32 %s7064_s29, 4  ;;  %s64_s7 = sshll.u32 %s7065_s6, 4  ;;  %s43_s30 = int_to_ptr.vmem [resolvable:$true] %s42_s30  ;;  %s65_s7 = int_to_ptr.vmem [resolvable:$true] %s64_s7 }
  0x36   :  { %s6985_s11 = scalar_lea.hbm %s7398_s2, 160 }
  0x37   :  { %p6986_p10 = scmp.ne.s32.totalorder %s7398_s2, %s6985_s11  ;;  %p6989_p11 = scmp.lt.u32.totalorder %s6985_s11, %s7398_s2 }
  0x39   :  { %p6991_p12 = pnand %p6989_p11, %p6986_p10 }
  0x3b   :  { %6994 = shalt.err (!%p6991_p12)
}
  0x3c   :  { %s6995_s0 = scalar_lea.vmem %s43_s30, 160  ;;  %p7000_p0 = scmp.lt.s32.totalorder %s43_s30, %s43_s30 }
  0x3d   :  { %p6996_p13 = scmp.ne.s32.totalorder %s43_s30, %s6995_s0  ;;  %p7001_p1 = scmp.lt.s32.totalorder %s6995_s0, %s6995_s0 }
  0x3f   :  { %p7002_p2 = por %p7001_p1, %p7000_p0 }
  0x41   :  { %p7003_p3 = pnand %p7002_p2, %p6996_p13 }
  0x43   :  { %7006 = shalt.err (!%p7003_p3)
}
  0x44   :  { %45 = dma.hbm_to_vmem [thread:$0]  %s7398_s2, 160, %s43_s30, [#allocation6]  }
  0x45   :  { %s7007_s18 = scalar_lea.hbm %s7400_s4, 160 }
  0x46   :  { %p7008_p4 = scmp.ne.s32.totalorder %s7400_s4, %s7007_s18  ;;  %p7011_p5 = scmp.lt.u32.totalorder %s7007_s18, %s7400_s4 }
  0x48   :  { %p7013_p6 = pnand %p7011_p5, %p7008_p4 }
  0x4a   :  { %7016 = shalt.err (!%p7013_p6)
}
  0x4b   :  { %s7017_s23 = scalar_lea.vmem %s65_s7, 160  ;;  %p7022_p8 = scmp.lt.s32.totalorder %s65_s7, %s65_s7 }
  0x4c   :  { %p7018_p7 = scmp.ne.s32.totalorder %s65_s7, %s7017_s23  ;;  %p7023_p9 = scmp.lt.s32.totalorder %s7017_s23, %s7017_s23 }
  0x4e   :  { %p7024_p10 = por %p7023_p9, %p7022_p8 }
  0x50   :  { %p7025_p11 = pnand %p7024_p10, %p7018_p7 }
  0x52   :  { %7028 = shalt.err (!%p7025_p11)
}
  0x53   :  { %67 = dma.hbm_to_vmem [thread:$0]  %s7400_s4, 160, %s65_s7, [#allocation9]  }
  0x54   :  { %7051 = dma.done.wait [#allocation3], 384  }
  0x55   :  { %7052 = vsyncadd [#allocation3], 4294966912 }
  0x56   :  { %7053 = dma.done.wait [#allocation6], 51360  }
  0x57   :  { %7054 = vsyncadd [#allocation6], 4294915936 }
  0x58   :  { %7055 = dma.done.wait [#allocation9], 204960  }
  0x59   :  { %7056 = vsyncadd [#allocation9], 4294762336  ;;  %v7066_v0 = vmov 0.0   ;;  %v87_v1 = vld [vmem:[#allocation5 + $0x8] sm:$0xff]  ;;  %v97_v2 = vld [vmem:[#allocation5 + $0x58] sm:$0xff]  ;;  %vm540_vm0 = vcmask 523264  }
  0x5a   :  { %821 = vmatprep.mubr.f32.mxu1 %v7066_v0  ;;  %v86_v3 = vld [vmem:[#allocation5] sm:$0xff]  ;;  %v4795_v4 = vpack.c.bf16 %v97_v2, %v87_v1  ;;  %v96_v5 = vld [vmem:[#allocation5 + $0x50] sm:$0xff]  ;;  %v107_v6 = vld [vmem:[#allocation5 + $0xa8] sm:$0xff]  ;;  %s7067_s4 = smov [#allocation11]  }
  0x5b   :  { %v117_v7 = vld [vmem:[#allocation5 + $0xf8] sm:$0xff]  ;;  %v4797_v8 = vpack.c.bf16 %v96_v5, %v86_v3  ;;  %v106_v10 = vld [vmem:[#allocation5 + $0xa0] sm:$0xff]  ;;  %v116_v11 = vld [vmem:[#allocation5 + $0xf0] sm:$0xff]  ;;  %s4769_s25 = sshll.u32 %s7067_s4, 4  ;;  %s4770_s25 = int_to_ptr.vmem [resolvable:$true] %s4769_s25 }
  0x5c   :  { %v4799_v9 = vpack.c.bf16 %v117_v7, %v107_v6  ;;  %v127_v12 = vld [vmem:[#allocation5 + $0x148] sm:$0xff]  ;;  %4796 = vmatprep.subr.bf16.mxu0 %v4795_v4  ;;  %v137_v13 = vld [vmem:[#allocation5 + $0x198] sm:$0xff]  ;;  %v4801_v14 = vpack.c.bf16 %v116_v11, %v106_v10  ;;  %v126_v16 = vld [vmem:[#allocation5 + $0x140] sm:$0xff]  ;;  %s7029_s26 = scalar_lea.vmem %s4770_s25, 1280  ;;  %p7034_p13 = scmp.lt.s32.totalorder %s4770_s25, %s4770_s25 }
  0x5d   :  { %4798 = vmatpush1.bf16.msra.mxu0 %v4797_v8  ;;  %v4803_v15 = vpack.c.bf16 %v137_v13, %v127_v12  ;;  %v136_v17 = vld [vmem:[#allocation5 + $0x190] sm:$0xff]  ;;  %v147_v18 = vld [vmem:[#allocation5 + $0x1e8] sm:$0xff]  ;;  %v157_v19 = vld [vmem:[#allocation5 + $0x238] sm:$0xff]  ;;  %p7030_p12 = scmp.ne.s32.totalorder %s4770_s25, %s7029_s26  ;;  %p7035_p0 = scmp.lt.s32.totalorder %s7029_s26, %s7029_s26 }
  0x5e   :  { %4800 = vmatprep.subr.bf16.mxu0 %v4799_v9  ;;  %v4805_v20 = vpack.c.bf16 %v136_v17, %v126_v16  ;;  %v4807_v21 = vpack.c.bf16 %v157_v19, %v147_v18  ;;  %v146_v22 = vld [vmem:[#allocation5 + $0x1e0] sm:$0xff]  ;;  %v156_v23 = vld [vmem:[#allocation5 + $0x230] sm:$0xff]  ;;  %v167_v24 = vld [vmem:[#allocation5 + $0x288] sm:$0xff] }
  0x5f   :  { %v177_v25 = vld [vmem:[#allocation5 + $0x2d8] sm:$0xff]  ;;  %v4809_v26 = vpack.c.bf16 %v156_v23, %v146_v22  ;;  %v166_v28 = vld [vmem:[#allocation5 + $0x280] sm:$0xff]  ;;  %v176_v29 = vld [vmem:[#allocation5 + $0x2d0] sm:$0xff]  ;;  %p7036_p1 = por %p7035_p0, %p7034_p13 }
  0x60   :  { %v4811_v27 = vpack.c.bf16 %v177_v25, %v167_v24  ;;  %v187_v30 = vld [vmem:[#allocation5 + $0x328] sm:$0xff]  ;;  %v197_v31 = vld [vmem:[#allocation5 + $0x378] sm:$0xff]  ;;  %v4813_v32 = vpack.c.bf16 %v176_v29, %v166_v28  ;;  %v186_v34 = vld [vmem:[#allocation5 + $0x320] sm:$0xff] }
  0x61   :  { %4802 = vmatpush1.bf16.msra.mxu0 %v4801_v14  ;;  %v4815_v33 = vpack.c.bf16 %v197_v31, %v187_v30  ;;  %v196_v35 = vld [vmem:[#allocation5 + $0x370] sm:$0xff]  ;;  %v207_v36 = vld [vmem:[#allocation5 + $0x3c8] sm:$0xff]  ;;  %v217_v37 = vld [vmem:[#allocation5 + $0x418] sm:$0xff]  ;;  %p7037_p2 = pnand %p7036_p1, %p7030_p12 }
  0x62   :  { %4804 = vmatprep.subr.bf16.mxu0 %v4803_v15  ;;  %v4817_v38 = vpack.c.bf16 %v196_v35, %v186_v34  ;;  %v4819_v39 = vpack.c.bf16 %v217_v37, %v207_v36  ;;  %v206_v40 = vld [vmem:[#allocation5 + $0x3c0] sm:$0xff]  ;;  %v216_v41 = vld [vmem:[#allocation5 + $0x410] sm:$0xff]  ;;  %v227_v43 = vld [vmem:[#allocation5 + $0x468] sm:$0xff] }
  0x63   :  { %v7159_v42 = vld [vmem:[#allocation2 + $0x8] sm:$0xff]  ;;  %v237_v44 = vld [vmem:[#allocation5 + $0x4b8] sm:$0xff]  ;;  %v4821_v45 = vpack.c.bf16 %v216_v41, %v206_v40  ;;  %v226_v47 = vld [vmem:[#allocation5 + $0x460] sm:$0xff] }
  0x64   :  { %608 = vmatprep.mubr.f32.mxu0 %v7159_v42  ;;  %v4823_v46 = vpack.c.bf16 %v237_v44, %v227_v43  ;;  %v236_v48 = vld [vmem:[#allocation5 + $0x4b0] sm:$0xff]  ;;  %v247_v49 = vld [vmem:[#allocation5 + $0x508] sm:$0xff]  ;;  %v257_v50 = vld [vmem:[#allocation5 + $0x558] sm:$0xff] }
  0x65   :  { %4806 = vmatpush1.bf16.msra.mxu0 %v4805_v20  ;;  %v4825_v51 = vpack.c.bf16 %v236_v48, %v226_v47  ;;  %v4827_v52 = vpack.c.bf16 %v257_v50, %v247_v49  ;;  %v246_v53 = vld [vmem:[#allocation5 + $0x500] sm:$0xff]  ;;  %v256_v54 = vld [vmem:[#allocation5 + $0x550] sm:$0xff]  ;;  %v267_v55 = vld [vmem:[#allocation5 + $0x5a8] sm:$0xff] }
  0x66   :  { %4808 = vmatprep.subr.bf16.mxu0 %v4807_v21  ;;  %v277_v56 = vld [vmem:[#allocation5 + $0x5f8] sm:$0xff]  ;;  %v4829_v57 = vpack.c.bf16 %v256_v54, %v246_v53  ;;  %v266_v59 = vld [vmem:[#allocation5 + $0x5a0] sm:$0xff]  ;;  %v276_v60 = vld [vmem:[#allocation5 + $0x5f0] sm:$0xff] }
  0x67   :  { %v4831_v58 = vpack.c.bf16 %v277_v56, %v267_v55  ;;  %v287_v61 = vld [vmem:[#allocation5 + $0x648] sm:$0xff]  ;;  %v297_v62 = vld [vmem:[#allocation5 + $0x698] sm:$0xff]  ;;  %v4833_v63 = vpack.c.bf16 %v276_v60, %v266_v59  ;;  %v286_v2 = vld [vmem:[#allocation5 + $0x640] sm:$0xff] }
  0x68   :  { %v4835_v1 = vpack.c.bf16 %v297_v62, %v287_v61  ;;  %v296_v3 = vld [vmem:[#allocation5 + $0x690] sm:$0xff]  ;;  %v307_v4 = vld [vmem:[#allocation5 + $0x6e8] sm:$0xff]  ;;  %v317_v5 = vld [vmem:[#allocation5 + $0x738] sm:$0xff] }
  0x69   :  { %4810 = vmatpush1.bf16.msra.mxu0 %v4809_v26  ;;  %v4837_v6 = vpack.c.bf16 %v296_v3, %v286_v2  ;;  %v4839_v7 = vpack.c.bf16 %v317_v5, %v307_v4  ;;  %v306_v8 = vld [vmem:[#allocation5 + $0x6e0] sm:$0xff]  ;;  %v316_v9 = vld [vmem:[#allocation5 + $0x730] sm:$0xff]  ;;  %v327_v10 = vld [vmem:[#allocation5 + $0x788] sm:$0xff] }
  0x6a   :  { %4812 = vmatprep.subr.bf16.mxu0 %v4811_v27  ;;  %v337_v11 = vld [vmem:[#allocation5 + $0x7d8] sm:$0xff]  ;;  %v4841_v12 = vpack.c.bf16 %v316_v9, %v306_v8  ;;  %v326_v13 = vld [vmem:[#allocation5 + $0x780] sm:$0xff]  ;;  %v336_v14 = vld [vmem:[#allocation5 + $0x7d0] sm:$0xff] }
  0x6b   :  { %v4843_v15 = vpack.c.bf16 %v337_v11, %v327_v10  ;;  %v409_v16 = vld [vmem:[#allocation5 + $0xa18] sm:$0xff]  ;;  %v419_v17 = vld [vmem:[#allocation5 + $0xa68] sm:$0xff]  ;;  %v408_v18 = vld [vmem:[#allocation5 + $0xa10] sm:$0xff]  ;;  %v4845_v25 = vpack.c.bf16 %v336_v14, %v326_v13 }
  0x6c   :  { %v347_v19 = vld [vmem:[#allocation5 + $0x828] sm:$0xff]  ;;  %v357_v20 = vld [vmem:[#allocation5 + $0x878] sm:$0xff]  ;;  %v4939_v21 = vpack.c.bf16 %v419_v17, %v409_v16  ;;  %v418_v22 = vld [vmem:[#allocation5 + $0xa60] sm:$0xff] }
  0x6d   :  { %4814 = vmatpush1.bf16.msra.mxu0 %v4813_v32  ;;  %v4941_v23 = vpack.c.bf16 %v418_v22, %v408_v18  ;;  %v429_v24 = vld [vmem:[#allocation5 + $0xab8] sm:$0xff]  ;;  %v439_v26 = vld [vmem:[#allocation5 + $0xb08] sm:$0xff]  ;;  %v428_v27 = vld [vmem:[#allocation5 + $0xab0] sm:$0xff]  ;;  %v4847_v29 = vpack.c.bf16 %v357_v20, %v347_v19 }
  0x6e   :  { %4816 = vmatprep.subr.bf16.mxu0 %v4815_v33  ;;  %4940 = vmatprep.subr.bf16.mxu1 %v4939_v21  ;;  %v438_v28 = vld [vmem:[#allocation5 + $0xb00] sm:$0xff]  ;;  %v356_v31 = vld [vmem:[#allocation5 + $0x870] sm:$0xff]  ;;  %v367_v32 = vld [vmem:[#allocation5 + $0x8c8] sm:$0xff]  ;;  %v4943_v33 = vpack.c.bf16 %v439_v26, %v429_v24 }
  0x6f   :  { %v346_v30 = vld [vmem:[#allocation5 + $0x820] sm:$0xff]  ;;  %4942 = vmatpush1.bf16.msra.mxu1 %v4941_v23  ;;  %v4945_v34 = vpack.c.bf16 %v438_v28, %v428_v27  ;;  %v377_v35 = vld [vmem:[#allocation5 + $0x918] sm:$0xff]  ;;  %v459_v37 = vld [vmem:[#allocation5 + $0xba8] sm:$0xff] }
  0x70   :  { %v449_v36 = vld [vmem:[#allocation5 + $0xb58] sm:$0xff]  ;;  %4944 = vmatprep.subr.bf16.mxu1 %v4943_v33  ;;  %v458_v40 = vld [vmem:[#allocation5 + $0xba0] sm:$0xff]  ;;  %v4849_v41 = vpack.c.bf16 %v356_v31, %v346_v30  ;;  %v376_v44 = vld [vmem:[#allocation5 + $0x910] sm:$0xff] }
  0x71   :  { %4818 = vmatpush1.bf16.msra.mxu0 %v4817_v38  ;;  %v4947_v38 = vpack.c.bf16 %v459_v37, %v449_v36  ;;  %v366_v43 = vld [vmem:[#allocation5 + $0x8c0] sm:$0xff]  ;;  %v469_v48 = vld [vmem:[#allocation5 + $0xbf8] sm:$0xff]  ;;  %v479_v49 = vld [vmem:[#allocation5 + $0xc48] sm:$0xff] }
  0x72   :  { %4820 = vmatprep.subr.bf16.mxu0 %v4819_v39  ;;  %v448_v39 = vld [vmem:[#allocation5 + $0xb50] sm:$0xff]  ;;  %v397_v50 = vld [vmem:[#allocation5 + $0x9b8] sm:$0xff]  ;;  %v478_v53 = vld [vmem:[#allocation5 + $0xc40] sm:$0xff]  ;;  %v4853_v54 = vpack.c.bf16 %v376_v44, %v366_v43 }
  0x73   :  { %4946 = vmatpush1.bf16.msra.mxu1 %v4945_v34  ;;  %v4949_v47 = vpack.c.bf16 %v458_v40, %v448_v39  ;;  %v386_v56 = vld [vmem:[#allocation5 + $0x960] sm:$0xff]  ;;  %v407_v59 = vld [vmem:[#allocation5 + $0xa08] sm:$0xff]  ;;  %v417_v60 = vld [vmem:[#allocation5 + $0xa58] sm:$0xff] }
  0x74   :  { %4948 = vmatprep.subr.bf16.mxu1 %v4947_v38  ;;  %v4859_v62 = vpack.c.bf16 %v417_v60, %v407_v59  ;;  %v427_v2 = vld [vmem:[#allocation5 + $0xaa8] sm:$0xff]  ;;  %v437_v3 = vld [vmem:[#allocation5 + $0xaf8] sm:$0xff]  ;;  %v426_v8 = vld [vmem:[#allocation5 + $0xaa0] sm:$0xff] }
  0x75   :  { %4822 = vmatpush1.bf16.msra.mxu0 %v4821_v45  ;;  %v4851_v45 = vpack.c.bf16 %v377_v35, %v367_v32  ;;  %v7162_v4 = vld [vmem:[#allocation2 + $0x10] sm:$0xff]  ;;  %v7164_v5 = vld [vmem:[#allocation2] sm:$0xff]  ;;  %v436_v9 = vld [vmem:[#allocation5 + $0xaf0] sm:$0xff] }
  0x76   :  { %4824 = vmatprep.subr.bf16.mxu0 %v4823_v46  ;;  %v387_v46 = vld [vmem:[#allocation5 + $0x968] sm:$0xff]  ;;  %v457_v11 = vld [vmem:[#allocation5 + $0xb98] sm:$0xff]  ;;  %v446_v14 = vld [vmem:[#allocation5 + $0xb40] sm:$0xff] }
  0x77   :  { %v4855_v55 = vpack.c.bf16 %v397_v50, %v387_v46  ;;  %4950 = vmatpush1.bf16.msra.mxu1 %v4949_v47  ;;  %v447_v10 = vld [vmem:[#allocation5 + $0xb48] sm:$0xff]  ;;  %v477_v17 = vld [vmem:[#allocation5 + $0xc38] sm:$0xff]  ;;  %v466_v20 = vld [vmem:[#allocation5 + $0xbe0] sm:$0xff] }
  0x78   :  { %v4867_v13 = vpack.c.bf16 %v457_v11, %v447_v10  ;;  %v467_v16 = vld [vmem:[#allocation5 + $0xbe8] sm:$0xff]  ;;  %v476_v21 = vld [vmem:[#allocation5 + $0xc30] sm:$0xff]  ;;  %v89_v22 = vld [vmem:[#allocation5 + $0x18] sm:$0xff] }
  0x79   :  { %4826 = vmatpush1.bf16.msra.mxu0 %v4825_v51  ;;  %v4951_v51 = vpack.c.bf16 %v479_v49, %v469_v48  ;;  %v4871_v19 = vpack.c.bf16 %v477_v17, %v467_v16  ;;  %v99_v23 = vld [vmem:[#allocation5 + $0x68] sm:$0xff]  ;;  %v4873_v24 = vpack.c.bf16 %v476_v21, %v466_v20  ;;  %v88_v26 = vld [vmem:[#allocation5 + $0x10] sm:$0xff]  ;;  %v98_v27 = vld [vmem:[#allocation5 + $0x60] sm:$0xff] }
  0x7a   :  { %4828 = vmatprep.subr.bf16.mxu0 %v4827_v52  ;;  %v468_v52 = vld [vmem:[#allocation5 + $0xbf0] sm:$0xff]  ;;  %v109_v28 = vld [vmem:[#allocation5 + $0xb8] sm:$0xff]  ;;  %v4877_v30 = vpack.c.bf16 %v98_v27, %v88_v26  ;;  %v118_v33 = vld [vmem:[#allocation5 + $0x100] sm:$0xff] }
  0x7b   :  { %4952 = vmatprep.subr.bf16.mxu1 %v4951_v51  ;;  %v108_v32 = vld [vmem:[#allocation5 + $0xb0] sm:$0xff]  ;;  %v129_v34 = vld [vmem:[#allocation5 + $0x158] sm:$0xff]  ;;  %v139_v35 = vld [vmem:[#allocation5 + $0x1a8] sm:$0xff] }
  0x7c   :  { %v4881_v36 = vpack.c.bf16 %v118_v33, %v108_v32  ;;  %v4883_v37 = vpack.c.bf16 %v139_v35, %v129_v34  ;;  %v128_v38 = vld [vmem:[#allocation5 + $0x150] sm:$0xff]  ;;  %v138_v39 = vld [vmem:[#allocation5 + $0x1a0] sm:$0xff]  ;;  %v149_v40 = vld [vmem:[#allocation5 + $0x1f8] sm:$0xff] }
  0x7d   :  { %4830 = vmatpush1.bf16.msra.mxu0 %v4829_v57  ;;  %v396_v57 = vld [vmem:[#allocation5 + $0x9b0] sm:$0xff]  ;;  %v4885_v43 = vpack.c.bf16 %v138_v39, %v128_v38  ;;  %v158_v46 = vld [vmem:[#allocation5 + $0x240] sm:$0xff]  ;;  %v169_v47 = vld [vmem:[#allocation5 + $0x298] sm:$0xff] }
  0x7e   :  { %4832 = vmatprep.subr.bf16.mxu0 %v4831_v58  ;;  %v4953_v58 = vpack.c.bf16 %v478_v53, %v468_v52  ;;  %v4857_v61 = vpack.c.bf16 %v396_v57, %v386_v56  ;;  %v179_v48 = vld [vmem:[#allocation5 + $0x2e8] sm:$0xff]  ;;  %v168_v51 = vld [vmem:[#allocation5 + $0x290] sm:$0xff]  ;;  %v178_v52 = vld [vmem:[#allocation5 + $0x2e0] sm:$0xff] }
  0x7f   :  { %v4891_v50 = vpack.c.bf16 %v179_v48, %v169_v47  ;;  %v189_v53 = vld [vmem:[#allocation5 + $0x338] sm:$0xff]  ;;  %v188_v57 = vld [vmem:[#allocation5 + $0x330] sm:$0xff]  ;;  %v219_v60 = vld [vmem:[#allocation5 + $0x428] sm:$0xff] }
  0x80   :  { %4954 = vmatpush1.bf16.msra.mxu1 %v4953_v58  ;;  %v198_v58 = vld [vmem:[#allocation5 + $0x380] sm:$0xff]  ;;  %v209_v59 = vld [vmem:[#allocation5 + $0x3d8] sm:$0xff]  ;;  %v259_v11 = vld [vmem:[#allocation5 + $0x568] sm:$0xff] }
  0x81   :  { %4834 = vmatpush1.bf16.msra.mxu0 %v4833_v63  ;;  %v406_v63 = vld [vmem:[#allocation5 + $0xa00] sm:$0xff]  ;;  %v249_v10 = vld [vmem:[#allocation5 + $0x518] sm:$0xff]  ;;  %v279_v17 = vld [vmem:[#allocation5 + $0x608] sm:$0xff] }
  0x82   :  { %4836 = vmatprep.subr.bf16.mxu0 %v4835_v1  ;;  %v416_v1 = vld [vmem:[#allocation5 + $0xa50] sm:$0xff]  ;;  %v269_v16 = vld [vmem:[#allocation5 + $0x5b8] sm:$0xff]  ;;  %v278_v21 = vld [vmem:[#allocation5 + $0x600] sm:$0xff] }
  0x83   :  { %4781 = vmatmul.mubr.msk.f32.vlgmr.msra.gmra.mrb[0].mxu1 %vm540_vm0, %v7162_v4  ;;  %v268_v20 = vld [vmem:[#allocation5 + $0x5b0] sm:$0xff]  ;;  %v413_v26 = vld [vmem:[#allocation5 + $0xa38] sm:$0xff]  ;;  %v422_v34 = vld [vmem:[#allocation5 + $0xa80] sm:$0xff] }
  0x84   :  { %1105 = vmatprep.mubr.f32.mxu1 %v7066_v0  ;;  %v412_v33 = vld [vmem:[#allocation5 + $0xa30] sm:$0xff]  ;;  %v433_v38 = vld [vmem:[#allocation5 + $0xad8] sm:$0xff]  ;;  %v442_v47 = vld [vmem:[#allocation5 + $0xb20] sm:$0xff] }
  0x85   :  { %4838 = vmatpush1.bf16.msra.mxu0 %v4837_v6  ;;  %v4861_v6 = vpack.c.bf16 %v416_v1, %v406_v63  ;;  %v208_v63 = vld [vmem:[#allocation5 + $0x3d0] sm:$0xff]  ;;  %v218_v1 = vld [vmem:[#allocation5 + $0x420] sm:$0xff]  ;;  %v5101_v35 = vpack.c.bf16 %v422_v34, %v412_v33 }
  0x86   :  { %4840 = vmatprep.subr.bf16.mxu0 %v4839_v7  ;;  %v4863_v7 = vpack.c.bf16 %v437_v3, %v427_v2  ;;  %v229_v2 = vld [vmem:[#allocation5 + $0x478] sm:$0xff]  ;;  %v239_v3 = vld [vmem:[#allocation5 + $0x4c8] sm:$0xff] }
  0x87   :  { %v1344_v33 = vld [vmem:[#allocation8 + $0xa0] sm:$0xff]  ;;  %v1354_v34 = vld [vmem:[#allocation8 + $0xf0] sm:$0xff] }
  0x89   :  { %4842 = vmatpush1.bf16.msra.mxu0 %v4841_v12  ;;  %v4865_v12 = vpack.c.bf16 %v436_v9, %v426_v8  ;;  %v228_v8 = vld [vmem:[#allocation5 + $0x470] sm:$0xff]  ;;  %v238_v9 = vld [vmem:[#allocation5 + $0x4c0] sm:$0xff] }
  0x8a   :  { %4844 = vmatprep.subr.bf16.mxu0 %v4843_v15  ;;  %v456_v15 = vld [vmem:[#allocation5 + $0xb90] sm:$0xff] }
  0x8b   :  { %v4869_v18 = vpack.c.bf16 %v456_v15, %v446_v14  ;;  %v248_v14 = vld [vmem:[#allocation5 + $0x510] sm:$0xff]  ;;  %v258_v15 = vld [vmem:[#allocation5 + $0x560] sm:$0xff] }
  0x8d   :  { %4846 = vmatpush1.bf16.msra.mxu0 %v4845_v25  ;;  %v4875_v25 = vpack.c.bf16 %v99_v23, %v89_v22  ;;  %v289_v22 = vld [vmem:[#allocation5 + $0x658] sm:$0xff]  ;;  %v299_v23 = vld [vmem:[#allocation5 + $0x6a8] sm:$0xff] }
  0x8e   :  { %4848 = vmatprep.subr.bf16.mxu0 %v4847_v29  ;;  %v119_v29 = vld [vmem:[#allocation5 + $0x108] sm:$0xff]  ;;  %v4915_v27 = vpack.c.bf16 %v299_v23, %v289_v22  ;;  %v1334_v22 = vld [vmem:[#allocation8 + $0x50] sm:$0xff] }
  0x8f   :  { %v4879_v31 = vpack.c.bf16 %v119_v29, %v109_v28  ;;  %v298_v28 = vld [vmem:[#allocation5 + $0x6a0] sm:$0xff]  ;;  %v309_v29 = vld [vmem:[#allocation5 + $0x6f8] sm:$0xff] }
  0x91   :  { %4850 = vmatpush1.bf16.msra.mxu0 %v4849_v41  ;;  %v159_v41 = vld [vmem:[#allocation5 + $0x248] sm:$0xff] }
  0x92   :  { %4852 = vmatprep.subr.bf16.mxu0 %v4851_v45  ;;  %v4887_v44 = vpack.c.bf16 %v159_v41, %v149_v40  ;;  %v148_v45 = vld [vmem:[#allocation5 + $0x1f0] sm:$0xff]  ;;  %v318_v40 = vld [vmem:[#allocation5 + $0x740] sm:$0xff]  ;;  %v329_v41 = vld [vmem:[#allocation5 + $0x798] sm:$0xff] }
  0x93   :  { %v4889_v49 = vpack.c.bf16 %v158_v46, %v148_v45  ;;  %v432_v46 = vld [vmem:[#allocation5 + $0xad0] sm:$0xff] }
  0x94   :  { %v5105_v48 = vpack.c.bf16 %v442_v47, %v432_v46  ;;  %v1364_v46 = vld [vmem:[#allocation8 + $0x140] sm:$0xff]  ;;  %v1374_v47 = vld [vmem:[#allocation8 + $0x190] sm:$0xff] }
  0x95   :  { %4854 = vmatpush1.bf16.msra.mxu0 %v4853_v54  ;;  %v199_v54 = vld [vmem:[#allocation5 + $0x388] sm:$0xff] }
  0x96   :  { %4856 = vmatprep.subr.bf16.mxu0 %v4855_v55  ;;  %v4893_v55 = vpack.c.bf16 %v178_v52, %v168_v51  ;;  %v4895_v56 = vpack.c.bf16 %v199_v54, %v189_v53  ;;  %v453_v51 = vld [vmem:[#allocation5 + $0xb78] sm:$0xff]  ;;  %v338_v53 = vld [vmem:[#allocation5 + $0x7e0] sm:$0xff] }
  0x97   :  { %v349_v54 = vld [vmem:[#allocation5 + $0x838] sm:$0xff] }
  0x99   :  { %4858 = vmatpush1.bf16.msra.mxu0 %v4857_v61  ;;  %v4897_v61 = vpack.c.bf16 %v198_v58, %v188_v57  ;;  %v452_v58 = vld [vmem:[#allocation5 + $0xb70] sm:$0xff] }
  0x9a   :  { %4860 = vmatprep.subr.bf16.mxu0 %v4859_v62  ;;  %v4899_v62 = vpack.c.bf16 %v219_v60, %v209_v59  ;;  %v462_v59 = vld [vmem:[#allocation5 + $0xbc0] sm:$0xff] }
  0x9b   :  { %v5109_v60 = vpack.c.bf16 %v462_v59, %v452_v58  ;;  %v1384_v58 = vld [vmem:[#allocation8 + $0x1e0] sm:$0xff]  ;;  %v1394_v59 = vld [vmem:[#allocation8 + $0x230] sm:$0xff] }
  0x9c   :  { %609 = vmatmul.mubr.f32.vlgmr.msra.gmra.mrb[0].mxu0 %v7164_v5 }
  0x9d   :  { %4862 = vmatpush1.bf16.msra.mxu0 %v4861_v6  ;;  %679 = vmatprep.mubr.f32.mxu0 %v7066_v0  ;;  %v4901_v6 = vpack.c.bf16 %v218_v1, %v208_v63  ;;  %v473_v63 = vld [vmem:[#allocation5 + $0xc18] sm:$0xff] }
  0x9e   :  { %4864 = vmatprep.subr.bf16.mxu0 %v4863_v7  ;;  %v4903_v7 = vpack.c.bf16 %v239_v3, %v229_v2  ;;  %v358_v2 = vld [vmem:[#allocation5 + $0x880] sm:$0xff]  ;;  %v369_v3 = vld [vmem:[#allocation5 + $0x8d8] sm:$0xff] }
  0xa1   :  { %4866 = vmatpush1.bf16.msra.mxu0 %v4865_v12  ;;  %v4905_v12 = vpack.c.bf16 %v238_v9, %v228_v8  ;;  %v472_v9 = vld [vmem:[#allocation5 + $0xc10] sm:$0xff] }
  0xa2   :  { %4868 = vmatprep.subr.bf16.mxu0 %v4867_v13  ;;  %v4907_v13 = vpack.c.bf16 %v259_v11, %v249_v10  ;;  %v482_v10 = vld [vmem:[#allocation5 + $0xc60] sm:$0xff] }
  0xa3   :  { %v5113_v11 = vpack.c.bf16 %v482_v10, %v472_v9  ;;  %v1404_v9 = vld [vmem:[#allocation8 + $0x280] sm:$0xff]  ;;  %v1414_v10 = vld [vmem:[#allocation8 + $0x2d0] sm:$0xff] }
  0xa5   :  { %4870 = vmatpush1.bf16.msra.mxu0 %v4869_v18  ;;  %v4909_v18 = vpack.c.bf16 %v258_v15, %v248_v14  ;;  %v1325_v14 = vld [vmem:[#allocation8 + $0x8] sm:$0xff] }
  0xa6   :  { %4872 = vmatprep.subr.bf16.mxu0 %v4871_v19  ;;  %v4911_v19 = vpack.c.bf16 %v279_v17, %v269_v16  ;;  %v378_v16 = vld [vmem:[#allocation5 + $0x920] sm:$0xff]  ;;  %v389_v17 = vld [vmem:[#allocation5 + $0x978] sm:$0xff] }
  0xa9   :  { %4874 = vmatpush1.bf16.msra.mxu0 %v4873_v24  ;;  %v4913_v24 = vpack.c.bf16 %v278_v21, %v268_v20  ;;  %v1324_v21 = vld [vmem:[#allocation8] sm:$0xff] }
  0xaa   :  { %4876 = vmatprep.subr.bf16.mxu0 %v4875_v25  ;;  %v288_v25 = vld [vmem:[#allocation5 + $0x650] sm:$0xff]  ;;  %v5197_v23 = vpack.c.bf16 %v1334_v22, %v1324_v21  ;;  %v1434_v21 = vld [vmem:[#allocation8 + $0x370] sm:$0xff] }
  0xac   :  { %4780 = vmatmul.mubr.msk.f32.vlgmr.msra.gmra.mrb[0].mxu0 %vm540_vm0, %v7162_v4 }
  0xad   :  { %4878 = vmatpush1.bf16.msra.mxu0 %v4877_v30  ;;  %750 = vmatprep.mubr.f32.mxu0 %v7159_v42  ;;  %v423_v30 = vld [vmem:[#allocation5 + $0xa88] sm:$0xff] }
  0xae   :  { %4880 = vmatprep.subr.bf16.mxu0 %v4879_v31  ;;  %v319_v31 = vld [vmem:[#allocation5 + $0x748] sm:$0xff]  ;;  %v5099_v32 = vpack.c.bf16 %v423_v30, %v413_v26  ;;  %v1345_v26 = vld [vmem:[#allocation8 + $0xa8] sm:$0xff] }
  0xaf   :  { %v4919_v39 = vpack.c.bf16 %v319_v31, %v309_v29  ;;  %v91_v29 = vld [vmem:[#allocation5 + $0x28] sm:$0xff]  ;;  %v101_v31 = vld [vmem:[#allocation5 + $0x78] sm:$0xff] }
  0xb0   :  { %5100 = vmatprep.subr.bf16.mxu1 %v5099_v32  ;;  %v1355_v30 = vld [vmem:[#allocation8 + $0xf8] sm:$0xff] }
  0xb1   :  { %4882 = vmatpush1.bf16.msra.mxu0 %v4881_v36  ;;  %v4917_v36 = vpack.c.bf16 %v298_v28, %v288_v25  ;;  %5102 = vmatpush1.bf16.msra.mxu1 %v5101_v35  ;;  %v388_v25 = vld [vmem:[#allocation5 + $0x970] sm:$0xff]  ;;  %v398_v28 = vld [vmem:[#allocation5 + $0x9c0] sm:$0xff]  ;;  %v5199_v32 = vpack.c.bf16 %v1355_v30, %v1345_v26  ;;  %v5201_v35 = vpack.c.bf16 %v1354_v34, %v1344_v33  ;;  %v201_v30 = vld [vmem:[#allocation5 + $0x398] sm:$0xff] }
  0xb2   :  { %4884 = vmatprep.subr.bf16.mxu0 %v4883_v37  ;;  %v308_v37 = vld [vmem:[#allocation5 + $0x6f0] sm:$0xff]  ;;  %v1454_v33 = vld [vmem:[#allocation8 + $0x410] sm:$0xff] }
  0xb5   :  { %4886 = vmatpush1.bf16.msra.mxu0 %v4885_v43  ;;  %v443_v43 = vld [vmem:[#allocation5 + $0xb28] sm:$0xff] }
  0xb6   :  { %4888 = vmatprep.subr.bf16.mxu0 %v4887_v44  ;;  %v339_v44 = vld [vmem:[#allocation5 + $0x7e8] sm:$0xff]  ;;  %v5103_v45 = vpack.c.bf16 %v443_v43, %v433_v38  ;;  %v1365_v38 = vld [vmem:[#allocation8 + $0x148] sm:$0xff] }
  0xb7   :  { %v4923_v52 = vpack.c.bf16 %v339_v44, %v329_v41  ;;  %v111_v41 = vld [vmem:[#allocation5 + $0xc8] sm:$0xff]  ;;  %v121_v44 = vld [vmem:[#allocation5 + $0x118] sm:$0xff] }
  0xb8   :  { %5104 = vmatprep.subr.bf16.mxu1 %v5103_v45  ;;  %v1375_v43 = vld [vmem:[#allocation8 + $0x198] sm:$0xff] }
  0xb9   :  { %4890 = vmatpush1.bf16.msra.mxu0 %v4889_v49  ;;  %v4921_v49 = vpack.c.bf16 %v318_v40, %v308_v37  ;;  %5106 = vmatpush1.bf16.msra.mxu1 %v5105_v48  ;;  %v90_v37 = vld [vmem:[#allocation5 + $0x20] sm:$0xff]  ;;  %v100_v40 = vld [vmem:[#allocation5 + $0x70] sm:$0xff]  ;;  %v5203_v45 = vpack.c.bf16 %v1375_v43, %v1365_v38  ;;  %v5205_v48 = vpack.c.bf16 %v1374_v47, %v1364_v46  ;;  %v221_v43 = vld [vmem:[#allocation5 + $0x438] sm:$0xff] }
  0xba   :  { %4892 = vmatprep.subr.bf16.mxu0 %v4891_v50  ;;  %v328_v50 = vld [vmem:[#allocation5 + $0x790] sm:$0xff]  ;;  %v1474_v46 = vld [vmem:[#allocation8 + $0x4b0] sm:$0xff] }
  0xbd   :  { %4894 = vmatpush1.bf16.msra.mxu0 %v4893_v55  ;;  %v463_v55 = vld [vmem:[#allocation5 + $0xbc8] sm:$0xff] }
  0xbe   :  { %4896 = vmatprep.subr.bf16.mxu0 %v4895_v56  ;;  %v359_v56 = vld [vmem:[#allocation5 + $0x888] sm:$0xff]  ;;  %v5107_v57 = vpack.c.bf16 %v463_v55, %v453_v51  ;;  %v1385_v51 = vld [vmem:[#allocation8 + $0x1e8] sm:$0xff] }
  0xbf   :  { %v4927_v1 = vpack.c.bf16 %v359_v56, %v349_v54  ;;  %v131_v54 = vld [vmem:[#allocation5 + $0x168] sm:$0xff]  ;;  %v141_v56 = vld [vmem:[#allocation5 + $0x1b8] sm:$0xff] }
  0xc0   :  { %5108 = vmatprep.subr.bf16.mxu1 %v5107_v57  ;;  %v1395_v55 = vld [vmem:[#allocation8 + $0x238] sm:$0xff] }
  0xc1   :  { %4898 = vmatpush1.bf16.msra.mxu0 %v4897_v61  ;;  %v4925_v61 = vpack.c.bf16 %v338_v53, %v328_v50  ;;  %5110 = vmatpush1.bf16.msra.mxu1 %v5109_v60  ;;  %v110_v50 = vld [vmem:[#allocation5 + $0xc0] sm:$0xff]  ;;  %v120_v53 = vld [vmem:[#allocation5 + $0x110] sm:$0xff]  ;;  %v5207_v57 = vpack.c.bf16 %v1395_v55, %v1385_v51  ;;  %v5209_v60 = vpack.c.bf16 %v1394_v59, %v1384_v58  ;;  %v241_v55 = vld [vmem:[#allocation5 + $0x4d8] sm:$0xff] }
  0xc2   :  { %4900 = vmatprep.subr.bf16.mxu0 %v4899_v62  ;;  %v348_v62 = vld [vmem:[#allocation5 + $0x830] sm:$0xff]  ;;  %v1494_v58 = vld [vmem:[#allocation8 + $0x550] sm:$0xff] }
  0xc5   :  { %4902 = vmatpush1.bf16.msra.mxu0 %v4901_v6  ;;  %v483_v6 = vld [vmem:[#allocation5 + $0xc68] sm:$0xff] }
  0xc6   :  { %4904 = vmatprep.subr.bf16.mxu0 %v4903_v7  ;;  %v379_v7 = vld [vmem:[#allocation5 + $0x928] sm:$0xff]  ;;  %v5111_v8 = vpack.c.bf16 %v483_v6, %v473_v63  ;;  %v1405_v63 = vld [vmem:[#allocation8 + $0x288] sm:$0xff] }
  0xc7   :  { %v4931_v15 = vpack.c.bf16 %v379_v7, %v369_v3  ;;  %v151_v3 = vld [vmem:[#allocation5 + $0x208] sm:$0xff]  ;;  %v161_v7 = vld [vmem:[#allocation5 + $0x258] sm:$0xff] }
  0xc8   :  { %5112 = vmatprep.subr.bf16.mxu1 %v5111_v8  ;;  %v1415_v6 = vld [vmem:[#allocation8 + $0x2d8] sm:$0xff] }
  0xc9   :  { %4906 = vmatpush1.bf16.msra.mxu0 %v4905_v12  ;;  %v4929_v12 = vpack.c.bf16 %v358_v2, %v348_v62  ;;  %5114 = vmatpush1.bf16.msra.mxu1 %v5113_v11  ;;  %v130_v62 = vld [vmem:[#allocation5 + $0x160] sm:$0xff]  ;;  %v140_v2 = vld [vmem:[#allocation5 + $0x1b0] sm:$0xff]  ;;  %v5211_v8 = vpack.c.bf16 %v1415_v6, %v1405_v63  ;;  %v5213_v11 = vpack.c.bf16 %v1414_v10, %v1404_v9  ;;  %v261_v6 = vld [vmem:[#allocation5 + $0x578] sm:$0xff] }
  0xca   :  { %4908 = vmatprep.subr.bf16.mxu0 %v4907_v13  ;;  %v368_v13 = vld [vmem:[#allocation5 + $0x8d0] sm:$0xff]  ;;  %v1514_v9 = vld [vmem:[#allocation8 + $0x5f0] sm:$0xff] }
  0xcc   :  { %4783 = vmatmul.mubr.msk.f32.vlgmr.msra.gmra.mrb[2].mxu1 %vm540_vm0, %v7162_v4 }
  0xcd   :  { %4910 = vmatpush1.bf16.msra.mxu0 %v4909_v18  ;;  %v1335_v18 = vld [vmem:[#allocation8 + $0x58] sm:$0xff] }
  0xce   :  { %4912 = vmatprep.subr.bf16.mxu0 %v4911_v19  ;;  %v399_v19 = vld [vmem:[#allocation5 + $0x9c8] sm:$0xff]  ;;  %v5195_v20 = vpack.c.bf16 %v1335_v18, %v1325_v14  ;;  %v1425_v14 = vld [vmem:[#allocation8 + $0x328] sm:$0xff] }
  0xcf   :  { %v181_v18 = vld [vmem:[#allocation5 + $0x2f8] sm:$0xff] }
  0xd0   :  { %5196 = vmatprep.subr.bf16.mxu1 %v5195_v20  ;;  %v1424_v20 = vld [vmem:[#allocation8 + $0x320] sm:$0xff] }
  0xd1   :  { %4914 = vmatpush1.bf16.msra.mxu0 %v4913_v24  ;;  %v4933_v24 = vpack.c.bf16 %v378_v16, %v368_v13  ;;  %5198 = vmatpush1.bf16.msra.mxu1 %v5197_v23  ;;  %v150_v13 = vld [vmem:[#allocation5 + $0x200] sm:$0xff]  ;;  %v171_v16 = vld [vmem:[#allocation5 + $0x2a8] sm:$0xff]  ;;  %v5217_v22 = vpack.c.bf16 %v1434_v21, %v1424_v20 }
  0xd2   :  { %4916 = vmatprep.subr.bf16.mxu0 %v4915_v27  ;;  %v4935_v27 = vpack.c.bf16 %v399_v19, %v389_v17  ;;  %5200 = vmatprep.subr.bf16.mxu1 %v5199_v32  ;;  %v1435_v17 = vld [vmem:[#allocation8 + $0x378] sm:$0xff]  ;;  %v4971_v26 = vpack.c.bf16 %v181_v18, %v171_v16  ;;  %v1444_v32 = vld [vmem:[#allocation8 + $0x3c0] sm:$0xff]  ;;  %v1534_v20 = vld [vmem:[#allocation8 + $0x690] sm:$0xff] }
  0xd3   :  { %v5215_v19 = vpack.c.bf16 %v1435_v17, %v1425_v14  ;;  %v5221_v34 = vpack.c.bf16 %v1454_v33, %v1444_v32  ;;  %v1535_v16 = vld [vmem:[#allocation8 + $0x698] sm:$0xff]  ;;  %v281_v17 = vld [vmem:[#allocation5 + $0x618] sm:$0xff] }
  0xd4   :  { %v1554_v32 = vld [vmem:[#allocation8 + $0x730] sm:$0xff] }
  0xd5   :  { %4918 = vmatpush1.bf16.msra.mxu0 %v4917_v36  ;;  %v4937_v36 = vpack.c.bf16 %v398_v28, %v388_v25  ;;  %5202 = vmatpush1.bf16.msra.mxu1 %v5201_v35  ;;  %v1445_v25 = vld [vmem:[#allocation8 + $0x3c8] sm:$0xff]  ;;  %v191_v28 = vld [vmem:[#allocation5 + $0x348] sm:$0xff] }
  0xd6   :  { %4920 = vmatprep.subr.bf16.mxu0 %v4919_v39  ;;  %v4955_v39 = vpack.c.bf16 %v101_v31, %v91_v29  ;;  %5204 = vmatprep.subr.bf16.mxu1 %v5203_v45  ;;  %v1455_v29 = vld [vmem:[#allocation8 + $0x418] sm:$0xff]  ;;  %v4975_v38 = vpack.c.bf16 %v201_v30, %v191_v28  ;;  %v1464_v45 = vld [vmem:[#allocation8 + $0x460] sm:$0xff] }
  0xd7   :  { %v5219_v31 = vpack.c.bf16 %v1455_v29, %v1445_v25  ;;  %v5225_v47 = vpack.c.bf16 %v1474_v46, %v1464_v45  ;;  %v1555_v28 = vld [vmem:[#allocation8 + $0x738] sm:$0xff]  ;;  %v301_v29 = vld [vmem:[#allocation5 + $0x6b8] sm:$0xff] }
  0xd8   :  { %v1574_v45 = vld [vmem:[#allocation8 + $0x7d0] sm:$0xff] }
  0xd9   :  { %4922 = vmatpush1.bf16.msra.mxu0 %v4921_v49  ;;  %v4957_v49 = vpack.c.bf16 %v100_v40, %v90_v37  ;;  %5206 = vmatpush1.bf16.msra.mxu1 %v5205_v48  ;;  %v1465_v37 = vld [vmem:[#allocation8 + $0x468] sm:$0xff]  ;;  %v211_v40 = vld [vmem:[#allocation5 + $0x3e8] sm:$0xff] }
  0xda   :  { %4924 = vmatprep.subr.bf16.mxu0 %v4923_v52  ;;  %v4959_v52 = vpack.c.bf16 %v121_v44, %v111_v41  ;;  %5208 = vmatprep.subr.bf16.mxu1 %v5207_v57  ;;  %v1475_v41 = vld [vmem:[#allocation8 + $0x4b8] sm:$0xff]  ;;  %v4979_v51 = vpack.c.bf16 %v221_v43, %v211_v40  ;;  %v1484_v57 = vld [vmem:[#allocation8 + $0x500] sm:$0xff] }
  0xdb   :  { %v5223_v44 = vpack.c.bf16 %v1475_v41, %v1465_v37  ;;  %v5229_v59 = vpack.c.bf16 %v1494_v58, %v1484_v57  ;;  %v1575_v40 = vld [vmem:[#allocation8 + $0x7d8] sm:$0xff]  ;;  %v321_v41 = vld [vmem:[#allocation5 + $0x758] sm:$0xff] }
  0xdc   :  { %v1594_v57 = vld [vmem:[#allocation8 + $0x870] sm:$0xff] }
  0xdd   :  { %4926 = vmatpush1.bf16.msra.mxu0 %v4925_v61  ;;  %v4961_v61 = vpack.c.bf16 %v120_v53, %v110_v50  ;;  %5210 = vmatpush1.bf16.msra.mxu1 %v5209_v60  ;;  %v220_v50 = vld [vmem:[#allocation5 + $0x430] sm:$0xff] }
  0xde   :  { %4928 = vmatprep.subr.bf16.mxu0 %v4927_v1  ;;  %v4963_v1 = vpack.c.bf16 %v141_v56, %v131_v54  ;;  %5212 = vmatprep.subr.bf16.mxu1 %v5211_v8  ;;  %v1485_v53 = vld [vmem:[#allocation8 + $0x508] sm:$0xff]  ;;  %v1495_v54 = vld [vmem:[#allocation8 + $0x558] sm:$0xff]  ;;  %v1504_v8 = vld [vmem:[#allocation8 + $0x5a0] sm:$0xff] }
  0xdf   :  { %v5227_v56 = vpack.c.bf16 %v1495_v54, %v1485_v53  ;;  %v5233_v10 = vpack.c.bf16 %v1514_v9, %v1504_v8  ;;  %v1595_v53 = vld [vmem:[#allocation8 + $0x878] sm:$0xff]  ;;  %v341_v54 = vld [vmem:[#allocation5 + $0x7f8] sm:$0xff] }
  0xe0   :  { %v1614_v8 = vld [vmem:[#allocation8 + $0x910] sm:$0xff] }
  0xe1   :  { %4930 = vmatpush1.bf16.msra.mxu0 %v4929_v12  ;;  %v4965_v12 = vpack.c.bf16 %v140_v2, %v130_v62  ;;  %5214 = vmatpush1.bf16.msra.mxu1 %v5213_v11  ;;  %v1505_v62 = vld [vmem:[#allocation8 + $0x5a8] sm:$0xff]  ;;  %v251_v2 = vld [vmem:[#allocation5 + $0x528] sm:$0xff] }
  0xe2   :  { %4932 = vmatprep.subr.bf16.mxu0 %v4931_v15  ;;  %v160_v15 = vld [vmem:[#allocation5 + $0x250] sm:$0xff]  ;;  %5216 = vmatprep.subr.bf16.mxu1 %v5215_v19  ;;  %v4987_v14 = vpack.c.bf16 %v261_v6, %v251_v2  ;;  %v1615_v2 = vld [vmem:[#allocation8 + $0x918] sm:$0xff] }
  0xe3   :  { %v4969_v23 = vpack.c.bf16 %v160_v15, %v150_v13  ;;  %v1525_v13 = vld [vmem:[#allocation8 + $0x648] sm:$0xff]  ;;  %v271_v15 = vld [vmem:[#allocation5 + $0x5c8] sm:$0xff] }
  0xe4   :  { %v5235_v18 = vpack.c.bf16 %v1535_v16, %v1525_v13  ;;  %v1524_v19 = vld [vmem:[#allocation8 + $0x640] sm:$0xff]  ;;  %v4991_v25 = vpack.c.bf16 %v281_v17, %v271_v15  ;;  %v1635_v15 = vld [vmem:[#allocation8 + $0x9b8] sm:$0xff]  ;;  %v381_v16 = vld [vmem:[#allocation5 + $0x938] sm:$0xff] }
  0xe5   :  { %4934 = vmatpush1.bf16.msra.mxu0 %v4933_v24  ;;  %v170_v24 = vld [vmem:[#allocation5 + $0x2a0] sm:$0xff]  ;;  %5218 = vmatpush1.bf16.msra.mxu1 %v5217_v22  ;;  %v5237_v21 = vpack.c.bf16 %v1534_v20, %v1524_v19 }
  0xe6   :  { %4936 = vmatprep.subr.bf16.mxu0 %v4935_v27  ;;  %v180_v27 = vld [vmem:[#allocation5 + $0x2f0] sm:$0xff]  ;;  %5220 = vmatprep.subr.bf16.mxu1 %v5219_v31  ;;  %v1634_v19 = vld [vmem:[#allocation8 + $0x9b0] sm:$0xff] }
  0xe7   :  { %v4973_v35 = vpack.c.bf16 %v180_v27, %v170_v24  ;;  %v1545_v24 = vld [vmem:[#allocation8 + $0x6e8] sm:$0xff]  ;;  %v291_v27 = vld [vmem:[#allocation5 + $0x668] sm:$0xff] }
  0xe8   :  { %v5239_v30 = vpack.c.bf16 %v1555_v28, %v1545_v24  ;;  %v1544_v31 = vld [vmem:[#allocation8 + $0x6e0] sm:$0xff]  ;;  %v4995_v37 = vpack.c.bf16 %v301_v29, %v291_v27  ;;  %v1645_v27 = vld [vmem:[#allocation8 + $0xa08] sm:$0xff]  ;;  %v1655_v28 = vld [vmem:[#allocation8 + $0xa58] sm:$0xff] }
  0xe9   :  { %4938 = vmatpush1.bf16.msra.mxu0 %v4937_v36  ;;  %v190_v36 = vld [vmem:[#allocation5 + $0x340] sm:$0xff]  ;;  %5222 = vmatpush1.bf16.msra.mxu1 %v5221_v34  ;;  %v5241_v33 = vpack.c.bf16 %v1554_v32, %v1544_v31  ;;  %v380_v24 = vld [vmem:[#allocation5 + $0x930] sm:$0xff]  ;;  %v5259_v29 = vpack.c.bf16 %v1655_v28, %v1645_v27  ;;  %v203_v27 = vld [vmem:[#allocation5 + $0x3a8] sm:$0xff] }
  0xea   :  { %4956 = vmatprep.subr.bf16.mxu0 %v4955_v39  ;;  %v200_v39 = vld [vmem:[#allocation5 + $0x390] sm:$0xff]  ;;  %5224 = vmatprep.subr.bf16.mxu1 %v5223_v44  ;;  %v390_v32 = vld [vmem:[#allocation5 + $0x980] sm:$0xff] }
  0xeb   :  { %v4977_v48 = vpack.c.bf16 %v200_v39, %v190_v36  ;;  %v1565_v36 = vld [vmem:[#allocation8 + $0x788] sm:$0xff]  ;;  %v311_v39 = vld [vmem:[#allocation5 + $0x708] sm:$0xff] }
  0xec   :  { %751 = vmatmul.mubr.f32.vlgmr.msra.gmra.mrb[2].mxu0 %v7164_v5  ;;  %v5243_v43 = vpack.c.bf16 %v1575_v40, %v1565_v36  ;;  %v1564_v44 = vld [vmem:[#allocation8 + $0x780] sm:$0xff] }
  0xed   :  { %4958 = vmatpush1.bf16.msra.mxu0 %v4957_v49  ;;  %892 = vmatprep.mubr.f32.mxu0 %v7159_v42  ;;  %v4967_v42 = vpack.c.bf16 %v161_v7, %v151_v3  ;;  %v210_v49 = vld [vmem:[#allocation5 + $0x3e0] sm:$0xff]  ;;  %v5245_v46 = vpack.c.bf16 %v1574_v45, %v1564_v44  ;;  %v431_v40 = vld [vmem:[#allocation5 + $0xac8] sm:$0xff] }
  0xee   :  { %4960 = vmatprep.subr.bf16.mxu0 %v4959_v52  ;;  %v231_v52 = vld [vmem:[#allocation5 + $0x488] sm:$0xff]  ;;  %5226 = vmatpush1.bf16.msra.mxu1 %v5225_v47  ;;  %v4981_v60 = vpack.c.bf16 %v220_v50, %v210_v49  ;;  %v1585_v49 = vld [vmem:[#allocation8 + $0x828] sm:$0xff]  ;;  %v4999_v50 = vpack.c.bf16 %v321_v41, %v311_v39  ;;  %v430_v45 = vld [vmem:[#allocation5 + $0xac0] sm:$0xff] }
  0xef   :  { %5228 = vmatprep.subr.bf16.mxu1 %v5227_v56  ;;  %v4983_v63 = vpack.c.bf16 %v241_v55, %v231_v52  ;;  %v1515_v3 = vld [vmem:[#allocation8 + $0x5f8] sm:$0xff]  ;;  %v5247_v55 = vpack.c.bf16 %v1595_v53, %v1585_v49  ;;  %v1584_v56 = vld [vmem:[#allocation8 + $0x820] sm:$0xff]  ;;  %v441_v41 = vld [vmem:[#allocation5 + $0xb18] sm:$0xff] }
  0xf0   :  { %v5231_v7 = vpack.c.bf16 %v1515_v3, %v1505_v62  ;;  %v331_v52 = vld [vmem:[#allocation5 + $0x7a8] sm:$0xff]  ;;  %v5249_v58 = vpack.c.bf16 %v1594_v57, %v1584_v56  ;;  %v361_v3 = vld [vmem:[#allocation5 + $0x898] sm:$0xff]  ;;  %v420_v39 = vld [vmem:[#allocation5 + $0xa70] sm:$0xff]  ;;  %v5023_v44 = vpack.c.bf16 %v441_v41, %v431_v40 }
  0xf1   :  { %4962 = vmatpush1.bf16.msra.mxu0 %v4961_v61  ;;  %v230_v61 = vld [vmem:[#allocation5 + $0x480] sm:$0xff]  ;;  %v5003_v62 = vpack.c.bf16 %v341_v54, %v331_v52  ;;  %v460_v52 = vld [vmem:[#allocation5 + $0xbb0] sm:$0xff]  ;;  %v471_v53 = vld [vmem:[#allocation5 + $0xc08] sm:$0xff] }
  0xf2   :  { %4964 = vmatprep.subr.bf16.mxu0 %v4963_v1  ;;  %v240_v1 = vld [vmem:[#allocation5 + $0x4d0] sm:$0xff]  ;;  %5230 = vmatpush1.bf16.msra.mxu1 %v5229_v59  ;;  %v481_v54 = vld [vmem:[#allocation5 + $0xc58] sm:$0xff]  ;;  %v470_v57 = vld [vmem:[#allocation5 + $0xc00] sm:$0xff] }
  0xf3   :  { %v4985_v11 = vpack.c.bf16 %v240_v1, %v230_v61  ;;  %5232 = vmatprep.subr.bf16.mxu1 %v5231_v7  ;;  %v1605_v61 = vld [vmem:[#allocation8 + $0x8c8] sm:$0xff]  ;;  %v351_v1 = vld [vmem:[#allocation5 + $0x848] sm:$0xff]  ;;  %v5031_v56 = vpack.c.bf16 %v481_v54, %v471_v53 }
  0xf4   :  { %v5251_v6 = vpack.c.bf16 %v1615_v2, %v1605_v61  ;;  %v1604_v7 = vld [vmem:[#allocation8 + $0x8c0] sm:$0xff]  ;;  %v5007_v13 = vpack.c.bf16 %v361_v3, %v351_v1  ;;  %v113_v1 = vld [vmem:[#allocation5 + $0xd8] sm:$0xff] }
  0xf5   :  { %4966 = vmatpush1.bf16.msra.mxu0 %v4965_v12  ;;  %v250_v12 = vld [vmem:[#allocation5 + $0x520] sm:$0xff]  ;;  %v5253_v9 = vpack.c.bf16 %v1614_v8, %v1604_v7  ;;  %v123_v2 = vld [vmem:[#allocation5 + $0x128] sm:$0xff]  ;;  %v112_v7 = vld [vmem:[#allocation5 + $0xd0] sm:$0xff] }
  0xf6   :  { %4968 = vmatprep.subr.bf16.mxu0 %v4967_v42  ;;  %v260_v42 = vld [vmem:[#allocation5 + $0x570] sm:$0xff]  ;;  %5234 = vmatpush1.bf16.msra.mxu1 %v5233_v10  ;;  %v122_v8 = vld [vmem:[#allocation5 + $0x120] sm:$0xff] }
  0xf7   :  { %v4989_v22 = vpack.c.bf16 %v260_v42, %v250_v12  ;;  %5236 = vmatprep.subr.bf16.mxu1 %v5235_v18  ;;  %v1625_v12 = vld [vmem:[#allocation8 + $0x968] sm:$0xff]  ;;  %v371_v42 = vld [vmem:[#allocation5 + $0x8e8] sm:$0xff] }
  0xf8   :  { %v5255_v17 = vpack.c.bf16 %v1635_v15, %v1625_v12  ;;  %v1624_v18 = vld [vmem:[#allocation8 + $0x960] sm:$0xff]  ;;  %v153_v15 = vld [vmem:[#allocation5 + $0x218] sm:$0xff] }
  0xf9   :  { %4970 = vmatpush1.bf16.msra.mxu0 %v4969_v23  ;;  %v270_v23 = vld [vmem:[#allocation5 + $0x5c0] sm:$0xff]  ;;  %v5257_v20 = vpack.c.bf16 %v1634_v19, %v1624_v18  ;;  %v7182_v12 = vld [vmem:[#allocation2 + $0x8] sm:$0xff] }
  0xfa   :  { %4972 = vmatprep.subr.bf16.mxu0 %v4971_v26  ;;  %v280_v26 = vld [vmem:[#allocation5 + $0x610] sm:$0xff]  ;;  %5238 = vmatpush1.bf16.msra.mxu1 %v5237_v21 }
  0xfb   :  { %v4993_v34 = vpack.c.bf16 %v280_v26, %v270_v23  ;;  %5240 = vmatprep.subr.bf16.mxu1 %v5239_v30  ;;  %v370_v23 = vld [vmem:[#allocation5 + $0x8e0] sm:$0xff]  ;;  %v401_v26 = vld [vmem:[#allocation5 + $0x9d8] sm:$0xff]  ;;  %v152_v19 = vld [vmem:[#allocation5 + $0x210] sm:$0xff] }
  0xfc   :  { %v5013_v30 = vpack.c.bf16 %v380_v24, %v370_v23  ;;  %v172_v24 = vld [vmem:[#allocation5 + $0x2b0] sm:$0xff] }
  0xfd   :  { %4974 = vmatpush1.bf16.msra.mxu0 %v4973_v35  ;;  %v290_v35 = vld [vmem:[#allocation5 + $0x660] sm:$0xff] }
  0xfe   :  { %4976 = vmatprep.subr.bf16.mxu0 %v4975_v38  ;;  %v300_v38 = vld [vmem:[#allocation5 + $0x6b0] sm:$0xff]  ;;  %5242 = vmatpush1.bf16.msra.mxu1 %v5241_v33 }
  0xff   :  { %v4997_v47 = vpack.c.bf16 %v300_v38, %v290_v35  ;;  %5244 = vmatprep.subr.bf16.mxu1 %v5243_v43  ;;  %v400_v33 = vld [vmem:[#allocation5 + $0x9d0] sm:$0xff]  ;;  %v421_v35 = vld [vmem:[#allocation5 + $0xa78] sm:$0xff]  ;;  %v410_v38 = vld [vmem:[#allocation5 + $0xa20] sm:$0xff] }
 0x100   :  { %v5017_v36 = vpack.c.bf16 %v400_v33, %v390_v32  ;;  %v5021_v43 = vpack.c.bf16 %v420_v39, %v410_v38  ;;  %v213_v32 = vld [vmem:[#allocation5 + $0x3f8] sm:$0xff]  ;;  %v223_v33 = vld [vmem:[#allocation5 + $0x448] sm:$0xff] }
 0x101   :  { %4978 = vmatpush1.bf16.msra.mxu0 %v4977_v48  ;;  %v310_v48 = vld [vmem:[#allocation5 + $0x700] sm:$0xff]  ;;  %v233_v38 = vld [vmem:[#allocation5 + $0x498] sm:$0xff]  ;;  %v243_v39 = vld [vmem:[#allocation5 + $0x4e8] sm:$0xff] }
 0x102   :  { %4980 = vmatprep.subr.bf16.mxu0 %v4979_v51  ;;  %v320_v51 = vld [vmem:[#allocation5 + $0x750] sm:$0xff]  ;;  %5246 = vmatpush1.bf16.msra.mxu1 %v5245_v46  ;;  %v5063_v41 = vpack.c.bf16 %v243_v39, %v233_v38  ;;  %v94_v38 = vld [vmem:[#allocation5 + $0x40] sm:$0xff] }
 0x103   :  { %v5001_v59 = vpack.c.bf16 %v320_v51, %v310_v48  ;;  %5248 = vmatprep.subr.bf16.mxu1 %v5247_v55  ;;  %v440_v46 = vld [vmem:[#allocation5 + $0xb10] sm:$0xff]  ;;  %v461_v48 = vld [vmem:[#allocation5 + $0xbb8] sm:$0xff]  ;;  %v450_v51 = vld [vmem:[#allocation5 + $0xb60] sm:$0xff] }
 0x104   :  { %v5025_v49 = vpack.c.bf16 %v440_v46, %v430_v45  ;;  %v5029_v55 = vpack.c.bf16 %v460_v52, %v450_v51  ;;  %v253_v45 = vld [vmem:[#allocation5 + $0x538] sm:$0xff]  ;;  %v263_v46 = vld [vmem:[#allocation5 + $0x588] sm:$0xff]  ;;  %v104_v39 = vld [vmem:[#allocation5 + $0x90] sm:$0xff] }
 0x105   :  { %4982 = vmatpush1.bf16.msra.mxu0 %v4981_v60  ;;  %v330_v60 = vld [vmem:[#allocation5 + $0x7a0] sm:$0xff]  ;;  %v273_v51 = vld [vmem:[#allocation5 + $0x5d8] sm:$0xff]  ;;  %v283_v52 = vld [vmem:[#allocation5 + $0x628] sm:$0xff] }
 0x106   :  { %4984 = vmatprep.subr.bf16.mxu0 %v4983_v63  ;;  %v340_v63 = vld [vmem:[#allocation5 + $0x7f0] sm:$0xff]  ;;  %5250 = vmatpush1.bf16.msra.mxu1 %v5249_v58  ;;  %v5071_v54 = vpack.c.bf16 %v283_v52, %v273_v51  ;;  %v145_v51 = vld [vmem:[#allocation5 + $0x1d8] sm:$0xff]  ;;  %v7199_v52 = vld [vmem:[#allocation2] sm:$0xff] }
 0x107   :  { %v5005_v10 = vpack.c.bf16 %v340_v63, %v330_v60  ;;  %5252 = vmatprep.subr.bf16.mxu1 %v5251_v6  ;;  %v480_v58 = vld [vmem:[#allocation5 + $0xc50] sm:$0xff]  ;;  %v103_v60 = vld [vmem:[#allocation5 + $0x88] sm:$0xff]  ;;  %v102_v63 = vld [vmem:[#allocation5 + $0x80] sm:$0xff]  ;;  %v5039_v6 = vpack.c.bf16 %v123_v2, %v113_v1 }
 0x109   :  { %4986 = vmatpush1.bf16.msra.mxu0 %v4985_v11  ;;  %v350_v11 = vld [vmem:[#allocation5 + $0x840] sm:$0xff] }
 0x10a   :  { %4988 = vmatprep.subr.bf16.mxu0 %v4987_v14  ;;  %v360_v14 = vld [vmem:[#allocation5 + $0x890] sm:$0xff]  ;;  %5254 = vmatpush1.bf16.msra.mxu1 %v5253_v9  ;;  %v133_v9 = vld [vmem:[#allocation5 + $0x178] sm:$0xff] }
 0x10b   :  { %v5009_v21 = vpack.c.bf16 %v360_v14, %v350_v11  ;;  %5256 = vmatprep.subr.bf16.mxu1 %v5255_v17  ;;  %v5041_v11 = vpack.c.bf16 %v122_v8, %v112_v7  ;;  %v132_v14 = vld [vmem:[#allocation5 + $0x170] sm:$0xff]  ;;  %v333_v7 = vld [vmem:[#allocation5 + $0x7b8] sm:$0xff]  ;;  %v343_v8 = vld [vmem:[#allocation5 + $0x808] sm:$0xff] }
 0x10d   :  { %4990 = vmatpush1.bf16.msra.mxu0 %v4989_v22  ;;  %v5011_v22 = vpack.c.bf16 %v381_v16, %v371_v42  ;;  %v142_v42 = vld [vmem:[#allocation5 + $0x1c0] sm:$0xff]  ;;  %v163_v16 = vld [vmem:[#allocation5 + $0x268] sm:$0xff] }
 0x10e   :  { %4992 = vmatprep.subr.bf16.mxu0 %v4991_v25  ;;  %v391_v25 = vld [vmem:[#allocation5 + $0x988] sm:$0xff]  ;;  %5258 = vmatpush1.bf16.msra.mxu1 %v5257_v20  ;;  %v5045_v17 = vpack.c.bf16 %v142_v42, %v132_v14  ;;  %v5047_v18 = vpack.c.bf16 %v163_v16, %v153_v15  ;;  %v162_v20 = vld [vmem:[#allocation5 + $0x260] sm:$0xff]  ;;  %v353_v14 = vld [vmem:[#allocation5 + $0x858] sm:$0xff] }
 0x10f   :  { %v5015_v31 = vpack.c.bf16 %v401_v26, %v391_v25  ;;  %5260 = vmatprep.subr.bf16.mxu1 %v5259_v29  ;;  %v182_v25 = vld [vmem:[#allocation5 + $0x300] sm:$0xff]  ;;  %v193_v26 = vld [vmem:[#allocation5 + $0x358] sm:$0xff]  ;;  %v363_v42 = vld [vmem:[#allocation5 + $0x8a8] sm:$0xff] }
 0x110   :  { %v5053_v28 = vpack.c.bf16 %v182_v25, %v172_v24  ;;  %v5055_v29 = vpack.c.bf16 %v203_v27, %v193_v26  ;;  %v5087_v16 = vpack.c.bf16 %v363_v42, %v353_v14  ;;  %v372_v24 = vld [vmem:[#allocation5 + $0x8f0] sm:$0xff]  ;;  %v382_v25 = vld [vmem:[#allocation5 + $0x940] sm:$0xff]  ;;  %v393_v26 = vld [vmem:[#allocation5 + $0x998] sm:$0xff] }
 0x111   :  { %4994 = vmatpush1.bf16.msra.mxu0 %v4993_v34  ;;  %v411_v34 = vld [vmem:[#allocation5 + $0xa28] sm:$0xff]  ;;  %v184_v14 = vld [vmem:[#allocation5 + $0x310] sm:$0xff] }
 0x112   :  { %4996 = vmatprep.subr.bf16.mxu0 %v4995_v37  ;;  %v5019_v37 = vpack.c.bf16 %v421_v35, %v411_v34  ;;  %v5059_v35 = vpack.c.bf16 %v223_v33, %v213_v32  ;;  %v403_v27 = vld [vmem:[#allocation5 + $0x9e8] sm:$0xff]  ;;  %v402_v32 = vld [vmem:[#allocation5 + $0x9e0] sm:$0xff] }
 0x113   :  { %v95_v33 = vld [vmem:[#allocation5 + $0x48] sm:$0xff] }
 0x114   :  { %v195_v42 = vld [vmem:[#allocation5 + $0x368] sm:$0xff] }
 0x115   :  { %4998 = vmatpush1.bf16.msra.mxu0 %v4997_v47  ;;  %v451_v47 = vld [vmem:[#allocation5 + $0xb68] sm:$0xff] }
 0x116   :  { %5000 = vmatprep.subr.bf16.mxu0 %v4999_v50  ;;  %v5027_v50 = vpack.c.bf16 %v461_v48, %v451_v47  ;;  %v5067_v48 = vpack.c.bf16 %v263_v46, %v253_v45  ;;  %v7194_v45 = vld [vmem:[#allocation7] sm:$0xff] }
 0x119   :  { %5002 = vmatpush1.bf16.msra.mxu0 %v5001_v59  ;;  %v93_v59 = vld [vmem:[#allocation5 + $0x38] sm:$0xff] }
 0x11a   :  { %5004 = vmatprep.subr.bf16.mxu0 %v5003_v62  ;;  %v5035_v61 = vpack.c.bf16 %v103_v60, %v93_v59  ;;  %v92_v62 = vld [vmem:[#allocation5 + $0x30] sm:$0xff] }
 0x11b   :  { %v5037_v3 = vpack.c.bf16 %v102_v63, %v92_v62  ;;  %v313_v62 = vld [vmem:[#allocation5 + $0x718] sm:$0xff]  ;;  %v323_v63 = vld [vmem:[#allocation5 + $0x768] sm:$0xff] }
 0x11c   :  { %v5079_v2 = vpack.c.bf16 %v323_v63, %v313_v62 }
 0x11d   :  { %5006 = vmatpush1.bf16.msra.mxu0 %v5005_v10  ;;  %v143_v10 = vld [vmem:[#allocation5 + $0x1c8] sm:$0xff] }
 0x11e   :  { %5008 = vmatprep.subr.bf16.mxu0 %v5007_v13  ;;  %v5043_v13 = vpack.c.bf16 %v143_v10, %v133_v9  ;;  %v5083_v10 = vpack.c.bf16 %v343_v8, %v333_v7  ;;  %v175_v8 = vld [vmem:[#allocation5 + $0x2c8] sm:$0xff] }
 0x121   :  { %5010 = vmatpush1.bf16.msra.mxu0 %v5009_v21  ;;  %v173_v21 = vld [vmem:[#allocation5 + $0x2b8] sm:$0xff] }
 0x122   :  { %5012 = vmatprep.subr.bf16.mxu0 %v5011_v22  ;;  %v5049_v22 = vpack.c.bf16 %v162_v20, %v152_v19  ;;  %v373_v19 = vld [vmem:[#allocation5 + $0x8f8] sm:$0xff]  ;;  %v383_v20 = vld [vmem:[#allocation5 + $0x948] sm:$0xff] }
 0x125   :  { %5014 = vmatpush1.bf16.msra.mxu0 %v5013_v30  ;;  %v192_v30 = vld [vmem:[#allocation5 + $0x350] sm:$0xff] }
 0x126   :  { %5016 = vmatprep.subr.bf16.mxu0 %v5015_v31  ;;  %v202_v31 = vld [vmem:[#allocation5 + $0x3a0] sm:$0xff] }
 0x127   :  { %v5057_v34 = vpack.c.bf16 %v202_v31, %v192_v30  ;;  %v5095_v30 = vpack.c.bf16 %v403_v27, %v393_v26  ;;  %v392_v31 = vld [vmem:[#allocation5 + $0x990] sm:$0xff]  ;;  %v214_v26 = vld [vmem:[#allocation5 + $0x400] sm:$0xff] }
 0x128   :  { %v224_v27 = vld [vmem:[#allocation5 + $0x450] sm:$0xff] }
 0x129   :  { %5018 = vmatpush1.bf16.msra.mxu0 %v5017_v36  ;;  %v212_v36 = vld [vmem:[#allocation5 + $0x3f0] sm:$0xff] }
 0x12a   :  { %5020 = vmatprep.subr.bf16.mxu0 %v5019_v37  ;;  %v222_v37 = vld [vmem:[#allocation5 + $0x440] sm:$0xff] }
 0x12b   :  { %v5061_v40 = vpack.c.bf16 %v222_v37, %v212_v36  ;;  %v5097_v36 = vpack.c.bf16 %v402_v32, %v392_v31  ;;  %v245_v31 = vld [vmem:[#allocation5 + $0x4f8] sm:$0xff] }
 0x12c   :  { %893 = vmatmul.mubr.f32.vlgmr.msra.gmra.mrb[4].mxu0 %v7164_v5  ;;  %v5033_v5 = vpack.c.bf16 %v480_v58, %v470_v57  ;;  %v293_v57 = vld [vmem:[#allocation5 + $0x678] sm:$0xff]  ;;  %v303_v58 = vld [vmem:[#allocation5 + $0x6c8] sm:$0xff] }
 0x12d   :  { %5022 = vmatpush1.bf16.msra.mxu0 %v5021_v43  ;;  %963 = vmatprep.mubr.f32.mxu0 %v7066_v0  ;;  %v232_v43 = vld [vmem:[#allocation5 + $0x490] sm:$0xff]  ;;  %v5075_v60 = vpack.c.bf16 %v303_v58, %v293_v57  ;;  %v134_v57 = vld [vmem:[#allocation5 + $0x180] sm:$0xff] }
 0x12e   :  { %5024 = vmatprep.subr.bf16.mxu0 %v5023_v44  ;;  %v242_v44 = vld [vmem:[#allocation5 + $0x4e0] sm:$0xff]  ;;  %v144_v58 = vld [vmem:[#allocation5 + $0x1d0] sm:$0xff] }
 0x12f   :  { %v5065_v47 = vpack.c.bf16 %v242_v44, %v232_v43  ;;  %v5117_v44 = vpack.c.bf16 %v104_v39, %v94_v38  ;;  %v255_v38 = vld [vmem:[#allocation5 + $0x548] sm:$0xff]  ;;  %v265_v39 = vld [vmem:[#allocation5 + $0x598] sm:$0xff] }
 0x131   :  { %5026 = vmatpush1.bf16.msra.mxu0 %v5025_v49  ;;  %v252_v49 = vld [vmem:[#allocation5 + $0x530] sm:$0xff] }
 0x132   :  { %5028 = vmatprep.subr.bf16.mxu0 %v5027_v50  ;;  %v262_v50 = vld [vmem:[#allocation5 + $0x580] sm:$0xff] }
 0x133   :  { %v5069_v53 = vpack.c.bf16 %v262_v50, %v252_v49  ;;  %v124_v49 = vld [vmem:[#allocation5 + $0x130] sm:$0xff]  ;;  %v135_v50 = vld [vmem:[#allocation5 + $0x188] sm:$0xff] }
 0x135   :  { %5030 = vmatpush1.bf16.msra.mxu0 %v5029_v55  ;;  %v272_v55 = vld [vmem:[#allocation5 + $0x5d0] sm:$0xff] }
 0x136   :  { %5032 = vmatprep.subr.bf16.mxu0 %v5031_v56  ;;  %v282_v56 = vld [vmem:[#allocation5 + $0x620] sm:$0xff] }
 0x137   :  { %v5073_v59 = vpack.c.bf16 %v282_v56, %v272_v55  ;;  %v5123_v56 = vpack.c.bf16 %v145_v51, %v135_v50  ;;  %v274_v51 = vld [vmem:[#allocation5 + $0x5e0] sm:$0xff] }
 0x139   :  { %5034 = vmatpush1.bf16.msra.mxu0 %v5033_v5  ;;  %v292_v5 = vld [vmem:[#allocation5 + $0x670] sm:$0xff] }
 0x13a   :  { %5036 = vmatprep.subr.bf16.mxu0 %v5035_v61  ;;  %v302_v61 = vld [vmem:[#allocation5 + $0x6c0] sm:$0xff] }
 0x13b   :  { %v5077_v1 = vpack.c.bf16 %v302_v61, %v292_v5  ;;  %v165_v5 = vld [vmem:[#allocation5 + $0x278] sm:$0xff] }
 0x13c   :  { %4782 = vmatmul.mubr.msk.f32.vlgmr.msra.gmra.mrb[4].mxu0 %vm540_vm0, %v7162_v4  ;;  %v183_v4 = vld [vmem:[#allocation5 + $0x308] sm:$0xff] }
 0x13d   :  { %5038 = vmatpush1.bf16.msra.mxu0 %v5037_v3  ;;  %1034 = vmatprep.mubr.f32.mxu0 %v7182_v12  ;;  %v5051_v23 = vpack.c.bf16 %v183_v4, %v173_v21  ;;  %v312_v3 = vld [vmem:[#allocation5 + $0x710] sm:$0xff] }
 0x13e   :  { %5040 = vmatprep.subr.bf16.mxu0 %v5039_v6  ;;  %v322_v6 = vld [vmem:[#allocation5 + $0x760] sm:$0xff] }
 0x13f   :  { %v5081_v9 = vpack.c.bf16 %v322_v6, %v312_v3  ;;  %v154_v6 = vld [vmem:[#allocation5 + $0x220] sm:$0xff] }
 0x141   :  { %5042 = vmatpush1.bf16.msra.mxu0 %v5041_v11  ;;  %v332_v11 = vld [vmem:[#allocation5 + $0x7b0] sm:$0xff] }
 0x142   :  { %5044 = vmatprep.subr.bf16.mxu0 %v5043_v13  ;;  %v342_v13 = vld [vmem:[#allocation5 + $0x800] sm:$0xff] }
 0x143   :  { %v5085_v15 = vpack.c.bf16 %v342_v13, %v332_v11  ;;  %v174_v13 = vld [vmem:[#allocation5 + $0x2c0] sm:$0xff] }
 0x145   :  { %5046 = vmatpush1.bf16.msra.mxu0 %v5045_v17  ;;  %v352_v17 = vld [vmem:[#allocation5 + $0x850] sm:$0xff] }
 0x146   :  { %5048 = vmatprep.subr.bf16.mxu0 %v5047_v18  ;;  %v362_v18 = vld [vmem:[#allocation5 + $0x8a0] sm:$0xff] }
 0x147   :  { %v5089_v4 = vpack.c.bf16 %v362_v18, %v352_v17  ;;  %v194_v18 = vld [vmem:[#allocation5 + $0x360] sm:$0xff] }
 0x149   :  { %5050 = vmatpush1.bf16.msra.mxu0 %v5049_v22 }
 0x14a   :  { %5052 = vmatprep.subr.bf16.mxu0 %v5051_v23  ;;  %v5091_v23 = vpack.c.bf16 %v383_v20, %v373_v19  ;;  %v204_v19 = vld [vmem:[#allocation5 + $0x3b0] sm:$0xff]  ;;  %v215_v20 = vld [vmem:[#allocation5 + $0x408] sm:$0xff] }
 0x14d   :  { %5054 = vmatpush1.bf16.msra.mxu0 %v5053_v28  ;;  %v490_v28 = vlaneseq }
 0x14e   :  { %5056 = vmatprep.subr.bf16.mxu0 %v5055_v29  ;;  %v5093_v29 = vpack.c.bf16 %v382_v25, %v372_v24 }
 0x151   :  { %5058 = vmatpush1.bf16.msra.mxu0 %v5057_v34  ;;  %v105_v34 = vld [vmem:[#allocation5 + $0x98] sm:$0xff] }
 0x152   :  { %5060 = vmatprep.subr.bf16.mxu0 %v5059_v35  ;;  %v7189_v35 = vshrl.u32 %v490_v28, 7  ;;  %v5115_v37 = vpack.c.bf16 %v105_v34, %v95_v33  ;;  %v5141_v33 = vpack.c.bf16 %v224_v27, %v214_v26  ;;  %v1715_v26 = vld [vmem:[#allocation8 + $0xc38] sm:$0xff] }
 0x154   :  { %v7192_v43 = vsub.s32 0, %v7189_v35  ;;  %v7197_v46 = vsub.s32 1, %v7189_v35 }
 0x155   :  { %5062 = vmatpush1.bf16.msra.mxu0 %v5061_v40  ;;  %v115_v40 = vld [vmem:[#allocation5 + $0xe8] sm:$0xff] }
 0x156   :  { %5064 = vmatprep.subr.bf16.mxu0 %v5063_v41  ;;  %v7185_v21 = vpop.f32.mrb[0].mxu1  ;;  %v125_v41 = vld [vmem:[#allocation5 + $0x138] sm:$0xff] }
 0x157   :  { %v7187_v22 = vpop.f32.mrb[1].mxu1 }
 0x159   :  { %5066 = vmatpush1.bf16.msra.mxu0 %v5065_v47  ;;  %v5119_v47 = vpack.c.bf16 %v125_v41, %v115_v40  ;;  %v5147_v41 = vpack.c.bf16 %v265_v39, %v255_v38  ;;  %v1725_v38 = vld [vmem:[#allocation8 + $0xc88] sm:$0xff]  ;;  %v1735_v39 = vld [vmem:[#allocation8 + $0xcd8] sm:$0xff] }
 0x15a   :  { %5068 = vmatprep.subr.bf16.mxu0 %v5067_v48  ;;  %v114_v48 = vld [vmem:[#allocation5 + $0xe0] sm:$0xff] }
 0x15b   :  { %v5121_v55 = vpack.c.bf16 %v124_v49, %v114_v48  ;;  %v275_v48 = vld [vmem:[#allocation5 + $0x5e8] sm:$0xff]  ;;  %v285_v49 = vld [vmem:[#allocation5 + $0x638] sm:$0xff] }
 0x15d   :  { %5070 = vmatpush1.bf16.msra.mxu0 %v5069_v53  ;;  %v493_v53 = vrot.slane %v7194_v45, %v7192_v43 }
 0x15e   :  { %5072 = vmatprep.subr.bf16.mxu0 %v5071_v54  ;;  %v497_v54 = vrot.slane %v7194_v45, %v7197_v46 }
 0x161   :  { %5074 = vmatpush1.bf16.msra.mxu0 %v5073_v59 }
 0x162   :  { %5076 = vmatprep.subr.bf16.mxu0 %v5075_v60  ;;  %v155_v60 = vld [vmem:[#allocation5 + $0x228] sm:$0xff] }
 0x163   :  { %v5127_v3 = vpack.c.bf16 %v165_v5, %v155_v60  ;;  %v1665_v60 = vld [vmem:[#allocation8 + $0xaa8] sm:$0xff]  ;;  %v1675_v5 = vld [vmem:[#allocation8 + $0xaf8] sm:$0xff] }
 0x165   :  { %5078 = vmatpush1.bf16.msra.mxu0 %v5077_v1  ;;  %v5125_v1 = vpack.c.bf16 %v144_v58, %v134_v57  ;;  %v295_v57 = vld [vmem:[#allocation5 + $0x688] sm:$0xff] }
 0x166   :  { %5080 = vmatprep.subr.bf16.mxu0 %v5079_v2 }
 0x169   :  { %5082 = vmatpush1.bf16.msra.mxu0 %v5081_v9  ;;  %v185_v9 = vld [vmem:[#allocation5 + $0x318] sm:$0xff] }
 0x16a   :  { %5084 = vmatprep.subr.bf16.mxu0 %v5083_v10  ;;  %v5131_v11 = vpack.c.bf16 %v185_v9, %v175_v8  ;;  %v5263_v9 = vpack.c.bf16 %v1675_v5, %v1665_v60  ;;  %v384_v60 = vld [vmem:[#allocation5 + $0x950] sm:$0xff] }
 0x16d   :  { %5086 = vmatpush1.bf16.msra.mxu0 %v5085_v15  ;;  %v205_v15 = vld [vmem:[#allocation5 + $0x3b8] sm:$0xff] }
 0x16e   :  { %5088 = vmatprep.subr.bf16.mxu0 %v5087_v16  ;;  %v5133_v16 = vpack.c.bf16 %v184_v14, %v174_v13  ;;  %v5135_v17 = vpack.c.bf16 %v205_v15, %v195_v42  ;;  %v315_v13 = vld [vmem:[#allocation5 + $0x728] sm:$0xff]  ;;  %v325_v14 = vld [vmem:[#allocation5 + $0x778] sm:$0xff] }
 0x16f   :  { %v1685_v42 = vld [vmem:[#allocation8 + $0xb48] sm:$0xff] }
 0x171   :  { %5090 = vmatpush1.bf16.msra.mxu0 %v5089_v4  ;;  %v225_v4 = vld [vmem:[#allocation5 + $0x458] sm:$0xff] }
 0x172   :  { %5092 = vmatprep.subr.bf16.mxu0 %v5091_v23  ;;  %v5137_v23 = vpack.c.bf16 %v204_v19, %v194_v18  ;;  %v5139_v25 = vpack.c.bf16 %v225_v4, %v215_v20  ;;  %v5159_v18 = vpack.c.bf16 %v325_v14, %v315_v13  ;;  %v1684_v20 = vld [vmem:[#allocation8 + $0xb40] sm:$0xff]  ;;  %v1694_v4 = vld [vmem:[#allocation8 + $0xb90] sm:$0xff] }
 0x173   :  { %v394_v13 = vld [vmem:[#allocation5 + $0x9a0] sm:$0xff]  ;;  %v404_v14 = vld [vmem:[#allocation5 + $0x9f0] sm:$0xff] }
 0x175   :  { %5094 = vmatpush1.bf16.msra.mxu0 %v5093_v29 }
 0x176   :  { %5096 = vmatprep.subr.bf16.mxu0 %v5095_v30  ;;  %v235_v30 = vld [vmem:[#allocation5 + $0x4a8] sm:$0xff] }
 0x177   :  { %v5143_v34 = vpack.c.bf16 %v245_v31, %v235_v30  ;;  %v344_v30 = vld [vmem:[#allocation5 + $0x810] sm:$0xff] }
 0x179   :  { %5098 = vmatpush1.bf16.msra.mxu0 %v5097_v36  ;;  %v234_v36 = vld [vmem:[#allocation5 + $0x4a0] sm:$0xff] }
 0x17a   :  { %5116 = vmatprep.subr.bf16.mxu0 %v5115_v37  ;;  %v244_v37 = vld [vmem:[#allocation5 + $0x4f0] sm:$0xff] }
 0x17b   :  { %v5145_v40 = vpack.c.bf16 %v244_v37, %v234_v36  ;;  %v355_v36 = vld [vmem:[#allocation5 + $0x868] sm:$0xff]  ;;  %v365_v37 = vld [vmem:[#allocation5 + $0x8b8] sm:$0xff] }
 0x17c   :  { %1035 = vmatmul.mubr.f32.vlgmr.msra.gmra.mrb[6].mxu0 %v7199_v52 }
 0x17d   :  { %5118 = vmatpush1.bf16.msra.mxu0 %v5117_v44  ;;  %1176 = vmatprep.mubr.f32.mxu0 %v7182_v12  ;;  %v164_v12 = vld [vmem:[#allocation5 + $0x270] sm:$0xff]  ;;  %v254_v44 = vld [vmem:[#allocation5 + $0x540] sm:$0xff] }
 0x17e   :  { %5120 = vmatprep.subr.bf16.mxu0 %v5119_v47  ;;  %v5129_v10 = vpack.c.bf16 %v164_v12, %v154_v6  ;;  %v264_v47 = vld [vmem:[#allocation5 + $0x590] sm:$0xff]  ;;  %v294_v6 = vld [vmem:[#allocation5 + $0x680] sm:$0xff] }
 0x17f   :  { %v681_v59 = vpop.f32.mrb[0].mxu0  ;;  %v5149_v50 = vpack.c.bf16 %v264_v47, %v254_v44  ;;  %v304_v12 = vld [vmem:[#allocation5 + $0x6d0] sm:$0xff]  ;;  %v354_v44 = vld [vmem:[#allocation5 + $0x860] sm:$0xff] }
 0x180   :  { %v7207_v61 = vadd.f32 %v681_v59, %v493_v53  ;;  %v683_v62 = vpop.f32.mrb[1].mxu0  ;;  %v284_v53 = vld [vmem:[#allocation5 + $0x630] sm:$0xff]  ;;  %v305_v59 = vld [vmem:[#allocation5 + $0x6d8] sm:$0xff]  ;;  %v5157_v15 = vpack.c.bf16 %v304_v12, %v294_v6  ;;  %v395_v6 = vld [vmem:[#allocation5 + $0x9a8] sm:$0xff] }
 0x181   :  { %v7209_v63 = vadd.f32 %v683_v62, %v497_v54  ;;  %5122 = vmatpush1.bf16.msra.mxu0 %v5121_v55  ;;  %v5151_v54 = vpack.c.bf16 %v285_v49, %v275_v48  ;;  %v1644_v55 = vld [vmem:[#allocation8 + $0xa00] sm:$0xff]  ;;  %v5155_v8 = vpack.c.bf16 %v305_v59, %v295_v57  ;;  %v5167_v48 = vpack.c.bf16 %v365_v37, %v355_v36  ;;  %v374_v59 = vld [vmem:[#allocation5 + $0x900] sm:$0xff]  ;;  %v405_v12 = vld [vmem:[#allocation5 + $0x9f8] sm:$0xff] }
 0x182   :  { %v4785_v2 = vmul.f32 -1.442695, %v7207_v61  ;;  %5124 = vmatprep.subr.bf16.mxu0 %v5123_v56  ;;  %v1654_v56 = vld [vmem:[#allocation8 + $0xa50] sm:$0xff]  ;;  %v364_v47 = vld [vmem:[#allocation5 + $0x8b0] sm:$0xff]  ;;  %v5275_v49 = vpack.c.bf16 %v1735_v39, %v1725_v38  ;;  %v504_v37 = vsub.s32 3, %v7189_v35 }
 0x183   :  { %v4786_v7 = vmul.f32 -1.442695, %v7209_v63  ;;  %v5169_v57 = vpack.c.bf16 %v364_v47, %v354_v44  ;;  %v434_v38 = vld [vmem:[#allocation5 + $0xae0] sm:$0xff]  ;;  %v444_v39 = vld [vmem:[#allocation5 + $0xb30] sm:$0xff] }
 0x184   :  { %6874 = vpow2.f32 %v4785_v2  ;;  %v5153_v2 = vpack.c.bf16 %v284_v53, %v274_v51  ;;  %v1734_v51 = vld [vmem:[#allocation8 + $0xcd0] sm:$0xff]  ;;  %v375_v53 = vld [vmem:[#allocation5 + $0x908] sm:$0xff] }
 0x185   :  { %6876 = vpow2.f32 %v4786_v7  ;;  %5126 = vmatpush1.bf16.msra.mxu0 %v5125_v1  ;;  %v1804_v44 = vld [vmem:[#allocation8 + $0xf00] sm:$0xff]  ;;  %v1814_v47 = vld [vmem:[#allocation8 + $0xf50] sm:$0xff] }
 0x186   :  { %5128 = vmatprep.subr.bf16.mxu0 %v5127_v3  ;;  %v5261_v3 = vpack.c.bf16 %v1654_v56, %v1644_v55  ;;  %v1745_v55 = vld [vmem:[#allocation8 + $0xd28] sm:$0xff]  ;;  %v1755_v56 = vld [vmem:[#allocation8 + $0xd78] sm:$0xff] }
 0x189   :  { %5130 = vmatpush1.bf16.msra.mxu0 %v5129_v10  ;;  %v1664_v10 = vld [vmem:[#allocation8 + $0xaa0] sm:$0xff] }
 0x18a   :  { %5132 = vmatprep.subr.bf16.mxu0 %v5131_v11  ;;  %v1674_v11 = vld [vmem:[#allocation8 + $0xaf0] sm:$0xff] }
 0x18d   :  { %5134 = vmatpush1.bf16.msra.mxu0 %v5133_v16  ;;  %v5265_v16 = vpack.c.bf16 %v1674_v11, %v1664_v10  ;;  %v5173_v10 = vpack.c.bf16 %v384_v60, %v374_v59 }
 0x18e   :  { %v6875_v24 = vpop.eup %6874  ;;  %5136 = vmatprep.subr.bf16.mxu0 %v5135_v17  ;;  %v314_v17 = vld [vmem:[#allocation5 + $0x720] sm:$0xff] }
 0x18f   :  { %v6877_v28 = vpop.eup %6876  ;;  %v1284_v29 = vadd.f32 1.0, %v6875_v24  ;;  %v345_v24 = vld [vmem:[#allocation5 + $0x818] sm:$0xff] }
 0x190   :  { %v1285_v32 = vadd.f32 1.0, %v6877_v28  ;;  %v5269_v28 = vpack.c.bf16 %v1694_v4, %v1684_v20  ;;  %v5177_v20 = vpack.c.bf16 %v404_v14, %v394_v13  ;;  %v474_v13 = vld [vmem:[#allocation5 + $0xc20] sm:$0xff]  ;;  %v484_v14 = vld [vmem:[#allocation5 + $0xc70] sm:$0xff] }
 0x191   :  { %6878 = vrcp.f32 %v1284_v29  ;;  %5138 = vmatpush1.bf16.msra.mxu0 %v5137_v23  ;;  %v335_v23 = vld [vmem:[#allocation5 + $0x7c8] sm:$0xff]  ;;  %v334_v29 = vld [vmem:[#allocation5 + $0x7c0] sm:$0xff] }
 0x192   :  { %6880 = vrcp.f32 %v1285_v32  ;;  %5140 = vmatprep.subr.bf16.mxu0 %v5139_v25  ;;  %v1705_v25 = vld [vmem:[#allocation8 + $0xbe8] sm:$0xff]  ;;  %v5163_v31 = vpack.c.bf16 %v345_v24, %v335_v23  ;;  %v414_v23 = vld [vmem:[#allocation5 + $0xa40] sm:$0xff] }
 0x193   :  { %v5271_v32 = vpack.c.bf16 %v1715_v26, %v1705_v25  ;;  %v424_v24 = vld [vmem:[#allocation5 + $0xa90] sm:$0xff] }
 0x195   :  { %5142 = vmatpush1.bf16.msra.mxu0 %v5141_v33  ;;  %v1704_v33 = vld [vmem:[#allocation8 + $0xbe0] sm:$0xff] }
 0x196   :  { %5144 = vmatprep.subr.bf16.mxu0 %v5143_v34  ;;  %v1714_v34 = vld [vmem:[#allocation8 + $0xc30] sm:$0xff] }
 0x199   :  { %5146 = vmatpush1.bf16.msra.mxu0 %v5145_v40  ;;  %v5165_v40 = vpack.c.bf16 %v344_v30, %v334_v29  ;;  %v435_v29 = vld [vmem:[#allocation5 + $0xae8] sm:$0xff]  ;;  %v445_v30 = vld [vmem:[#allocation5 + $0xb38] sm:$0xff] }
 0x19a   :  { %5148 = vmatprep.subr.bf16.mxu0 %v5147_v41  ;;  %v5273_v41 = vpack.c.bf16 %v1714_v34, %v1704_v33  ;;  %v500_v33 = vsub.s32 2, %v7189_v35  ;;  %v5181_v34 = vpack.c.bf16 %v424_v24, %v414_v23 }
 0x19b   :  { %v6879_v58 = vpop.eup %6878 }
 0x19c   :  { %v6881_v62 = vpop.eup %6880  ;;  %v7217_v7 = vmul.f32 %v6879_v58, %v7207_v61  ;;  %v324_v61 = vld [vmem:[#allocation5 + $0x770] sm:$0xff] }
 0x19d   :  { %v7214_v1 = vmul.f32 %v6881_v62, %v7209_v63  ;;  %5150 = vmatpush1.bf16.msra.mxu0 %v5149_v50  ;;  %v1695_v63 = vld [vmem:[#allocation8 + $0xb98] sm:$0xff]  ;;  %v5161_v27 = vpack.c.bf16 %v324_v61, %v314_v17  ;;  %v1724_v50 = vld [vmem:[#allocation8 + $0xc80] sm:$0xff]  ;;  %v5279_v62 = vpack.c.bf16 %v1755_v56, %v1745_v55  ;;  %v425_v61 = vld [vmem:[#allocation5 + $0xa98] sm:$0xff]  ;;  %v5185_v55 = vpack.c.bf16 %v444_v39, %v434_v38 }
 0x19e   :  { %5152 = vmatprep.subr.bf16.mxu0 %v5151_v54  ;;  %v5267_v19 = vpack.c.bf16 %v1695_v63, %v1685_v42  ;;  %v385_v54 = vld [vmem:[#allocation5 + $0x958] sm:$0xff]  ;;  %v5277_v58 = vpack.c.bf16 %v1734_v51, %v1724_v50  ;;  %v5175_v42 = vpack.c.bf16 %v405_v12, %v395_v6  ;;  %v415_v17 = vld [vmem:[#allocation5 + $0xa48] sm:$0xff]  ;;  %v5293_v56 = vpack.c.bf16 %v1814_v47, %v1804_v44 }
 0x19f   :  { %3042 = vmatprep.mubr.f32.mxu1 %v7214_v1  ;;  %v5171_v5 = vpack.c.bf16 %v385_v54, %v375_v53  ;;  %v5179_v25 = vpack.c.bf16 %v425_v61, %v415_v17  ;;  %v1825_v50 = vld [vmem:[#allocation8 + $0xfa8] sm:$0xff]  ;;  %v1835_v51 = vld [vmem:[#allocation8 + $0xff8] sm:$0xff]  ;;  %v501_v53 = vrot.slane %v7194_v45, %v500_v33  ;;  %v505_v54 = vrot.slane %v7194_v45, %v504_v37  ;;  %v1854_v17 = vld [vmem:[#allocation8 + $0x1090] sm:$0xff] }
 0x1a0   :  { %3043 = vmatmul.mubr.f32.vlgmr.msra.gmra.mrb[4].mxu1 %v7217_v7  ;;  %v5295_v60 = vpack.c.bf16 %v1835_v51, %v1825_v50  ;;  %v1845_v6 = vld [vmem:[#allocation8 + $0x1048] sm:$0xff]  ;;  %v1855_v12 = vld [vmem:[#allocation8 + $0x1098] sm:$0xff]  ;;  %v1884_v44 = vld [vmem:[#allocation8 + $0x1180] sm:$0xff] }
 0x1a1   :  { %5154 = vmatpush1.bf16.msra.mxu0 %v5153_v2  ;;  %5262 = vmatpush1.bf16.msra.mxu1 %v5261_v3  ;;  %v1744_v2 = vld [vmem:[#allocation8 + $0xd20] sm:$0xff]  ;;  %v1754_v3 = vld [vmem:[#allocation8 + $0xd70] sm:$0xff]  ;;  %v1327_v61 = vld [vmem:[#allocation8 + $0x18] sm:$0xff] }
 0x1a2   :  { %5156 = vmatprep.subr.bf16.mxu0 %v5155_v8  ;;  %5264 = vmatprep.subr.bf16.mxu1 %v5263_v9  ;;  %v1765_v8 = vld [vmem:[#allocation8 + $0xdc8] sm:$0xff]  ;;  %v1775_v9 = vld [vmem:[#allocation8 + $0xe18] sm:$0xff]  ;;  %v5281_v11 = vpack.c.bf16 %v1754_v3, %v1744_v2 }
 0x1a3   :  { %v5283_v63 = vpack.c.bf16 %v1775_v9, %v1765_v8  ;;  %v485_v3 = vld [vmem:[#allocation5 + $0xc78] sm:$0xff] }
 0x1a4   :  { %v1377_v50 = vld [vmem:[#allocation8 + $0x1a8] sm:$0xff] }
 0x1a5   :  { %5158 = vmatpush1.bf16.msra.mxu0 %v5157_v15  ;;  %5266 = vmatpush1.bf16.msra.mxu1 %v5265_v16  ;;  %v1764_v15 = vld [vmem:[#allocation8 + $0xdc0] sm:$0xff]  ;;  %v1774_v16 = vld [vmem:[#allocation8 + $0xe10] sm:$0xff] }
 0x1a6   :  { %5160 = vmatprep.subr.bf16.mxu0 %v5159_v18  ;;  %5268 = vmatprep.subr.bf16.mxu1 %v5267_v19  ;;  %v1785_v18 = vld [vmem:[#allocation8 + $0xe68] sm:$0xff]  ;;  %v1795_v19 = vld [vmem:[#allocation8 + $0xeb8] sm:$0xff]  ;;  %v5285_v4 = vpack.c.bf16 %v1774_v16, %v1764_v15  ;;  %v5299_v15 = vpack.c.bf16 %v1855_v12, %v1845_v6  ;;  %v1844_v16 = vld [vmem:[#allocation8 + $0x1040] sm:$0xff] }
 0x1a7   :  { %v5287_v26 = vpack.c.bf16 %v1795_v19, %v1785_v18  ;;  %v1337_v18 = vld [vmem:[#allocation8 + $0x68] sm:$0xff]  ;;  %v5301_v24 = vpack.c.bf16 %v1854_v17, %v1844_v16  ;;  %v1935_v12 = vld [vmem:[#allocation8 + $0x1318] sm:$0xff]  ;;  %v1924_v16 = vld [vmem:[#allocation8 + $0x12c0] sm:$0xff] }
 0x1a8   :  { %v1865_v19 = vld [vmem:[#allocation8 + $0x10e8] sm:$0xff] }
 0x1a9   :  { %5162 = vmatpush1.bf16.msra.mxu0 %v5161_v27  ;;  %5270 = vmatpush1.bf16.msra.mxu1 %v5269_v28  ;;  %v1784_v27 = vld [vmem:[#allocation8 + $0xe60] sm:$0xff]  ;;  %v1794_v28 = vld [vmem:[#allocation8 + $0xeb0] sm:$0xff]  ;;  %v1925_v6 = vld [vmem:[#allocation8 + $0x12c8] sm:$0xff] }
 0x1aa   :  { %5164 = vmatprep.subr.bf16.mxu0 %v5163_v31  ;;  %5272 = vmatprep.subr.bf16.mxu1 %v5271_v32  ;;  %v1805_v31 = vld [vmem:[#allocation8 + $0xf08] sm:$0xff]  ;;  %v1815_v32 = vld [vmem:[#allocation8 + $0xf58] sm:$0xff]  ;;  %v5289_v36 = vpack.c.bf16 %v1794_v28, %v1784_v27  ;;  %v1336_v27 = vld [vmem:[#allocation8 + $0x60] sm:$0xff] }
 0x1ab   :  { %v6916_v51 = vld [vmem:[#allocation2 + $0x10] sm:$0xff] }
 0x1ad   :  { %5166 = vmatpush1.bf16.msra.mxu0 %v5165_v40  ;;  %5274 = vmatpush1.bf16.msra.mxu1 %v5273_v41  ;;  %v5183_v40 = vpack.c.bf16 %v445_v30, %v435_v29  ;;  %v5291_v41 = vpack.c.bf16 %v1815_v32, %v1805_v31  ;;  %v1874_v29 = vld [vmem:[#allocation8 + $0x1130] sm:$0xff]  ;;  %v1347_v30 = vld [vmem:[#allocation8 + $0xb8] sm:$0xff]  ;;  %v1357_v31 = vld [vmem:[#allocation8 + $0x108] sm:$0xff] }
 0x1ae   :  { %5168 = vmatprep.subr.bf16.mxu0 %v5167_v48  ;;  %5276 = vmatprep.subr.bf16.mxu1 %v5275_v49  ;;  %v455_v48 = vld [vmem:[#allocation5 + $0xb88] sm:$0xff]  ;;  %v465_v49 = vld [vmem:[#allocation5 + $0xbd8] sm:$0xff]  ;;  %v5519_v39 = vpack.c.bf16 %v1357_v31, %v1347_v30 }
 0x1af   :  { %v5187_v59 = vpack.c.bf16 %v465_v49, %v455_v48  ;;  %v1885_v32 = vld [vmem:[#allocation8 + $0x1188] sm:$0xff]  ;;  %v1894_v48 = vld [vmem:[#allocation8 + $0x11d0] sm:$0xff]  ;;  %v1367_v49 = vld [vmem:[#allocation8 + $0x158] sm:$0xff] }
 0x1b0   :  { %v1427_v30 = vld [vmem:[#allocation8 + $0x338] sm:$0xff]  ;;  %v1437_v31 = vld [vmem:[#allocation8 + $0x388] sm:$0xff] }
 0x1b1   :  { %5170 = vmatpush1.bf16.msra.mxu0 %v5169_v57  ;;  %5278 = vmatpush1.bf16.msra.mxu1 %v5277_v58  ;;  %v454_v57 = vld [vmem:[#allocation5 + $0xb80] sm:$0xff]  ;;  %v464_v58 = vld [vmem:[#allocation5 + $0xbd0] sm:$0xff] }
 0x1b2   :  { %5172 = vmatprep.subr.bf16.mxu0 %v5171_v5  ;;  %5280 = vmatprep.subr.bf16.mxu1 %v5279_v62  ;;  %v1824_v5 = vld [vmem:[#allocation8 + $0xfa0] sm:$0xff] }
 0x1b3   :  { %v475_v62 = vld [vmem:[#allocation5 + $0xc28] sm:$0xff] }
 0x1b5   :  { %5174 = vmatpush1.bf16.msra.mxu0 %v5173_v10  ;;  %5282 = vmatpush1.bf16.msra.mxu1 %v5281_v11  ;;  %v5189_v10 = vpack.c.bf16 %v464_v58, %v454_v57  ;;  %v5523_v57 = vpack.c.bf16 %v1377_v50, %v1367_v49  ;;  %v1366_v58 = vld [vmem:[#allocation8 + $0x150] sm:$0xff]  ;;  %v1964_v49 = vld [vmem:[#allocation8 + $0x1400] sm:$0xff] }
 0x1b6   :  { %5176 = vmatprep.subr.bf16.mxu0 %v5175_v42  ;;  %5284 = vmatprep.subr.bf16.mxu1 %v5283_v63  ;;  %v5191_v63 = vpack.c.bf16 %v485_v3, %v475_v62  ;;  %v1387_v62 = vld [vmem:[#allocation8 + $0x1f8] sm:$0xff]  ;;  %v1974_v50 = vld [vmem:[#allocation8 + $0x1450] sm:$0xff] }
 0x1b9   :  { %5178 = vmatpush1.bf16.msra.mxu0 %v5177_v20  ;;  %5286 = vmatpush1.bf16.msra.mxu1 %v5285_v4  ;;  %v1875_v20 = vld [vmem:[#allocation8 + $0x1138] sm:$0xff] }
 0x1ba   :  { %5180 = vmatprep.subr.bf16.mxu0 %v5179_v25  ;;  %5288 = vmatprep.subr.bf16.mxu1 %v5287_v26  ;;  %v5515_v25 = vpack.c.bf16 %v1337_v18, %v1327_v61  ;;  %v1326_v26 = vld [vmem:[#allocation8 + $0x10] sm:$0xff]  ;;  %v5303_v28 = vpack.c.bf16 %v1875_v20, %v1865_v19  ;;  %v5315_v61 = vpack.c.bf16 %v1935_v12, %v1925_v6  ;;  %v1407_v19 = vld [vmem:[#allocation8 + $0x298] sm:$0xff]  ;;  %v1417_v20 = vld [vmem:[#allocation8 + $0x2e8] sm:$0xff] }
 0x1bb   :  { %v1934_v18 = vld [vmem:[#allocation8 + $0x1310] sm:$0xff]  ;;  %v1984_v6 = vld [vmem:[#allocation8 + $0x14a0] sm:$0xff] }
 0x1bc   :  { %1177 = vmatmul.mubr.f32.vlgmr.msra.gmra.mrb[8].mxu0 %v7199_v52  ;;  %v1834_v52 = vld [vmem:[#allocation8 + $0xff0] sm:$0xff] }
 0x1bd   :  { %5182 = vmatpush1.bf16.msra.mxu0 %v5181_v34  ;;  %5290 = vmatpush1.bf16.msra.mxu1 %v5289_v36  ;;  %v5297_v11 = vpack.c.bf16 %v1834_v52, %v1824_v5  ;;  %v1895_v34 = vld [vmem:[#allocation8 + $0x11d8] sm:$0xff]  ;;  %v5517_v36 = vpack.c.bf16 %v1336_v27, %v1326_v26  ;;  %v1914_v52 = vld [vmem:[#allocation8 + $0x1270] sm:$0xff]  ;;  %v1416_v27 = vld [vmem:[#allocation8 + $0x2e0] sm:$0xff] }
 0x1be   :  { %5184 = vmatprep.subr.bf16.mxu0 %v5183_v40  ;;  %5292 = vmatprep.subr.bf16.mxu1 %v5291_v41  ;;  %v1346_v40 = vld [vmem:[#allocation8 + $0xb0] sm:$0xff]  ;;  %v1356_v41 = vld [vmem:[#allocation8 + $0x100] sm:$0xff]  ;;  %v5307_v47 = vpack.c.bf16 %v1895_v34, %v1885_v32  ;;  %v1965_v32 = vld [vmem:[#allocation8 + $0x1408] sm:$0xff] }
 0x1bf   :  { %v752_v2 = vpop.f32.mrb[2].mxu0  ;;  %1247 = vmatprep.mubr.f32.mxu0 %v7066_v0  ;;  %v1406_v26 = vld [vmem:[#allocation8 + $0x290] sm:$0xff]  ;;  %v1975_v34 = vld [vmem:[#allocation8 + $0x1458] sm:$0xff] }
 0x1c0   :  { %v753_v8 = vadd.f32 %v752_v2, %v501_v53  ;;  %v754_v9 = vpop.f32.mrb[3].mxu0  ;;  %v1905_v53 = vld [vmem:[#allocation8 + $0x1228] sm:$0xff]  ;;  %v1994_v12 = vld [vmem:[#allocation8 + $0x14f0] sm:$0xff] }
 0x1c1   :  { %v755_v45 = vadd.f32 %v754_v9, %v505_v54  ;;  %5186 = vmatpush1.bf16.msra.mxu0 %v5185_v55  ;;  %5294 = vmatpush1.bf16.msra.mxu1 %v5293_v56  ;;  %v1915_v54 = vld [vmem:[#allocation8 + $0x1278] sm:$0xff]  ;;  %v5521_v55 = vpack.c.bf16 %v1356_v41, %v1346_v40  ;;  %v5309_v56 = vpack.c.bf16 %v1894_v48, %v1884_v44  ;;  %v1397_v2 = vld [vmem:[#allocation8 + $0x248] sm:$0xff]  ;;  %v1426_v40 = vld [vmem:[#allocation8 + $0x330] sm:$0xff] }
 0x1c2   :  { %v7232_v42 = vadd.f32 %v7185_v21, %v753_v8  ;;  %5188 = vmatprep.subr.bf16.mxu0 %v5187_v59  ;;  %5296 = vmatprep.subr.bf16.mxu1 %v5295_v60  ;;  %v5193_v21 = vpack.c.bf16 %v484_v14, %v474_v13  ;;  %v1376_v59 = vld [vmem:[#allocation8 + $0x1a0] sm:$0xff]  ;;  %v5311_v5 = vpack.c.bf16 %v1915_v54, %v1905_v53  ;;  %v1447_v44 = vld [vmem:[#allocation8 + $0x3d8] sm:$0xff]  ;;  %v1985_v54 = vld [vmem:[#allocation8 + $0x14a8] sm:$0xff] }
 0x1c3   :  { %v7235_v0 = vadd.f32 %v7187_v22, %v755_v45  ;;  %v1864_v22 = vld [vmem:[#allocation8 + $0x10e0] sm:$0xff]  ;;  %v5525_v45 = vpack.c.bf16 %v1376_v59, %v1366_v58  ;;  %v5527_v14 = vpack.c.bf16 %v1397_v2, %v1387_v62  ;;  %v5323_v48 = vpack.c.bf16 %v1975_v34, %v1965_v32  ;;  %v1446_v58 = vld [vmem:[#allocation8 + $0x3d0] sm:$0xff] }
 0x1c4   :  { %v4787_v4 = vmul.f32 -1.442695, %v7232_v42  ;;  %v5305_v38 = vpack.c.bf16 %v1874_v29, %v1864_v22  ;;  %v1904_v60 = vld [vmem:[#allocation8 + $0x1220] sm:$0xff]  ;;  %v1954_v29 = vld [vmem:[#allocation8 + $0x13b0] sm:$0xff]  ;;  %v5325_v62 = vpack.c.bf16 %v1974_v50, %v1964_v49  ;;  %v2065_v49 = vld [vmem:[#allocation8 + $0x1728] sm:$0xff] }
 0x1c5   :  { %v4788_v23 = vmul.f32 -1.442695, %v7235_v0  ;;  %5190 = vmatpush1.bf16.msra.mxu0 %v5189_v10  ;;  %5298 = vmatpush1.bf16.msra.mxu1 %v5297_v11  ;;  %v7241_v10 = vpop.f32.mrb[2].mxu1  ;;  %v5313_v13 = vpack.c.bf16 %v1914_v52, %v1904_v60  ;;  %v1436_v41 = vld [vmem:[#allocation8 + $0x380] sm:$0xff]  ;;  %v1477_v52 = vld [vmem:[#allocation8 + $0x4c8] sm:$0xff]  ;;  %v1506_v34 = vld [vmem:[#allocation8 + $0x5b0] sm:$0xff] }
 0x1c6   :  { %6882 = vpow2.f32 %v4787_v4  ;;  %5192 = vmatprep.subr.bf16.mxu0 %v5191_v63  ;;  %5300 = vmatprep.subr.bf16.mxu1 %v5299_v15  ;;  %v1386_v63 = vld [vmem:[#allocation8 + $0x1f0] sm:$0xff]  ;;  %v1396_v15 = vld [vmem:[#allocation8 + $0x240] sm:$0xff]  ;;  %v7243_v17 = vpop.f32.mrb[3].mxu1  ;;  %v1945_v4 = vld [vmem:[#allocation8 + $0x1368] sm:$0xff]  ;;  %v5537_v53 = vpack.c.bf16 %v1436_v41, %v1426_v40 }
 0x1c7   :  { %6884 = vpow2.f32 %v4788_v23  ;;  %v1955_v23 = vld [vmem:[#allocation8 + $0x13b8] sm:$0xff]  ;;  %v1456_v59 = vld [vmem:[#allocation8 + $0x420] sm:$0xff] }
 0x1c8   :  { %v5319_v22 = vpack.c.bf16 %v1955_v23, %v1945_v4  ;;  %v1486_v23 = vld [vmem:[#allocation8 + $0x510] sm:$0xff]  ;;  %v2075_v50 = vld [vmem:[#allocation8 + $0x1778] sm:$0xff] }
 0x1c9   :  { %5194 = vmatpush1.bf16.msra.mxu0 %v5193_v21  ;;  %5302 = vmatpush1.bf16.msra.mxu1 %v5301_v24  ;;  %v5529_v21 = vpack.c.bf16 %v1396_v15, %v1386_v63  ;;  %v5317_v24 = vpack.c.bf16 %v1934_v18, %v1924_v16  ;;  %v1497_v63 = vld [vmem:[#allocation8 + $0x568] sm:$0xff]  ;;  %v2004_v16 = vld [vmem:[#allocation8 + $0x1540] sm:$0xff] }
 0x1ca   :  { %5516 = vmatprep.subr.bf16.mxu0 %v5515_v25  ;;  %5304 = vmatprep.subr.bf16.mxu1 %v5303_v28  ;;  %v5531_v25 = vpack.c.bf16 %v1417_v20, %v1407_v19  ;;  %v1944_v28 = vld [vmem:[#allocation8 + $0x1360] sm:$0xff]  ;;  %v2025_v19 = vld [vmem:[#allocation8 + $0x15e8] sm:$0xff]  ;;  %v2035_v20 = vld [vmem:[#allocation8 + $0x1638] sm:$0xff] }
 0x1cc   :  { %4784 = vmatmul.mubr.msk.f32.vlgmr.msra.gmra.mrb[8].mxu0 %vm540_vm0, %v6916_v51 }
 0x1cd   :  { %5518 = vmatpush1.bf16.msra.mxu0 %v5517_v36  ;;  %3397 = vmatprep.mubr.f32.mxu0 %v7214_v1  ;;  %v5533_v36 = vpack.c.bf16 %v1416_v27, %v1406_v26  ;;  %v5335_v27 = vpack.c.bf16 %v2035_v20, %v2025_v19  ;;  %v1587_v19 = vld [vmem:[#allocation8 + $0x838] sm:$0xff]  ;;  %v1597_v20 = vld [vmem:[#allocation8 + $0x888] sm:$0xff] }
 0x1ce   :  { %5306 = vmatpush1.bf16.msra.mxu1 %v5305_v38  ;;  %5520 = vmatprep.subr.bf16.mxu0 %v5519_v39  ;;  %v5321_v38 = vpack.c.bf16 %v1954_v29, %v1944_v28  ;;  %v5535_v39 = vpack.c.bf16 %v1437_v31, %v1427_v30  ;;  %v2024_v28 = vld [vmem:[#allocation8 + $0x15e0] sm:$0xff]  ;;  %v2045_v30 = vld [vmem:[#allocation8 + $0x1688] sm:$0xff]  ;;  %v2055_v31 = vld [vmem:[#allocation8 + $0x16d8] sm:$0xff] }
 0x1cf   :  { %5308 = vmatprep.subr.bf16.mxu1 %v5307_v47  ;;  %v1457_v47 = vld [vmem:[#allocation8 + $0x428] sm:$0xff]  ;;  %v5339_v41 = vpack.c.bf16 %v2055_v31, %v2045_v30  ;;  %v1607_v30 = vld [vmem:[#allocation8 + $0x8d8] sm:$0xff] }
 0x1d0   :  { %v6883_v3 = vpop.eup %6882  ;;  %v1617_v31 = vld [vmem:[#allocation8 + $0x928] sm:$0xff] }
 0x1d1   :  { %v6885_v8 = vpop.eup %6884  ;;  %v1286_v9 = vadd.f32 1.0, %v6883_v3  ;;  %5522 = vmatpush1.bf16.msra.mxu0 %v5521_v55  ;;  %v1995_v55 = vld [vmem:[#allocation8 + $0x14f8] sm:$0xff] }
 0x1d2   :  { %v1287_v11 = vadd.f32 1.0, %v6885_v8  ;;  %5310 = vmatpush1.bf16.msra.mxu1 %v5309_v56  ;;  %5524 = vmatprep.subr.bf16.mxu0 %v5523_v57  ;;  %v5539_v57 = vpack.c.bf16 %v1457_v47, %v1447_v44  ;;  %v5327_v3 = vpack.c.bf16 %v1995_v55, %v1985_v54  ;;  %v5541_v8 = vpack.c.bf16 %v1456_v59, %v1446_v58  ;;  %v2044_v44 = vld [vmem:[#allocation8 + $0x1680] sm:$0xff]  ;;  %v2054_v47 = vld [vmem:[#allocation8 + $0x16d0] sm:$0xff]  ;;  %v1547_v55 = vld [vmem:[#allocation8 + $0x6f8] sm:$0xff] }
 0x1d3   :  { %6886 = vrcp.f32 %v1286_v9  ;;  %5312 = vmatprep.subr.bf16.mxu1 %v5311_v5  ;;  %v1467_v5 = vld [vmem:[#allocation8 + $0x478] sm:$0xff]  ;;  %v2005_v9 = vld [vmem:[#allocation8 + $0x1548] sm:$0xff]  ;;  %v1536_v54 = vld [vmem:[#allocation8 + $0x6a0] sm:$0xff]  ;;  %v5343_v58 = vpack.c.bf16 %v2075_v50, %v2065_v49 }
 0x1d4   :  { %6888 = vrcp.f32 %v1287_v11  ;;  %v1466_v11 = vld [vmem:[#allocation8 + $0x470] sm:$0xff]  ;;  %v2064_v59 = vld [vmem:[#allocation8 + $0x1720] sm:$0xff]  ;;  %v1627_v49 = vld [vmem:[#allocation8 + $0x978] sm:$0xff] }
 0x1d5   :  { %5526 = vmatpush1.bf16.msra.mxu0 %v5525_v45  ;;  %v2015_v45 = vld [vmem:[#allocation8 + $0x1598] sm:$0xff]  ;;  %v1637_v50 = vld [vmem:[#allocation8 + $0x9c8] sm:$0xff] }
 0x1d6   :  { %5314 = vmatpush1.bf16.msra.mxu1 %v5313_v13  ;;  %5528 = vmatprep.subr.bf16.mxu0 %v5527_v14  ;;  %v1476_v13 = vld [vmem:[#allocation8 + $0x4c0] sm:$0xff]  ;;  %v1487_v14 = vld [vmem:[#allocation8 + $0x518] sm:$0xff]  ;;  %v5331_v15 = vpack.c.bf16 %v2015_v45, %v2005_v9  ;;  %v1577_v45 = vld [vmem:[#allocation8 + $0x7e8] sm:$0xff] }
 0x1d7   :  { %5316 = vmatprep.subr.bf16.mxu1 %v5315_v61  ;;  %v2014_v61 = vld [vmem:[#allocation8 + $0x1590] sm:$0xff]  ;;  %v5545_v18 = vpack.c.bf16 %v1476_v13, %v1466_v11  ;;  %v5547_v4 = vpack.c.bf16 %v1497_v63, %v1487_v14  ;;  %v1567_v9 = vld [vmem:[#allocation8 + $0x798] sm:$0xff]  ;;  %v2084_v13 = vld [vmem:[#allocation8 + $0x17c0] sm:$0xff] }
 0x1d8   :  { %v5333_v26 = vpack.c.bf16 %v2014_v61, %v2004_v16  ;;  %v2094_v14 = vld [vmem:[#allocation8 + $0x1810] sm:$0xff]  ;;  %v5563_v16 = vpack.c.bf16 %v1577_v45, %v1567_v9 }
 0x1d9   :  { %5530 = vmatpush1.bf16.msra.mxu0 %v5529_v21  ;;  %v1496_v21 = vld [vmem:[#allocation8 + $0x560] sm:$0xff]  ;;  %v1566_v61 = vld [vmem:[#allocation8 + $0x790] sm:$0xff] }
 0x1da   :  { %5318 = vmatpush1.bf16.msra.mxu1 %v5317_v24  ;;  %5532 = vmatprep.subr.bf16.mxu0 %v5531_v25  ;;  %v1507_v24 = vld [vmem:[#allocation8 + $0x5b8] sm:$0xff]  ;;  %v1517_v25 = vld [vmem:[#allocation8 + $0x608] sm:$0xff]  ;;  %v5549_v29 = vpack.c.bf16 %v1496_v21, %v1486_v23  ;;  %v2104_v21 = vld [vmem:[#allocation8 + $0x1860] sm:$0xff] }
 0x1db   :  { %5320 = vmatprep.subr.bf16.mxu1 %v5319_v22  ;;  %v2034_v22 = vld [vmem:[#allocation8 + $0x1630] sm:$0xff]  ;;  %v5551_v32 = vpack.c.bf16 %v1517_v25, %v1507_v24 }
 0x1dc   :  { %v5337_v40 = vpack.c.bf16 %v2034_v22, %v2024_v28  ;;  %v2114_v24 = vld [vmem:[#allocation8 + $0x18b0] sm:$0xff]  ;;  %v5567_v28 = vpack.c.bf16 %v1597_v20, %v1587_v19  ;;  %v2184_v19 = vld [vmem:[#allocation8 + $0x1ae0] sm:$0xff] }
 0x1dd   :  { %v6887_v51 = vpop.eup %6886  ;;  %5534 = vmatpush1.bf16.msra.mxu0 %v5533_v36  ;;  %v1516_v36 = vld [vmem:[#allocation8 + $0x600] sm:$0xff]  ;;  %v1586_v22 = vld [vmem:[#allocation8 + $0x830] sm:$0xff] }
 0x1de   :  { %v6889_v56 = vpop.eup %6888  ;;  %5322 = vmatpush1.bf16.msra.mxu1 %v5321_v38  ;;  %5536 = vmatprep.subr.bf16.mxu0 %v5535_v39  ;;  %v7249_v2 = vmul.f32 %v6887_v51, %v7232_v42  ;;  %v5329_v42 = vpack.c.bf16 %v1994_v12, %v1984_v6  ;;  %v1527_v38 = vld [vmem:[#allocation8 + $0x658] sm:$0xff]  ;;  %v1537_v39 = vld [vmem:[#allocation8 + $0x6a8] sm:$0xff]  ;;  %v1546_v12 = vld [vmem:[#allocation8 + $0x6f0] sm:$0xff] }
 0x1df   :  { %v7246_v60 = vmul.f32 %v6889_v56, %v7235_v0  ;;  %5324 = vmatprep.subr.bf16.mxu1 %v5323_v48  ;;  %v5543_v0 = vpack.c.bf16 %v1477_v52, %v1467_v5  ;;  %v5553_v48 = vpack.c.bf16 %v1516_v36, %v1506_v34  ;;  %v5555_v51 = vpack.c.bf16 %v1537_v39, %v1527_v38  ;;  %v1557_v56 = vld [vmem:[#allocation8 + $0x748] sm:$0xff]  ;;  %v2074_v5 = vld [vmem:[#allocation8 + $0x1770] sm:$0xff]  ;;  %v2124_v36 = vld [vmem:[#allocation8 + $0x1900] sm:$0xff] }
 0x1e0   :  { %v5559_v6 = vpack.c.bf16 %v1557_v56, %v1547_v55  ;;  %v2134_v38 = vld [vmem:[#allocation8 + $0x1950] sm:$0xff] }
 0x1e1   :  { %3113 = vmatprep.mubr.f32.mxu1 %v7246_v60  ;;  %5538 = vmatpush1.bf16.msra.mxu0 %v5537_v53  ;;  %v1526_v53 = vld [vmem:[#allocation8 + $0x650] sm:$0xff] }
 0x1e2   :  { %3114 = vmatmul.mubr.f32.vlgmr.msra.gmra.mrb[4].mxu1 %v7249_v2  ;;  %5540 = vmatprep.subr.bf16.mxu0 %v5539_v57  ;;  %v5341_v57 = vpack.c.bf16 %v2054_v47, %v2044_v44  ;;  %v5557_v52 = vpack.c.bf16 %v1536_v54, %v1526_v53  ;;  %v5571_v44 = vpack.c.bf16 %v1617_v31, %v1607_v30  ;;  %v1606_v47 = vld [vmem:[#allocation8 + $0x8d0] sm:$0xff]  ;;  %v2144_v54 = vld [vmem:[#allocation8 + $0x19a0] sm:$0xff] }
 0x1e3   :  { %5326 = vmatpush1.bf16.msra.mxu1 %v5325_v62  ;;  %v2085_v62 = vld [vmem:[#allocation8 + $0x17c8] sm:$0xff]  ;;  %v2154_v55 = vld [vmem:[#allocation8 + $0x19f0] sm:$0xff] }
 0x1e4   :  { %5328 = vmatprep.subr.bf16.mxu1 %v5327_v3  ;;  %v2095_v3 = vld [vmem:[#allocation8 + $0x1818] sm:$0xff]  ;;  %v2174_v9 = vld [vmem:[#allocation8 + $0x1a90] sm:$0xff] }
 0x1e5   :  { %5542 = vmatpush1.bf16.msra.mxu0 %v5541_v8  ;;  %v1556_v8 = vld [vmem:[#allocation8 + $0x740] sm:$0xff]  ;;  %v5347_v11 = vpack.c.bf16 %v2095_v3, %v2085_v62  ;;  %v1647_v62 = vld [vmem:[#allocation8 + $0xa18] sm:$0xff]  ;;  %v1657_v3 = vld [vmem:[#allocation8 + $0xa68] sm:$0xff] }
 0x1e6   :  { %5544 = vmatprep.subr.bf16.mxu0 %v5543_v0  ;;  %v5345_v0 = vpack.c.bf16 %v2074_v5, %v2064_v59  ;;  %v5561_v63 = vpack.c.bf16 %v1556_v8, %v1546_v12  ;;  %v5575_v59 = vpack.c.bf16 %v1637_v50, %v1627_v49  ;;  %v1626_v5 = vld [vmem:[#allocation8 + $0x970] sm:$0xff]  ;;  %v2164_v8 = vld [vmem:[#allocation8 + $0x1a40] sm:$0xff]  ;;  %v1707_v50 = vld [vmem:[#allocation8 + $0xbf8] sm:$0xff] }
 0x1e7   :  { %5330 = vmatpush1.bf16.msra.mxu1 %v5329_v42  ;;  %v2105_v42 = vld [vmem:[#allocation8 + $0x1868] sm:$0xff]  ;;  %v2194_v20 = vld [vmem:[#allocation8 + $0x1b30] sm:$0xff] }
 0x1e8   :  { %5332 = vmatprep.subr.bf16.mxu1 %v5331_v15  ;;  %v2115_v15 = vld [vmem:[#allocation8 + $0x18b8] sm:$0xff] }
 0x1e9   :  { %5546 = vmatpush1.bf16.msra.mxu0 %v5545_v18  ;;  %v1576_v18 = vld [vmem:[#allocation8 + $0x7e0] sm:$0xff]  ;;  %v5351_v23 = vpack.c.bf16 %v2115_v15, %v2105_v42  ;;  %v1667_v42 = vld [vmem:[#allocation8 + $0xab8] sm:$0xff]  ;;  %v1677_v15 = vld [vmem:[#allocation8 + $0xb08] sm:$0xff] }
 0x1ea   :  { %5548 = vmatprep.subr.bf16.mxu0 %v5547_v4  ;;  %v5349_v4 = vpack.c.bf16 %v2094_v14, %v2084_v13  ;;  %v5565_v25 = vpack.c.bf16 %v1576_v18, %v1566_v61  ;;  %v5579_v13 = vpack.c.bf16 %v1657_v3, %v1647_v62  ;;  %v1646_v14 = vld [vmem:[#allocation8 + $0xa10] sm:$0xff]  ;;  %v508_v61 = vsub.s32 4, %v7189_v35  ;;  %v2255_v62 = vld [vmem:[#allocation8 + $0x1d18] sm:$0xff] }
 0x1eb   :  { %5334 = vmatpush1.bf16.msra.mxu1 %v5333_v26  ;;  %v2125_v26 = vld [vmem:[#allocation8 + $0x1908] sm:$0xff]  ;;  %v7256_v30 = vld [vmem:[#allocation7] sm:$0xff] }
 0x1ec   :  { %5336 = vmatprep.subr.bf16.mxu1 %v5335_v27  ;;  %v2135_v27 = vld [vmem:[#allocation8 + $0x1958] sm:$0xff]  ;;  %v509_v31 = vrot.slane %v7256_v30, %v508_v61 }
 0x1ed   :  { %5550 = vmatpush1.bf16.msra.mxu0 %v5549_v29  ;;  %v1596_v29 = vld [vmem:[#allocation8 + $0x880] sm:$0xff]  ;;  %v5355_v34 = vpack.c.bf16 %v2135_v27, %v2125_v26  ;;  %v1666_v26 = vld [vmem:[#allocation8 + $0xab0] sm:$0xff] }
 0x1ee   :  { %5552 = vmatprep.subr.bf16.mxu0 %v5551_v32  ;;  %v5353_v32 = vpack.c.bf16 %v2114_v24, %v2104_v21  ;;  %v5569_v39 = vpack.c.bf16 %v1596_v29, %v1586_v22  ;;  %v2205_v21 = vld [vmem:[#allocation8 + $0x1b88] sm:$0xff]  ;;  %v2215_v24 = vld [vmem:[#allocation8 + $0x1bd8] sm:$0xff]  ;;  %v1676_v27 = vld [vmem:[#allocation8 + $0xb00] sm:$0xff]  ;;  %v5369_v29 = vpack.c.bf16 %v2194_v20, %v2184_v19 }
 0x1ef   :  { %5338 = vmatpush1.bf16.msra.mxu1 %v5337_v40  ;;  %v2145_v40 = vld [vmem:[#allocation8 + $0x19a8] sm:$0xff]  ;;  %v1726_v19 = vld [vmem:[#allocation8 + $0xc90] sm:$0xff]  ;;  %v1736_v20 = vld [vmem:[#allocation8 + $0xce0] sm:$0xff] }
 0x1f0   :  { %5340 = vmatprep.subr.bf16.mxu1 %v5339_v41  ;;  %v2155_v41 = vld [vmem:[#allocation8 + $0x19f8] sm:$0xff]  ;;  %v1697_v22 = vld [vmem:[#allocation8 + $0xba8] sm:$0xff] }
 0x1f1   :  { %5554 = vmatpush1.bf16.msra.mxu0 %v5553_v48  ;;  %v1616_v48 = vld [vmem:[#allocation8 + $0x920] sm:$0xff]  ;;  %v5359_v53 = vpack.c.bf16 %v2155_v41, %v2145_v40  ;;  %v2225_v40 = vld [vmem:[#allocation8 + $0x1c28] sm:$0xff]  ;;  %v2235_v41 = vld [vmem:[#allocation8 + $0x1c78] sm:$0xff] }
 0x1f2   :  { %5556 = vmatprep.subr.bf16.mxu0 %v5555_v51  ;;  %v5357_v51 = vpack.c.bf16 %v2134_v38, %v2124_v36  ;;  %v5573_v56 = vpack.c.bf16 %v1616_v48, %v1606_v47  ;;  %v2214_v36 = vld [vmem:[#allocation8 + $0x1bd0] sm:$0xff]  ;;  %v1696_v48 = vld [vmem:[#allocation8 + $0xba0] sm:$0xff] }
 0x1f3   :  { %5342 = vmatpush1.bf16.msra.mxu1 %v5341_v57  ;;  %v2165_v57 = vld [vmem:[#allocation8 + $0x1a48] sm:$0xff]  ;;  %v1686_v47 = vld [vmem:[#allocation8 + $0xb50] sm:$0xff] }
 0x1f4   :  { %5344 = vmatprep.subr.bf16.mxu1 %v5343_v58  ;;  %v2175_v58 = vld [vmem:[#allocation8 + $0x1a98] sm:$0xff] }
 0x1f5   :  { %5558 = vmatpush1.bf16.msra.mxu0 %v5557_v52  ;;  %v1636_v52 = vld [vmem:[#allocation8 + $0x9c0] sm:$0xff]  ;;  %v5363_v12 = vpack.c.bf16 %v2175_v58, %v2165_v57  ;;  %v2234_v58 = vld [vmem:[#allocation8 + $0x1c70] sm:$0xff] }
 0x1f6   :  { %5560 = vmatprep.subr.bf16.mxu0 %v5559_v6  ;;  %v5361_v6 = vpack.c.bf16 %v2154_v55, %v2144_v54  ;;  %v5577_v45 = vpack.c.bf16 %v1636_v52, %v1626_v5  ;;  %v2224_v57 = vld [vmem:[#allocation8 + $0x1c20] sm:$0xff]  ;;  %v5589_v5 = vpack.c.bf16 %v1696_v48, %v1686_v47  ;;  %v2245_v52 = vld [vmem:[#allocation8 + $0x1cc8] sm:$0xff]  ;;  %v1766_v48 = vld [vmem:[#allocation8 + $0xdd0] sm:$0xff] }
 0x1f7   :  { %5346 = vmatpush1.bf16.msra.mxu1 %v5345_v0  ;;  %v2185_v0 = vld [vmem:[#allocation8 + $0x1ae8] sm:$0xff] }
 0x1f8   :  { %5348 = vmatprep.subr.bf16.mxu1 %v5347_v11  ;;  %v2195_v11 = vld [vmem:[#allocation8 + $0x1b38] sm:$0xff] }
 0x1f9   :  { %5562 = vmatpush1.bf16.msra.mxu0 %v5561_v63  ;;  %v1656_v63 = vld [vmem:[#allocation8 + $0xa60] sm:$0xff]  ;;  %v5367_v18 = vpack.c.bf16 %v2195_v11, %v2185_v0  ;;  %v1737_v0 = vld [vmem:[#allocation8 + $0xce8] sm:$0xff]  ;;  %v5377_v11 = vpack.c.bf16 %v2234_v58, %v2224_v57 }
 0x1fa   :  { %5564 = vmatprep.subr.bf16.mxu0 %v5563_v16  ;;  %v5365_v16 = vpack.c.bf16 %v2174_v9, %v2164_v8  ;;  %v1716_v8 = vld [vmem:[#allocation8 + $0xc40] sm:$0xff] }
 0x1fb   :  { %5350 = vmatpush1.bf16.msra.mxu1 %v5349_v4  ;;  %v5581_v4 = vpack.c.bf16 %v1656_v63, %v1646_v14  ;;  %v2244_v14 = vld [vmem:[#allocation8 + $0x1cc0] sm:$0xff]  ;;  %v2254_v63 = vld [vmem:[#allocation8 + $0x1d10] sm:$0xff] }
 0x1fc   :  { %5352 = vmatprep.subr.bf16.mxu1 %v5351_v23  ;;  %v512_v23 = vsub.s32 5, %v7189_v35 }
 0x1fd   :  { %5566 = vmatpush1.bf16.msra.mxu0 %v5565_v25  ;;  %v5583_v25 = vpack.c.bf16 %v1677_v15, %v1667_v42  ;;  %v2265_v15 = vld [vmem:[#allocation8 + $0x1d68] sm:$0xff] }
 0x1fe   :  { %5568 = vmatprep.subr.bf16.mxu0 %v5567_v28  ;;  %v1687_v28 = vld [vmem:[#allocation8 + $0xb58] sm:$0xff]  ;;  %v513_v38 = vrot.slane %v7256_v30, %v512_v23 }
 0x1ff   :  { %5354 = vmatpush1.bf16.msra.mxu1 %v5353_v32  ;;  %v5371_v32 = vpack.c.bf16 %v2215_v24, %v2205_v21  ;;  %v1757_v21 = vld [vmem:[#allocation8 + $0xd88] sm:$0xff]  ;;  %v5381_v24 = vpack.c.bf16 %v2254_v63, %v2244_v14  ;;  %v1836_v14 = vld [vmem:[#allocation8 + $0x1000] sm:$0xff] }
 0x200   :  { %5356 = vmatprep.subr.bf16.mxu1 %v5355_v34  ;;  %v2204_v34 = vld [vmem:[#allocation8 + $0x1b80] sm:$0xff] }
 0x201   :  { %5570 = vmatpush1.bf16.msra.mxu0 %v5569_v39  ;;  %v5585_v39 = vpack.c.bf16 %v1676_v27, %v1666_v26  ;;  %v2264_v26 = vld [vmem:[#allocation8 + $0x1d60] sm:$0xff]  ;;  %v2274_v27 = vld [vmem:[#allocation8 + $0x1db0] sm:$0xff] }
 0x202   :  { %5572 = vmatprep.subr.bf16.mxu0 %v5571_v44  ;;  %v5587_v44 = vpack.c.bf16 %v1697_v22, %v1687_v28  ;;  %v5597_v28 = vpack.c.bf16 %v1736_v20, %v1726_v19  ;;  %v2285_v22 = vld [vmem:[#allocation8 + $0x1e08] sm:$0xff] }
 0x203   :  { %5358 = vmatpush1.bf16.msra.mxu1 %v5357_v51  ;;  %v1717_v51 = vld [vmem:[#allocation8 + $0xc48] sm:$0xff] }
 0x204   :  { %5360 = vmatprep.subr.bf16.mxu1 %v5359_v53  ;;  %v5373_v53 = vpack.c.bf16 %v2214_v36, %v2204_v34  ;;  %v1756_v34 = vld [vmem:[#allocation8 + $0xd80] sm:$0xff]  ;;  %v1767_v36 = vld [vmem:[#allocation8 + $0xdd8] sm:$0xff]  ;;  %v1857_v19 = vld [vmem:[#allocation8 + $0x10a8] sm:$0xff] }
 0x205   :  { %5574 = vmatpush1.bf16.msra.mxu0 %v5573_v56  ;;  %v5375_v56 = vpack.c.bf16 %v2235_v41, %v2225_v40  ;;  %v2305_v20 = vld [vmem:[#allocation8 + $0x1ea8] sm:$0xff] }
 0x206   :  { %5576 = vmatprep.subr.bf16.mxu0 %v5575_v59 }
 0x207   :  { %5362 = vmatpush1.bf16.msra.mxu1 %v5361_v6  ;;  %v5591_v6 = vpack.c.bf16 %v1717_v51, %v1707_v50 }
 0x208   :  { %5364 = vmatprep.subr.bf16.mxu1 %v5363_v12  ;;  %v1706_v12 = vld [vmem:[#allocation8 + $0xbf0] sm:$0xff] }
 0x209   :  { %5578 = vmatpush1.bf16.msra.mxu0 %v5577_v45  ;;  %v1727_v45 = vld [vmem:[#allocation8 + $0xc98] sm:$0xff]  ;;  %v5593_v42 = vpack.c.bf16 %v1716_v8, %v1706_v12  ;;  %v1806_v8 = vld [vmem:[#allocation8 + $0xf10] sm:$0xff] }
 0x20a   :  { %5580 = vmatprep.subr.bf16.mxu0 %v5579_v13  ;;  %v5379_v13 = vpack.c.bf16 %v2255_v62, %v2245_v52  ;;  %v1796_v52 = vld [vmem:[#allocation8 + $0xec0] sm:$0xff]  ;;  %v1807_v62 = vld [vmem:[#allocation8 + $0xf18] sm:$0xff] }
 0x20b   :  { %5366 = vmatpush1.bf16.msra.mxu1 %v5365_v16  ;;  %v2275_v16 = vld [vmem:[#allocation8 + $0x1db8] sm:$0xff] }
 0x20c   :  { %3398 = vmatmul.mubr.f32.vlgmr.msra.gmra.mrb[10].mxu0 %v7217_v7  ;;  %5368 = vmatprep.subr.bf16.mxu1 %v5367_v18  ;;  %v5595_v18 = vpack.c.bf16 %v1737_v0, %v1727_v45  ;;  %v1827_v45 = vld [vmem:[#allocation8 + $0xfb8] sm:$0xff]  ;;  %v1837_v0 = vld [vmem:[#allocation8 + $0x1008] sm:$0xff] }
 0x20d   :  { %5582 = vmatpush1.bf16.msra.mxu0 %v5581_v4  ;;  %3468 = vmatprep.mubr.f32.mxu0 %v7246_v60  ;;  %v1747_v4 = vld [vmem:[#allocation8 + $0xd38] sm:$0xff]  ;;  %v5615_v63 = vpack.c.bf16 %v1837_v0, %v1827_v45  ;;  %v2365_v45 = vld [vmem:[#allocation8 + $0x2088] sm:$0xff] }
 0x20e   :  { %5584 = vmatprep.subr.bf16.mxu0 %v5583_v25  ;;  %v5383_v25 = vpack.c.bf16 %v2275_v16, %v2265_v15  ;;  %v2294_v15 = vld [vmem:[#allocation8 + $0x1e50] sm:$0xff]  ;;  %v1847_v16 = vld [vmem:[#allocation8 + $0x1058] sm:$0xff] }
 0x20f   :  { %v965_v49 = vpop.f32.mrb[4].mxu0  ;;  %5370 = vmatpush1.bf16.msra.mxu1 %v5369_v29  ;;  %v2295_v29 = vld [vmem:[#allocation8 + $0x1e58] sm:$0xff] }
 0x210   :  { %v7265_v54 = vadd.f32 %v965_v49, %v509_v31  ;;  %v967_v55 = vpop.f32.mrb[5].mxu0  ;;  %5372 = vmatprep.subr.bf16.mxu1 %v5371_v32  ;;  %v5599_v31 = vpack.c.bf16 %v1757_v21, %v1747_v4  ;;  %v1746_v32 = vld [vmem:[#allocation8 + $0xd30] sm:$0xff]  ;;  %v5387_v40 = vpack.c.bf16 %v2295_v29, %v2285_v22  ;;  %v1776_v49 = vld [vmem:[#allocation8 + $0xe20] sm:$0xff]  ;;  %v2315_v4 = vld [vmem:[#allocation8 + $0x1ef8] sm:$0xff]  ;;  %v5619_v29 = vpack.c.bf16 %v1857_v19, %v1847_v16 }
 0x211   :  { %v7267_v59 = vadd.f32 %v967_v55, %v513_v38  ;;  %5586 = vmatpush1.bf16.msra.mxu0 %v5585_v39  ;;  %v1777_v38 = vld [vmem:[#allocation8 + $0xe28] sm:$0xff]  ;;  %v5385_v39 = vpack.c.bf16 %v2274_v27, %v2264_v26  ;;  %v5601_v41 = vpack.c.bf16 %v1756_v34, %v1746_v32  ;;  %v5605_v57 = vpack.c.bf16 %v1776_v49, %v1766_v48  ;;  %v1846_v27 = vld [vmem:[#allocation8 + $0x1050] sm:$0xff]  ;;  %v2304_v32 = vld [vmem:[#allocation8 + $0x1ea0] sm:$0xff] }
 0x212   :  { %v4789_v3 = vmul.f32 -1.442695, %v7265_v54  ;;  %5588 = vmatprep.subr.bf16.mxu0 %v5587_v44  ;;  %v5603_v47 = vpack.c.bf16 %v1777_v38, %v1767_v36  ;;  %v1797_v55 = vld [vmem:[#allocation8 + $0xec8] sm:$0xff]  ;;  %v2314_v34 = vld [vmem:[#allocation8 + $0x1ef0] sm:$0xff]  ;;  %v1867_v36 = vld [vmem:[#allocation8 + $0x10f8] sm:$0xff] }
 0x213   :  { %v4790_v9 = vmul.f32 -1.442695, %v7267_v59  ;;  %5374 = vmatpush1.bf16.msra.mxu1 %v5373_v53  ;;  %v1787_v53 = vld [vmem:[#allocation8 + $0xe78] sm:$0xff]  ;;  %v1877_v38 = vld [vmem:[#allocation8 + $0x1148] sm:$0xff]  ;;  %v2324_v49 = vld [vmem:[#allocation8 + $0x1f40] sm:$0xff] }
 0x214   :  { %6890 = vpow2.f32 %v4789_v3  ;;  %5376 = vmatprep.subr.bf16.mxu1 %v5375_v56  ;;  %v5607_v58 = vpack.c.bf16 %v1797_v55, %v1787_v53  ;;  %v1817_v3 = vld [vmem:[#allocation8 + $0xf68] sm:$0xff]  ;;  %v2375_v0 = vld [vmem:[#allocation8 + $0x20d8] sm:$0xff]  ;;  %v2364_v16 = vld [vmem:[#allocation8 + $0x2080] sm:$0xff] }
 0x215   :  { %6892 = vpow2.f32 %v4790_v9  ;;  %5590 = vmatpush1.bf16.msra.mxu0 %v5589_v5  ;;  %v1786_v5 = vld [vmem:[#allocation8 + $0xe70] sm:$0xff]  ;;  %v5611_v12 = vpack.c.bf16 %v1817_v3, %v1807_v62  ;;  %v1816_v9 = vld [vmem:[#allocation8 + $0xf60] sm:$0xff]  ;;  %v1897_v53 = vld [vmem:[#allocation8 + $0x11e8] sm:$0xff] }
 0x216   :  { %5592 = vmatprep.subr.bf16.mxu0 %v5591_v6  ;;  %v5609_v6 = vpack.c.bf16 %v1796_v52, %v1786_v5  ;;  %v2345_v55 = vld [vmem:[#allocation8 + $0x1fe8] sm:$0xff]  ;;  %v1886_v5 = vld [vmem:[#allocation8 + $0x1190] sm:$0xff]  ;;  %v1896_v52 = vld [vmem:[#allocation8 + $0x11e0] sm:$0xff] }
 0x217   :  { %5378 = vmatpush1.bf16.msra.mxu1 %v5377_v11  ;;  %v5613_v11 = vpack.c.bf16 %v1816_v9, %v1806_v8  ;;  %v1907_v8 = vld [vmem:[#allocation8 + $0x1238] sm:$0xff]  ;;  %v1917_v9 = vld [vmem:[#allocation8 + $0x1288] sm:$0xff] }
 0x218   :  { %5380 = vmatprep.subr.bf16.mxu1 %v5379_v13  ;;  %v1826_v13 = vld [vmem:[#allocation8 + $0xfb0] sm:$0xff]  ;;  %v1927_v19 = vld [vmem:[#allocation8 + $0x12d8] sm:$0xff] }
 0x219   :  { %5594 = vmatpush1.bf16.msra.mxu0 %v5593_v42  ;;  %v2284_v42 = vld [vmem:[#allocation8 + $0x1e00] sm:$0xff] }
 0x21a   :  { %5596 = vmatprep.subr.bf16.mxu0 %v5595_v18  ;;  %v5389_v26 = vpack.c.bf16 %v2294_v15, %v2284_v42  ;;  %v5631_v42 = vpack.c.bf16 %v1917_v9, %v1907_v8  ;;  %v5403_v15 = vpack.c.bf16 %v2375_v0, %v2365_v45  ;;  %v1987_v8 = vld [vmem:[#allocation8 + $0x14b8] sm:$0xff]  ;;  %v1997_v9 = vld [vmem:[#allocation8 + $0x1508] sm:$0xff]  ;;  %v516_v45 = vsub.s32 6, %v7189_v35 }
 0x21b   :  { %5382 = vmatpush1.bf16.msra.mxu1 %v5381_v24  ;;  %v2445_v0 = vld [vmem:[#allocation8 + $0x2308] sm:$0xff] }
 0x21c   :  { %5384 = vmatprep.subr.bf16.mxu1 %v5383_v25  ;;  %v5617_v25 = vpack.c.bf16 %v1836_v14, %v1826_v13  ;;  %v1906_v14 = vld [vmem:[#allocation8 + $0x1230] sm:$0xff] }
 0x21d   :  { %5598 = vmatpush1.bf16.msra.mxu0 %v5597_v28  ;;  %v1856_v28 = vld [vmem:[#allocation8 + $0x10a0] sm:$0xff] }
 0x21e   :  { %v6891_v44 = vpop.eup %6890  ;;  %5600 = vmatprep.subr.bf16.mxu0 %v5599_v31  ;;  %v5391_v31 = vpack.c.bf16 %v2315_v4, %v2305_v20  ;;  %v1937_v20 = vld [vmem:[#allocation8 + $0x1328] sm:$0xff] }
 0x21f   :  { %v6893_v50 = vpop.eup %6892  ;;  %v1288_v51 = vadd.f32 1.0, %v6891_v44  ;;  %5386 = vmatpush1.bf16.msra.mxu1 %v5385_v39  ;;  %v2325_v39 = vld [vmem:[#allocation8 + $0x1f48] sm:$0xff]  ;;  %v1866_v44 = vld [vmem:[#allocation8 + $0x10f0] sm:$0xff] }
 0x220   :  { %v1289_v56 = vadd.f32 1.0, %v6893_v50  ;;  %5388 = vmatprep.subr.bf16.mxu1 %v5387_v40  ;;  %v5621_v40 = vpack.c.bf16 %v1856_v28, %v1846_v27  ;;  %v2334_v50 = vld [vmem:[#allocation8 + $0x1f90] sm:$0xff]  ;;  %v2385_v4 = vld [vmem:[#allocation8 + $0x2128] sm:$0xff]  ;;  %v1936_v28 = vld [vmem:[#allocation8 + $0x1320] sm:$0xff] }
 0x221   :  { %6894 = vrcp.f32 %v1288_v51  ;;  %5602 = vmatpush1.bf16.msra.mxu0 %v5601_v41  ;;  %v5393_v41 = vpack.c.bf16 %v2314_v34, %v2304_v32  ;;  %v1887_v51 = vld [vmem:[#allocation8 + $0x1198] sm:$0xff]  ;;  %v1926_v27 = vld [vmem:[#allocation8 + $0x12d0] sm:$0xff]  ;;  %v2384_v32 = vld [vmem:[#allocation8 + $0x2120] sm:$0xff] }
 0x222   :  { %6896 = vrcp.f32 %v1289_v56  ;;  %5604 = vmatprep.subr.bf16.mxu0 %v5603_v47  ;;  %v5623_v47 = vpack.c.bf16 %v1877_v38, %v1867_v36  ;;  %v2355_v56 = vld [vmem:[#allocation8 + $0x2038] sm:$0xff]  ;;  %v5627_v62 = vpack.c.bf16 %v1897_v53, %v1887_v51  ;;  %v2394_v34 = vld [vmem:[#allocation8 + $0x2170] sm:$0xff]  ;;  %v1957_v38 = vld [vmem:[#allocation8 + $0x13c8] sm:$0xff] }
 0x223   :  { %v5399_v3 = vpack.c.bf16 %v2355_v56, %v2345_v55  ;;  %v1947_v36 = vld [vmem:[#allocation8 + $0x1378] sm:$0xff]  ;;  %v1977_v53 = vld [vmem:[#allocation8 + $0x1468] sm:$0xff] }
 0x224   :  { %v1967_v51 = vld [vmem:[#allocation8 + $0x1418] sm:$0xff]  ;;  %v2425_v55 = vld [vmem:[#allocation8 + $0x2268] sm:$0xff] }
 0x225   :  { %5606 = vmatpush1.bf16.msra.mxu0 %v5605_v57  ;;  %v2435_v56 = vld [vmem:[#allocation8 + $0x22b8] sm:$0xff] }
 0x226   :  { %5608 = vmatprep.subr.bf16.mxu0 %v5607_v58  ;;  %v5397_v58 = vpack.c.bf16 %v2334_v50, %v2324_v49  ;;  %v2404_v49 = vld [vmem:[#allocation8 + $0x21c0] sm:$0xff]  ;;  %v2414_v50 = vld [vmem:[#allocation8 + $0x2210] sm:$0xff] }
 0x229   :  { %5610 = vmatpush1.bf16.msra.mxu0 %v5609_v6  ;;  %v2344_v6 = vld [vmem:[#allocation8 + $0x1fe0] sm:$0xff] }
 0x22a   :  { %5612 = vmatprep.subr.bf16.mxu0 %v5611_v12  ;;  %v2354_v12 = vld [vmem:[#allocation8 + $0x2030] sm:$0xff] }
 0x22b   :  { %v6895_v18 = vpop.eup %6894  ;;  %v5401_v13 = vpack.c.bf16 %v2354_v12, %v2344_v6  ;;  %v2424_v6 = vld [vmem:[#allocation8 + $0x2260] sm:$0xff]  ;;  %v2434_v12 = vld [vmem:[#allocation8 + $0x22b0] sm:$0xff] }
 0x22c   :  { %v6897_v21 = vpop.eup %6896  ;;  %v7275_v22 = vmul.f32 %v6895_v18, %v7265_v54  ;;  %v1876_v54 = vld [vmem:[#allocation8 + $0x1140] sm:$0xff]  ;;  %v2374_v18 = vld [vmem:[#allocation8 + $0x20d0] sm:$0xff] }
 0x22d   :  { %v7272_v24 = vmul.f32 %v6897_v21, %v7267_v59  ;;  %5614 = vmatpush1.bf16.msra.mxu0 %v5613_v11  ;;  %v2335_v59 = vld [vmem:[#allocation8 + $0x1f98] sm:$0xff]  ;;  %v5625_v57 = vpack.c.bf16 %v1876_v54, %v1866_v44  ;;  %v5629_v11 = vpack.c.bf16 %v1896_v52, %v1886_v5  ;;  %v1946_v44 = vld [vmem:[#allocation8 + $0x1370] sm:$0xff]  ;;  %v1956_v54 = vld [vmem:[#allocation8 + $0x13c0] sm:$0xff]  ;;  %v5643_v5 = vpack.c.bf16 %v1977_v53, %v1967_v51 }
 0x22e   :  { %5616 = vmatprep.subr.bf16.mxu0 %v5615_v63  ;;  %v5395_v48 = vpack.c.bf16 %v2335_v59, %v2325_v39  ;;  %v1916_v63 = vld [vmem:[#allocation8 + $0x1280] sm:$0xff]  ;;  %v2395_v21 = vld [vmem:[#allocation8 + $0x2178] sm:$0xff]  ;;  %v2405_v39 = vld [vmem:[#allocation8 + $0x21c8] sm:$0xff] }
 0x22f   :  { %3184 = vmatprep.mubr.f32.mxu1 %v7272_v24  ;;  %v2415_v59 = vld [vmem:[#allocation8 + $0x2218] sm:$0xff]  ;;  %v1966_v52 = vld [vmem:[#allocation8 + $0x1410] sm:$0xff] }
 0x230   :  { %3185 = vmatmul.mubr.f32.vlgmr.msra.gmra.mrb[4].mxu1 %v7275_v22 }
 0x231   :  { %5618 = vmatpush1.bf16.msra.mxu0 %v5617_v25  ;;  %5390 = vmatpush1.bf16.msra.mxu1 %v5389_v26  ;;  %v5633_v25 = vpack.c.bf16 %v1916_v63, %v1906_v14  ;;  %v5405_v26 = vpack.c.bf16 %v2374_v18, %v2364_v16  ;;  %v520_v14 = vsub.s32 7, %v7189_v35  ;;  %v5417_v63 = vpack.c.bf16 %v2434_v12, %v2424_v6  ;;  %v1996_v16 = vld [vmem:[#allocation8 + $0x1500] sm:$0xff]  ;;  %v2057_v6 = vld [vmem:[#allocation8 + $0x16e8] sm:$0xff]  ;;  %v2843_v35 = vld [vmem:[#allocation8 + $0x2f78] sm:$0xff] }
 0x232   :  { %5620 = vmatprep.subr.bf16.mxu0 %v5619_v29  ;;  %5392 = vmatprep.subr.bf16.mxu1 %v5391_v31  ;;  %v5635_v29 = vpack.c.bf16 %v1937_v20, %v1927_v19  ;;  %v5407_v31 = vpack.c.bf16 %v2395_v21, %v2385_v4  ;;  %v2444_v18 = vld [vmem:[#allocation8 + $0x2300] sm:$0xff]  ;;  %v2454_v20 = vld [vmem:[#allocation8 + $0x2350] sm:$0xff]  ;;  %v2007_v4 = vld [vmem:[#allocation8 + $0x1558] sm:$0xff] }
 0x233   :  { %v2017_v21 = vld [vmem:[#allocation8 + $0x15a8] sm:$0xff] }
 0x235   :  { %5622 = vmatpush1.bf16.msra.mxu0 %v5621_v40  ;;  %5394 = vmatpush1.bf16.msra.mxu1 %v5393_v41  ;;  %v5637_v40 = vpack.c.bf16 %v1936_v28, %v1926_v27  ;;  %v5409_v41 = vpack.c.bf16 %v2394_v34, %v2384_v32  ;;  %v2475_v27 = vld [vmem:[#allocation8 + $0x23f8] sm:$0xff]  ;;  %v521_v28 = vrot.slane %v7256_v30, %v520_v14  ;;  %v2006_v34 = vld [vmem:[#allocation8 + $0x1550] sm:$0xff] }
 0x236   :  { %5624 = vmatprep.subr.bf16.mxu0 %v5623_v47  ;;  %5396 = vmatprep.subr.bf16.mxu1 %v5395_v48  ;;  %v5639_v47 = vpack.c.bf16 %v1957_v38, %v1947_v36  ;;  %v5411_v48 = vpack.c.bf16 %v2415_v59, %v2405_v39  ;;  %v5651_v32 = vpack.c.bf16 %v2017_v21, %v2007_v4  ;;  %v2016_v36 = vld [vmem:[#allocation8 + $0x15a0] sm:$0xff]  ;;  %v2535_v4 = vld [vmem:[#allocation8 + $0x25d8] sm:$0xff] }
 0x237   :  { %v2464_v38 = vld [vmem:[#allocation8 + $0x23a0] sm:$0xff] }
 0x239   :  { %5626 = vmatpush1.bf16.msra.mxu0 %v5625_v57  ;;  %5398 = vmatpush1.bf16.msra.mxu1 %v5397_v58  ;;  %v5641_v57 = vpack.c.bf16 %v1956_v54, %v1946_v44  ;;  %v5413_v58 = vpack.c.bf16 %v2414_v50, %v2404_v49  ;;  %v2037_v44 = vld [vmem:[#allocation8 + $0x1648] sm:$0xff]  ;;  %v2495_v49 = vld [vmem:[#allocation8 + $0x2498] sm:$0xff] }
 0x23a   :  { %5628 = vmatprep.subr.bf16.mxu0 %v5627_v62  ;;  %5400 = vmatprep.subr.bf16.mxu1 %v5399_v3  ;;  %v1976_v62 = vld [vmem:[#allocation8 + $0x1460] sm:$0xff]  ;;  %v5415_v3 = vpack.c.bf16 %v2435_v56, %v2425_v55  ;;  %v2026_v56 = vld [vmem:[#allocation8 + $0x15f0] sm:$0xff] }
 0x23d   :  { %5630 = vmatpush1.bf16.msra.mxu0 %v5629_v11  ;;  %5402 = vmatpush1.bf16.msra.mxu1 %v5401_v13  ;;  %v2455_v11 = vld [vmem:[#allocation8 + $0x2358] sm:$0xff]  ;;  %v5645_v13 = vpack.c.bf16 %v1976_v62, %v1966_v52  ;;  %v2494_v62 = vld [vmem:[#allocation8 + $0x2490] sm:$0xff] }
 0x23e   :  { %5632 = vmatprep.subr.bf16.mxu0 %v5631_v42  ;;  %5404 = vmatprep.subr.bf16.mxu1 %v5403_v15  ;;  %v5647_v42 = vpack.c.bf16 %v1997_v9, %v1987_v8  ;;  %v1986_v15 = vld [vmem:[#allocation8 + $0x14b0] sm:$0xff]  ;;  %v5419_v19 = vpack.c.bf16 %v2455_v11, %v2445_v0  ;;  %v2505_v8 = vld [vmem:[#allocation8 + $0x24e8] sm:$0xff] }
 0x241   :  { %5634 = vmatpush1.bf16.msra.mxu0 %v5633_v25  ;;  %5406 = vmatpush1.bf16.msra.mxu1 %v5405_v26  ;;  %v517_v25 = vrot.slane %v7256_v30, %v516_v45  ;;  %v2465_v26 = vld [vmem:[#allocation8 + $0x23a8] sm:$0xff]  ;;  %v5653_v30 = vpack.c.bf16 %v2016_v36, %v2006_v34  ;;  %v2087_v34 = vld [vmem:[#allocation8 + $0x17d8] sm:$0xff] }
 0x242   :  { %5636 = vmatprep.subr.bf16.mxu0 %v5635_v29  ;;  %5408 = vmatprep.subr.bf16.mxu1 %v5407_v31  ;;  %v5649_v29 = vpack.c.bf16 %v1996_v16, %v1986_v15  ;;  %v5421_v31 = vpack.c.bf16 %v2454_v20, %v2444_v18  ;;  %v5423_v59 = vpack.c.bf16 %v2475_v27, %v2465_v26  ;;  %v2514_v16 = vld [vmem:[#allocation8 + $0x2530] sm:$0xff]  ;;  %v2067_v18 = vld [vmem:[#allocation8 + $0x1738] sm:$0xff]  ;;  %v2525_v20 = vld [vmem:[#allocation8 + $0x2588] sm:$0xff] }
 0x243   :  { %v2066_v27 = vld [vmem:[#allocation8 + $0x1730] sm:$0xff]  ;;  %v2097_v36 = vld [vmem:[#allocation8 + $0x1828] sm:$0xff] }
 0x245   :  { %5638 = vmatpush1.bf16.msra.mxu0 %v5637_v40  ;;  %5410 = vmatpush1.bf16.msra.mxu1 %v5409_v41  ;;  %v2474_v40 = vld [vmem:[#allocation8 + $0x23f0] sm:$0xff]  ;;  %v2027_v41 = vld [vmem:[#allocation8 + $0x15f8] sm:$0xff] }
 0x246   :  { %5640 = vmatprep.subr.bf16.mxu0 %v5639_v47  ;;  %5412 = vmatprep.subr.bf16.mxu1 %v5411_v48  ;;  %v2485_v48 = vld [vmem:[#allocation8 + $0x2448] sm:$0xff]  ;;  %v5425_v53 = vpack.c.bf16 %v2474_v40, %v2464_v38  ;;  %v5655_v55 = vpack.c.bf16 %v2037_v44, %v2027_v41  ;;  %v5667_v41 = vpack.c.bf16 %v2097_v36, %v2087_v34  ;;  %v2086_v44 = vld [vmem:[#allocation8 + $0x17d0] sm:$0xff]  ;;  %v2156_v36 = vld [vmem:[#allocation8 + $0x1a00] sm:$0xff] }
 0x247   :  { %v5427_v52 = vpack.c.bf16 %v2495_v49, %v2485_v48  ;;  %v2545_v38 = vld [vmem:[#allocation8 + $0x2628] sm:$0xff]  ;;  %v2554_v49 = vld [vmem:[#allocation8 + $0x2670] sm:$0xff] }
 0x248   :  { %v2146_v34 = vld [vmem:[#allocation8 + $0x19b0] sm:$0xff] }
 0x249   :  { %5642 = vmatpush1.bf16.msra.mxu0 %v5641_v57  ;;  %5414 = vmatpush1.bf16.msra.mxu1 %v5413_v58  ;;  %v2036_v57 = vld [vmem:[#allocation8 + $0x1640] sm:$0xff] }
 0x24a   :  { %5644 = vmatprep.subr.bf16.mxu0 %v5643_v5  ;;  %5416 = vmatprep.subr.bf16.mxu1 %v5415_v3  ;;  %v2484_v58 = vld [vmem:[#allocation8 + $0x2440] sm:$0xff]  ;;  %v2047_v3 = vld [vmem:[#allocation8 + $0x1698] sm:$0xff]  ;;  %v5657_v0 = vpack.c.bf16 %v2036_v57, %v2026_v56 }
 0x24b   :  { %v5429_v11 = vpack.c.bf16 %v2494_v62, %v2484_v58  ;;  %v2575_v56 = vld [vmem:[#allocation8 + $0x2718] sm:$0xff] }
 0x24c   :  { %3469 = vmatmul.mubr.f32.vlgmr.msra.gmra.mrb[10].mxu0 %v7249_v2 }
 0x24d   :  { %5646 = vmatpush1.bf16.msra.mxu0 %v5645_v13  ;;  %3539 = vmatprep.mubr.f32.mxu0 %v7272_v24  ;;  %v5659_v13 = vpack.c.bf16 %v2057_v6, %v2047_v3 }
 0x24e   :  { %5418 = vmatpush1.bf16.msra.mxu1 %v5417_v63  ;;  %5648 = vmatprep.subr.bf16.mxu0 %v5647_v42  ;;  %v2056_v63 = vld [vmem:[#allocation8 + $0x16e0] sm:$0xff] }
 0x24f   :  { %v1036_v39 = vpop.f32.mrb[6].mxu0  ;;  %5420 = vmatprep.subr.bf16.mxu1 %v5419_v19  ;;  %v2504_v42 = vld [vmem:[#allocation8 + $0x24e0] sm:$0xff]  ;;  %v2077_v19 = vld [vmem:[#allocation8 + $0x1788] sm:$0xff] }
 0x250   :  { %v1037_v54 = vadd.f32 %v1036_v39, %v517_v25  ;;  %v1038_v47 = vpop.f32.mrb[7].mxu0  ;;  %v5433_v25 = vpack.c.bf16 %v2514_v16, %v2504_v42  ;;  %v5663_v26 = vpack.c.bf16 %v2077_v19, %v2067_v18  ;;  %v2555_v39 = vld [vmem:[#allocation8 + $0x2678] sm:$0xff]  ;;  %v2126_v18 = vld [vmem:[#allocation8 + $0x1910] sm:$0xff]  ;;  %v2136_v19 = vld [vmem:[#allocation8 + $0x1960] sm:$0xff] }
 0x251   :  { %v1039_v50 = vadd.f32 %v1038_v47, %v521_v28  ;;  %5650 = vmatpush1.bf16.msra.mxu0 %v5649_v29  ;;  %v2076_v28 = vld [vmem:[#allocation8 + $0x1780] sm:$0xff]  ;;  %v5439_v48 = vpack.c.bf16 %v2555_v39, %v2545_v38  ;;  %v2167_v38 = vld [vmem:[#allocation8 + $0x1a58] sm:$0xff]  ;;  %v2177_v39 = vld [vmem:[#allocation8 + $0x1aa8] sm:$0xff] }
 0x252   :  { %v7290_v51 = vadd.f32 %v7241_v10, %v1037_v54  ;;  %5422 = vmatpush1.bf16.msra.mxu1 %v5421_v31  ;;  %5652 = vmatprep.subr.bf16.mxu0 %v5651_v32  ;;  %v2515_v10 = vld [vmem:[#allocation8 + $0x2538] sm:$0xff]  ;;  %v2524_v29 = vld [vmem:[#allocation8 + $0x2580] sm:$0xff]  ;;  %v5435_v31 = vpack.c.bf16 %v2535_v4, %v2525_v20  ;;  %v2534_v32 = vld [vmem:[#allocation8 + $0x25d0] sm:$0xff] }
 0x253   :  { %v7293_v5 = vadd.f32 %v7243_v17, %v1039_v50  ;;  %5424 = vmatprep.subr.bf16.mxu1 %v5423_v59  ;;  %v2046_v17 = vld [vmem:[#allocation8 + $0x1690] sm:$0xff]  ;;  %v5431_v15 = vpack.c.bf16 %v2515_v10, %v2505_v8  ;;  %v5665_v59 = vpack.c.bf16 %v2076_v28, %v2066_v27  ;;  %v5437_v40 = vpack.c.bf16 %v2534_v32, %v2524_v29  ;;  %v2096_v54 = vld [vmem:[#allocation8 + $0x1820] sm:$0xff]  ;;  %v2107_v50 = vld [vmem:[#allocation8 + $0x1878] sm:$0xff] }
 0x254   :  { %v4791_v12 = vmul.f32 -1.442695, %v7290_v51  ;;  %v5661_v21 = vpack.c.bf16 %v2056_v63, %v2046_v17  ;;  %v2544_v47 = vld [vmem:[#allocation8 + $0x2620] sm:$0xff]  ;;  %v2585_v17 = vld [vmem:[#allocation8 + $0x2768] sm:$0xff]  ;;  %v2595_v63 = vld [vmem:[#allocation8 + $0x27b8] sm:$0xff]  ;;  %v5677_v29 = vpack.c.bf16 %v2136_v19, %v2126_v18 }
 0x255   :  { %v4792_v9 = vmul.f32 -1.442695, %v7293_v5  ;;  %5654 = vmatpush1.bf16.msra.mxu0 %v5653_v30  ;;  %v2117_v30 = vld [vmem:[#allocation8 + $0x18c8] sm:$0xff]  ;;  %v5441_v3 = vpack.c.bf16 %v2554_v49, %v2544_v47  ;;  %v2116_v8 = vld [vmem:[#allocation8 + $0x18c0] sm:$0xff]  ;;  %v5447_v4 = vpack.c.bf16 %v2595_v63, %v2585_v17  ;;  %v2615_v28 = vld [vmem:[#allocation8 + $0x2858] sm:$0xff] }
 0x256   :  { %6898 = vpow2.f32 %v4791_v12  ;;  %5426 = vmatpush1.bf16.msra.mxu1 %v5425_v53  ;;  %5656 = vmatprep.subr.bf16.mxu0 %v5655_v55  ;;  %v2565_v55 = vld [vmem:[#allocation8 + $0x26c8] sm:$0xff]  ;;  %v5671_v6 = vpack.c.bf16 %v2117_v30, %v2107_v50  ;;  %v2106_v12 = vld [vmem:[#allocation8 + $0x1870] sm:$0xff]  ;;  %v2564_v10 = vld [vmem:[#allocation8 + $0x26c0] sm:$0xff]  ;;  %v5683_v50 = vpack.c.bf16 %v2177_v39, %v2167_v38 }
 0x257   :  { %6900 = vpow2.f32 %v4792_v9  ;;  %5428 = vmatprep.subr.bf16.mxu1 %v5427_v52  ;;  %v5669_v52 = vpack.c.bf16 %v2096_v54, %v2086_v44  ;;  %v5443_v9 = vpack.c.bf16 %v2575_v56, %v2565_v55  ;;  %v5673_v42 = vpack.c.bf16 %v2116_v8, %v2106_v12  ;;  %v2584_v20 = vld [vmem:[#allocation8 + $0x2760] sm:$0xff]  ;;  %v2605_v27 = vld [vmem:[#allocation8 + $0x2808] sm:$0xff]  ;;  %v2166_v30 = vld [vmem:[#allocation8 + $0x1a50] sm:$0xff] }
 0x258   :  { %v5681_v54 = vpack.c.bf16 %v2156_v36, %v2146_v34  ;;  %v2625_v47 = vld [vmem:[#allocation8 + $0x28a8] sm:$0xff]  ;;  %v2187_v56 = vld [vmem:[#allocation8 + $0x1af8] sm:$0xff]  ;;  %v2644_v63 = vld [vmem:[#allocation8 + $0x2940] sm:$0xff] }
 0x259   :  { %5658 = vmatpush1.bf16.msra.mxu0 %v5657_v0  ;;  %v2574_v0 = vld [vmem:[#allocation8 + $0x2710] sm:$0xff]  ;;  %v2645_v8 = vld [vmem:[#allocation8 + $0x2948] sm:$0xff]  ;;  %v2675_v18 = vld [vmem:[#allocation8 + $0x2a38] sm:$0xff] }
 0x25a   :  { %5430 = vmatpush1.bf16.msra.mxu1 %v5429_v11  ;;  %5660 = vmatprep.subr.bf16.mxu0 %v5659_v13  ;;  %v2127_v11 = vld [vmem:[#allocation8 + $0x1918] sm:$0xff]  ;;  %v2137_v13 = vld [vmem:[#allocation8 + $0x1968] sm:$0xff]  ;;  %v2226_v38 = vld [vmem:[#allocation8 + $0x1c30] sm:$0xff] }
 0x25b   :  { %5432 = vmatprep.subr.bf16.mxu1 %v5431_v15  ;;  %v5445_v15 = vpack.c.bf16 %v2574_v0, %v2564_v10  ;;  %v5675_v16 = vpack.c.bf16 %v2137_v13, %v2127_v11  ;;  %v2655_v10 = vld [vmem:[#allocation8 + $0x2998] sm:$0xff]  ;;  %v2196_v0 = vld [vmem:[#allocation8 + $0x1b40] sm:$0xff]  ;;  %v2217_v13 = vld [vmem:[#allocation8 + $0x1be8] sm:$0xff] }
 0x25c   :  { %v2207_v11 = vld [vmem:[#allocation8 + $0x1b98] sm:$0xff]  ;;  %v5459_v17 = vpack.c.bf16 %v2655_v10, %v2645_v8  ;;  %v2236_v39 = vld [vmem:[#allocation8 + $0x1c80] sm:$0xff]  ;;  %v2725_v10 = vld [vmem:[#allocation8 + $0x2bc8] sm:$0xff] }
 0x25d   :  { %5662 = vmatpush1.bf16.msra.mxu0 %v5661_v21  ;;  %v2594_v21 = vld [vmem:[#allocation8 + $0x27b0] sm:$0xff]  ;;  %v5691_v19 = vpack.c.bf16 %v2217_v13, %v2207_v11  ;;  %v2695_v34 = vld [vmem:[#allocation8 + $0x2ad8] sm:$0xff]  ;;  %v2276_v11 = vld [vmem:[#allocation8 + $0x1dc0] sm:$0xff] }
 0x25e   :  { %5434 = vmatpush1.bf16.msra.mxu1 %v5433_v25  ;;  %5664 = vmatprep.subr.bf16.mxu0 %v5663_v26  ;;  %v2147_v25 = vld [vmem:[#allocation8 + $0x19b8] sm:$0xff]  ;;  %v2157_v26 = vld [vmem:[#allocation8 + $0x1a08] sm:$0xff] }
 0x25f   :  { %5436 = vmatprep.subr.bf16.mxu1 %v5435_v31  ;;  %v5449_v31 = vpack.c.bf16 %v2594_v21, %v2584_v20  ;;  %v5679_v32 = vpack.c.bf16 %v2157_v26, %v2147_v25  ;;  %v2206_v20 = vld [vmem:[#allocation8 + $0x1b90] sm:$0xff]  ;;  %v2227_v21 = vld [vmem:[#allocation8 + $0x1c38] sm:$0xff]  ;;  %v2237_v25 = vld [vmem:[#allocation8 + $0x1c88] sm:$0xff] }
 0x260   :  { %v6899_v53 = vpop.eup %6898  ;;  %v5695_v36 = vpack.c.bf16 %v2237_v25, %v2227_v21  ;;  %v2287_v13 = vld [vmem:[#allocation8 + $0x1e18] sm:$0xff]  ;;  %v2296_v21 = vld [vmem:[#allocation8 + $0x1e60] sm:$0xff] }
 0x261   :  { %v6901_v57 = vpop.eup %6900  ;;  %v1290_v58 = vadd.f32 1.0, %v6899_v53  ;;  %5666 = vmatpush1.bf16.msra.mxu0 %v5665_v59  ;;  %v5451_v59 = vpack.c.bf16 %v2615_v28, %v2605_v27  ;;  %v2176_v53 = vld [vmem:[#allocation8 + $0x1aa0] sm:$0xff]  ;;  %v2307_v25 = vld [vmem:[#allocation8 + $0x1eb8] sm:$0xff] }
 0x262   :  { %v1291_v62 = vadd.f32 1.0, %v6901_v57  ;;  %5438 = vmatpush1.bf16.msra.mxu1 %v5437_v40  ;;  %5668 = vmatprep.subr.bf16.mxu0 %v5667_v41  ;;  %v2604_v40 = vld [vmem:[#allocation8 + $0x2800] sm:$0xff]  ;;  %v2614_v41 = vld [vmem:[#allocation8 + $0x2850] sm:$0xff]  ;;  %v2197_v57 = vld [vmem:[#allocation8 + $0x1b48] sm:$0xff]  ;;  %v5685_v12 = vpack.c.bf16 %v2176_v53, %v2166_v30 }
 0x263   :  { %6902 = vrcp.f32 %v1290_v58  ;;  %5440 = vmatprep.subr.bf16.mxu1 %v5439_v48  ;;  %v2635_v48 = vld [vmem:[#allocation8 + $0x28f8] sm:$0xff]  ;;  %v5453_v58 = vpack.c.bf16 %v2614_v41, %v2604_v40  ;;  %v2664_v28 = vld [vmem:[#allocation8 + $0x29e0] sm:$0xff]  ;;  %v2257_v40 = vld [vmem:[#allocation8 + $0x1d28] sm:$0xff] }
 0x264   :  { %6904 = vrcp.f32 %v1291_v62  ;;  %v5455_v62 = vpack.c.bf16 %v2635_v48, %v2625_v47  ;;  %v2694_v47 = vld [vmem:[#allocation8 + $0x2ad0] sm:$0xff]  ;;  %v5697_v48 = vpack.c.bf16 %v2236_v39, %v2226_v38 }
 0x265   :  { %5670 = vmatpush1.bf16.msra.mxu0 %v5669_v52  ;;  %v2246_v53 = vld [vmem:[#allocation8 + $0x1cd0] sm:$0xff] }
 0x266   :  { %5442 = vmatpush1.bf16.msra.mxu1 %v5441_v3  ;;  %5672 = vmatprep.subr.bf16.mxu0 %v5671_v6  ;;  %v2624_v3 = vld [vmem:[#allocation8 + $0x28a0] sm:$0xff]  ;;  %v2634_v6 = vld [vmem:[#allocation8 + $0x28f0] sm:$0xff] }
 0x267   :  { %5444 = vmatprep.subr.bf16.mxu1 %v5443_v9  ;;  %v2186_v9 = vld [vmem:[#allocation8 + $0x1af0] sm:$0xff] }
 0x268   :  { %v2306_v39 = vld [vmem:[#allocation8 + $0x1eb0] sm:$0xff] }
 0x269   :  { %5674 = vmatpush1.bf16.msra.mxu0 %v5673_v42  ;;  %v2654_v42 = vld [vmem:[#allocation8 + $0x2990] sm:$0xff] }
 0x26a   :  { %5446 = vmatpush1.bf16.msra.mxu1 %v5445_v15  ;;  %5676 = vmatprep.subr.bf16.mxu0 %v5675_v16  ;;  %v5689_v15 = vpack.c.bf16 %v2196_v0, %v2186_v9  ;;  %v2665_v16 = vld [vmem:[#allocation8 + $0x29e8] sm:$0xff]  ;;  %v5461_v26 = vpack.c.bf16 %v2654_v42, %v2644_v63  ;;  %v2266_v0 = vld [vmem:[#allocation8 + $0x1d70] sm:$0xff]  ;;  %v2724_v42 = vld [vmem:[#allocation8 + $0x2bc0] sm:$0xff] }
 0x26b   :  { %5448 = vmatprep.subr.bf16.mxu1 %v5447_v4  ;;  %v2216_v4 = vld [vmem:[#allocation8 + $0x1be0] sm:$0xff]  ;;  %v5463_v27 = vpack.c.bf16 %v2675_v18, %v2665_v16  ;;  %v5705_v16 = vpack.c.bf16 %v2276_v11, %v2266_v0  ;;  %v2745_v18 = vld [vmem:[#allocation8 + $0x2c68] sm:$0xff]  ;;  %v2346_v11 = vld [vmem:[#allocation8 + $0x1ff0] sm:$0xff] }
 0x26d   :  { %v6903_v44 = vpop.eup %6902  ;;  %5678 = vmatpush1.bf16.msra.mxu0 %v5677_v29  ;;  %v2674_v29 = vld [vmem:[#allocation8 + $0x2a30] sm:$0xff] }
 0x26e   :  { %v6905_v49 = vpop.eup %6904  ;;  %5450 = vmatpush1.bf16.msra.mxu1 %v5449_v31  ;;  %5680 = vmatprep.subr.bf16.mxu0 %v5679_v32  ;;  %v7301_v52 = vmul.f32 %v6903_v44, %v7290_v51  ;;  %v5457_v51 = vpack.c.bf16 %v2634_v6, %v2624_v3  ;;  %v5693_v31 = vpack.c.bf16 %v2216_v4, %v2206_v20  ;;  %v2685_v32 = vld [vmem:[#allocation8 + $0x2a88] sm:$0xff]  ;;  %v2704_v6 = vld [vmem:[#allocation8 + $0x2b20] sm:$0xff]  ;;  %v2286_v4 = vld [vmem:[#allocation8 + $0x1e10] sm:$0xff] }
 0x26f   :  { %v7298_v55 = vmul.f32 %v6905_v49, %v7293_v5  ;;  %5452 = vmatprep.subr.bf16.mxu1 %v5451_v59  ;;  %v5687_v5 = vpack.c.bf16 %v2197_v57, %v2187_v56  ;;  %v2247_v59 = vld [vmem:[#allocation8 + $0x1cd8] sm:$0xff]  ;;  %v5465_v41 = vpack.c.bf16 %v2674_v29, %v2664_v28  ;;  %v5467_v44 = vpack.c.bf16 %v2695_v34, %v2685_v32  ;;  %v2705_v49 = vld [vmem:[#allocation8 + $0x2b28] sm:$0xff]  ;;  %v2256_v56 = vld [vmem:[#allocation8 + $0x1d20] sm:$0xff] }
 0x270   :  { %v5699_v30 = vpack.c.bf16 %v2257_v40, %v2247_v59  ;;  %v2267_v57 = vld [vmem:[#allocation8 + $0x1d78] sm:$0xff]  ;;  %v5701_v8 = vpack.c.bf16 %v2256_v56, %v2246_v53  ;;  %v2744_v29 = vld [vmem:[#allocation8 + $0x2c60] sm:$0xff]  ;;  %v5709_v32 = vpack.c.bf16 %v2296_v21, %v2286_v4  ;;  %v2765_v34 = vld [vmem:[#allocation8 + $0x2d08] sm:$0xff] }
 0x271   :  { %3255 = vmatprep.mubr.f32.mxu1 %v7298_v55  ;;  %5682 = vmatpush1.bf16.msra.mxu0 %v5681_v54  ;;  %v2684_v54 = vld [vmem:[#allocation8 + $0x2a80] sm:$0xff]  ;;  %v2327_v40 = vld [vmem:[#allocation8 + $0x1f58] sm:$0xff]  ;;  %v2326_v56 = vld [vmem:[#allocation8 + $0x1f50] sm:$0xff] }
 0x272   :  { %3256 = vmatmul.mubr.f32.vlgmr.msra.gmra.mrb[4].mxu1 %v7301_v52  ;;  %5684 = vmatprep.subr.bf16.mxu0 %v5683_v50  ;;  %v2715_v50 = vld [vmem:[#allocation8 + $0x2b78] sm:$0xff]  ;;  %v2316_v59 = vld [vmem:[#allocation8 + $0x1f00] sm:$0xff]  ;;  %v2366_v21 = vld [vmem:[#allocation8 + $0x2090] sm:$0xff] }
 0x273   :  { %5454 = vmatpush1.bf16.msra.mxu1 %v5453_v58  ;;  %v2277_v58 = vld [vmem:[#allocation8 + $0x1dc8] sm:$0xff]  ;;  %v5471_v3 = vpack.c.bf16 %v2715_v50, %v2705_v49  ;;  %v5713_v49 = vpack.c.bf16 %v2316_v59, %v2306_v39  ;;  %v2855_v39 = vld [vmem:[#allocation8 + $0x2fd8] sm:$0xff] }
 0x274   :  { %5456 = vmatprep.subr.bf16.mxu1 %v5455_v62  ;;  %v5469_v62 = vpack.c.bf16 %v2694_v47, %v2684_v54  ;;  %v5703_v9 = vpack.c.bf16 %v2277_v58, %v2267_v57  ;;  %v2764_v47 = vld [vmem:[#allocation8 + $0x2d00] sm:$0xff]  ;;  %v2785_v50 = vld [vmem:[#allocation8 + $0x2da8] sm:$0xff]  ;;  %v2347_v58 = vld [vmem:[#allocation8 + $0x1ff8] sm:$0xff] }
 0x275   :  { %5686 = vmatpush1.bf16.msra.mxu0 %v5685_v12  ;;  %v2714_v12 = vld [vmem:[#allocation8 + $0x2b70] sm:$0xff]  ;;  %v2336_v57 = vld [vmem:[#allocation8 + $0x1fa0] sm:$0xff] }
 0x276   :  { %5688 = vmatprep.subr.bf16.mxu0 %v5687_v5  ;;  %v2735_v5 = vld [vmem:[#allocation8 + $0x2c18] sm:$0xff] }
 0x277   :  { %5458 = vmatpush1.bf16.msra.mxu1 %v5457_v51  ;;  %v2297_v51 = vld [vmem:[#allocation8 + $0x1e68] sm:$0xff]  ;;  %v5475_v63 = vpack.c.bf16 %v2735_v5, %v2725_v10  ;;  %v5717_v10 = vpack.c.bf16 %v2336_v57, %v2326_v56 }
 0x278   :  { %5460 = vmatprep.subr.bf16.mxu1 %v5459_v17  ;;  %v5473_v17 = vpack.c.bf16 %v2714_v12, %v2704_v6  ;;  %v5707_v20 = vpack.c.bf16 %v2297_v51, %v2287_v13  ;;  %v2784_v12 = vld [vmem:[#allocation8 + $0x2da0] sm:$0xff]  ;;  %v2805_v5 = vld [vmem:[#allocation8 + $0x2e48] sm:$0xff]  ;;  %v2367_v51 = vld [vmem:[#allocation8 + $0x2098] sm:$0xff] }
 0x279   :  { %5690 = vmatpush1.bf16.msra.mxu0 %v5689_v15  ;;  %v2734_v15 = vld [vmem:[#allocation8 + $0x2c10] sm:$0xff]  ;;  %v2356_v13 = vld [vmem:[#allocation8 + $0x2040] sm:$0xff]  ;;  %v2865_v57 = vld [vmem:[#allocation8 + $0x3028] sm:$0xff] }
 0x27a   :  { %5692 = vmatprep.subr.bf16.mxu0 %v5691_v19  ;;  %v2755_v19 = vld [vmem:[#allocation8 + $0x2cb8] sm:$0xff] }
 0x27b   :  { %5462 = vmatpush1.bf16.msra.mxu1 %v5461_v26  ;;  %v2317_v26 = vld [vmem:[#allocation8 + $0x1f08] sm:$0xff]  ;;  %v5479_v28 = vpack.c.bf16 %v2755_v19, %v2745_v18  ;;  %v5721_v18 = vpack.c.bf16 %v2356_v13, %v2346_v11  ;;  %v2864_v13 = vld [vmem:[#allocation8 + $0x3020] sm:$0xff] }
 0x27c   :  { %5464 = vmatprep.subr.bf16.mxu1 %v5463_v27  ;;  %v5477_v27 = vpack.c.bf16 %v2734_v15, %v2724_v42  ;;  %v5711_v38 = vpack.c.bf16 %v2317_v26, %v2307_v25  ;;  %v2804_v15 = vld [vmem:[#allocation8 + $0x2e40] sm:$0xff]  ;;  %v2825_v19 = vld [vmem:[#allocation8 + $0x2ee8] sm:$0xff]  ;;  %v2387_v26 = vld [vmem:[#allocation8 + $0x2138] sm:$0xff] }
 0x27d   :  { %5694 = vmatpush1.bf16.msra.mxu0 %v5693_v31  ;;  %v2754_v31 = vld [vmem:[#allocation8 + $0x2cb0] sm:$0xff]  ;;  %v2376_v25 = vld [vmem:[#allocation8 + $0x20e0] sm:$0xff] }
 0x27e   :  { %5696 = vmatprep.subr.bf16.mxu0 %v5695_v36  ;;  %v2775_v36 = vld [vmem:[#allocation8 + $0x2d58] sm:$0xff] }
 0x27f   :  { %5466 = vmatpush1.bf16.msra.mxu1 %v5465_v41  ;;  %v2337_v41 = vld [vmem:[#allocation8 + $0x1fa8] sm:$0xff]  ;;  %v5483_v54 = vpack.c.bf16 %v2775_v36, %v2765_v34  ;;  %v5725_v34 = vpack.c.bf16 %v2376_v25, %v2366_v21  ;;  %v487_v36 = vld [vmem:[#allocation7 + $0x8] sm:$0x3] }
 0x280   :  { %5468 = vmatprep.subr.bf16.mxu1 %v5467_v44  ;;  %v5481_v44 = vpack.c.bf16 %v2754_v31, %v2744_v29  ;;  %v5715_v53 = vpack.c.bf16 %v2337_v41, %v2327_v40  ;;  %v2824_v31 = vld [vmem:[#allocation8 + $0x2ee0] sm:$0xff]  ;;  %v2386_v40 = vld [vmem:[#allocation8 + $0x2130] sm:$0xff]  ;;  %v2447_v21 = vld [vmem:[#allocation8 + $0x2318] sm:$0xff] }
 0x281   :  { %5698 = vmatpush1.bf16.msra.mxu0 %v5697_v48  ;;  %v2774_v48 = vld [vmem:[#allocation8 + $0x2d50] sm:$0xff]  ;;  %v2396_v41 = vld [vmem:[#allocation8 + $0x2180] sm:$0xff]  ;;  %v2457_v25 = vld [vmem:[#allocation8 + $0x2368] sm:$0xff] }
 0x282   :  { %5700 = vmatprep.subr.bf16.mxu0 %v5699_v30  ;;  %v2795_v30 = vld [vmem:[#allocation8 + $0x2df8] sm:$0xff]  ;;  %v5729_v56 = vpack.c.bf16 %v2396_v41, %v2386_v40  ;;  %v2477_v40 = vld [vmem:[#allocation8 + $0x2408] sm:$0xff] }
 0x283   :  { %5470 = vmatpush1.bf16.msra.mxu1 %v5469_v62  ;;  %v2357_v62 = vld [vmem:[#allocation8 + $0x2048] sm:$0xff]  ;;  %v5487_v6 = vpack.c.bf16 %v2795_v30, %v2785_v50  ;;  %v2844_v50 = vld [vmem:[#allocation8 + $0x2f80] sm:$0xff]  ;;  %v2854_v30 = vld [vmem:[#allocation8 + $0x2fd0] sm:$0xff] }
 0x284   :  { %5472 = vmatprep.subr.bf16.mxu1 %v5471_v3  ;;  %v5485_v3 = vpack.c.bf16 %v2774_v48, %v2764_v47  ;;  %v5719_v0 = vpack.c.bf16 %v2357_v62, %v2347_v58  ;;  %v525_v48 = vrot.slane %v487_v36, %v7192_v43  ;;  %v2875_v58 = vld [vmem:[#allocation8 + $0x3078] sm:$0xff] }
 0x285   :  { %5702 = vmatpush1.bf16.msra.mxu0 %v5701_v8  ;;  %v2794_v8 = vld [vmem:[#allocation8 + $0x2df0] sm:$0xff]  ;;  %v5503_v11 = vpack.c.bf16 %v2875_v58, %v2865_v57  ;;  %v2487_v57 = vld [vmem:[#allocation8 + $0x2458] sm:$0xff]  ;;  %v2497_v58 = vld [vmem:[#allocation8 + $0x24a8] sm:$0xff] }
 0x286   :  { %5704 = vmatprep.subr.bf16.mxu0 %v5703_v9  ;;  %v2815_v9 = vld [vmem:[#allocation8 + $0x2e98] sm:$0xff] }
 0x287   :  { %5474 = vmatpush1.bf16.msra.mxu1 %v5473_v17  ;;  %v2377_v17 = vld [vmem:[#allocation8 + $0x20e8] sm:$0xff]  ;;  %v5491_v42 = vpack.c.bf16 %v2815_v9, %v2805_v5  ;;  %v5501_v5 = vpack.c.bf16 %v2854_v30, %v2844_v50  ;;  %v1339_v50 = vld [vmem:[#allocation8 + $0x78] sm:$0xff] }
 0x288   :  { %5476 = vmatprep.subr.bf16.mxu1 %v5475_v63  ;;  %v5489_v63 = vpack.c.bf16 %v2794_v8, %v2784_v12  ;;  %v5723_v4 = vpack.c.bf16 %v2377_v17, %v2367_v51  ;;  %v2427_v8 = vld [vmem:[#allocation8 + $0x2278] sm:$0xff]  ;;  %v2874_v51 = vld [vmem:[#allocation8 + $0x3070] sm:$0xff] }
 0x289   :  { %5706 = vmatpush1.bf16.msra.mxu0 %v5705_v16  ;;  %v2814_v16 = vld [vmem:[#allocation8 + $0x2e90] sm:$0xff] }
 0x28a   :  { %5708 = vmatprep.subr.bf16.mxu0 %v5707_v20  ;;  %v2835_v20 = vld [vmem:[#allocation8 + $0x2f38] sm:$0xff] }
 0x28b   :  { %5478 = vmatpush1.bf16.msra.mxu1 %v5477_v27  ;;  %v2397_v27 = vld [vmem:[#allocation8 + $0x2188] sm:$0xff]  ;;  %v5495_v29 = vpack.c.bf16 %v2835_v20, %v2825_v19  ;;  %v2426_v19 = vld [vmem:[#allocation8 + $0x2270] sm:$0xff]  ;;  %v2436_v20 = vld [vmem:[#allocation8 + $0x22c0] sm:$0xff] }
 0x28c   :  { %3540 = vmatmul.mubr.f32.vlgmr.msra.gmra.mrb[10].mxu0 %v7275_v22  ;;  %5480 = vmatprep.subr.bf16.mxu1 %v5479_v28  ;;  %v5493_v28 = vpack.c.bf16 %v2814_v16, %v2804_v15  ;;  %v5727_v59 = vpack.c.bf16 %v2397_v27, %v2387_v26  ;;  %v2895_v15 = vld [vmem:[#allocation8 + $0x3118] sm:$0xff]  ;;  %v5505_v26 = vpack.c.bf16 %v2874_v51, %v2864_v13  ;;  %v2517_v51 = vld [vmem:[#allocation8 + $0x2548] sm:$0xff] }
 0x28d   :  { %5710 = vmatpush1.bf16.msra.mxu0 %v5709_v32  ;;  %3610 = vmatprep.mubr.f32.mxu0 %v7298_v55  ;;  %v2834_v32 = vld [vmem:[#allocation8 + $0x2f30] sm:$0xff]  ;;  %v2507_v13 = vld [vmem:[#allocation8 + $0x24f8] sm:$0xff] }
 0x28e   :  { %5712 = vmatprep.subr.bf16.mxu0 %v5711_v38  ;;  %v2845_v38 = vld [vmem:[#allocation8 + $0x2f88] sm:$0xff]  ;;  %v5497_v47 = vpack.c.bf16 %v2834_v32, %v2824_v31  ;;  %v5737_v31 = vpack.c.bf16 %v2436_v20, %v2426_v19  ;;  %v2527_v19 = vld [vmem:[#allocation8 + $0x2598] sm:$0xff] }
 0x28f   :  { %5482 = vmatpush1.bf16.msra.mxu1 %v5481_v44  ;;  %v2407_v44 = vld [vmem:[#allocation8 + $0x21d8] sm:$0xff]  ;;  %v2905_v32 = vld [vmem:[#allocation8 + $0x3168] sm:$0xff] }
 0x290   :  { %5484 = vmatprep.subr.bf16.mxu1 %v5483_v54  ;;  %v2417_v54 = vld [vmem:[#allocation8 + $0x2228] sm:$0xff] }
 0x291   :  { %5714 = vmatpush1.bf16.msra.mxu0 %v5713_v49  ;;  %v5499_v49 = vpack.c.bf16 %v2855_v39, %v2845_v38  ;;  %v5731_v62 = vpack.c.bf16 %v2417_v54, %v2407_v44  ;;  %v2446_v38 = vld [vmem:[#allocation8 + $0x2310] sm:$0xff]  ;;  %v2456_v39 = vld [vmem:[#allocation8 + $0x2360] sm:$0xff]  ;;  %v2537_v20 = vld [vmem:[#allocation8 + $0x25e8] sm:$0xff] }
 0x292   :  { %5716 = vmatprep.subr.bf16.mxu0 %v5715_v53  ;;  %v529_v53 = vrot.slane %v487_v36, %v7197_v46  ;;  %v5739_v36 = vpack.c.bf16 %v2457_v25, %v2447_v21  ;;  %v2904_v54 = vld [vmem:[#allocation8 + $0x3160] sm:$0xff]  ;;  %v5755_v21 = vpack.c.bf16 %v2537_v20, %v2527_v19  ;;  %v2526_v25 = vld [vmem:[#allocation8 + $0x2590] sm:$0xff] }
 0x293   :  { %5486 = vmatpush1.bf16.msra.mxu1 %v5485_v3  ;;  %v2406_v3 = vld [vmem:[#allocation8 + $0x21d0] sm:$0xff]  ;;  %v1388_v20 = vld [vmem:[#allocation8 + $0x200] sm:$0xff] }
 0x294   :  { %5488 = vmatprep.subr.bf16.mxu1 %v5487_v6  ;;  %v2416_v6 = vld [vmem:[#allocation8 + $0x2220] sm:$0xff] }
 0x295   :  { %5718 = vmatpush1.bf16.msra.mxu0 %v5717_v10  ;;  %v2437_v10 = vld [vmem:[#allocation8 + $0x22c8] sm:$0xff] }
 0x296   :  { %5720 = vmatprep.subr.bf16.mxu0 %v5719_v0 }
 0x297   :  { %5490 = vmatpush1.bf16.msra.mxu1 %v5489_v63  ;;  %v5733_v63 = vpack.c.bf16 %v2416_v6, %v2406_v3 }
 0x298   :  { %5492 = vmatprep.subr.bf16.mxu1 %v5491_v42  ;;  %v2885_v42 = vld [vmem:[#allocation8 + $0x30c8] sm:$0xff] }
 0x299   :  { %5722 = vmatpush1.bf16.msra.mxu0 %v5721_v18  ;;  %v5735_v18 = vpack.c.bf16 %v2437_v10, %v2427_v8  ;;  %v5507_v27 = vpack.c.bf16 %v2895_v15, %v2885_v42  ;;  %v5747_v8 = vpack.c.bf16 %v2497_v58, %v2487_v57  ;;  %v2486_v10 = vld [vmem:[#allocation8 + $0x2450] sm:$0xff]  ;;  %v5751_v15 = vpack.c.bf16 %v2517_v51, %v2507_v13  ;;  %v2576_v58 = vld [vmem:[#allocation8 + $0x2720] sm:$0xff] }
 0x29a   :  { %5724 = vmatprep.subr.bf16.mxu0 %v5723_v4  ;;  %v2566_v57 = vld [vmem:[#allocation8 + $0x26d0] sm:$0xff]  ;;  %v2596_v51 = vld [vmem:[#allocation8 + $0x27c0] sm:$0xff] }
 0x29b   :  { %5494 = vmatpush1.bf16.msra.mxu1 %v5493_v28  ;;  %v2884_v28 = vld [vmem:[#allocation8 + $0x30c0] sm:$0xff]  ;;  %v2586_v13 = vld [vmem:[#allocation8 + $0x2770] sm:$0xff] }
 0x29c   :  { %5496 = vmatprep.subr.bf16.mxu1 %v5495_v29  ;;  %v2894_v29 = vld [vmem:[#allocation8 + $0x3110] sm:$0xff]  ;;  %v5769_v19 = vpack.c.bf16 %v2596_v51, %v2586_v13 }
 0x29d   :  { %5726 = vmatpush1.bf16.msra.mxu0 %v5725_v34  ;;  %v2915_v34 = vld [vmem:[#allocation8 + $0x31b8] sm:$0xff]  ;;  %v5509_v41 = vpack.c.bf16 %v2894_v29, %v2884_v28  ;;  %v2557_v28 = vld [vmem:[#allocation8 + $0x2688] sm:$0xff]  ;;  %v1458_v13 = vld [vmem:[#allocation8 + $0x430] sm:$0xff] }
 0x29e   :  { %5728 = vmatprep.subr.bf16.mxu0 %v5727_v59  ;;  %v2467_v59 = vld [vmem:[#allocation8 + $0x23b8] sm:$0xff]  ;;  %v5511_v44 = vpack.c.bf16 %v2915_v34, %v2905_v32  ;;  %v1338_v34 = vld [vmem:[#allocation8 + $0x70] sm:$0xff] }
 0x29f   :  { %v1249_v12 = vpop.f32.mrb[8].mxu0  ;;  %5498 = vmatpush1.bf16.msra.mxu1 %v5497_v47  ;;  %v2914_v47 = vld [vmem:[#allocation8 + $0x31b0] sm:$0xff]  ;;  %v5743_v30 = vpack.c.bf16 %v2477_v40, %v2467_v59  ;;  %v1349_v59 = vld [vmem:[#allocation8 + $0xc8] sm:$0xff]  ;;  %v1359_v40 = vld [vmem:[#allocation8 + $0x118] sm:$0xff] }
 0x2a0   :  { %v7309_v9 = vadd.f32 %v1249_v12, %v525_v48  ;;  %v1251_v0 = vpop.f32.mrb[9].mxu0  ;;  %5500 = vmatprep.subr.bf16.mxu1 %v5499_v49  ;;  %v5741_v48 = vpack.c.bf16 %v2456_v39, %v2446_v38  ;;  %v1329_v49 = vld [vmem:[#allocation8 + $0x28] sm:$0xff]  ;;  %v2556_v38 = vld [vmem:[#allocation8 + $0x2680] sm:$0xff] }
 0x2a1   :  { %v7311_v17 = vadd.f32 %v1251_v0, %v529_v53  ;;  %5730 = vmatpush1.bf16.msra.mxu0 %v5729_v56  ;;  %v2466_v53 = vld [vmem:[#allocation8 + $0x23b0] sm:$0xff]  ;;  %v2476_v56 = vld [vmem:[#allocation8 + $0x2400] sm:$0xff]  ;;  %v5835_v3 = vpack.c.bf16 %v1339_v50, %v1329_v49 }
 0x2a2   :  { %v4793_v16 = vmul.f32 -1.442695, %v7309_v9  ;;  %5732 = vmatprep.subr.bf16.mxu0 %v5731_v62  ;;  %v5513_v62 = vpack.c.bf16 %v2914_v47, %v2904_v54  ;;  %v5745_v6 = vpack.c.bf16 %v2476_v56, %v2466_v53  ;;  %v2577_v54 = vld [vmem:[#allocation8 + $0x2728] sm:$0xff]  ;;  %v1348_v50 = vld [vmem:[#allocation8 + $0xc0] sm:$0xff]  ;;  %v5839_v56 = vpack.c.bf16 %v1359_v40, %v1349_v59  ;;  %v2626_v40 = vld [vmem:[#allocation8 + $0x28b0] sm:$0xff] }
 0x2a3   :  { %v4794_v4 = vmul.f32 -1.442695, %v7311_v17  ;;  %5502 = vmatpush1.bf16.msra.mxu1 %v5501_v5  ;;  %v2496_v5 = vld [vmem:[#allocation8 + $0x24a0] sm:$0xff] }
 0x2a4   :  { %6906 = vpow2.f32 %v4793_v16  ;;  %5504 = vmatprep.subr.bf16.mxu1 %v5503_v11  ;;  %v5749_v42 = vpack.c.bf16 %v2496_v5, %v2486_v10  ;;  %v2506_v16 = vld [vmem:[#allocation8 + $0x24f0] sm:$0xff]  ;;  %v5765_v10 = vpack.c.bf16 %v2576_v58, %v2566_v57  ;;  %v1368_v5 = vld [vmem:[#allocation8 + $0x160] sm:$0xff] }
 0x2a5   :  { %6908 = vpow2.f32 %v4794_v4  ;;  %5734 = vmatpush1.bf16.msra.mxu0 %v5733_v63  ;;  %v1428_v57 = vld [vmem:[#allocation8 + $0x340] sm:$0xff]  ;;  %v1438_v58 = vld [vmem:[#allocation8 + $0x390] sm:$0xff] }
 0x2a6   :  { %5736 = vmatprep.subr.bf16.mxu0 %v5735_v18  ;;  %v2516_v18 = vld [vmem:[#allocation8 + $0x2540] sm:$0xff] }
 0x2a7   :  { %5506 = vmatpush1.bf16.msra.mxu1 %v5505_v26  ;;  %v5753_v4 = vpack.c.bf16 %v2516_v18, %v2506_v16  ;;  %v2536_v26 = vld [vmem:[#allocation8 + $0x25e0] sm:$0xff]  ;;  %v2617_v16 = vld [vmem:[#allocation8 + $0x2868] sm:$0xff] }
 0x2a8   :  { %5508 = vmatprep.subr.bf16.mxu1 %v5507_v27  ;;  %v2547_v27 = vld [vmem:[#allocation8 + $0x2638] sm:$0xff]  ;;  %v5757_v29 = vpack.c.bf16 %v2536_v26, %v2526_v25  ;;  %v1398_v25 = vld [vmem:[#allocation8 + $0x250] sm:$0xff] }
 0x2a9   :  { %5738 = vmatpush1.bf16.msra.mxu0 %v5737_v31  ;;  %v1328_v31 = vld [vmem:[#allocation8 + $0x20] sm:$0xff]  ;;  %v5759_v32 = vpack.c.bf16 %v2557_v28, %v2547_v27  ;;  %v2606_v26 = vld [vmem:[#allocation8 + $0x2810] sm:$0xff]  ;;  %v1409_v28 = vld [vmem:[#allocation8 + $0x2a8] sm:$0xff] }
 0x2aa   :  { %5740 = vmatprep.subr.bf16.mxu0 %v5739_v36  ;;  %v2546_v36 = vld [vmem:[#allocation8 + $0x2630] sm:$0xff]  ;;  %v2616_v27 = vld [vmem:[#allocation8 + $0x2860] sm:$0xff] }
 0x2ab   :  { %5510 = vmatpush1.bf16.msra.mxu1 %v5509_v41  ;;  %v5761_v49 = vpack.c.bf16 %v2556_v38, %v2546_v36  ;;  %v5773_v36 = vpack.c.bf16 %v2616_v27, %v2606_v26  ;;  %v1408_v38 = vld [vmem:[#allocation8 + $0x2a0] sm:$0xff]  ;;  %v1478_v26 = vld [vmem:[#allocation8 + $0x4d0] sm:$0xff] }
 0x2ac   :  { %5512 = vmatprep.subr.bf16.mxu1 %v5511_v44  ;;  %v2567_v44 = vld [vmem:[#allocation8 + $0x26d8] sm:$0xff] }
 0x2ad   :  { %5742 = vmatpush1.bf16.msra.mxu0 %v5741_v48  ;;  %v5837_v48 = vpack.c.bf16 %v1338_v34, %v1328_v31  ;;  %v2627_v31 = vld [vmem:[#allocation8 + $0x28b8] sm:$0xff]  ;;  %v5849_v34 = vpack.c.bf16 %v1398_v25, %v1388_v20  ;;  %v2697_v20 = vld [vmem:[#allocation8 + $0x2ae8] sm:$0xff]  ;;  %v1468_v25 = vld [vmem:[#allocation8 + $0x480] sm:$0xff] }
 0x2ae   :  { %v6907_v12 = vpop.eup %6906  ;;  %5744 = vmatprep.subr.bf16.mxu0 %v5743_v30  ;;  %v1358_v30 = vld [vmem:[#allocation8 + $0x110] sm:$0xff] }
 0x2af   :  { %v6909_v0 = vpop.eup %6908  ;;  %v1292_v11 = vadd.f32 1.0, %v6907_v12  ;;  %5514 = vmatpush1.bf16.msra.mxu1 %v5513_v62  ;;  %v1369_v62 = vld [vmem:[#allocation8 + $0x168] sm:$0xff]  ;;  %v2587_v12 = vld [vmem:[#allocation8 + $0x2778] sm:$0xff] }
 0x2b0   :  { %v1293_v63 = vadd.f32 1.0, %v6909_v0  ;;  %5836 = vmatprep.subr.bf16.mxu1 %v5835_v3  ;;  %v5763_v3 = vpack.c.bf16 %v2577_v54, %v2567_v44  ;;  %v1429_v44 = vld [vmem:[#allocation8 + $0x348] sm:$0xff] }
 0x2b1   :  { %6910 = vrcp.f32 %v1292_v11  ;;  %5746 = vmatpush1.bf16.msra.mxu0 %v5745_v6  ;;  %v1379_v6 = vld [vmem:[#allocation8 + $0x1b8] sm:$0xff] }
 0x2b2   :  { %6912 = vrcp.f32 %v1293_v63  ;;  %5748 = vmatprep.subr.bf16.mxu0 %v5747_v8  ;;  %v5841_v8 = vpack.c.bf16 %v1358_v30, %v1348_v50  ;;  %v5843_v0 = vpack.c.bf16 %v1379_v6, %v1369_v62  ;;  %v1389_v63 = vld [vmem:[#allocation8 + $0x208] sm:$0xff]  ;;  %v2646_v6 = vld [vmem:[#allocation8 + $0x2950] sm:$0xff] }
 0x2b3   :  { %v2657_v50 = vld [vmem:[#allocation8 + $0x29a8] sm:$0xff] }
 0x2b5   :  { %5750 = vmatpush1.bf16.msra.mxu0 %v5749_v42  ;;  %v1399_v42 = vld [vmem:[#allocation8 + $0x258] sm:$0xff] }
 0x2b6   :  { %5752 = vmatprep.subr.bf16.mxu0 %v5751_v15  ;;  %v2607_v15 = vld [vmem:[#allocation8 + $0x2818] sm:$0xff] }
 0x2b9   :  { %5754 = vmatpush1.bf16.msra.mxu0 %v5753_v4  ;;  %v5847_v4 = vpack.c.bf16 %v1399_v42, %v1389_v63  ;;  %v2666_v42 = vld [vmem:[#allocation8 + $0x29f0] sm:$0xff] }
 0x2ba   :  { %5756 = vmatprep.subr.bf16.mxu0 %v5755_v21  ;;  %v5771_v21 = vpack.c.bf16 %v2617_v16, %v2607_v15  ;;  %v2676_v15 = vld [vmem:[#allocation8 + $0x2a40] sm:$0xff]  ;;  %v1469_v16 = vld [vmem:[#allocation8 + $0x488] sm:$0xff] }
 0x2bb   :  { %v6911_v39 = vpop.eup %6910 }
 0x2bc   :  { %v6913_v41 = vpop.eup %6912  ;;  %v7319_v53 = vmul.f32 %v6911_v39, %v7309_v9  ;;  %v1378_v9 = vld [vmem:[#allocation8 + $0x1b0] sm:$0xff] }
 0x2bd   :  { %v7316_v47 = vmul.f32 %v6913_v41, %v7311_v17  ;;  %5758 = vmatpush1.bf16.msra.mxu0 %v5757_v29  ;;  %v2597_v17 = vld [vmem:[#allocation8 + $0x27c8] sm:$0xff]  ;;  %v5845_v18 = vpack.c.bf16 %v1378_v9, %v1368_v5  ;;  %v1419_v29 = vld [vmem:[#allocation8 + $0x2f8] sm:$0xff]  ;;  %v1418_v39 = vld [vmem:[#allocation8 + $0x2f0] sm:$0xff]  ;;  %v5857_v9 = vpack.c.bf16 %v1438_v58, %v1428_v57 }
 0x2be   :  { %5760 = vmatprep.subr.bf16.mxu0 %v5759_v32  ;;  %v5767_v11 = vpack.c.bf16 %v2597_v17, %v2587_v12  ;;  %v2637_v32 = vld [vmem:[#allocation8 + $0x2908] sm:$0xff]  ;;  %v5851_v59 = vpack.c.bf16 %v1419_v29, %v1409_v28  ;;  %v2636_v41 = vld [vmem:[#allocation8 + $0x2900] sm:$0xff]  ;;  %v5853_v30 = vpack.c.bf16 %v1418_v39, %v1408_v38  ;;  %v2686_v29 = vld [vmem:[#allocation8 + $0x2a90] sm:$0xff]  ;;  %v5865_v39 = vpack.c.bf16 %v1478_v26, %v1468_v25 }
 0x2bf   :  { %3326 = vmatprep.mubr.f32.mxu1 %v7316_v47  ;;  %v5775_v54 = vpack.c.bf16 %v2637_v32, %v2627_v31  ;;  %v2656_v12 = vld [vmem:[#allocation8 + $0x29a0] sm:$0xff]  ;;  %v1449_v17 = vld [vmem:[#allocation8 + $0x3e8] sm:$0xff] }
 0x2c0   :  { %3327 = vmatmul.mubr.f32.vlgmr.msra.gmra.mrb[4].mxu1 %v7319_v53  ;;  %v2677_v5 = vld [vmem:[#allocation8 + $0x2a48] sm:$0xff]  ;;  %v2696_v31 = vld [vmem:[#allocation8 + $0x2ae0] sm:$0xff] }
 0x2c1   :  { %5838 = vmatpush1.bf16.msra.mxu1 %v5837_v48  ;;  %5762 = vmatpush1.bf16.msra.mxu0 %v5761_v49  ;;  %v1439_v48 = vld [vmem:[#allocation8 + $0x398] sm:$0xff]  ;;  %v1489_v32 = vld [vmem:[#allocation8 + $0x528] sm:$0xff] }
 0x2c2   :  { %3752 = vmatprep.mubr.f32.mxu1 %v7214_v1  ;;  %5840 = vmatprep.subr.bf16.mxu1 %v5839_v56  ;;  %v2647_v49 = vld [vmem:[#allocation8 + $0x2958] sm:$0xff]  ;;  %v5777_v56 = vpack.c.bf16 %v2636_v41, %v2626_v40  ;;  %v5855_v62 = vpack.c.bf16 %v1439_v48, %v1429_v44  ;;  %v2717_v38 = vld [vmem:[#allocation8 + $0x2b88] sm:$0xff]  ;;  %v1488_v40 = vld [vmem:[#allocation8 + $0x520] sm:$0xff] }
 0x2c3   :  { %5764 = vmatprep.subr.bf16.mxu0 %v5763_v3  ;;  %v5779_v3 = vpack.c.bf16 %v2657_v50, %v2647_v49  ;;  %v1498_v41 = vld [vmem:[#allocation8 + $0x570] sm:$0xff]  ;;  %v2716_v49 = vld [vmem:[#allocation8 + $0x2b80] sm:$0xff]  ;;  %v1509_v50 = vld [vmem:[#allocation8 + $0x5c8] sm:$0xff] }
 0x2c4   :  { %v2706_v48 = vld [vmem:[#allocation8 + $0x2b30] sm:$0xff]  ;;  %v2737_v57 = vld [vmem:[#allocation8 + $0x2c28] sm:$0xff]  ;;  %v5869_v58 = vpack.c.bf16 %v1498_v41, %v1488_v40 }
 0x2c5   :  { %5842 = vmatpush1.bf16.msra.mxu1 %v5841_v8  ;;  %5766 = vmatpush1.bf16.msra.mxu0 %v5765_v10  ;;  %v1459_v8 = vld [vmem:[#allocation8 + $0x438] sm:$0xff]  ;;  %v2777_v25 = vld [vmem:[#allocation8 + $0x2d68] sm:$0xff] }
 0x2c6   :  { %5844 = vmatprep.subr.bf16.mxu1 %v5843_v0  ;;  %5768 = vmatprep.subr.bf16.mxu0 %v5767_v11  ;;  %v2667_v10 = vld [vmem:[#allocation8 + $0x29f8] sm:$0xff]  ;;  %v5781_v0 = vpack.c.bf16 %v2656_v12, %v2646_v6  ;;  %v1448_v11 = vld [vmem:[#allocation8 + $0x3e0] sm:$0xff]  ;;  %v5859_v51 = vpack.c.bf16 %v1459_v8, %v1449_v17  ;;  %v1518_v6 = vld [vmem:[#allocation8 + $0x610] sm:$0xff] }
 0x2c7   :  { %v5783_v63 = vpack.c.bf16 %v2677_v5, %v2667_v10  ;;  %v2726_v8 = vld [vmem:[#allocation8 + $0x2bd0] sm:$0xff]  ;;  %v2736_v10 = vld [vmem:[#allocation8 + $0x2c20] sm:$0xff]  ;;  %v1529_v5 = vld [vmem:[#allocation8 + $0x668] sm:$0xff] }
 0x2c8   :  { %v2797_v40 = vld [vmem:[#allocation8 + $0x2e08] sm:$0xff] }
 0x2c9   :  { %5846 = vmatpush1.bf16.msra.mxu1 %v5845_v18  ;;  %5770 = vmatpush1.bf16.msra.mxu0 %v5769_v19  ;;  %v1479_v18 = vld [vmem:[#allocation8 + $0x4d8] sm:$0xff] }
 0x2ca   :  { %5848 = vmatprep.subr.bf16.mxu1 %v5847_v4  ;;  %5772 = vmatprep.subr.bf16.mxu0 %v5771_v21  ;;  %v2687_v19 = vld [vmem:[#allocation8 + $0x2a98] sm:$0xff]  ;;  %v5861_v4 = vpack.c.bf16 %v1458_v13, %v1448_v11  ;;  %v5785_v21 = vpack.c.bf16 %v2676_v15, %v2666_v42  ;;  %v5863_v27 = vpack.c.bf16 %v1479_v18, %v1469_v16  ;;  %v2757_v11 = vld [vmem:[#allocation8 + $0x2cc8] sm:$0xff]  ;;  %v1538_v42 = vld [vmem:[#allocation8 + $0x6b0] sm:$0xff] }
 0x2cb   :  { %v5787_v28 = vpack.c.bf16 %v2697_v20, %v2687_v19  ;;  %v2746_v18 = vld [vmem:[#allocation8 + $0x2c70] sm:$0xff]  ;;  %v2756_v19 = vld [vmem:[#allocation8 + $0x2cc0] sm:$0xff]  ;;  %v1549_v20 = vld [vmem:[#allocation8 + $0x708] sm:$0xff] }
 0x2cc   :  { %3611 = vmatmul.mubr.f32.vlgmr.msra.gmra.mrb[10].mxu0 %v7301_v52 }
 0x2cd   :  { %5850 = vmatpush1.bf16.msra.mxu1 %v5849_v34  ;;  %5774 = vmatpush1.bf16.msra.mxu0 %v5773_v36  ;;  %v1499_v34 = vld [vmem:[#allocation8 + $0x578] sm:$0xff] }
 0x2ce   :  { %3681 = vmatprep.mubr.f32.mxu0 %v7316_v47  ;;  %5852 = vmatprep.subr.bf16.mxu1 %v5851_v59  ;;  %v2707_v36 = vld [vmem:[#allocation8 + $0x2b38] sm:$0xff]  ;;  %v5789_v59 = vpack.c.bf16 %v2696_v31, %v2686_v29  ;;  %v5867_v44 = vpack.c.bf16 %v1499_v34, %v1489_v32  ;;  %v1558_v29 = vld [vmem:[#allocation8 + $0x750] sm:$0xff] }
 0x2cf   :  { %5776 = vmatprep.subr.bf16.mxu0 %v5775_v54  ;;  %v5791_v54 = vpack.c.bf16 %v2717_v38, %v2707_v36  ;;  %v2766_v34 = vld [vmem:[#allocation8 + $0x2d10] sm:$0xff]  ;;  %v2776_v36 = vld [vmem:[#allocation8 + $0x2d60] sm:$0xff]  ;;  %v1569_v38 = vld [vmem:[#allocation8 + $0x7a8] sm:$0xff] }
 0x2d1   :  { %5854 = vmatpush1.bf16.msra.mxu1 %v5853_v30  ;;  %5778 = vmatpush1.bf16.msra.mxu0 %v5777_v56  ;;  %v1519_v30 = vld [vmem:[#allocation8 + $0x618] sm:$0xff] }
 0x2d2   :  { %5856 = vmatprep.subr.bf16.mxu1 %v5855_v62  ;;  %5780 = vmatprep.subr.bf16.mxu0 %v5779_v3  ;;  %v2727_v56 = vld [vmem:[#allocation8 + $0x2bd8] sm:$0xff]  ;;  %v5793_v62 = vpack.c.bf16 %v2716_v49, %v2706_v48  ;;  %v1508_v3 = vld [vmem:[#allocation8 + $0x5c0] sm:$0xff]  ;;  %v5871_v12 = vpack.c.bf16 %v1519_v30, %v1509_v50  ;;  %v1578_v48 = vld [vmem:[#allocation8 + $0x7f0] sm:$0xff] }
 0x2d3   :  { %v5795_v17 = vpack.c.bf16 %v2737_v57, %v2727_v56  ;;  %v5873_v13 = vpack.c.bf16 %v1518_v6, %v1508_v3  ;;  %v2786_v30 = vld [vmem:[#allocation8 + $0x2db0] sm:$0xff]  ;;  %v2796_v56 = vld [vmem:[#allocation8 + $0x2e00] sm:$0xff]  ;;  %v1589_v57 = vld [vmem:[#allocation8 + $0x848] sm:$0xff] }
 0x2d4   :  { %v2817_v3 = vld [vmem:[#allocation8 + $0x2ea8] sm:$0xff] }
 0x2d5   :  { %5858 = vmatpush1.bf16.msra.mxu1 %v5857_v9  ;;  %5782 = vmatpush1.bf16.msra.mxu0 %v5781_v0  ;;  %v1539_v9 = vld [vmem:[#allocation8 + $0x6b8] sm:$0xff] }
 0x2d6   :  { %5860 = vmatprep.subr.bf16.mxu1 %v5859_v51  ;;  %5784 = vmatprep.subr.bf16.mxu0 %v5783_v63  ;;  %v2747_v0 = vld [vmem:[#allocation8 + $0x2c78] sm:$0xff]  ;;  %v5797_v51 = vpack.c.bf16 %v2736_v10, %v2726_v8  ;;  %v1528_v63 = vld [vmem:[#allocation8 + $0x660] sm:$0xff]  ;;  %v5875_v15 = vpack.c.bf16 %v1539_v9, %v1529_v5  ;;  %v1598_v8 = vld [vmem:[#allocation8 + $0x890] sm:$0xff] }
 0x2d7   :  { %v5799_v16 = vpack.c.bf16 %v2757_v11, %v2747_v0  ;;  %v5877_v26 = vpack.c.bf16 %v1538_v42, %v1528_v63  ;;  %v2806_v9 = vld [vmem:[#allocation8 + $0x2e50] sm:$0xff]  ;;  %v2816_v0 = vld [vmem:[#allocation8 + $0x2ea0] sm:$0xff]  ;;  %v1609_v11 = vld [vmem:[#allocation8 + $0x8e8] sm:$0xff] }
 0x2d8   :  { %v2837_v63 = vld [vmem:[#allocation8 + $0x2f48] sm:$0xff] }
 0x2d9   :  { %5862 = vmatpush1.bf16.msra.mxu1 %v5861_v4  ;;  %5786 = vmatpush1.bf16.msra.mxu0 %v5785_v21  ;;  %v1559_v4 = vld [vmem:[#allocation8 + $0x758] sm:$0xff] }
 0x2da   :  { %5864 = vmatprep.subr.bf16.mxu1 %v5863_v27  ;;  %5788 = vmatprep.subr.bf16.mxu0 %v5787_v28  ;;  %v2767_v21 = vld [vmem:[#allocation8 + $0x2d18] sm:$0xff]  ;;  %v5801_v27 = vpack.c.bf16 %v2756_v19, %v2746_v18  ;;  %v1548_v28 = vld [vmem:[#allocation8 + $0x700] sm:$0xff]  ;;  %v5879_v31 = vpack.c.bf16 %v1559_v4, %v1549_v20  ;;  %v1618_v18 = vld [vmem:[#allocation8 + $0x930] sm:$0xff] }
 0x2db   :  { %v5803_v32 = vpack.c.bf16 %v2777_v25, %v2767_v21  ;;  %v5881_v41 = vpack.c.bf16 %v1558_v29, %v1548_v28  ;;  %v2826_v4 = vld [vmem:[#allocation8 + $0x2ef0] sm:$0xff]  ;;  %v2836_v21 = vld [vmem:[#allocation8 + $0x2f40] sm:$0xff]  ;;  %v1629_v25 = vld [vmem:[#allocation8 + $0x988] sm:$0xff] }
 0x2dc   :  { %v2857_v28 = vld [vmem:[#allocation8 + $0x2fe8] sm:$0xff] }
 0x2dd   :  { %5866 = vmatpush1.bf16.msra.mxu1 %v5865_v39  ;;  %5790 = vmatpush1.bf16.msra.mxu0 %v5789_v59  ;;  %v1579_v39 = vld [vmem:[#allocation8 + $0x7f8] sm:$0xff] }
 0x2de   :  { %5868 = vmatprep.subr.bf16.mxu1 %v5867_v44  ;;  %5792 = vmatprep.subr.bf16.mxu0 %v5791_v54  ;;  %v2787_v59 = vld [vmem:[#allocation8 + $0x2db8] sm:$0xff]  ;;  %v5805_v44 = vpack.c.bf16 %v2776_v36, %v2766_v34  ;;  %v1568_v54 = vld [vmem:[#allocation8 + $0x7a0] sm:$0xff]  ;;  %v5883_v49 = vpack.c.bf16 %v1579_v39, %v1569_v38  ;;  %v1638_v34 = vld [vmem:[#allocation8 + $0x9d0] sm:$0xff] }
 0x2df   :  { %v5807_v50 = vpack.c.bf16 %v2797_v40, %v2787_v59  ;;  %v5885_v6 = vpack.c.bf16 %v1578_v48, %v1568_v54  ;;  %v2846_v39 = vld [vmem:[#allocation8 + $0x2f90] sm:$0xff]  ;;  %v2856_v59 = vld [vmem:[#allocation8 + $0x2fe0] sm:$0xff]  ;;  %v1649_v40 = vld [vmem:[#allocation8 + $0xa28] sm:$0xff] }
 0x2e0   :  { %v2877_v54 = vld [vmem:[#allocation8 + $0x3088] sm:$0xff] }
 0x2e1   :  { %5870 = vmatpush1.bf16.msra.mxu1 %v5869_v58  ;;  %5794 = vmatpush1.bf16.msra.mxu0 %v5793_v62  ;;  %v1599_v58 = vld [vmem:[#allocation8 + $0x898] sm:$0xff] }
 0x2e2   :  { %5872 = vmatprep.subr.bf16.mxu1 %v5871_v12  ;;  %5796 = vmatprep.subr.bf16.mxu0 %v5795_v17  ;;  %v2807_v62 = vld [vmem:[#allocation8 + $0x2e58] sm:$0xff]  ;;  %v5809_v12 = vpack.c.bf16 %v2796_v56, %v2786_v30  ;;  %v1588_v17 = vld [vmem:[#allocation8 + $0x840] sm:$0xff]  ;;  %v5887_v10 = vpack.c.bf16 %v1599_v58, %v1589_v57  ;;  %v1658_v57 = vld [vmem:[#allocation8 + $0xa70] sm:$0xff] }
 0x2e3   :  { %v5811_v5 = vpack.c.bf16 %v2817_v3, %v2807_v62  ;;  %v5889_v42 = vpack.c.bf16 %v1598_v8, %v1588_v17  ;;  %v1648_v56 = vld [vmem:[#allocation8 + $0xa20] sm:$0xff]  ;;  %v2866_v58 = vld [vmem:[#allocation8 + $0x3030] sm:$0xff]  ;;  %v1669_v3 = vld [vmem:[#allocation8 + $0xac8] sm:$0xff] }
 0x2e4   :  { %v2876_v62 = vld [vmem:[#allocation8 + $0x3080] sm:$0xff]  ;;  %v2897_v17 = vld [vmem:[#allocation8 + $0x3128] sm:$0xff]  ;;  %v5901_v8 = vpack.c.bf16 %v1658_v57, %v1648_v56 }
 0x2e5   :  { %5874 = vmatpush1.bf16.msra.mxu1 %v5873_v13  ;;  %5798 = vmatpush1.bf16.msra.mxu0 %v5797_v51  ;;  %v1619_v13 = vld [vmem:[#allocation8 + $0x938] sm:$0xff]  ;;  %v1728_v57 = vld [vmem:[#allocation8 + $0xca0] sm:$0xff] }
 0x2e6   :  { %5876 = vmatprep.subr.bf16.mxu1 %v5875_v15  ;;  %5800 = vmatprep.subr.bf16.mxu0 %v5799_v16  ;;  %v2827_v51 = vld [vmem:[#allocation8 + $0x2ef8] sm:$0xff]  ;;  %v5813_v15 = vpack.c.bf16 %v2816_v0, %v2806_v9  ;;  %v1608_v16 = vld [vmem:[#allocation8 + $0x8e0] sm:$0xff]  ;;  %v5891_v19 = vpack.c.bf16 %v1619_v13, %v1609_v11  ;;  %v1678_v0 = vld [vmem:[#allocation8 + $0xb10] sm:$0xff] }
 0x2e7   :  { %v5815_v20 = vpack.c.bf16 %v2837_v63, %v2827_v51  ;;  %v5893_v29 = vpack.c.bf16 %v1618_v18, %v1608_v16  ;;  %v1668_v9 = vld [vmem:[#allocation8 + $0xac0] sm:$0xff]  ;;  %v2886_v11 = vld [vmem:[#allocation8 + $0x30d0] sm:$0xff]  ;;  %v1689_v63 = vld [vmem:[#allocation8 + $0xb68] sm:$0xff] }
 0x2e8   :  { %v2896_v51 = vld [vmem:[#allocation8 + $0x3120] sm:$0xff]  ;;  %v2917_v16 = vld [vmem:[#allocation8 + $0x31c8] sm:$0xff]  ;;  %v5905_v18 = vpack.c.bf16 %v1678_v0, %v1668_v9 }
 0x2e9   :  { %5878 = vmatpush1.bf16.msra.mxu1 %v5877_v26  ;;  %5802 = vmatpush1.bf16.msra.mxu0 %v5801_v27  ;;  %v1639_v26 = vld [vmem:[#allocation8 + $0x9d8] sm:$0xff] }
 0x2ea   :  { %5880 = vmatprep.subr.bf16.mxu1 %v5879_v31  ;;  %5804 = vmatprep.subr.bf16.mxu0 %v5803_v32  ;;  %v2847_v27 = vld [vmem:[#allocation8 + $0x2f98] sm:$0xff]  ;;  %v5817_v31 = vpack.c.bf16 %v2836_v21, %v2826_v4  ;;  %v1628_v32 = vld [vmem:[#allocation8 + $0x980] sm:$0xff]  ;;  %v5895_v36 = vpack.c.bf16 %v1639_v26, %v1629_v25  ;;  %v1698_v21 = vld [vmem:[#allocation8 + $0xbb0] sm:$0xff] }
 0x2eb   :  { %v5819_v38 = vpack.c.bf16 %v2857_v28, %v2847_v27  ;;  %v5897_v48 = vpack.c.bf16 %v1638_v34, %v1628_v32  ;;  %v1688_v4 = vld [vmem:[#allocation8 + $0xb60] sm:$0xff]  ;;  %v2906_v25 = vld [vmem:[#allocation8 + $0x3170] sm:$0xff]  ;;  %v1709_v28 = vld [vmem:[#allocation8 + $0xc08] sm:$0xff] }
 0x2ec   :  { %v2916_v27 = vld [vmem:[#allocation8 + $0x31c0] sm:$0xff]  ;;  %v1341_v32 = vld [vmem:[#allocation8 + $0x88] sm:$0xff]  ;;  %v5909_v34 = vpack.c.bf16 %v1698_v21, %v1688_v4 }
 0x2ed   :  { %5882 = vmatpush1.bf16.msra.mxu1 %v5881_v41  ;;  %5806 = vmatpush1.bf16.msra.mxu0 %v5805_v44  ;;  %v1659_v41 = vld [vmem:[#allocation8 + $0xa78] sm:$0xff] }
 0x2ee   :  { %5884 = vmatprep.subr.bf16.mxu1 %v5883_v49  ;;  %5808 = vmatprep.subr.bf16.mxu0 %v5807_v50  ;;  %v2867_v44 = vld [vmem:[#allocation8 + $0x3038] sm:$0xff]  ;;  %v5821_v49 = vpack.c.bf16 %v2856_v59, %v2846_v39  ;;  %v5899_v50 = vpack.c.bf16 %v1659_v41, %v1649_v40  ;;  %v1708_v39 = vld [vmem:[#allocation8 + $0xc00] sm:$0xff]  ;;  %v1718_v59 = vld [vmem:[#allocation8 + $0xc50] sm:$0xff] }
 0x2ef   :  { %v5823_v30 = vpack.c.bf16 %v2877_v54, %v2867_v44  ;;  %v1330_v41 = vld [vmem:[#allocation8 + $0x30] sm:$0xff]  ;;  %v1340_v44 = vld [vmem:[#allocation8 + $0x80] sm:$0xff]  ;;  %v1729_v54 = vld [vmem:[#allocation8 + $0xca8] sm:$0xff] }
 0x2f0   :  { %v6157_v56 = vpack.c.bf16 %v1340_v44, %v1330_v41  ;;  %v1788_v41 = vld [vmem:[#allocation8 + $0xe80] sm:$0xff]  ;;  %v1798_v44 = vld [vmem:[#allocation8 + $0xed0] sm:$0xff] }
 0x2f1   :  { %5886 = vmatpush1.bf16.msra.mxu1 %v5885_v6  ;;  %5810 = vmatpush1.bf16.msra.mxu0 %v5809_v12  ;;  %v1679_v6 = vld [vmem:[#allocation8 + $0xb18] sm:$0xff] }
 0x2f2   :  { %5888 = vmatprep.subr.bf16.mxu1 %v5887_v10  ;;  %5812 = vmatprep.subr.bf16.mxu0 %v5811_v5  ;;  %v2887_v12 = vld [vmem:[#allocation8 + $0x30d8] sm:$0xff]  ;;  %v5825_v10 = vpack.c.bf16 %v2876_v62, %v2866_v58  ;;  %v5903_v5 = vpack.c.bf16 %v1679_v6, %v1669_v3  ;;  %v1738_v58 = vld [vmem:[#allocation8 + $0xcf0] sm:$0xff] }
 0x2f3   :  { %v5827_v13 = vpack.c.bf16 %v2897_v17, %v2887_v12  ;;  %v1350_v62 = vld [vmem:[#allocation8 + $0xd0] sm:$0xff]  ;;  %v1360_v12 = vld [vmem:[#allocation8 + $0x120] sm:$0xff]  ;;  %v1749_v17 = vld [vmem:[#allocation8 + $0xd48] sm:$0xff]  ;;  %v5917_v9 = vpack.c.bf16 %v1738_v58, %v1728_v57  ;;  %v5929_v58 = vpack.c.bf16 %v1798_v44, %v1788_v41 }
 0x2f4   :  { %v6161_v0 = vpack.c.bf16 %v1360_v12, %v1350_v62  ;;  %v1441_v57 = vld [vmem:[#allocation8 + $0x3a8] sm:$0xff]  ;;  %v1818_v12 = vld [vmem:[#allocation8 + $0xf70] sm:$0xff] }
 0x2f5   :  { %5890 = vmatpush1.bf16.msra.mxu1 %v5889_v42  ;;  %5814 = vmatpush1.bf16.msra.mxu0 %v5813_v15  ;;  %v1699_v42 = vld [vmem:[#allocation8 + $0xbb8] sm:$0xff] }
 0x2f6   :  { %5892 = vmatprep.subr.bf16.mxu1 %v5891_v19  ;;  %5816 = vmatprep.subr.bf16.mxu0 %v5815_v20  ;;  %v2907_v15 = vld [vmem:[#allocation8 + $0x3178] sm:$0xff]  ;;  %v5829_v19 = vpack.c.bf16 %v2896_v51, %v2886_v11  ;;  %v5907_v20 = vpack.c.bf16 %v1699_v42, %v1689_v63  ;;  %v1758_v51 = vld [vmem:[#allocation8 + $0xd90] sm:$0xff] }
 0x2f7   :  { %v5831_v26 = vpack.c.bf16 %v2917_v16, %v2907_v15  ;;  %v1370_v63 = vld [vmem:[#allocation8 + $0x170] sm:$0xff]  ;;  %v1380_v15 = vld [vmem:[#allocation8 + $0x1c0] sm:$0xff]  ;;  %v1769_v16 = vld [vmem:[#allocation8 + $0xde8] sm:$0xff] }
 0x2f8   :  { %v6165_v21 = vpack.c.bf16 %v1380_v15, %v1370_v63  ;;  %v1838_v15 = vld [vmem:[#allocation8 + $0x1010] sm:$0xff] }
 0x2f9   :  { %5894 = vmatpush1.bf16.msra.mxu1 %v5893_v29  ;;  %5818 = vmatpush1.bf16.msra.mxu0 %v5817_v31  ;;  %v1719_v29 = vld [vmem:[#allocation8 + $0xc58] sm:$0xff] }
 0x2fa   :  { %5896 = vmatprep.subr.bf16.mxu1 %v5895_v36  ;;  %5820 = vmatprep.subr.bf16.mxu0 %v5819_v38  ;;  %v1331_v31 = vld [vmem:[#allocation8 + $0x38] sm:$0xff]  ;;  %v5833_v36 = vpack.c.bf16 %v2916_v27, %v2906_v25  ;;  %v5911_v38 = vpack.c.bf16 %v1719_v29, %v1709_v28  ;;  %v1778_v27 = vld [vmem:[#allocation8 + $0xe30] sm:$0xff] }
 0x2fb   :  { %v6155_v40 = vpack.c.bf16 %v1341_v32, %v1331_v31  ;;  %v1390_v28 = vld [vmem:[#allocation8 + $0x210] sm:$0xff]  ;;  %v1400_v31 = vld [vmem:[#allocation8 + $0x260] sm:$0xff]  ;;  %v1789_v32 = vld [vmem:[#allocation8 + $0xe88] sm:$0xff] }
 0x2fd   :  { %5898 = vmatpush1.bf16.msra.mxu1 %v5897_v48  ;;  %5822 = vmatpush1.bf16.msra.mxu0 %v5821_v49  ;;  %v1739_v48 = vld [vmem:[#allocation8 + $0xcf8] sm:$0xff] }
 0x2fe   :  { %5900 = vmatprep.subr.bf16.mxu1 %v5899_v50  ;;  %5824 = vmatprep.subr.bf16.mxu0 %v5823_v30  ;;  %v1351_v49 = vld [vmem:[#allocation8 + $0xd8] sm:$0xff]  ;;  %v1361_v50 = vld [vmem:[#allocation8 + $0x128] sm:$0xff]  ;;  %v5913_v30 = vpack.c.bf16 %v1718_v59, %v1708_v39  ;;  %v5915_v3 = vpack.c.bf16 %v1739_v48, %v1729_v54  ;;  %v6169_v59 = vpack.c.bf16 %v1400_v31, %v1390_v28  ;;  %v1410_v54 = vld [vmem:[#allocation8 + $0x2b0] sm:$0xff] }
 0x2ff   :  { %v6159_v6 = vpack.c.bf16 %v1361_v50, %v1351_v49  ;;  %v1420_v49 = vld [vmem:[#allocation8 + $0x300] sm:$0xff]  ;;  %v1809_v50 = vld [vmem:[#allocation8 + $0xf28] sm:$0xff]  ;;  %v1858_v31 = vld [vmem:[#allocation8 + $0x10b0] sm:$0xff] }
 0x300   :  { %3753 = vmatmul.mubr.f32.vlgmr.msra.gmra.mrb[6].mxu1 %v7217_v7  ;;  %v6173_v62 = vpack.c.bf16 %v1420_v49, %v1410_v54  ;;  %v1878_v49 = vld [vmem:[#allocation8 + $0x1150] sm:$0xff] }
 0x301   :  { %5902 = vmatpush1.bf16.msra.mxu1 %v5901_v8  ;;  %3823 = vmatprep.mubr.f32.mxu1 %v7246_v60  ;;  %v1759_v8 = vld [vmem:[#allocation8 + $0xd98] sm:$0xff] }
 0x302   :  { %5826 = vmatpush1.bf16.msra.mxu0 %v5825_v10  ;;  %5904 = vmatprep.subr.bf16.mxu1 %v5903_v5  ;;  %v1371_v10 = vld [vmem:[#allocation8 + $0x178] sm:$0xff]  ;;  %v1381_v5 = vld [vmem:[#allocation8 + $0x1c8] sm:$0xff]  ;;  %v5919_v11 = vpack.c.bf16 %v1759_v8, %v1749_v17  ;;  %v1430_v17 = vld [vmem:[#allocation8 + $0x350] sm:$0xff] }
 0x303   :  { %5828 = vmatprep.subr.bf16.mxu0 %v5827_v13  ;;  %v1748_v13 = vld [vmem:[#allocation8 + $0xd40] sm:$0xff]  ;;  %v6163_v42 = vpack.c.bf16 %v1381_v5, %v1371_v10  ;;  %v1829_v5 = vld [vmem:[#allocation8 + $0xfc8] sm:$0xff] }
 0x304   :  { %v5921_v4 = vpack.c.bf16 %v1758_v51, %v1748_v13  ;;  %v1440_v10 = vld [vmem:[#allocation8 + $0x3a0] sm:$0xff] }
 0x305   :  { %5906 = vmatpush1.bf16.msra.mxu1 %v5905_v18  ;;  %v1779_v18 = vld [vmem:[#allocation8 + $0xe38] sm:$0xff]  ;;  %v6177_v51 = vpack.c.bf16 %v1440_v10, %v1430_v17  ;;  %v1898_v10 = vld [vmem:[#allocation8 + $0x11f0] sm:$0xff] }
 0x306   :  { %5830 = vmatpush1.bf16.msra.mxu0 %v5829_v19  ;;  %5908 = vmatprep.subr.bf16.mxu1 %v5907_v20  ;;  %v1391_v19 = vld [vmem:[#allocation8 + $0x218] sm:$0xff]  ;;  %v1401_v20 = vld [vmem:[#allocation8 + $0x268] sm:$0xff]  ;;  %v5923_v25 = vpack.c.bf16 %v1779_v18, %v1769_v16  ;;  %v1450_v16 = vld [vmem:[#allocation8 + $0x3f0] sm:$0xff] }
 0x307   :  { %5832 = vmatprep.subr.bf16.mxu0 %v5831_v26  ;;  %v1768_v26 = vld [vmem:[#allocation8 + $0xde0] sm:$0xff]  ;;  %v6167_v29 = vpack.c.bf16 %v1401_v20, %v1391_v19  ;;  %v1849_v20 = vld [vmem:[#allocation8 + $0x1068] sm:$0xff] }
 0x308   :  { %v5925_v39 = vpack.c.bf16 %v1778_v27, %v1768_v26  ;;  %v1460_v19 = vld [vmem:[#allocation8 + $0x440] sm:$0xff] }
 0x309   :  { %5910 = vmatpush1.bf16.msra.mxu1 %v5909_v34  ;;  %v1799_v34 = vld [vmem:[#allocation8 + $0xed8] sm:$0xff]  ;;  %v6181_v27 = vpack.c.bf16 %v1460_v19, %v1450_v16  ;;  %v1918_v19 = vld [vmem:[#allocation8 + $0x1290] sm:$0xff] }
 0x30a   :  { %5834 = vmatpush1.bf16.msra.mxu0 %v5833_v36  ;;  %5912 = vmatprep.subr.bf16.mxu1 %v5911_v38  ;;  %v1411_v36 = vld [vmem:[#allocation8 + $0x2b8] sm:$0xff]  ;;  %v1421_v38 = vld [vmem:[#allocation8 + $0x308] sm:$0xff] }
 0x30b   :  { %6156 = vmatprep.subr.bf16.mxu0 %v6155_v40  ;;  %v5927_v40 = vpack.c.bf16 %v1799_v34, %v1789_v32  ;;  %v6171_v48 = vpack.c.bf16 %v1421_v38, %v1411_v36  ;;  %v1470_v32 = vld [vmem:[#allocation8 + $0x490] sm:$0xff]  ;;  %v1480_v36 = vld [vmem:[#allocation8 + $0x4e0] sm:$0xff]  ;;  %v1869_v38 = vld [vmem:[#allocation8 + $0x1108] sm:$0xff] }
 0x30c   :  { %v6185_v44 = vpack.c.bf16 %v1480_v36, %v1470_v32  ;;  %v1938_v36 = vld [vmem:[#allocation8 + $0x1330] sm:$0xff] }
 0x30d   :  { %3682 = vmatmul.mubr.f32.vlgmr.msra.gmra.mrb[10].mxu0 %v7319_v53  ;;  %5914 = vmatpush1.bf16.msra.mxu1 %v5913_v30  ;;  %v1819_v30 = vld [vmem:[#allocation8 + $0xf78] sm:$0xff] }
 0x30e   :  { %6158 = vmatpush1.bf16.msra.mxu0 %v6157_v56  ;;  %4107 = vmatprep.mubr.f32.mxu0 %v7214_v1  ;;  %v1431_v56 = vld [vmem:[#allocation8 + $0x358] sm:$0xff] }
 0x30f   :  { %5916 = vmatprep.subr.bf16.mxu1 %v5915_v3  ;;  %6160 = vmatprep.subr.bf16.mxu0 %v6159_v6  ;;  %v5931_v3 = vpack.c.bf16 %v1819_v30, %v1809_v50  ;;  %v1808_v6 = vld [vmem:[#allocation8 + $0xf20] sm:$0xff]  ;;  %v6175_v8 = vpack.c.bf16 %v1441_v57, %v1431_v56  ;;  %v1490_v50 = vld [vmem:[#allocation8 + $0x530] sm:$0xff]  ;;  %v1889_v57 = vld [vmem:[#allocation8 + $0x11a8] sm:$0xff] }
 0x310   :  { %v5933_v13 = vpack.c.bf16 %v1818_v12, %v1808_v6  ;;  %v1500_v56 = vld [vmem:[#allocation8 + $0x580] sm:$0xff] }
 0x311   :  { %5918 = vmatpush1.bf16.msra.mxu1 %v5917_v9  ;;  %v1839_v9 = vld [vmem:[#allocation8 + $0x1018] sm:$0xff]  ;;  %v6189_v12 = vpack.c.bf16 %v1500_v56, %v1490_v50  ;;  %v1958_v56 = vld [vmem:[#allocation8 + $0x13d0] sm:$0xff] }
 0x312   :  { %6162 = vmatpush1.bf16.msra.mxu0 %v6161_v0  ;;  %5920 = vmatprep.subr.bf16.mxu1 %v5919_v11  ;;  %v1451_v0 = vld [vmem:[#allocation8 + $0x3f8] sm:$0xff]  ;;  %v1461_v11 = vld [vmem:[#allocation8 + $0x448] sm:$0xff]  ;;  %v5935_v63 = vpack.c.bf16 %v1839_v9, %v1829_v5  ;;  %v1510_v5 = vld [vmem:[#allocation8 + $0x5d0] sm:$0xff] }
 0x313   :  { %6164 = vmatprep.subr.bf16.mxu0 %v6163_v42  ;;  %v1828_v42 = vld [vmem:[#allocation8 + $0xfc0] sm:$0xff]  ;;  %v6179_v18 = vpack.c.bf16 %v1461_v11, %v1451_v0  ;;  %v1909_v11 = vld [vmem:[#allocation8 + $0x1248] sm:$0xff] }
 0x314   :  { %v5937_v26 = vpack.c.bf16 %v1838_v15, %v1828_v42  ;;  %v1520_v0 = vld [vmem:[#allocation8 + $0x620] sm:$0xff] }
 0x315   :  { %5922 = vmatpush1.bf16.msra.mxu1 %v5921_v4  ;;  %v1859_v4 = vld [vmem:[#allocation8 + $0x10b8] sm:$0xff]  ;;  %v6193_v15 = vpack.c.bf16 %v1520_v0, %v1510_v5  ;;  %v1978_v0 = vld [vmem:[#allocation8 + $0x1470] sm:$0xff] }
 0x316   :  { %6166 = vmatpush1.bf16.msra.mxu0 %v6165_v21  ;;  %5924 = vmatprep.subr.bf16.mxu1 %v5923_v25  ;;  %v1471_v21 = vld [vmem:[#allocation8 + $0x498] sm:$0xff]  ;;  %v1481_v25 = vld [vmem:[#allocation8 + $0x4e8] sm:$0xff]  ;;  %v5939_v28 = vpack.c.bf16 %v1859_v4, %v1849_v20  ;;  %v1530_v20 = vld [vmem:[#allocation8 + $0x670] sm:$0xff] }
 0x317   :  { %6168 = vmatprep.subr.bf16.mxu0 %v6167_v29  ;;  %v1848_v29 = vld [vmem:[#allocation8 + $0x1060] sm:$0xff]  ;;  %v6183_v34 = vpack.c.bf16 %v1481_v25, %v1471_v21  ;;  %v1929_v25 = vld [vmem:[#allocation8 + $0x12e8] sm:$0xff] }
 0x318   :  { %v5941_v41 = vpack.c.bf16 %v1858_v31, %v1848_v29  ;;  %v1540_v21 = vld [vmem:[#allocation8 + $0x6c0] sm:$0xff] }
 0x319   :  { %5926 = vmatpush1.bf16.msra.mxu1 %v5925_v39  ;;  %v1879_v39 = vld [vmem:[#allocation8 + $0x1158] sm:$0xff]  ;;  %v6197_v31 = vpack.c.bf16 %v1540_v21, %v1530_v20  ;;  %v1998_v21 = vld [vmem:[#allocation8 + $0x1510] sm:$0xff] }
 0x31a   :  { %6170 = vmatpush1.bf16.msra.mxu0 %v6169_v59  ;;  %5928 = vmatprep.subr.bf16.mxu1 %v5927_v40  ;;  %v1491_v59 = vld [vmem:[#allocation8 + $0x538] sm:$0xff]  ;;  %v1501_v40 = vld [vmem:[#allocation8 + $0x588] sm:$0xff]  ;;  %v5943_v54 = vpack.c.bf16 %v1879_v39, %v1869_v38  ;;  %v1550_v38 = vld [vmem:[#allocation8 + $0x710] sm:$0xff] }
 0x31b   :  { %6172 = vmatprep.subr.bf16.mxu0 %v6171_v48  ;;  %v1868_v48 = vld [vmem:[#allocation8 + $0x1100] sm:$0xff]  ;;  %v6187_v30 = vpack.c.bf16 %v1501_v40, %v1491_v59  ;;  %v1949_v40 = vld [vmem:[#allocation8 + $0x1388] sm:$0xff] }
 0x31c   :  { %v5945_v6 = vpack.c.bf16 %v1878_v49, %v1868_v48  ;;  %v1560_v59 = vld [vmem:[#allocation8 + $0x760] sm:$0xff] }
 0x31d   :  { %5930 = vmatpush1.bf16.msra.mxu1 %v5929_v58  ;;  %v1899_v58 = vld [vmem:[#allocation8 + $0x11f8] sm:$0xff]  ;;  %v6201_v49 = vpack.c.bf16 %v1560_v59, %v1550_v38  ;;  %v2018_v59 = vld [vmem:[#allocation8 + $0x15b0] sm:$0xff] }
 0x31e   :  { %6174 = vmatpush1.bf16.msra.mxu0 %v6173_v62  ;;  %5932 = vmatprep.subr.bf16.mxu1 %v5931_v3  ;;  %v1511_v62 = vld [vmem:[#allocation8 + $0x5d8] sm:$0xff]  ;;  %v1521_v3 = vld [vmem:[#allocation8 + $0x628] sm:$0xff]  ;;  %v5947_v17 = vpack.c.bf16 %v1899_v58, %v1889_v57  ;;  %v1570_v57 = vld [vmem:[#allocation8 + $0x7b0] sm:$0xff] }
 0x31f   :  { %6176 = vmatprep.subr.bf16.mxu0 %v6175_v8  ;;  %v1888_v8 = vld [vmem:[#allocation8 + $0x11a0] sm:$0xff]  ;;  %v6191_v9 = vpack.c.bf16 %v1521_v3, %v1511_v62  ;;  %v1969_v3 = vld [vmem:[#allocation8 + $0x1428] sm:$0xff] }
 0x320   :  { %v5949_v42 = vpack.c.bf16 %v1898_v10, %v1888_v8  ;;  %v1580_v62 = vld [vmem:[#allocation8 + $0x800] sm:$0xff] }
 0x321   :  { %5934 = vmatpush1.bf16.msra.mxu1 %v5933_v13  ;;  %v1919_v13 = vld [vmem:[#allocation8 + $0x1298] sm:$0xff]  ;;  %v6205_v10 = vpack.c.bf16 %v1580_v62, %v1570_v57  ;;  %v2038_v62 = vld [vmem:[#allocation8 + $0x1650] sm:$0xff] }
 0x322   :  { %6178 = vmatpush1.bf16.msra.mxu0 %v6177_v51  ;;  %5936 = vmatprep.subr.bf16.mxu1 %v5935_v63  ;;  %v1531_v51 = vld [vmem:[#allocation8 + $0x678] sm:$0xff]  ;;  %v1541_v63 = vld [vmem:[#allocation8 + $0x6c8] sm:$0xff]  ;;  %v5951_v16 = vpack.c.bf16 %v1919_v13, %v1909_v11  ;;  %v1590_v11 = vld [vmem:[#allocation8 + $0x850] sm:$0xff] }
 0x323   :  { %6180 = vmatprep.subr.bf16.mxu0 %v6179_v18  ;;  %v1908_v18 = vld [vmem:[#allocation8 + $0x1240] sm:$0xff]  ;;  %v6195_v4 = vpack.c.bf16 %v1541_v63, %v1531_v51  ;;  %v1989_v63 = vld [vmem:[#allocation8 + $0x14c8] sm:$0xff] }
 0x324   :  { %v5953_v29 = vpack.c.bf16 %v1918_v19, %v1908_v18  ;;  %v1600_v51 = vld [vmem:[#allocation8 + $0x8a0] sm:$0xff] }
 0x325   :  { %5938 = vmatpush1.bf16.msra.mxu1 %v5937_v26  ;;  %v1939_v26 = vld [vmem:[#allocation8 + $0x1338] sm:$0xff]  ;;  %v6209_v19 = vpack.c.bf16 %v1600_v51, %v1590_v11  ;;  %v2048_v11 = vld [vmem:[#allocation8 + $0x16a0] sm:$0xff]  ;;  %v1670_v51 = vld [vmem:[#allocation8 + $0xad0] sm:$0xff] }
 0x326   :  { %6182 = vmatpush1.bf16.msra.mxu0 %v6181_v27  ;;  %5940 = vmatprep.subr.bf16.mxu1 %v5939_v28  ;;  %v1551_v27 = vld [vmem:[#allocation8 + $0x718] sm:$0xff]  ;;  %v1561_v28 = vld [vmem:[#allocation8 + $0x768] sm:$0xff]  ;;  %v5955_v32 = vpack.c.bf16 %v1939_v26, %v1929_v25  ;;  %v1610_v25 = vld [vmem:[#allocation8 + $0x8f0] sm:$0xff] }
 0x327   :  { %6184 = vmatprep.subr.bf16.mxu0 %v6183_v34  ;;  %v1928_v34 = vld [vmem:[#allocation8 + $0x12e0] sm:$0xff]  ;;  %v6199_v39 = vpack.c.bf16 %v1561_v28, %v1551_v27  ;;  %v2009_v28 = vld [vmem:[#allocation8 + $0x1568] sm:$0xff] }
 0x328   :  { %v5957_v48 = vpack.c.bf16 %v1938_v36, %v1928_v34  ;;  %v1620_v27 = vld [vmem:[#allocation8 + $0x940] sm:$0xff] }
 0x329   :  { %5942 = vmatpush1.bf16.msra.mxu1 %v5941_v41  ;;  %v1959_v41 = vld [vmem:[#allocation8 + $0x13d8] sm:$0xff]  ;;  %v6213_v36 = vpack.c.bf16 %v1620_v27, %v1610_v25  ;;  %v2078_v27 = vld [vmem:[#allocation8 + $0x1790] sm:$0xff] }
 0x32a   :  { %6186 = vmatpush1.bf16.msra.mxu0 %v6185_v44  ;;  %5944 = vmatprep.subr.bf16.mxu1 %v5943_v54  ;;  %v1571_v44 = vld [vmem:[#allocation8 + $0x7b8] sm:$0xff]  ;;  %v1581_v54 = vld [vmem:[#allocation8 + $0x808] sm:$0xff]  ;;  %v5959_v50 = vpack.c.bf16 %v1959_v41, %v1949_v40  ;;  %v1630_v40 = vld [vmem:[#allocation8 + $0x990] sm:$0xff] }
 0x32b   :  { %6188 = vmatprep.subr.bf16.mxu0 %v6187_v30  ;;  %v1948_v30 = vld [vmem:[#allocation8 + $0x1380] sm:$0xff]  ;;  %v6203_v58 = vpack.c.bf16 %v1581_v54, %v1571_v44  ;;  %v2029_v54 = vld [vmem:[#allocation8 + $0x1608] sm:$0xff] }
 0x32c   :  { %v5961_v8 = vpack.c.bf16 %v1958_v56, %v1948_v30  ;;  %v1640_v44 = vld [vmem:[#allocation8 + $0x9e0] sm:$0xff] }
 0x32d   :  { %5946 = vmatpush1.bf16.msra.mxu1 %v5945_v6  ;;  %v1979_v6 = vld [vmem:[#allocation8 + $0x1478] sm:$0xff]  ;;  %v6217_v56 = vpack.c.bf16 %v1640_v44, %v1630_v40  ;;  %v2098_v44 = vld [vmem:[#allocation8 + $0x1830] sm:$0xff] }
 0x32e   :  { %6190 = vmatpush1.bf16.msra.mxu0 %v6189_v12  ;;  %5948 = vmatprep.subr.bf16.mxu1 %v5947_v17  ;;  %v1591_v12 = vld [vmem:[#allocation8 + $0x858] sm:$0xff]  ;;  %v1601_v17 = vld [vmem:[#allocation8 + $0x8a8] sm:$0xff]  ;;  %v5963_v5 = vpack.c.bf16 %v1979_v6, %v1969_v3  ;;  %v1650_v6 = vld [vmem:[#allocation8 + $0xa30] sm:$0xff] }
 0x32f   :  { %6192 = vmatprep.subr.bf16.mxu0 %v6191_v9  ;;  %v1968_v9 = vld [vmem:[#allocation8 + $0x1420] sm:$0xff]  ;;  %v6207_v13 = vpack.c.bf16 %v1601_v17, %v1591_v12  ;;  %v2049_v17 = vld [vmem:[#allocation8 + $0x16a8] sm:$0xff] }
 0x330   :  { %v5965_v18 = vpack.c.bf16 %v1978_v0, %v1968_v9  ;;  %v1660_v12 = vld [vmem:[#allocation8 + $0xa80] sm:$0xff] }
 0x331   :  { %5950 = vmatpush1.bf16.msra.mxu1 %v5949_v42  ;;  %v1999_v42 = vld [vmem:[#allocation8 + $0x1518] sm:$0xff]  ;;  %v6221_v0 = vpack.c.bf16 %v1660_v12, %v1650_v6  ;;  %v2108_v6 = vld [vmem:[#allocation8 + $0x1880] sm:$0xff]  ;;  %v2118_v12 = vld [vmem:[#allocation8 + $0x18d0] sm:$0xff] }
 0x332   :  { %6194 = vmatpush1.bf16.msra.mxu0 %v6193_v15  ;;  %5952 = vmatprep.subr.bf16.mxu1 %v5951_v16  ;;  %v1611_v15 = vld [vmem:[#allocation8 + $0x8f8] sm:$0xff]  ;;  %v1621_v16 = vld [vmem:[#allocation8 + $0x948] sm:$0xff]  ;;  %v5967_v20 = vpack.c.bf16 %v1999_v42, %v1989_v63 }
 0x333   :  { %6196 = vmatprep.subr.bf16.mxu0 %v6195_v4  ;;  %v1988_v4 = vld [vmem:[#allocation8 + $0x14c0] sm:$0xff]  ;;  %v6211_v26 = vpack.c.bf16 %v1621_v16, %v1611_v15  ;;  %v2069_v16 = vld [vmem:[#allocation8 + $0x1748] sm:$0xff] }
 0x334   :  { %v5969_v34 = vpack.c.bf16 %v1998_v21, %v1988_v4  ;;  %v1680_v15 = vld [vmem:[#allocation8 + $0xb20] sm:$0xff] }
 0x335   :  { %5954 = vmatpush1.bf16.msra.mxu1 %v5953_v29  ;;  %v2019_v29 = vld [vmem:[#allocation8 + $0x15b8] sm:$0xff]  ;;  %v6225_v21 = vpack.c.bf16 %v1680_v15, %v1670_v51  ;;  %v2138_v15 = vld [vmem:[#allocation8 + $0x1970] sm:$0xff] }
 0x336   :  { %6198 = vmatpush1.bf16.msra.mxu0 %v6197_v31  ;;  %5956 = vmatprep.subr.bf16.mxu1 %v5955_v32  ;;  %v1631_v31 = vld [vmem:[#allocation8 + $0x998] sm:$0xff]  ;;  %v1641_v32 = vld [vmem:[#allocation8 + $0x9e8] sm:$0xff]  ;;  %v5971_v38 = vpack.c.bf16 %v2019_v29, %v2009_v28  ;;  %v1690_v28 = vld [vmem:[#allocation8 + $0xb70] sm:$0xff] }
 0x337   :  { %6200 = vmatprep.subr.bf16.mxu0 %v6199_v39  ;;  %v2008_v39 = vld [vmem:[#allocation8 + $0x1560] sm:$0xff]  ;;  %v6215_v41 = vpack.c.bf16 %v1641_v32, %v1631_v31  ;;  %v2089_v32 = vld [vmem:[#allocation8 + $0x17e8] sm:$0xff] }
 0x338   :  { %v5973_v30 = vpack.c.bf16 %v2018_v59, %v2008_v39  ;;  %v1700_v31 = vld [vmem:[#allocation8 + $0xbc0] sm:$0xff] }
 0x339   :  { %5958 = vmatpush1.bf16.msra.mxu1 %v5957_v48  ;;  %v2039_v48 = vld [vmem:[#allocation8 + $0x1658] sm:$0xff]  ;;  %v6229_v59 = vpack.c.bf16 %v1700_v31, %v1690_v28  ;;  %v2158_v31 = vld [vmem:[#allocation8 + $0x1a10] sm:$0xff] }
 0x33a   :  { %6202 = vmatpush1.bf16.msra.mxu0 %v6201_v49  ;;  %5960 = vmatprep.subr.bf16.mxu1 %v5959_v50  ;;  %v1651_v49 = vld [vmem:[#allocation8 + $0xa38] sm:$0xff]  ;;  %v1661_v50 = vld [vmem:[#allocation8 + $0xa88] sm:$0xff]  ;;  %v5975_v57 = vpack.c.bf16 %v2039_v48, %v2029_v54  ;;  %v1710_v54 = vld [vmem:[#allocation8 + $0xc10] sm:$0xff] }
 0x33b   :  { %6204 = vmatprep.subr.bf16.mxu0 %v6203_v58  ;;  %v2028_v58 = vld [vmem:[#allocation8 + $0x1600] sm:$0xff]  ;;  %v6219_v3 = vpack.c.bf16 %v1661_v50, %v1651_v49  ;;  %v2109_v50 = vld [vmem:[#allocation8 + $0x1888] sm:$0xff] }
 0x33c   :  { %v5977_v9 = vpack.c.bf16 %v2038_v62, %v2028_v58  ;;  %v1720_v49 = vld [vmem:[#allocation8 + $0xc60] sm:$0xff] }
 0x33d   :  { %5962 = vmatpush1.bf16.msra.mxu1 %v5961_v8  ;;  %v2059_v8 = vld [vmem:[#allocation8 + $0x16f8] sm:$0xff]  ;;  %v6233_v62 = vpack.c.bf16 %v1720_v49, %v1710_v54  ;;  %v2178_v49 = vld [vmem:[#allocation8 + $0x1ab0] sm:$0xff] }
 0x33e   :  { %6206 = vmatpush1.bf16.msra.mxu0 %v6205_v10  ;;  %5964 = vmatprep.subr.bf16.mxu1 %v5963_v5  ;;  %v1671_v10 = vld [vmem:[#allocation8 + $0xad8] sm:$0xff]  ;;  %v1681_v5 = vld [vmem:[#allocation8 + $0xb28] sm:$0xff]  ;;  %v5979_v63 = vpack.c.bf16 %v2059_v8, %v2049_v17  ;;  %v1730_v17 = vld [vmem:[#allocation8 + $0xcb0] sm:$0xff] }
 0x33f   :  { %6208 = vmatprep.subr.bf16.mxu0 %v6207_v13  ;;  %v2058_v13 = vld [vmem:[#allocation8 + $0x16f0] sm:$0xff]  ;;  %v6223_v42 = vpack.c.bf16 %v1681_v5, %v1671_v10  ;;  %v1740_v10 = vld [vmem:[#allocation8 + $0xd00] sm:$0xff]  ;;  %v2129_v5 = vld [vmem:[#allocation8 + $0x1928] sm:$0xff] }
 0x340   :  { %3824 = vmatmul.mubr.f32.vlgmr.msra.gmra.mrb[6].mxu1 %v7249_v2  ;;  %v5981_v4 = vpack.c.bf16 %v2058_v13, %v2048_v11  ;;  %v1761_v11 = vld [vmem:[#allocation8 + $0xda8] sm:$0xff]  ;;  %v5993_v13 = vpack.c.bf16 %v2118_v12, %v2108_v6  ;;  %v6237_v51 = vpack.c.bf16 %v1740_v10, %v1730_v17  ;;  %v2198_v10 = vld [vmem:[#allocation8 + $0x1b50] sm:$0xff] }
 0x341   :  { %5966 = vmatpush1.bf16.msra.mxu1 %v5965_v18  ;;  %3894 = vmatprep.mubr.f32.mxu1 %v7272_v24  ;;  %v2079_v18 = vld [vmem:[#allocation8 + $0x1798] sm:$0xff] }
 0x342   :  { %6210 = vmatpush1.bf16.msra.mxu0 %v6209_v19  ;;  %5968 = vmatprep.subr.bf16.mxu1 %v5967_v20  ;;  %v1691_v19 = vld [vmem:[#allocation8 + $0xb78] sm:$0xff]  ;;  %v1701_v20 = vld [vmem:[#allocation8 + $0xbc8] sm:$0xff]  ;;  %v5983_v25 = vpack.c.bf16 %v2079_v18, %v2069_v16  ;;  %v1750_v16 = vld [vmem:[#allocation8 + $0xd50] sm:$0xff] }
 0x343   :  { %6212 = vmatprep.subr.bf16.mxu0 %v6211_v26  ;;  %v2068_v26 = vld [vmem:[#allocation8 + $0x1740] sm:$0xff]  ;;  %v6227_v29 = vpack.c.bf16 %v1701_v20, %v1691_v19  ;;  %v2149_v20 = vld [vmem:[#allocation8 + $0x19c8] sm:$0xff] }
 0x344   :  { %v5985_v39 = vpack.c.bf16 %v2078_v27, %v2068_v26  ;;  %v1760_v19 = vld [vmem:[#allocation8 + $0xda0] sm:$0xff] }
 0x345   :  { %5970 = vmatpush1.bf16.msra.mxu1 %v5969_v34  ;;  %v2099_v34 = vld [vmem:[#allocation8 + $0x1838] sm:$0xff]  ;;  %v6241_v27 = vpack.c.bf16 %v1760_v19, %v1750_v16  ;;  %v2218_v19 = vld [vmem:[#allocation8 + $0x1bf0] sm:$0xff] }
 0x346   :  { %6214 = vmatpush1.bf16.msra.mxu0 %v6213_v36  ;;  %5972 = vmatprep.subr.bf16.mxu1 %v5971_v38  ;;  %v1711_v36 = vld [vmem:[#allocation8 + $0xc18] sm:$0xff]  ;;  %v1721_v38 = vld [vmem:[#allocation8 + $0xc68] sm:$0xff]  ;;  %v5987_v40 = vpack.c.bf16 %v2099_v34, %v2089_v32  ;;  %v1770_v32 = vld [vmem:[#allocation8 + $0xdf0] sm:$0xff] }
 0x347   :  { %6216 = vmatprep.subr.bf16.mxu0 %v6215_v41  ;;  %v2088_v41 = vld [vmem:[#allocation8 + $0x17e0] sm:$0xff]  ;;  %v6231_v48 = vpack.c.bf16 %v1721_v38, %v1711_v36  ;;  %v2169_v38 = vld [vmem:[#allocation8 + $0x1a68] sm:$0xff] }
 0x348   :  { %v5989_v58 = vpack.c.bf16 %v2098_v44, %v2088_v41  ;;  %v1780_v36 = vld [vmem:[#allocation8 + $0xe40] sm:$0xff] }
 0x349   :  { %5974 = vmatpush1.bf16.msra.mxu1 %v5973_v30  ;;  %v2119_v30 = vld [vmem:[#allocation8 + $0x18d8] sm:$0xff]  ;;  %v6245_v44 = vpack.c.bf16 %v1780_v36, %v1770_v32  ;;  %v2238_v36 = vld [vmem:[#allocation8 + $0x1c90] sm:$0xff] }
 0x34a   :  { %6218 = vmatpush1.bf16.msra.mxu0 %v6217_v56  ;;  %5976 = vmatprep.subr.bf16.mxu1 %v5975_v57  ;;  %v1731_v56 = vld [vmem:[#allocation8 + $0xcb8] sm:$0xff]  ;;  %v1741_v57 = vld [vmem:[#allocation8 + $0xd08] sm:$0xff] }
 0x34b   :  { %6220 = vmatprep.subr.bf16.mxu0 %v6219_v3  ;;  %v5991_v3 = vpack.c.bf16 %v2119_v30, %v2109_v50  ;;  %v6235_v8 = vpack.c.bf16 %v1741_v57, %v1731_v56  ;;  %v1790_v50 = vld [vmem:[#allocation8 + $0xe90] sm:$0xff]  ;;  %v1800_v56 = vld [vmem:[#allocation8 + $0xee0] sm:$0xff]  ;;  %v2189_v57 = vld [vmem:[#allocation8 + $0x1b08] sm:$0xff] }
 0x34c   :  { %v6249_v12 = vpack.c.bf16 %v1800_v56, %v1790_v50  ;;  %v2258_v56 = vld [vmem:[#allocation8 + $0x1d30] sm:$0xff] }
 0x34d   :  { %5978 = vmatpush1.bf16.msra.mxu1 %v5977_v9  ;;  %4108 = vmatmul.mubr.f32.vlgmr.msra.gmra.mrb[12].mxu0 %v7217_v7  ;;  %v2139_v9 = vld [vmem:[#allocation8 + $0x1978] sm:$0xff] }
 0x34e   :  { %6222 = vmatpush1.bf16.msra.mxu0 %v6221_v0  ;;  %4178 = vmatprep.mubr.f32.mxu0 %v7246_v60  ;;  %v1751_v0 = vld [vmem:[#allocation8 + $0xd58] sm:$0xff] }
 0x34f   :  { %5980 = vmatprep.subr.bf16.mxu1 %v5979_v63  ;;  %6224 = vmatprep.subr.bf16.mxu0 %v6223_v42  ;;  %v5995_v63 = vpack.c.bf16 %v2139_v9, %v2129_v5  ;;  %v2128_v42 = vld [vmem:[#allocation8 + $0x1920] sm:$0xff]  ;;  %v6239_v18 = vpack.c.bf16 %v1761_v11, %v1751_v0  ;;  %v1810_v5 = vld [vmem:[#allocation8 + $0xf30] sm:$0xff]  ;;  %v2209_v11 = vld [vmem:[#allocation8 + $0x1ba8] sm:$0xff] }
 0x350   :  { %v5997_v26 = vpack.c.bf16 %v2138_v15, %v2128_v42  ;;  %v1820_v0 = vld [vmem:[#allocation8 + $0xf80] sm:$0xff] }
 0x351   :  { %5982 = vmatpush1.bf16.msra.mxu1 %v5981_v4  ;;  %v2159_v4 = vld [vmem:[#allocation8 + $0x1a18] sm:$0xff]  ;;  %v6253_v15 = vpack.c.bf16 %v1820_v0, %v1810_v5  ;;  %v2278_v0 = vld [vmem:[#allocation8 + $0x1dd0] sm:$0xff] }
 0x352   :  { %6226 = vmatpush1.bf16.msra.mxu0 %v6225_v21  ;;  %5984 = vmatprep.subr.bf16.mxu1 %v5983_v25  ;;  %v1771_v21 = vld [vmem:[#allocation8 + $0xdf8] sm:$0xff]  ;;  %v1781_v25 = vld [vmem:[#allocation8 + $0xe48] sm:$0xff]  ;;  %v5999_v28 = vpack.c.bf16 %v2159_v4, %v2149_v20  ;;  %v1830_v20 = vld [vmem:[#allocation8 + $0xfd0] sm:$0xff] }
 0x353   :  { %6228 = vmatprep.subr.bf16.mxu0 %v6227_v29  ;;  %v2148_v29 = vld [vmem:[#allocation8 + $0x19c0] sm:$0xff]  ;;  %v6243_v34 = vpack.c.bf16 %v1781_v25, %v1771_v21  ;;  %v2229_v25 = vld [vmem:[#allocation8 + $0x1c48] sm:$0xff] }
 0x354   :  { %v6001_v41 = vpack.c.bf16 %v2158_v31, %v2148_v29  ;;  %v1840_v21 = vld [vmem:[#allocation8 + $0x1020] sm:$0xff] }
 0x355   :  { %5986 = vmatpush1.bf16.msra.mxu1 %v5985_v39  ;;  %v2179_v39 = vld [vmem:[#allocation8 + $0x1ab8] sm:$0xff]  ;;  %v6257_v31 = vpack.c.bf16 %v1840_v21, %v1830_v20  ;;  %v2298_v21 = vld [vmem:[#allocation8 + $0x1e70] sm:$0xff] }
 0x356   :  { %6230 = vmatpush1.bf16.msra.mxu0 %v6229_v59  ;;  %5988 = vmatprep.subr.bf16.mxu1 %v5987_v40  ;;  %v1791_v59 = vld [vmem:[#allocation8 + $0xe98] sm:$0xff]  ;;  %v1801_v40 = vld [vmem:[#allocation8 + $0xee8] sm:$0xff]  ;;  %v6003_v54 = vpack.c.bf16 %v2179_v39, %v2169_v38  ;;  %v1850_v38 = vld [vmem:[#allocation8 + $0x1070] sm:$0xff] }
 0x357   :  { %6232 = vmatprep.subr.bf16.mxu0 %v6231_v48  ;;  %v2168_v48 = vld [vmem:[#allocation8 + $0x1a60] sm:$0xff]  ;;  %v6247_v30 = vpack.c.bf16 %v1801_v40, %v1791_v59  ;;  %v2249_v40 = vld [vmem:[#allocation8 + $0x1ce8] sm:$0xff] }
 0x358   :  { %v6005_v6 = vpack.c.bf16 %v2178_v49, %v2168_v48  ;;  %v1860_v59 = vld [vmem:[#allocation8 + $0x10c0] sm:$0xff] }
 0x359   :  { %5990 = vmatpush1.bf16.msra.mxu1 %v5989_v58  ;;  %v2199_v58 = vld [vmem:[#allocation8 + $0x1b58] sm:$0xff]  ;;  %v6261_v49 = vpack.c.bf16 %v1860_v59, %v1850_v38  ;;  %v2318_v59 = vld [vmem:[#allocation8 + $0x1f10] sm:$0xff] }
 0x35a   :  { %6234 = vmatpush1.bf16.msra.mxu0 %v6233_v62  ;;  %5992 = vmatprep.subr.bf16.mxu1 %v5991_v3  ;;  %v1811_v62 = vld [vmem:[#allocation8 + $0xf38] sm:$0xff]  ;;  %v1821_v3 = vld [vmem:[#allocation8 + $0xf88] sm:$0xff]  ;;  %v6007_v17 = vpack.c.bf16 %v2199_v58, %v2189_v57  ;;  %v1870_v57 = vld [vmem:[#allocation8 + $0x1110] sm:$0xff] }
 0x35b   :  { %6236 = vmatprep.subr.bf16.mxu0 %v6235_v8  ;;  %v2188_v8 = vld [vmem:[#allocation8 + $0x1b00] sm:$0xff]  ;;  %v6251_v9 = vpack.c.bf16 %v1821_v3, %v1811_v62  ;;  %v2269_v3 = vld [vmem:[#allocation8 + $0x1d88] sm:$0xff] }
 0x35c   :  { %v6009_v42 = vpack.c.bf16 %v2198_v10, %v2188_v8  ;;  %v1880_v62 = vld [vmem:[#allocation8 + $0x1160] sm:$0xff] }
 0x35d   :  { %5994 = vmatpush1.bf16.msra.mxu1 %v5993_v13  ;;  %v2219_v13 = vld [vmem:[#allocation8 + $0x1bf8] sm:$0xff]  ;;  %v6265_v10 = vpack.c.bf16 %v1880_v62, %v1870_v57  ;;  %v2338_v62 = vld [vmem:[#allocation8 + $0x1fb0] sm:$0xff] }
 0x35e   :  { %6238 = vmatpush1.bf16.msra.mxu0 %v6237_v51  ;;  %5996 = vmatprep.subr.bf16.mxu1 %v5995_v63  ;;  %v1831_v51 = vld [vmem:[#allocation8 + $0xfd8] sm:$0xff]  ;;  %v1841_v63 = vld [vmem:[#allocation8 + $0x1028] sm:$0xff]  ;;  %v6011_v16 = vpack.c.bf16 %v2219_v13, %v2209_v11  ;;  %v1890_v11 = vld [vmem:[#allocation8 + $0x11b0] sm:$0xff] }
 0x35f   :  { %6240 = vmatprep.subr.bf16.mxu0 %v6239_v18  ;;  %v2208_v18 = vld [vmem:[#allocation8 + $0x1ba0] sm:$0xff]  ;;  %v6255_v4 = vpack.c.bf16 %v1841_v63, %v1831_v51  ;;  %v2289_v63 = vld [vmem:[#allocation8 + $0x1e28] sm:$0xff] }
 0x360   :  { %v6013_v29 = vpack.c.bf16 %v2218_v19, %v2208_v18  ;;  %v1900_v51 = vld [vmem:[#allocation8 + $0x1200] sm:$0xff] }
 0x361   :  { %5998 = vmatpush1.bf16.msra.mxu1 %v5997_v26  ;;  %v2239_v26 = vld [vmem:[#allocation8 + $0x1c98] sm:$0xff]  ;;  %v6269_v19 = vpack.c.bf16 %v1900_v51, %v1890_v11  ;;  %v2358_v51 = vld [vmem:[#allocation8 + $0x2050] sm:$0xff] }
 0x362   :  { %6242 = vmatpush1.bf16.msra.mxu0 %v6241_v27  ;;  %6000 = vmatprep.subr.bf16.mxu1 %v5999_v28  ;;  %v1851_v27 = vld [vmem:[#allocation8 + $0x1078] sm:$0xff]  ;;  %v1861_v28 = vld [vmem:[#allocation8 + $0x10c8] sm:$0xff]  ;;  %v6015_v32 = vpack.c.bf16 %v2239_v26, %v2229_v25  ;;  %v1910_v25 = vld [vmem:[#allocation8 + $0x1250] sm:$0xff] }
 0x363   :  { %6244 = vmatprep.subr.bf16.mxu0 %v6243_v34  ;;  %v2228_v34 = vld [vmem:[#allocation8 + $0x1c40] sm:$0xff]  ;;  %v6259_v39 = vpack.c.bf16 %v1861_v28, %v1851_v27  ;;  %v2309_v28 = vld [vmem:[#allocation8 + $0x1ec8] sm:$0xff] }
 0x364   :  { %v6017_v48 = vpack.c.bf16 %v2238_v36, %v2228_v34  ;;  %v1920_v27 = vld [vmem:[#allocation8 + $0x12a0] sm:$0xff] }
 0x365   :  { %6002 = vmatpush1.bf16.msra.mxu1 %v6001_v41  ;;  %v2259_v41 = vld [vmem:[#allocation8 + $0x1d38] sm:$0xff]  ;;  %v6273_v36 = vpack.c.bf16 %v1920_v27, %v1910_v25  ;;  %v2368_v25 = vld [vmem:[#allocation8 + $0x20a0] sm:$0xff]  ;;  %v1990_v27 = vld [vmem:[#allocation8 + $0x14d0] sm:$0xff] }
 0x366   :  { %6246 = vmatpush1.bf16.msra.mxu0 %v6245_v44  ;;  %6004 = vmatprep.subr.bf16.mxu1 %v6003_v54  ;;  %v1871_v44 = vld [vmem:[#allocation8 + $0x1118] sm:$0xff]  ;;  %v1881_v54 = vld [vmem:[#allocation8 + $0x1168] sm:$0xff]  ;;  %v6019_v50 = vpack.c.bf16 %v2259_v41, %v2249_v40  ;;  %v1930_v40 = vld [vmem:[#allocation8 + $0x12f0] sm:$0xff] }
 0x367   :  { %6248 = vmatprep.subr.bf16.mxu0 %v6247_v30  ;;  %v2248_v30 = vld [vmem:[#allocation8 + $0x1ce0] sm:$0xff]  ;;  %v6263_v58 = vpack.c.bf16 %v1881_v54, %v1871_v44  ;;  %v2329_v54 = vld [vmem:[#allocation8 + $0x1f68] sm:$0xff] }
 0x368   :  { %v6021_v8 = vpack.c.bf16 %v2258_v56, %v2248_v30  ;;  %v1940_v44 = vld [vmem:[#allocation8 + $0x1340] sm:$0xff] }
 0x369   :  { %6006 = vmatpush1.bf16.msra.mxu1 %v6005_v6  ;;  %v2279_v6 = vld [vmem:[#allocation8 + $0x1dd8] sm:$0xff]  ;;  %v6277_v56 = vpack.c.bf16 %v1940_v44, %v1930_v40  ;;  %v2388_v44 = vld [vmem:[#allocation8 + $0x2140] sm:$0xff] }
 0x36a   :  { %6250 = vmatpush1.bf16.msra.mxu0 %v6249_v12  ;;  %6008 = vmatprep.subr.bf16.mxu1 %v6007_v17  ;;  %v1891_v12 = vld [vmem:[#allocation8 + $0x11b8] sm:$0xff]  ;;  %v1901_v17 = vld [vmem:[#allocation8 + $0x1208] sm:$0xff]  ;;  %v6023_v5 = vpack.c.bf16 %v2279_v6, %v2269_v3  ;;  %v1950_v3 = vld [vmem:[#allocation8 + $0x1390] sm:$0xff] }
 0x36b   :  { %6252 = vmatprep.subr.bf16.mxu0 %v6251_v9  ;;  %v2268_v9 = vld [vmem:[#allocation8 + $0x1d80] sm:$0xff]  ;;  %v6267_v13 = vpack.c.bf16 %v1901_v17, %v1891_v12  ;;  %v2349_v17 = vld [vmem:[#allocation8 + $0x2008] sm:$0xff] }
 0x36c   :  { %v6025_v18 = vpack.c.bf16 %v2278_v0, %v2268_v9  ;;  %v1960_v12 = vld [vmem:[#allocation8 + $0x13e0] sm:$0xff] }
 0x36d   :  { %6010 = vmatpush1.bf16.msra.mxu1 %v6009_v42  ;;  %v2299_v42 = vld [vmem:[#allocation8 + $0x1e78] sm:$0xff]  ;;  %v6281_v0 = vpack.c.bf16 %v1960_v12, %v1950_v3 }
 0x36e   :  { %6254 = vmatpush1.bf16.msra.mxu0 %v6253_v15  ;;  %6012 = vmatprep.subr.bf16.mxu1 %v6011_v16  ;;  %v1911_v15 = vld [vmem:[#allocation8 + $0x1258] sm:$0xff]  ;;  %v1921_v16 = vld [vmem:[#allocation8 + $0x12a8] sm:$0xff]  ;;  %v6027_v20 = vpack.c.bf16 %v2299_v42, %v2289_v63  ;;  %v1970_v42 = vld [vmem:[#allocation8 + $0x1430] sm:$0xff] }
 0x36f   :  { %6256 = vmatprep.subr.bf16.mxu0 %v6255_v4  ;;  %v2288_v4 = vld [vmem:[#allocation8 + $0x1e20] sm:$0xff]  ;;  %v6271_v26 = vpack.c.bf16 %v1921_v16, %v1911_v15  ;;  %v2369_v16 = vld [vmem:[#allocation8 + $0x20a8] sm:$0xff] }
 0x370   :  { %v6029_v34 = vpack.c.bf16 %v2298_v21, %v2288_v4  ;;  %v1980_v15 = vld [vmem:[#allocation8 + $0x1480] sm:$0xff] }
 0x371   :  { %6014 = vmatpush1.bf16.msra.mxu1 %v6013_v29  ;;  %v2319_v29 = vld [vmem:[#allocation8 + $0x1f18] sm:$0xff]  ;;  %v6285_v21 = vpack.c.bf16 %v1980_v15, %v1970_v42 }
 0x372   :  { %6258 = vmatpush1.bf16.msra.mxu0 %v6257_v31  ;;  %6016 = vmatprep.subr.bf16.mxu1 %v6015_v32  ;;  %v1931_v31 = vld [vmem:[#allocation8 + $0x12f8] sm:$0xff]  ;;  %v1941_v32 = vld [vmem:[#allocation8 + $0x1348] sm:$0xff]  ;;  %v6031_v38 = vpack.c.bf16 %v2319_v29, %v2309_v28 }
 0x373   :  { %6260 = vmatprep.subr.bf16.mxu0 %v6259_v39  ;;  %v2308_v39 = vld [vmem:[#allocation8 + $0x1ec0] sm:$0xff]  ;;  %v6275_v41 = vpack.c.bf16 %v1941_v32, %v1931_v31  ;;  %v2389_v32 = vld [vmem:[#allocation8 + $0x2148] sm:$0xff]  ;;  %v2051_v15 = vld [vmem:[#allocation8 + $0x16b8] sm:$0xff] }
 0x374   :  { %v6033_v30 = vpack.c.bf16 %v2318_v59, %v2308_v39  ;;  %v2000_v31 = vld [vmem:[#allocation8 + $0x1520] sm:$0xff] }
 0x375   :  { %6018 = vmatpush1.bf16.msra.mxu1 %v6017_v48  ;;  %v2339_v48 = vld [vmem:[#allocation8 + $0x1fb8] sm:$0xff]  ;;  %v7337_v59 = vld [vmem:[#allocation10] sm:$0xff]  ;;  %v6289_v40 = vpack.c.bf16 %v2000_v31, %v1990_v27 }
 0x376   :  { %6262 = vmatpush1.bf16.msra.mxu0 %v6261_v49  ;;  %6020 = vmatprep.subr.bf16.mxu1 %v6019_v50  ;;  %v1951_v49 = vld [vmem:[#allocation8 + $0x1398] sm:$0xff]  ;;  %v1961_v50 = vld [vmem:[#allocation8 + $0x13e8] sm:$0xff]  ;;  %v6035_v57 = vpack.c.bf16 %v2339_v48, %v2329_v54  ;;  %v2398_v54 = vld [vmem:[#allocation8 + $0x2190] sm:$0xff]  ;;  %v2935_v3 = vrot.slane %v7337_v59, %v7197_v46 }
 0x377   :  { %6264 = vmatprep.subr.bf16.mxu0 %v6263_v58  ;;  %v2328_v58 = vld [vmem:[#allocation8 + $0x1f60] sm:$0xff]  ;;  %v6279_v6 = vpack.c.bf16 %v1961_v50, %v1951_v49  ;;  %v2010_v48 = vld [vmem:[#allocation8 + $0x1570] sm:$0xff]  ;;  %v2459_v31 = vld [vmem:[#allocation8 + $0x2378] sm:$0xff] }
 0x378   :  { %v6037_v9 = vpack.c.bf16 %v2338_v62, %v2328_v58  ;;  %v2020_v50 = vld [vmem:[#allocation8 + $0x15c0] sm:$0xff]  ;;  %v2031_v58 = vld [vmem:[#allocation8 + $0x1618] sm:$0xff]  ;;  %v2041_v62 = vld [vmem:[#allocation8 + $0x1668] sm:$0xff] }
 0x379   :  { %6022 = vmatpush1.bf16.msra.mxu1 %v6021_v8  ;;  %v2359_v8 = vld [vmem:[#allocation8 + $0x2058] sm:$0xff]  ;;  %v6293_v12 = vpack.c.bf16 %v2020_v50, %v2010_v48  ;;  %v2080_v48 = vld [vmem:[#allocation8 + $0x17a0] sm:$0xff] }
 0x37a   :  { %6266 = vmatpush1.bf16.msra.mxu0 %v6265_v10  ;;  %6024 = vmatprep.subr.bf16.mxu1 %v6023_v5  ;;  %v1971_v10 = vld [vmem:[#allocation8 + $0x1438] sm:$0xff]  ;;  %v1981_v5 = vld [vmem:[#allocation8 + $0x1488] sm:$0xff]  ;;  %v6039_v11 = vpack.c.bf16 %v2359_v8, %v2349_v17  ;;  %v2408_v8 = vld [vmem:[#allocation8 + $0x21e0] sm:$0xff] }
 0x37b   :  { %6268 = vmatprep.subr.bf16.mxu0 %v6267_v13  ;;  %v2348_v13 = vld [vmem:[#allocation8 + $0x2000] sm:$0xff]  ;;  %v6283_v63 = vpack.c.bf16 %v1981_v5, %v1971_v10  ;;  %v2418_v10 = vld [vmem:[#allocation8 + $0x2230] sm:$0xff]  ;;  %v2479_v50 = vld [vmem:[#allocation8 + $0x2418] sm:$0xff] }
 0x37c   :  { %v6041_v4 = vpack.c.bf16 %v2358_v51, %v2348_v13  ;;  %v2030_v5 = vld [vmem:[#allocation8 + $0x1610] sm:$0xff]  ;;  %v2429_v13 = vld [vmem:[#allocation8 + $0x2288] sm:$0xff]  ;;  %v2439_v51 = vld [vmem:[#allocation8 + $0x22d8] sm:$0xff] }
 0x37d   :  { %6026 = vmatpush1.bf16.msra.mxu1 %v6025_v18  ;;  %v2379_v18 = vld [vmem:[#allocation8 + $0x20f8] sm:$0xff] }
 0x37e   :  { %6270 = vmatpush1.bf16.msra.mxu0 %v6269_v19  ;;  %6028 = vmatprep.subr.bf16.mxu1 %v6027_v20  ;;  %v1991_v19 = vld [vmem:[#allocation8 + $0x14d8] sm:$0xff]  ;;  %v2001_v20 = vld [vmem:[#allocation8 + $0x1528] sm:$0xff]  ;;  %v6043_v28 = vpack.c.bf16 %v2379_v18, %v2369_v16 }
 0x37f   :  { %6272 = vmatprep.subr.bf16.mxu0 %v6271_v26  ;;  %v2378_v26 = vld [vmem:[#allocation8 + $0x20f0] sm:$0xff]  ;;  %v6287_v29 = vpack.c.bf16 %v2001_v20, %v1991_v19  ;;  %v2061_v16 = vld [vmem:[#allocation8 + $0x1708] sm:$0xff]  ;;  %v6053_v19 = vpack.c.bf16 %v2418_v10, %v2408_v8  ;;  %v2100_v8 = vld [vmem:[#allocation8 + $0x1840] sm:$0xff] }
 0x380   :  { %3895 = vmatmul.mubr.f32.vlgmr.msra.gmra.mrb[6].mxu1 %v7275_v22  ;;  %v6045_v39 = vpack.c.bf16 %v2378_v26, %v2368_v25  ;;  %v2438_v25 = vld [vmem:[#allocation8 + $0x22d0] sm:$0xff]  ;;  %v6299_v27 = vpack.c.bf16 %v2061_v16, %v2051_v15  ;;  %v2489_v10 = vld [vmem:[#allocation8 + $0x2468] sm:$0xff] }
 0x381   :  { %6030 = vmatpush1.bf16.msra.mxu1 %v6029_v34  ;;  %3965 = vmatprep.mubr.f32.mxu1 %v7298_v55  ;;  %v2399_v34 = vld [vmem:[#allocation8 + $0x2198] sm:$0xff]  ;;  %v2050_v26 = vld [vmem:[#allocation8 + $0x16b0] sm:$0xff] }
 0x382   :  { %6274 = vmatpush1.bf16.msra.mxu0 %v6273_v36  ;;  %6032 = vmatprep.subr.bf16.mxu1 %v6031_v38  ;;  %v2011_v36 = vld [vmem:[#allocation8 + $0x1578] sm:$0xff]  ;;  %v2021_v38 = vld [vmem:[#allocation8 + $0x15c8] sm:$0xff]  ;;  %v2110_v15 = vld [vmem:[#allocation8 + $0x1890] sm:$0xff] }
 0x383   :  { %6276 = vmatprep.subr.bf16.mxu0 %v6275_v41  ;;  %v6047_v41 = vpack.c.bf16 %v2399_v34, %v2389_v32  ;;  %v6291_v49 = vpack.c.bf16 %v2021_v38, %v2011_v36  ;;  %v2071_v32 = vld [vmem:[#allocation8 + $0x1758] sm:$0xff]  ;;  %v2081_v34 = vld [vmem:[#allocation8 + $0x17a8] sm:$0xff] }
 0x385   :  { %6034 = vmatpush1.bf16.msra.mxu1 %v6033_v30  ;;  %v2409_v30 = vld [vmem:[#allocation8 + $0x21e8] sm:$0xff] }
 0x386   :  { %6278 = vmatpush1.bf16.msra.mxu0 %v6277_v56  ;;  %6036 = vmatprep.subr.bf16.mxu1 %v6035_v57  ;;  %v2419_v56 = vld [vmem:[#allocation8 + $0x2238] sm:$0xff]  ;;  %v2931_v57 = vrot.slane %v7337_v59, %v7192_v43 }
 0x387   :  { %6280 = vmatprep.subr.bf16.mxu0 %v6279_v6  ;;  %v6049_v6 = vpack.c.bf16 %v2398_v54, %v2388_v44  ;;  %v6051_v17 = vpack.c.bf16 %v2419_v56, %v2409_v30  ;;  %v2070_v44 = vld [vmem:[#allocation8 + $0x1750] sm:$0xff]  ;;  %v6303_v54 = vpack.c.bf16 %v2081_v34, %v2071_v32  ;;  %v2091_v30 = vld [vmem:[#allocation8 + $0x17f8] sm:$0xff]  ;;  %v2101_v56 = vld [vmem:[#allocation8 + $0x1848] sm:$0xff] }
 0x388   :  { %v2140_v34 = vld [vmem:[#allocation8 + $0x1980] sm:$0xff] }
 0x389   :  { %6038 = vmatpush1.bf16.msra.mxu1 %v6037_v9 }
 0x38a   :  { %6282 = vmatpush1.bf16.msra.mxu0 %v6281_v0  ;;  %6040 = vmatprep.subr.bf16.mxu1 %v6039_v11  ;;  %v6295_v0 = vpack.c.bf16 %v2041_v62, %v2031_v58  ;;  %v2040_v11 = vld [vmem:[#allocation8 + $0x1660] sm:$0xff]  ;;  %v6305_v58 = vpack.c.bf16 %v2080_v48, %v2070_v44 }
 0x38b   :  { %6284 = vmatprep.subr.bf16.mxu0 %v6283_v63  ;;  %v6297_v20 = vpack.c.bf16 %v2040_v11, %v2030_v5  ;;  %v2499_v5 = vld [vmem:[#allocation8 + $0x24b8] sm:$0xff]  ;;  %v2528_v48 = vld [vmem:[#allocation8 + $0x25a0] sm:$0xff] }
 0x38d   :  { %6042 = vmatpush1.bf16.msra.mxu1 %v6041_v4  ;;  %4179 = vmatmul.mubr.f32.vlgmr.msra.gmra.mrb[12].mxu0 %v7249_v2  ;;  %v6055_v4 = vpack.c.bf16 %v2439_v51, %v2429_v13  ;;  %v6067_v51 = vpack.c.bf16 %v2499_v5, %v2489_v10  ;;  %v2558_v10 = vld [vmem:[#allocation8 + $0x2690] sm:$0xff] }
 0x38e   :  { %6286 = vmatpush1.bf16.msra.mxu0 %v6285_v21  ;;  %4249 = vmatprep.mubr.f32.mxu0 %v7272_v24  ;;  %v2428_v21 = vld [vmem:[#allocation8 + $0x2280] sm:$0xff]  ;;  %v2170_v5 = vld [vmem:[#allocation8 + $0x1a70] sm:$0xff] }
 0x38f   :  { %6044 = vmatprep.subr.bf16.mxu1 %v6043_v28  ;;  %6288 = vmatprep.subr.bf16.mxu0 %v6287_v29  ;;  %v2060_v28 = vld [vmem:[#allocation8 + $0x1700] sm:$0xff]  ;;  %v2449_v29 = vld [vmem:[#allocation8 + $0x2328] sm:$0xff]  ;;  %v6057_v36 = vpack.c.bf16 %v2438_v25, %v2428_v21 }
 0x390   :  { %v6301_v38 = vpack.c.bf16 %v2060_v28, %v2050_v26  ;;  %v2141_v21 = vld [vmem:[#allocation8 + $0x1988] sm:$0xff]  ;;  %v2508_v28 = vld [vmem:[#allocation8 + $0x2500] sm:$0xff] }
 0x391   :  { %6046 = vmatpush1.bf16.msra.mxu1 %v6045_v39  ;;  %v6059_v39 = vpack.c.bf16 %v2459_v31, %v2449_v29  ;;  %v2518_v29 = vld [vmem:[#allocation8 + $0x2550] sm:$0xff] }
 0x392   :  { %6290 = vmatpush1.bf16.msra.mxu0 %v6289_v40  ;;  %6048 = vmatprep.subr.bf16.mxu1 %v6047_v41  ;;  %v2448_v40 = vld [vmem:[#allocation8 + $0x2320] sm:$0xff]  ;;  %v2458_v41 = vld [vmem:[#allocation8 + $0x2370] sm:$0xff] }
 0x393   :  { %v3328_v9 = vpop.f32.mrb[4].mxu1  ;;  %6292 = vmatprep.subr.bf16.mxu0 %v6291_v49  ;;  %v2469_v49 = vld [vmem:[#allocation8 + $0x23c8] sm:$0xff]  ;;  %v2130_v31 = vld [vmem:[#allocation8 + $0x1930] sm:$0xff] }
 0x394   :  { %v6809_v63 = vadd.f32 %v3328_v9, %v2931_v57  ;;  %v3330_v42 = vpop.f32.mrb[5].mxu1  ;;  %v6061_v57 = vpack.c.bf16 %v2458_v41, %v2448_v40  ;;  %v6063_v62 = vpack.c.bf16 %v2479_v50, %v2469_v49  ;;  %v2111_v9 = vld [vmem:[#allocation8 + $0x1898] sm:$0xff]  ;;  %v2161_v40 = vld [vmem:[#allocation8 + $0x1a28] sm:$0xff]  ;;  %v6073_v41 = vpack.c.bf16 %v2518_v29, %v2508_v28  ;;  %v2538_v49 = vld [vmem:[#allocation8 + $0x25f0] sm:$0xff] }
 0x395   :  { %v6810_v18 = vadd.f32 %v3330_v42, %v2935_v3  ;;  %6050 = vmatpush1.bf16.msra.mxu1 %v6049_v6  ;;  %v2468_v3 = vld [vmem:[#allocation8 + $0x23c0] sm:$0xff]  ;;  %v2478_v6 = vld [vmem:[#allocation8 + $0x2410] sm:$0xff]  ;;  %v6317_v44 = vpack.c.bf16 %v2140_v34, %v2130_v31  ;;  %v2221_v28 = vld [vmem:[#allocation8 + $0x1c08] sm:$0xff] }
 0x396   :  { %4753 = vst [vmem:[#allocation11] sm:$0xff] %v6809_v63  ;;  %6294 = vmatpush1.bf16.msra.mxu0 %v6293_v12  ;;  %6052 = vmatprep.subr.bf16.mxu1 %v6051_v17  ;;  %v2090_v12 = vld [vmem:[#allocation8 + $0x17f0] sm:$0xff]  ;;  %v6307_v17 = vpack.c.bf16 %v2101_v56, %v2091_v30  ;;  %v6065_v11 = vpack.c.bf16 %v2478_v6, %v2468_v3  ;;  %v2488_v63 = vld [vmem:[#allocation8 + $0x2460] sm:$0xff]  ;;  %v2181_v3 = vld [vmem:[#allocation8 + $0x1ac8] sm:$0xff] }
 0x397   :  { %4754 = vst [vmem:[#allocation11 + $0x8] sm:$0xff] %v6810_v18  ;;  %6296 = vmatprep.subr.bf16.mxu0 %v6295_v0  ;;  %v2121_v0 = vld [vmem:[#allocation8 + $0x18e8] sm:$0xff]  ;;  %v6309_v13 = vpack.c.bf16 %v2100_v8, %v2090_v12  ;;  %v2498_v42 = vld [vmem:[#allocation8 + $0x24b0] sm:$0xff]  ;;  %v2120_v18 = vld [vmem:[#allocation8 + $0x18e0] sm:$0xff]  ;;  %v6077_v6 = vpack.c.bf16 %v2538_v49, %v2528_v48 }
 0x398   :  { %v6311_v16 = vpack.c.bf16 %v2121_v0, %v2111_v9  ;;  %v6069_v25 = vpack.c.bf16 %v2498_v42, %v2488_v63  ;;  %v6313_v26 = vpack.c.bf16 %v2120_v18, %v2110_v15  ;;  %v2150_v50 = vld [vmem:[#allocation8 + $0x19d0] sm:$0xff]  ;;  %v2160_v56 = vld [vmem:[#allocation8 + $0x1a20] sm:$0xff]  ;;  %v2201_v63 = vld [vmem:[#allocation8 + $0x1b68] sm:$0xff] }
 0x399   :  { %6054 = vmatpush1.bf16.msra.mxu1 %v6053_v19  ;;  %v2509_v19 = vld [vmem:[#allocation8 + $0x2508] sm:$0xff]  ;;  %v6321_v12 = vpack.c.bf16 %v2160_v56, %v2150_v50  ;;  %v2548_v8 = vld [vmem:[#allocation8 + $0x2640] sm:$0xff] }
 0x39a   :  { %6298 = vmatpush1.bf16.msra.mxu0 %v6297_v20  ;;  %6056 = vmatprep.subr.bf16.mxu1 %v6055_v4  ;;  %v2519_v20 = vld [vmem:[#allocation8 + $0x2558] sm:$0xff]  ;;  %v2180_v0 = vld [vmem:[#allocation8 + $0x1ac0] sm:$0xff]  ;;  %v6081_v42 = vpack.c.bf16 %v2558_v10, %v2548_v8  ;;  %v2241_v48 = vld [vmem:[#allocation8 + $0x1ca8] sm:$0xff] }
 0x39b   :  { %6300 = vmatprep.subr.bf16.mxu0 %v6299_v27  ;;  %v2131_v4 = vld [vmem:[#allocation8 + $0x1938] sm:$0xff]  ;;  %v6071_v27 = vpack.c.bf16 %v2519_v20, %v2509_v19  ;;  %v6325_v15 = vpack.c.bf16 %v2180_v0, %v2170_v5  ;;  %v2568_v18 = vld [vmem:[#allocation8 + $0x26e0] sm:$0xff]  ;;  %v2578_v19 = vld [vmem:[#allocation8 + $0x2730] sm:$0xff] }
 0x39c   :  { %v6315_v32 = vpack.c.bf16 %v2141_v21, %v2131_v4  ;;  %v2190_v20 = vld [vmem:[#allocation8 + $0x1b10] sm:$0xff]  ;;  %v2200_v21 = vld [vmem:[#allocation8 + $0x1b60] sm:$0xff]  ;;  %v6085_v29 = vpack.c.bf16 %v2578_v19, %v2568_v18  ;;  %v2261_v8 = vld [vmem:[#allocation8 + $0x1d48] sm:$0xff] }
 0x39d   :  { %6058 = vmatpush1.bf16.msra.mxu1 %v6057_v36  ;;  %v2529_v36 = vld [vmem:[#allocation8 + $0x25a8] sm:$0xff]  ;;  %v6329_v31 = vpack.c.bf16 %v2200_v21, %v2190_v20  ;;  %v2588_v34 = vld [vmem:[#allocation8 + $0x2780] sm:$0xff] }
 0x39e   :  { %6302 = vmatpush1.bf16.msra.mxu0 %v6301_v38  ;;  %6060 = vmatprep.subr.bf16.mxu1 %v6059_v39  ;;  %v2539_v38 = vld [vmem:[#allocation8 + $0x25f8] sm:$0xff]  ;;  %v2608_v56 = vld [vmem:[#allocation8 + $0x2820] sm:$0xff]  ;;  %v2281_v18 = vld [vmem:[#allocation8 + $0x1de8] sm:$0xff] }
 0x39f   :  { %6304 = vmatprep.subr.bf16.mxu0 %v6303_v54  ;;  %v2151_v39 = vld [vmem:[#allocation8 + $0x19d8] sm:$0xff]  ;;  %v6075_v54 = vpack.c.bf16 %v2539_v38, %v2529_v36  ;;  %v2598_v36 = vld [vmem:[#allocation8 + $0x27d0] sm:$0xff]  ;;  %v2628_v0 = vld [vmem:[#allocation8 + $0x28c0] sm:$0xff] }
 0x3a0   :  { %v6319_v30 = vpack.c.bf16 %v2161_v40, %v2151_v39  ;;  %v2210_v38 = vld [vmem:[#allocation8 + $0x1bb0] sm:$0xff]  ;;  %v2220_v40 = vld [vmem:[#allocation8 + $0x1c00] sm:$0xff]  ;;  %v6089_v49 = vpack.c.bf16 %v2598_v36, %v2588_v34  ;;  %v2301_v34 = vld [vmem:[#allocation8 + $0x1e88] sm:$0xff] }
 0x3a1   :  { %6062 = vmatpush1.bf16.msra.mxu1 %v6061_v57  ;;  %v2549_v57 = vld [vmem:[#allocation8 + $0x2648] sm:$0xff]  ;;  %v6333_v50 = vpack.c.bf16 %v2220_v40, %v2210_v38  ;;  %v2648_v21 = vld [vmem:[#allocation8 + $0x2960] sm:$0xff] }
 0x3a2   :  { %6306 = vmatpush1.bf16.msra.mxu0 %v6305_v58  ;;  %6064 = vmatprep.subr.bf16.mxu1 %v6063_v62  ;;  %v2559_v58 = vld [vmem:[#allocation8 + $0x2698] sm:$0xff]  ;;  %v2668_v40 = vld [vmem:[#allocation8 + $0x2a00] sm:$0xff] }
 0x3a3   :  { %6308 = vmatprep.subr.bf16.mxu0 %v6307_v17  ;;  %v2171_v62 = vld [vmem:[#allocation8 + $0x1a78] sm:$0xff]  ;;  %v6079_v17 = vpack.c.bf16 %v2559_v58, %v2549_v57  ;;  %v2618_v57 = vld [vmem:[#allocation8 + $0x2870] sm:$0xff] }
 0x3a4   :  { %v6323_v9 = vpack.c.bf16 %v2181_v3, %v2171_v62  ;;  %v2230_v58 = vld [vmem:[#allocation8 + $0x1c50] sm:$0xff]  ;;  %v2240_v3 = vld [vmem:[#allocation8 + $0x1ca0] sm:$0xff]  ;;  %v6093_v10 = vpack.c.bf16 %v2618_v57, %v2608_v56  ;;  %v2321_v56 = vld [vmem:[#allocation8 + $0x1f28] sm:$0xff] }
 0x3a5   :  { %6066 = vmatpush1.bf16.msra.mxu1 %v6065_v11  ;;  %v2569_v11 = vld [vmem:[#allocation8 + $0x26e8] sm:$0xff]  ;;  %v6337_v5 = vpack.c.bf16 %v2240_v3, %v2230_v58  ;;  %v2698_v3 = vld [vmem:[#allocation8 + $0x2af0] sm:$0xff] }
 0x3a6   :  { %6310 = vmatpush1.bf16.msra.mxu0 %v6309_v13  ;;  %6068 = vmatprep.subr.bf16.mxu1 %v6067_v51  ;;  %v2579_v13 = vld [vmem:[#allocation8 + $0x2738] sm:$0xff] }
 0x3a7   :  { %6312 = vmatprep.subr.bf16.mxu0 %v6311_v16  ;;  %v2191_v51 = vld [vmem:[#allocation8 + $0x1b18] sm:$0xff]  ;;  %v6083_v16 = vpack.c.bf16 %v2579_v13, %v2569_v11  ;;  %v2638_v11 = vld [vmem:[#allocation8 + $0x2910] sm:$0xff] }
 0x3a8   :  { %v6327_v4 = vpack.c.bf16 %v2201_v63, %v2191_v51  ;;  %v2250_v13 = vld [vmem:[#allocation8 + $0x1cf0] sm:$0xff]  ;;  %v2260_v63 = vld [vmem:[#allocation8 + $0x1d40] sm:$0xff]  ;;  %v6097_v19 = vpack.c.bf16 %v2638_v11, %v2628_v0  ;;  %v2341_v0 = vld [vmem:[#allocation8 + $0x1fc8] sm:$0xff] }
 0x3a9   :  { %6070 = vmatpush1.bf16.msra.mxu1 %v6069_v25  ;;  %v2589_v25 = vld [vmem:[#allocation8 + $0x2788] sm:$0xff]  ;;  %v6341_v20 = vpack.c.bf16 %v2260_v63, %v2250_v13  ;;  %v2708_v63 = vld [vmem:[#allocation8 + $0x2b40] sm:$0xff] }
 0x3aa   :  { %6314 = vmatpush1.bf16.msra.mxu0 %v6313_v26  ;;  %6072 = vmatprep.subr.bf16.mxu1 %v6071_v27  ;;  %v2599_v26 = vld [vmem:[#allocation8 + $0x27d8] sm:$0xff] }
 0x3ab   :  { %6316 = vmatprep.subr.bf16.mxu0 %v6315_v32  ;;  %v2211_v27 = vld [vmem:[#allocation8 + $0x1bb8] sm:$0xff]  ;;  %v6087_v32 = vpack.c.bf16 %v2599_v26, %v2589_v25  ;;  %v2658_v25 = vld [vmem:[#allocation8 + $0x29b0] sm:$0xff] }
 0x3ac   :  { %v6331_v39 = vpack.c.bf16 %v2221_v28, %v2211_v27  ;;  %v2270_v26 = vld [vmem:[#allocation8 + $0x1d90] sm:$0xff]  ;;  %v2280_v28 = vld [vmem:[#allocation8 + $0x1de0] sm:$0xff]  ;;  %v6101_v36 = vpack.c.bf16 %v2658_v25, %v2648_v21  ;;  %v2361_v21 = vld [vmem:[#allocation8 + $0x2068] sm:$0xff] }
 0x3ad   :  { %6074 = vmatpush1.bf16.msra.mxu1 %v6073_v41  ;;  %v2609_v41 = vld [vmem:[#allocation8 + $0x2828] sm:$0xff]  ;;  %v6345_v38 = vpack.c.bf16 %v2280_v28, %v2270_v26  ;;  %v2728_v28 = vld [vmem:[#allocation8 + $0x2be0] sm:$0xff] }
 0x3ae   :  { %6318 = vmatpush1.bf16.msra.mxu0 %v6317_v44  ;;  %6076 = vmatprep.subr.bf16.mxu1 %v6075_v54  ;;  %v2619_v44 = vld [vmem:[#allocation8 + $0x2878] sm:$0xff] }
 0x3af   :  { %6320 = vmatprep.subr.bf16.mxu0 %v6319_v30  ;;  %v2231_v54 = vld [vmem:[#allocation8 + $0x1c58] sm:$0xff]  ;;  %v6091_v30 = vpack.c.bf16 %v2619_v44, %v2609_v41  ;;  %v2678_v41 = vld [vmem:[#allocation8 + $0x2a50] sm:$0xff] }
 0x3b0   :  { %v6335_v62 = vpack.c.bf16 %v2241_v48, %v2231_v54  ;;  %v2290_v54 = vld [vmem:[#allocation8 + $0x1e30] sm:$0xff]  ;;  %v2300_v48 = vld [vmem:[#allocation8 + $0x1e80] sm:$0xff]  ;;  %v6105_v57 = vpack.c.bf16 %v2678_v41, %v2668_v40  ;;  %v2381_v40 = vld [vmem:[#allocation8 + $0x2108] sm:$0xff] }
 0x3b1   :  { %6078 = vmatpush1.bf16.msra.mxu1 %v6077_v6  ;;  %v2629_v6 = vld [vmem:[#allocation8 + $0x28c8] sm:$0xff]  ;;  %v6349_v58 = vpack.c.bf16 %v2300_v48, %v2290_v54  ;;  %v2748_v48 = vld [vmem:[#allocation8 + $0x2c80] sm:$0xff] }
 0x3b2   :  { %6322 = vmatpush1.bf16.msra.mxu0 %v6321_v12  ;;  %6080 = vmatprep.subr.bf16.mxu1 %v6079_v17  ;;  %v2639_v12 = vld [vmem:[#allocation8 + $0x2918] sm:$0xff] }
 0x3b3   :  { %6324 = vmatprep.subr.bf16.mxu0 %v6323_v9  ;;  %v2251_v17 = vld [vmem:[#allocation8 + $0x1cf8] sm:$0xff]  ;;  %v6095_v9 = vpack.c.bf16 %v2639_v12, %v2629_v6  ;;  %v2310_v6 = vld [vmem:[#allocation8 + $0x1ed0] sm:$0xff] }
 0x3b4   :  { %v6339_v51 = vpack.c.bf16 %v2261_v8, %v2251_v17  ;;  %v2320_v8 = vld [vmem:[#allocation8 + $0x1f20] sm:$0xff] }
 0x3b5   :  { %6082 = vmatpush1.bf16.msra.mxu1 %v6081_v42  ;;  %v2649_v42 = vld [vmem:[#allocation8 + $0x2968] sm:$0xff]  ;;  %v6353_v13 = vpack.c.bf16 %v2320_v8, %v2310_v6  ;;  %v2768_v8 = vld [vmem:[#allocation8 + $0x2d20] sm:$0xff] }
 0x3b6   :  { %6326 = vmatpush1.bf16.msra.mxu0 %v6325_v15  ;;  %6084 = vmatprep.subr.bf16.mxu1 %v6083_v16  ;;  %v2659_v15 = vld [vmem:[#allocation8 + $0x29b8] sm:$0xff] }
 0x3b7   :  { %6328 = vmatprep.subr.bf16.mxu0 %v6327_v4  ;;  %v2271_v16 = vld [vmem:[#allocation8 + $0x1d98] sm:$0xff]  ;;  %v6099_v4 = vpack.c.bf16 %v2659_v15, %v2649_v42  ;;  %v2718_v42 = vld [vmem:[#allocation8 + $0x2b90] sm:$0xff] }
 0x3b8   :  { %v6343_v27 = vpack.c.bf16 %v2281_v18, %v2271_v16  ;;  %v2330_v15 = vld [vmem:[#allocation8 + $0x1f70] sm:$0xff]  ;;  %v2340_v18 = vld [vmem:[#allocation8 + $0x1fc0] sm:$0xff]  ;;  %v6113_v25 = vpack.c.bf16 %v2718_v42, %v2708_v63  ;;  %v2421_v63 = vld [vmem:[#allocation8 + $0x2248] sm:$0xff]  ;;  %v2939_v42 = vrot.slane %v7337_v59, %v500_v33 }
 0x3b9   :  { %6086 = vmatpush1.bf16.msra.mxu1 %v6085_v29  ;;  %v2669_v29 = vld [vmem:[#allocation8 + $0x2a08] sm:$0xff]  ;;  %v6357_v26 = vpack.c.bf16 %v2340_v18, %v2330_v15 }
 0x3ba   :  { %6330 = vmatpush1.bf16.msra.mxu0 %v6329_v31  ;;  %6088 = vmatprep.subr.bf16.mxu1 %v6087_v32  ;;  %v2679_v31 = vld [vmem:[#allocation8 + $0x2a58] sm:$0xff]  ;;  %v2441_v33 = vld [vmem:[#allocation8 + $0x22e8] sm:$0xff] }
 0x3bb   :  { %6332 = vmatprep.subr.bf16.mxu0 %v6331_v39  ;;  %v2291_v32 = vld [vmem:[#allocation8 + $0x1e38] sm:$0xff]  ;;  %v6103_v39 = vpack.c.bf16 %v2679_v31, %v2669_v29  ;;  %v2738_v29 = vld [vmem:[#allocation8 + $0x2c30] sm:$0xff] }
 0x3bc   :  { %v6347_v44 = vpack.c.bf16 %v2301_v34, %v2291_v32  ;;  %v2350_v31 = vld [vmem:[#allocation8 + $0x2010] sm:$0xff]  ;;  %v2360_v34 = vld [vmem:[#allocation8 + $0x2060] sm:$0xff]  ;;  %v6117_v41 = vpack.c.bf16 %v2738_v29, %v2728_v28  ;;  %v2819_v28 = vld [vmem:[#allocation8 + $0x2eb8] sm:$0xff] }
 0x3bd   :  { %6090 = vmatpush1.bf16.msra.mxu1 %v6089_v49  ;;  %v2689_v49 = vld [vmem:[#allocation8 + $0x2aa8] sm:$0xff] }
 0x3be   :  { %6334 = vmatpush1.bf16.msra.mxu0 %v6333_v50  ;;  %6092 = vmatprep.subr.bf16.mxu1 %v6091_v30  ;;  %v2699_v50 = vld [vmem:[#allocation8 + $0x2af8] sm:$0xff] }
 0x3bf   :  { %6336 = vmatprep.subr.bf16.mxu0 %v6335_v62  ;;  %v2311_v30 = vld [vmem:[#allocation8 + $0x1ed8] sm:$0xff]  ;;  %v2688_v62 = vld [vmem:[#allocation8 + $0x2aa0] sm:$0xff]  ;;  %v6107_v12 = vpack.c.bf16 %v2699_v50, %v2689_v49  ;;  %v2758_v49 = vld [vmem:[#allocation8 + $0x2cd0] sm:$0xff] }
 0x3c0   :  { %3966 = vmatmul.mubr.f32.vlgmr.msra.gmra.mrb[6].mxu1 %v7301_v52  ;;  %v6351_v17 = vpack.c.bf16 %v2321_v56, %v2311_v30  ;;  %v6109_v11 = vpack.c.bf16 %v2698_v3, %v2688_v62  ;;  %v2370_v50 = vld [vmem:[#allocation8 + $0x20b0] sm:$0xff]  ;;  %v2380_v56 = vld [vmem:[#allocation8 + $0x2100] sm:$0xff]  ;;  %v2391_v62 = vld [vmem:[#allocation8 + $0x2158] sm:$0xff]  ;;  %v6121_v6 = vpack.c.bf16 %v2758_v49, %v2748_v48 }
 0x3c1   :  { %6094 = vmatpush1.bf16.msra.mxu1 %v6093_v10  ;;  %4036 = vmatprep.mubr.f32.mxu1 %v7316_v47  ;;  %v2709_v10 = vld [vmem:[#allocation8 + $0x2b48] sm:$0xff]  ;;  %v2839_v49 = vld [vmem:[#allocation8 + $0x2f58] sm:$0xff] }
 0x3c2   :  { %6338 = vmatpush1.bf16.msra.mxu0 %v6337_v5  ;;  %6096 = vmatprep.subr.bf16.mxu1 %v6095_v9  ;;  %v2719_v5 = vld [vmem:[#allocation8 + $0x2b98] sm:$0xff]  ;;  %v2401_v3 = vld [vmem:[#allocation8 + $0x21a8] sm:$0xff] }
 0x3c3   :  { %6340 = vmatprep.subr.bf16.mxu0 %v6339_v51  ;;  %v2331_v9 = vld [vmem:[#allocation8 + $0x1f78] sm:$0xff]  ;;  %v6111_v51 = vpack.c.bf16 %v2719_v5, %v2709_v10  ;;  %v2778_v10 = vld [vmem:[#allocation8 + $0x2d70] sm:$0xff]  ;;  %v2829_v48 = vld [vmem:[#allocation8 + $0x2f08] sm:$0xff] }
 0x3c4   :  { %v6355_v16 = vpack.c.bf16 %v2341_v0, %v2331_v9  ;;  %v2390_v5 = vld [vmem:[#allocation8 + $0x2150] sm:$0xff]  ;;  %v6367_v9 = vpack.c.bf16 %v2401_v3, %v2391_v62  ;;  %v2400_v0 = vld [vmem:[#allocation8 + $0x21a0] sm:$0xff]  ;;  %v6125_v15 = vpack.c.bf16 %v2778_v10, %v2768_v8  ;;  %v2849_v8 = vld [vmem:[#allocation8 + $0x2fa8] sm:$0xff] }
 0x3c5   :  { %6098 = vmatpush1.bf16.msra.mxu1 %v6097_v19  ;;  %v2729_v19 = vld [vmem:[#allocation8 + $0x2be8] sm:$0xff]  ;;  %v6369_v18 = vpack.c.bf16 %v2400_v0, %v2390_v5  ;;  %v2828_v62 = vld [vmem:[#allocation8 + $0x2f00] sm:$0xff]  ;;  %v2838_v3 = vld [vmem:[#allocation8 + $0x2f50] sm:$0xff] }
 0x3c6   :  { %6342 = vmatpush1.bf16.msra.mxu0 %v6341_v20  ;;  %6100 = vmatprep.subr.bf16.mxu1 %v6099_v4  ;;  %v2739_v20 = vld [vmem:[#allocation8 + $0x2c38] sm:$0xff]  ;;  %v6137_v0 = vpack.c.bf16 %v2838_v3, %v2828_v62  ;;  %v2908_v3 = vld [vmem:[#allocation8 + $0x3180] sm:$0xff] }
 0x3c7   :  { %6344 = vmatprep.subr.bf16.mxu0 %v6343_v27  ;;  %v2351_v4 = vld [vmem:[#allocation8 + $0x2018] sm:$0xff]  ;;  %v6115_v27 = vpack.c.bf16 %v2739_v20, %v2729_v19  ;;  %v2788_v20 = vld [vmem:[#allocation8 + $0x2dc0] sm:$0xff] }
 0x3c8   :  { %v6359_v32 = vpack.c.bf16 %v2361_v21, %v2351_v4  ;;  %v2798_v4 = vld [vmem:[#allocation8 + $0x2e10] sm:$0xff]  ;;  %v2859_v10 = vld [vmem:[#allocation8 + $0x2ff8] sm:$0xff] }
 0x3c9   :  { %6102 = vmatpush1.bf16.msra.mxu1 %v6101_v36  ;;  %v2749_v36 = vld [vmem:[#allocation8 + $0x2c88] sm:$0xff]  ;;  %v2410_v21 = vld [vmem:[#allocation8 + $0x21f0] sm:$0xff]  ;;  %v2471_v5 = vld [vmem:[#allocation8 + $0x23d8] sm:$0xff] }
 0x3ca   :  { %6346 = vmatpush1.bf16.msra.mxu0 %v6345_v38  ;;  %6104 = vmatprep.subr.bf16.mxu1 %v6103_v39  ;;  %v2759_v38 = vld [vmem:[#allocation8 + $0x2cd8] sm:$0xff] }
 0x3cb   :  { %6348 = vmatprep.subr.bf16.mxu0 %v6347_v44  ;;  %v2371_v39 = vld [vmem:[#allocation8 + $0x20b8] sm:$0xff]  ;;  %v6361_v44 = vpack.c.bf16 %v2360_v34, %v2350_v31  ;;  %v6119_v54 = vpack.c.bf16 %v2759_v38, %v2749_v36  ;;  %v6129_v36 = vpack.c.bf16 %v2798_v4, %v2788_v20  ;;  %v2501_v4 = vld [vmem:[#allocation8 + $0x24c8] sm:$0xff] }
 0x3cc   :  { %v6363_v30 = vpack.c.bf16 %v2381_v40, %v2371_v39  ;;  %v2431_v31 = vld [vmem:[#allocation8 + $0x2298] sm:$0xff]  ;;  %v2808_v39 = vld [vmem:[#allocation8 + $0x2e60] sm:$0xff]  ;;  %v2818_v40 = vld [vmem:[#allocation8 + $0x2eb0] sm:$0xff] }
 0x3cd   :  { %6106 = vmatpush1.bf16.msra.mxu1 %v6105_v57  ;;  %4250 = vmatmul.mubr.f32.vlgmr.msra.gmra.mrb[12].mxu0 %v7275_v22  ;;  %v2769_v57 = vld [vmem:[#allocation8 + $0x2d28] sm:$0xff]  ;;  %v2491_v20 = vld [vmem:[#allocation8 + $0x2478] sm:$0xff] }
 0x3ce   :  { %6350 = vmatpush1.bf16.msra.mxu0 %v6349_v58  ;;  %4320 = vmatprep.mubr.f32.mxu0 %v7298_v55  ;;  %v2779_v58 = vld [vmem:[#allocation8 + $0x2d78] sm:$0xff] }
 0x3cf   :  { %6108 = vmatprep.subr.bf16.mxu1 %v6107_v12  ;;  %6352 = vmatprep.subr.bf16.mxu0 %v6351_v17  ;;  %v6365_v12 = vpack.c.bf16 %v2380_v56, %v2370_v50  ;;  %v6123_v17 = vpack.c.bf16 %v2779_v58, %v2769_v57  ;;  %v2451_v50 = vld [vmem:[#allocation8 + $0x2338] sm:$0xff]  ;;  %v6133_v56 = vpack.c.bf16 %v2818_v40, %v2808_v39  ;;  %v2888_v40 = vld [vmem:[#allocation8 + $0x30e0] sm:$0xff] }
 0x3d0   :  { %v6135_v58 = vpack.c.bf16 %v2839_v49, %v2829_v48  ;;  %v2520_v48 = vld [vmem:[#allocation8 + $0x2560] sm:$0xff]  ;;  %v2909_v49 = vld [vmem:[#allocation8 + $0x3188] sm:$0xff] }
 0x3d1   :  { %6110 = vmatpush1.bf16.msra.mxu1 %v6109_v11  ;;  %v2789_v11 = vld [vmem:[#allocation8 + $0x2dc8] sm:$0xff] }
 0x3d2   :  { %6354 = vmatpush1.bf16.msra.mxu0 %v6353_v13  ;;  %6112 = vmatprep.subr.bf16.mxu1 %v6111_v51  ;;  %v2799_v13 = vld [vmem:[#allocation8 + $0x2e18] sm:$0xff] }
 0x3d3   :  { %6356 = vmatprep.subr.bf16.mxu0 %v6355_v16  ;;  %v2411_v51 = vld [vmem:[#allocation8 + $0x21f8] sm:$0xff]  ;;  %v2943_v16 = vrot.slane %v7337_v59, %v504_v37  ;;  %v6127_v19 = vpack.c.bf16 %v2799_v13, %v2789_v11  ;;  %v6139_v13 = vpack.c.bf16 %v2859_v10, %v2849_v8  ;;  %v2540_v8 = vld [vmem:[#allocation8 + $0x2600] sm:$0xff]  ;;  %v1333_v10 = vld [vmem:[#allocation8 + $0x48] sm:$0xff] }
 0x3d5   :  { %6114 = vmatpush1.bf16.msra.mxu1 %v6113_v25  ;;  %v6371_v25 = vpack.c.bf16 %v2421_v63, %v2411_v51  ;;  %v2848_v51 = vld [vmem:[#allocation8 + $0x2fa0] sm:$0xff]  ;;  %v2858_v63 = vld [vmem:[#allocation8 + $0x2ff0] sm:$0xff] }
 0x3d6   :  { %6358 = vmatpush1.bf16.msra.mxu0 %v6357_v26  ;;  %6116 = vmatprep.subr.bf16.mxu1 %v6115_v27  ;;  %v2420_v26 = vld [vmem:[#allocation8 + $0x2240] sm:$0xff]  ;;  %v2809_v27 = vld [vmem:[#allocation8 + $0x2e68] sm:$0xff] }
 0x3d7   :  { %6360 = vmatprep.subr.bf16.mxu0 %v6359_v32  ;;  %v6373_v37 = vpack.c.bf16 %v2420_v26, %v2410_v21  ;;  %v6131_v59 = vpack.c.bf16 %v2819_v28, %v2809_v27  ;;  %v6141_v21 = vpack.c.bf16 %v2858_v63, %v2848_v51  ;;  %v2868_v27 = vld [vmem:[#allocation8 + $0x3040] sm:$0xff]  ;;  %v2878_v28 = vld [vmem:[#allocation8 + $0x3090] sm:$0xff] }
 0x3d8   :  { %v1332_v63 = vld [vmem:[#allocation8 + $0x40] sm:$0xff] }
 0x3d9   :  { %6118 = vmatpush1.bf16.msra.mxu1 %v6117_v41  ;;  %v2430_v41 = vld [vmem:[#allocation8 + $0x2290] sm:$0xff] }
 0x3da   :  { %6362 = vmatpush1.bf16.msra.mxu0 %v6361_v44  ;;  %6120 = vmatprep.subr.bf16.mxu1 %v6119_v54  ;;  %v6375_v44 = vpack.c.bf16 %v2441_v33, %v2431_v31  ;;  %v2440_v54 = vld [vmem:[#allocation8 + $0x22e0] sm:$0xff]  ;;  %v6387_v31 = vpack.c.bf16 %v2501_v4, %v2491_v20  ;;  %v1363_v20 = vld [vmem:[#allocation8 + $0x138] sm:$0xff] }
 0x3db   :  { %6364 = vmatprep.subr.bf16.mxu0 %v6363_v30  ;;  %v2461_v30 = vld [vmem:[#allocation8 + $0x2388] sm:$0xff]  ;;  %v6377_v57 = vpack.c.bf16 %v2440_v54, %v2430_v41  ;;  %v2500_v33 = vld [vmem:[#allocation8 + $0x24c0] sm:$0xff]  ;;  %v2898_v41 = vld [vmem:[#allocation8 + $0x3130] sm:$0xff] }
 0x3dc   :  { %v2571_v4 = vld [vmem:[#allocation8 + $0x26f8] sm:$0xff] }
 0x3dd   :  { %6122 = vmatpush1.bf16.msra.mxu1 %v6121_v6  ;;  %v2450_v6 = vld [vmem:[#allocation8 + $0x2330] sm:$0xff] }
 0x3de   :  { %6366 = vmatpush1.bf16.msra.mxu0 %v6365_v12  ;;  %6124 = vmatprep.subr.bf16.mxu1 %v6123_v17  ;;  %v6379_v12 = vpack.c.bf16 %v2461_v30, %v2451_v50  ;;  %v2460_v17 = vld [vmem:[#allocation8 + $0x2380] sm:$0xff]  ;;  %v2919_v50 = vld [vmem:[#allocation8 + $0x31d8] sm:$0xff] }
 0x3df   :  { %6368 = vmatprep.subr.bf16.mxu0 %v6367_v9  ;;  %v2481_v9 = vld [vmem:[#allocation8 + $0x2428] sm:$0xff]  ;;  %v6381_v11 = vpack.c.bf16 %v2460_v17, %v2450_v6  ;;  %v2531_v30 = vld [vmem:[#allocation8 + $0x25b8] sm:$0xff]  ;;  %v6151_v62 = vpack.c.bf16 %v2919_v50, %v2909_v49  ;;  %v2918_v6 = vld [vmem:[#allocation8 + $0x31d0] sm:$0xff] }
 0x3e0   :  { %v3683_v29 = vpop.f32.mrb[10].mxu0  ;;  %v2600_v49 = vld [vmem:[#allocation8 + $0x27e0] sm:$0xff]  ;;  %v1393_v50 = vld [vmem:[#allocation8 + $0x228] sm:$0xff] }
 0x3e1   :  { %v6811_v32 = vadd.f32 %v3683_v29, %v2939_v42  ;;  %v3685_v34 = vpop.f32.mrb[11].mxu0  ;;  %6126 = vmatpush1.bf16.msra.mxu1 %v6125_v15  ;;  %v2470_v42 = vld [vmem:[#allocation8 + $0x23d0] sm:$0xff]  ;;  %v6383_v15 = vpack.c.bf16 %v2481_v9, %v2471_v5  ;;  %v1343_v5 = vld [vmem:[#allocation8 + $0x98] sm:$0xff] }
 0x3e2   :  { %v6812_v38 = vadd.f32 %v3685_v34, %v2943_v16  ;;  %6370 = vmatpush1.bf16.msra.mxu0 %v6369_v18  ;;  %6128 = vmatprep.subr.bf16.mxu1 %v6127_v19  ;;  %v2480_v16 = vld [vmem:[#allocation8 + $0x2420] sm:$0xff]  ;;  %v2869_v18 = vld [vmem:[#allocation8 + $0x3048] sm:$0xff]  ;;  %v2879_v19 = vld [vmem:[#allocation8 + $0x3098] sm:$0xff]  ;;  %v6475_v51 = vpack.c.bf16 %v1343_v5, %v1333_v10 }
 0x3e3   :  { %4755 = vst [vmem:[#allocation11 + $0x10] sm:$0xff] %v6811_v32  ;;  %6372 = vmatprep.subr.bf16.mxu0 %v6371_v25  ;;  %v6385_v25 = vpack.c.bf16 %v2480_v16, %v2470_v42  ;;  %v6143_v26 = vpack.c.bf16 %v2879_v19, %v2869_v18  ;;  %v2490_v29 = vld [vmem:[#allocation8 + $0x2470] sm:$0xff]  ;;  %v2889_v32 = vld [vmem:[#allocation8 + $0x30e8] sm:$0xff]  ;;  %v2899_v34 = vld [vmem:[#allocation8 + $0x3138] sm:$0xff] }
 0x3e4   :  { %4756 = vst [vmem:[#allocation11 + $0x18] sm:$0xff] %v6812_v38  ;;  %v2521_v38 = vld [vmem:[#allocation8 + $0x2568] sm:$0xff]  ;;  %v6147_v39 = vpack.c.bf16 %v2899_v34, %v2889_v32  ;;  %v2551_v9 = vld [vmem:[#allocation8 + $0x2658] sm:$0xff]  ;;  %v1342_v42 = vld [vmem:[#allocation8 + $0x90] sm:$0xff] }
 0x3e5   :  { %6130 = vmatpush1.bf16.msra.mxu1 %v6129_v36  ;;  %v2511_v36 = vld [vmem:[#allocation8 + $0x2518] sm:$0xff]  ;;  %v2560_v18 = vld [vmem:[#allocation8 + $0x26a0] sm:$0xff]  ;;  %v1353_v19 = vld [vmem:[#allocation8 + $0xe8] sm:$0xff] }
 0x3e6   :  { %6374 = vmatpush1.bf16.msra.mxu0 %v6373_v37  ;;  %6132 = vmatprep.subr.bf16.mxu1 %v6131_v59  ;;  %v6145_v37 = vpack.c.bf16 %v2878_v28, %v2868_v27  ;;  %v6389_v59 = vpack.c.bf16 %v2500_v33, %v2490_v29  ;;  %v6391_v54 = vpack.c.bf16 %v2521_v38, %v2511_v36  ;;  %v1352_v28 = vld [vmem:[#allocation8 + $0xe0] sm:$0xff]  ;;  %v1362_v29 = vld [vmem:[#allocation8 + $0x130] sm:$0xff]  ;;  %v1373_v34 = vld [vmem:[#allocation8 + $0x188] sm:$0xff] }
 0x3e7   :  { %6376 = vmatprep.subr.bf16.mxu0 %v6375_v44  ;;  %v2510_v44 = vld [vmem:[#allocation8 + $0x2510] sm:$0xff]  ;;  %v6479_v27 = vpack.c.bf16 %v1363_v20, %v1353_v19  ;;  %v2580_v32 = vld [vmem:[#allocation8 + $0x2740] sm:$0xff]  ;;  %v1383_v36 = vld [vmem:[#allocation8 + $0x1d8] sm:$0xff] }
 0x3e8   :  { %v2591_v38 = vld [vmem:[#allocation8 + $0x2798] sm:$0xff]  ;;  %v1413_v10 = vld [vmem:[#allocation8 + $0x2c8] sm:$0xff] }
 0x3e9   :  { %6134 = vmatpush1.bf16.msra.mxu1 %v6133_v56  ;;  %v2541_v56 = vld [vmem:[#allocation8 + $0x2608] sm:$0xff]  ;;  %v1423_v5 = vld [vmem:[#allocation8 + $0x318] sm:$0xff] }
 0x3ea   :  { %6378 = vmatpush1.bf16.msra.mxu0 %v6377_v57  ;;  %6136 = vmatprep.subr.bf16.mxu1 %v6135_v58  ;;  %v6149_v57 = vpack.c.bf16 %v2898_v41, %v2888_v40  ;;  %v6393_v58 = vpack.c.bf16 %v2520_v48, %v2510_v44  ;;  %v6395_v17 = vpack.c.bf16 %v2541_v56, %v2531_v30  ;;  %v1372_v41 = vld [vmem:[#allocation8 + $0x180] sm:$0xff]  ;;  %v1382_v44 = vld [vmem:[#allocation8 + $0x1d0] sm:$0xff]  ;;  %v1403_v30 = vld [vmem:[#allocation8 + $0x278] sm:$0xff] }
 0x3eb   :  { %6380 = vmatprep.subr.bf16.mxu0 %v6379_v12  ;;  %v2530_v12 = vld [vmem:[#allocation8 + $0x25b0] sm:$0xff]  ;;  %v6483_v40 = vpack.c.bf16 %v1383_v36, %v1373_v34  ;;  %v2611_v56 = vld [vmem:[#allocation8 + $0x2838] sm:$0xff]  ;;  %v1433_v19 = vld [vmem:[#allocation8 + $0x368] sm:$0xff] }
 0x3ec   :  { %v1443_v20 = vld [vmem:[#allocation8 + $0x3b8] sm:$0xff]  ;;  %v1453_v34 = vld [vmem:[#allocation8 + $0x408] sm:$0xff] }
 0x3ed   :  { %6138 = vmatpush1.bf16.msra.mxu1 %v6137_v0  ;;  %v2561_v0 = vld [vmem:[#allocation8 + $0x26a8] sm:$0xff]  ;;  %v1463_v36 = vld [vmem:[#allocation8 + $0x458] sm:$0xff] }
 0x3ee   :  { %6382 = vmatpush1.bf16.msra.mxu0 %v6381_v11  ;;  %6140 = vmatprep.subr.bf16.mxu1 %v6139_v13  ;;  %v6153_v11 = vpack.c.bf16 %v2918_v6, %v2908_v3  ;;  %v6397_v13 = vpack.c.bf16 %v2540_v8, %v2530_v12  ;;  %v6399_v16 = vpack.c.bf16 %v2561_v0, %v2551_v9  ;;  %v1392_v3 = vld [vmem:[#allocation8 + $0x220] sm:$0xff]  ;;  %v1402_v6 = vld [vmem:[#allocation8 + $0x270] sm:$0xff]  ;;  %v2631_v9 = vld [vmem:[#allocation8 + $0x28d8] sm:$0xff] }
 0x3ef   :  { %6384 = vmatprep.subr.bf16.mxu0 %v6383_v15  ;;  %v2550_v15 = vld [vmem:[#allocation8 + $0x2650] sm:$0xff]  ;;  %v2620_v8 = vld [vmem:[#allocation8 + $0x2880] sm:$0xff]  ;;  %v2641_v0 = vld [vmem:[#allocation8 + $0x2928] sm:$0xff] }
 0x3f1   :  { %6142 = vmatpush1.bf16.msra.mxu1 %v6141_v21  ;;  %v2581_v21 = vld [vmem:[#allocation8 + $0x2748] sm:$0xff] }
 0x3f2   :  { %6386 = vmatpush1.bf16.msra.mxu0 %v6385_v25  ;;  %6144 = vmatprep.subr.bf16.mxu1 %v6143_v26  ;;  %v6477_v25 = vpack.c.bf16 %v1342_v42, %v1332_v63  ;;  %v6401_v26 = vpack.c.bf16 %v2560_v18, %v2550_v15  ;;  %v6403_v33 = vpack.c.bf16 %v2581_v21, %v2571_v4  ;;  %v1422_v63 = vld [vmem:[#allocation8 + $0x310] sm:$0xff]  ;;  %v2640_v18 = vld [vmem:[#allocation8 + $0x2920] sm:$0xff]  ;;  %v2651_v4 = vld [vmem:[#allocation8 + $0x2978] sm:$0xff] }
 0x3f3   :  { %6388 = vmatprep.subr.bf16.mxu0 %v6387_v31  ;;  %v2570_v31 = vld [vmem:[#allocation8 + $0x26f0] sm:$0xff]  ;;  %v6491_v15 = vpack.c.bf16 %v1423_v5, %v1413_v10  ;;  %v2661_v21 = vld [vmem:[#allocation8 + $0x29c8] sm:$0xff]  ;;  %v1503_v5 = vld [vmem:[#allocation8 + $0x598] sm:$0xff] }
 0x3f4   :  { %v2630_v42 = vld [vmem:[#allocation8 + $0x28d0] sm:$0xff]  ;;  %v1493_v10 = vld [vmem:[#allocation8 + $0x548] sm:$0xff] }
 0x3f5   :  { %6146 = vmatpush1.bf16.msra.mxu1 %v6145_v37  ;;  %v2601_v37 = vld [vmem:[#allocation8 + $0x27e8] sm:$0xff] }
 0x3f6   :  { %6390 = vmatpush1.bf16.msra.mxu0 %v6389_v59  ;;  %6148 = vmatprep.subr.bf16.mxu1 %v6147_v39  ;;  %v6481_v59 = vpack.c.bf16 %v1362_v29, %v1352_v28  ;;  %v6405_v39 = vpack.c.bf16 %v2580_v32, %v2570_v31  ;;  %v6407_v48 = vpack.c.bf16 %v2601_v37, %v2591_v38  ;;  %v1432_v28 = vld [vmem:[#allocation8 + $0x360] sm:$0xff]  ;;  %v1442_v29 = vld [vmem:[#allocation8 + $0x3b0] sm:$0xff]  ;;  %v2671_v38 = vld [vmem:[#allocation8 + $0x2a18] sm:$0xff] }
 0x3f7   :  { %6392 = vmatprep.subr.bf16.mxu0 %v6391_v54  ;;  %v2590_v54 = vld [vmem:[#allocation8 + $0x2790] sm:$0xff]  ;;  %v2660_v32 = vld [vmem:[#allocation8 + $0x29c0] sm:$0xff]  ;;  %v2681_v37 = vld [vmem:[#allocation8 + $0x2a68] sm:$0xff] }
 0x3f8   :  { %v2650_v31 = vld [vmem:[#allocation8 + $0x2970] sm:$0xff] }
 0x3f9   :  { %6150 = vmatpush1.bf16.msra.mxu1 %v6149_v57  ;;  %v2621_v57 = vld [vmem:[#allocation8 + $0x2888] sm:$0xff] }
 0x3fa   :  { %6394 = vmatpush1.bf16.msra.mxu0 %v6393_v58  ;;  %6152 = vmatprep.subr.bf16.mxu1 %v6151_v62  ;;  %v6485_v58 = vpack.c.bf16 %v1382_v44, %v1372_v41  ;;  %v6487_v62 = vpack.c.bf16 %v1403_v30, %v1393_v50  ;;  %v6411_v12 = vpack.c.bf16 %v2621_v57, %v2611_v56  ;;  %v1452_v41 = vld [vmem:[#allocation8 + $0x400] sm:$0xff]  ;;  %v1462_v44 = vld [vmem:[#allocation8 + $0x450] sm:$0xff]  ;;  %v1473_v50 = vld [vmem:[#allocation8 + $0x4a8] sm:$0xff] }
 0x3fb   :  { %6396 = vmatprep.subr.bf16.mxu0 %v6395_v17  ;;  %v2610_v17 = vld [vmem:[#allocation8 + $0x2830] sm:$0xff]  ;;  %v1483_v30 = vld [vmem:[#allocation8 + $0x4f8] sm:$0xff]  ;;  %v2701_v57 = vld [vmem:[#allocation8 + $0x2b08] sm:$0xff] }
 0x3fc   :  { %v2691_v56 = vld [vmem:[#allocation8 + $0x2ab8] sm:$0xff] }
 0x3fd   :  { %6154 = vmatpush1.bf16.msra.mxu1 %v6153_v11  ;;  %v6489_v11 = vpack.c.bf16 %v1402_v6, %v1392_v3  ;;  %v1472_v3 = vld [vmem:[#allocation8 + $0x4a0] sm:$0xff]  ;;  %v1482_v6 = vld [vmem:[#allocation8 + $0x4f0] sm:$0xff] }
 0x3fe   :  { %6398 = vmatpush1.bf16.msra.mxu0 %v6397_v13  ;;  %6476 = vmatprep.subr.bf16.mxu1 %v6475_v51  ;;  %v6413_v13 = vpack.c.bf16 %v2620_v8, %v2610_v17  ;;  %v1412_v51 = vld [vmem:[#allocation8 + $0x2c0] sm:$0xff]  ;;  %v6427_v17 = vpack.c.bf16 %v2701_v57, %v2691_v56  ;;  %v2771_v56 = vld [vmem:[#allocation8 + $0x2d38] sm:$0xff]  ;;  %v2781_v57 = vld [vmem:[#allocation8 + $0x2d88] sm:$0xff] }
 0x3ff   :  { %6400 = vmatprep.subr.bf16.mxu0 %v6399_v16  ;;  %v6415_v16 = vpack.c.bf16 %v2641_v0, %v2631_v9  ;;  %v2700_v8 = vld [vmem:[#allocation8 + $0x2b00] sm:$0xff]  ;;  %v2711_v9 = vld [vmem:[#allocation8 + $0x2b58] sm:$0xff]  ;;  %v2721_v0 = vld [vmem:[#allocation8 + $0x2ba8] sm:$0xff] }
 0x400   :  { %4037 = vmatmul.mubr.f32.vlgmr.msra.gmra.mrb[6].mxu1 %v7319_v53 }
 0x401   :  { %6478 = vmatpush1.bf16.msra.mxu1 %v6477_v25  ;;  %4462 = vmatprep.mubr.f32.mxu1 %v7214_v1  ;;  %v6409_v1 = vpack.c.bf16 %v2600_v49, %v2590_v54  ;;  %v6493_v25 = vpack.c.bf16 %v1422_v63, %v1412_v51  ;;  %v2670_v54 = vld [vmem:[#allocation8 + $0x2a10] sm:$0xff]  ;;  %v2680_v49 = vld [vmem:[#allocation8 + $0x2a60] sm:$0xff]  ;;  %v6507_v51 = vpack.c.bf16 %v1503_v5, %v1493_v10  ;;  %v1573_v10 = vld [vmem:[#allocation8 + $0x7c8] sm:$0xff] }
 0x402   :  { %6402 = vmatpush1.bf16.msra.mxu0 %v6401_v26  ;;  %6480 = vmatprep.subr.bf16.mxu1 %v6479_v27  ;;  %v6417_v26 = vpack.c.bf16 %v2640_v18, %v2630_v42  ;;  %v6495_v27 = vpack.c.bf16 %v1443_v20, %v1433_v19  ;;  %v1492_v63 = vld [vmem:[#allocation8 + $0x540] sm:$0xff]  ;;  %v1502_v42 = vld [vmem:[#allocation8 + $0x590] sm:$0xff]  ;;  %v1513_v19 = vld [vmem:[#allocation8 + $0x5e8] sm:$0xff] }
 0x403   :  { %6404 = vmatprep.subr.bf16.mxu0 %v6403_v33  ;;  %v6419_v33 = vpack.c.bf16 %v2661_v21, %v2651_v4  ;;  %v2720_v18 = vld [vmem:[#allocation8 + $0x2ba0] sm:$0xff]  ;;  %v1523_v20 = vld [vmem:[#allocation8 + $0x638] sm:$0xff]  ;;  %v2741_v21 = vld [vmem:[#allocation8 + $0x2c48] sm:$0xff] }
 0x404   :  { %v2731_v4 = vld [vmem:[#allocation8 + $0x2bf8] sm:$0xff] }
 0x405   :  { %6482 = vmatpush1.bf16.msra.mxu1 %v6481_v59  ;;  %v6497_v59 = vpack.c.bf16 %v1442_v29, %v1432_v28  ;;  %v1512_v28 = vld [vmem:[#allocation8 + $0x5e0] sm:$0xff]  ;;  %v1522_v29 = vld [vmem:[#allocation8 + $0x630] sm:$0xff]  ;;  %v1583_v5 = vld [vmem:[#allocation8 + $0x818] sm:$0xff] }
 0x406   :  { %6406 = vmatpush1.bf16.msra.mxu0 %v6405_v39  ;;  %6484 = vmatprep.subr.bf16.mxu1 %v6483_v40  ;;  %v6421_v39 = vpack.c.bf16 %v2660_v32, %v2650_v31  ;;  %v6499_v40 = vpack.c.bf16 %v1463_v36, %v1453_v34  ;;  %v2730_v31 = vld [vmem:[#allocation8 + $0x2bf0] sm:$0xff]  ;;  %v2740_v32 = vld [vmem:[#allocation8 + $0x2c40] sm:$0xff]  ;;  %v1533_v34 = vld [vmem:[#allocation8 + $0x688] sm:$0xff] }
 0x407   :  { %6408 = vmatprep.subr.bf16.mxu0 %v6407_v48  ;;  %v6423_v48 = vpack.c.bf16 %v2681_v37, %v2671_v38  ;;  %v1543_v36 = vld [vmem:[#allocation8 + $0x6d8] sm:$0xff]  ;;  %v2761_v37 = vld [vmem:[#allocation8 + $0x2ce8] sm:$0xff] }
 0x408   :  { %v2751_v38 = vld [vmem:[#allocation8 + $0x2c98] sm:$0xff] }
 0x409   :  { %6486 = vmatpush1.bf16.msra.mxu1 %v6485_v58  ;;  %v6501_v58 = vpack.c.bf16 %v1462_v44, %v1452_v41  ;;  %v1532_v41 = vld [vmem:[#allocation8 + $0x680] sm:$0xff]  ;;  %v1542_v44 = vld [vmem:[#allocation8 + $0x6d0] sm:$0xff] }
 0x40a   :  { %6410 = vmatpush1.bf16.msra.mxu0 %v6409_v1  ;;  %6488 = vmatprep.subr.bf16.mxu1 %v6487_v62  ;;  %v6425_v1 = vpack.c.bf16 %v2680_v49, %v2670_v54  ;;  %v6503_v62 = vpack.c.bf16 %v1483_v30, %v1473_v50  ;;  %v2750_v54 = vld [vmem:[#allocation8 + $0x2c90] sm:$0xff]  ;;  %v2760_v49 = vld [vmem:[#allocation8 + $0x2ce0] sm:$0xff]  ;;  %v1553_v50 = vld [vmem:[#allocation8 + $0x728] sm:$0xff] }
 0x40b   :  { %6412 = vmatprep.subr.bf16.mxu0 %v6411_v12  ;;  %v2690_v12 = vld [vmem:[#allocation8 + $0x2ab0] sm:$0xff]  ;;  %v1563_v30 = vld [vmem:[#allocation8 + $0x778] sm:$0xff] }
 0x40d   :  { %4321 = vmatmul.mubr.f32.vlgmr.msra.gmra.mrb[12].mxu0 %v7301_v52  ;;  %6490 = vmatpush1.bf16.msra.mxu1 %v6489_v11  ;;  %v6505_v11 = vpack.c.bf16 %v1482_v6, %v1472_v3  ;;  %v1552_v3 = vld [vmem:[#allocation8 + $0x720] sm:$0xff]  ;;  %v1562_v6 = vld [vmem:[#allocation8 + $0x770] sm:$0xff] }
 0x40e   :  { %6414 = vmatpush1.bf16.msra.mxu0 %v6413_v13  ;;  %4391 = vmatprep.mubr.f32.mxu0 %v7316_v47  ;;  %v6429_v13 = vpack.c.bf16 %v2700_v8, %v2690_v12  ;;  %v2770_v12 = vld [vmem:[#allocation8 + $0x2d30] sm:$0xff]  ;;  %v2780_v8 = vld [vmem:[#allocation8 + $0x2d80] sm:$0xff] }
 0x40f   :  { %6492 = vmatprep.subr.bf16.mxu1 %v6491_v15  ;;  %6416 = vmatprep.subr.bf16.mxu0 %v6415_v16  ;;  %v2710_v15 = vld [vmem:[#allocation8 + $0x2b50] sm:$0xff]  ;;  %v6431_v16 = vpack.c.bf16 %v2721_v0, %v2711_v9  ;;  %v2791_v9 = vld [vmem:[#allocation8 + $0x2dd8] sm:$0xff]  ;;  %v2801_v0 = vld [vmem:[#allocation8 + $0x2e28] sm:$0xff] }
 0x411   :  { %6494 = vmatpush1.bf16.msra.mxu1 %v6493_v25  ;;  %v6509_v25 = vpack.c.bf16 %v1502_v42, %v1492_v63  ;;  %v1572_v63 = vld [vmem:[#allocation8 + $0x7c0] sm:$0xff]  ;;  %v1582_v42 = vld [vmem:[#allocation8 + $0x810] sm:$0xff] }
 0x412   :  { %6418 = vmatpush1.bf16.msra.mxu0 %v6417_v26  ;;  %6496 = vmatprep.subr.bf16.mxu1 %v6495_v27  ;;  %v6433_v26 = vpack.c.bf16 %v2720_v18, %v2710_v15  ;;  %v6511_v27 = vpack.c.bf16 %v1523_v20, %v1513_v19  ;;  %v2790_v15 = vld [vmem:[#allocation8 + $0x2dd0] sm:$0xff]  ;;  %v2800_v18 = vld [vmem:[#allocation8 + $0x2e20] sm:$0xff]  ;;  %v1593_v19 = vld [vmem:[#allocation8 + $0x868] sm:$0xff] }
 0x413   :  { %6420 = vmatprep.subr.bf16.mxu0 %v6419_v33  ;;  %v6435_v33 = vpack.c.bf16 %v2741_v21, %v2731_v4  ;;  %v1603_v20 = vld [vmem:[#allocation8 + $0x8b8] sm:$0xff]  ;;  %v2821_v21 = vld [vmem:[#allocation8 + $0x2ec8] sm:$0xff] }
 0x414   :  { %v2811_v4 = vld [vmem:[#allocation8 + $0x2e78] sm:$0xff] }
 0x415   :  { %6498 = vmatpush1.bf16.msra.mxu1 %v6497_v59  ;;  %v6513_v59 = vpack.c.bf16 %v1522_v29, %v1512_v28  ;;  %v1592_v28 = vld [vmem:[#allocation8 + $0x860] sm:$0xff]  ;;  %v1602_v29 = vld [vmem:[#allocation8 + $0x8b0] sm:$0xff] }
 0x416   :  { %6422 = vmatpush1.bf16.msra.mxu0 %v6421_v39  ;;  %6500 = vmatprep.subr.bf16.mxu1 %v6499_v40  ;;  %v6437_v39 = vpack.c.bf16 %v2740_v32, %v2730_v31  ;;  %v6515_v40 = vpack.c.bf16 %v1543_v36, %v1533_v34  ;;  %v2810_v31 = vld [vmem:[#allocation8 + $0x2e70] sm:$0xff]  ;;  %v2820_v32 = vld [vmem:[#allocation8 + $0x2ec0] sm:$0xff]  ;;  %v1613_v34 = vld [vmem:[#allocation8 + $0x908] sm:$0xff] }
 0x417   :  { %6424 = vmatprep.subr.bf16.mxu0 %v6423_v48  ;;  %v6439_v48 = vpack.c.bf16 %v2761_v37, %v2751_v38  ;;  %v1623_v36 = vld [vmem:[#allocation8 + $0x958] sm:$0xff]  ;;  %v2841_v37 = vld [vmem:[#allocation8 + $0x2f68] sm:$0xff] }
 0x418   :  { %v2831_v38 = vld [vmem:[#allocation8 + $0x2f18] sm:$0xff] }
 0x419   :  { %6502 = vmatpush1.bf16.msra.mxu1 %v6501_v58  ;;  %v6517_v58 = vpack.c.bf16 %v1542_v44, %v1532_v41  ;;  %v1612_v41 = vld [vmem:[#allocation8 + $0x900] sm:$0xff]  ;;  %v1622_v44 = vld [vmem:[#allocation8 + $0x950] sm:$0xff] }
 0x41a   :  { %6426 = vmatpush1.bf16.msra.mxu0 %v6425_v1  ;;  %6504 = vmatprep.subr.bf16.mxu1 %v6503_v62  ;;  %v6441_v1 = vpack.c.bf16 %v2760_v49, %v2750_v54  ;;  %v6519_v62 = vpack.c.bf16 %v1563_v30, %v1553_v50  ;;  %v2830_v54 = vld [vmem:[#allocation8 + $0x2f10] sm:$0xff]  ;;  %v2840_v49 = vld [vmem:[#allocation8 + $0x2f60] sm:$0xff]  ;;  %v1633_v50 = vld [vmem:[#allocation8 + $0x9a8] sm:$0xff] }
 0x41b   :  { %6428 = vmatprep.subr.bf16.mxu0 %v6427_v17  ;;  %v6443_v17 = vpack.c.bf16 %v2781_v57, %v2771_v56  ;;  %v1643_v30 = vld [vmem:[#allocation8 + $0x9f8] sm:$0xff]  ;;  %v2861_v57 = vld [vmem:[#allocation8 + $0x3008] sm:$0xff] }
 0x41c   :  { %v2851_v56 = vld [vmem:[#allocation8 + $0x2fb8] sm:$0xff] }
 0x41d   :  { %6506 = vmatpush1.bf16.msra.mxu1 %v6505_v11  ;;  %v6521_v11 = vpack.c.bf16 %v1562_v6, %v1552_v3  ;;  %v1632_v3 = vld [vmem:[#allocation8 + $0x9a0] sm:$0xff]  ;;  %v1642_v6 = vld [vmem:[#allocation8 + $0x9f0] sm:$0xff] }
 0x41e   :  { %6430 = vmatpush1.bf16.msra.mxu0 %v6429_v13  ;;  %6508 = vmatprep.subr.bf16.mxu1 %v6507_v51  ;;  %v6445_v13 = vpack.c.bf16 %v2780_v8, %v2770_v12  ;;  %v6523_v51 = vpack.c.bf16 %v1583_v5, %v1573_v10  ;;  %v2850_v12 = vld [vmem:[#allocation8 + $0x2fb0] sm:$0xff]  ;;  %v2860_v8 = vld [vmem:[#allocation8 + $0x3000] sm:$0xff]  ;;  %v1653_v10 = vld [vmem:[#allocation8 + $0xa48] sm:$0xff] }
 0x41f   :  { %6432 = vmatprep.subr.bf16.mxu0 %v6431_v16  ;;  %v6447_v16 = vpack.c.bf16 %v2801_v0, %v2791_v9  ;;  %v1663_v5 = vld [vmem:[#allocation8 + $0xa98] sm:$0xff]  ;;  %v2881_v0 = vld [vmem:[#allocation8 + $0x30a8] sm:$0xff] }
 0x420   :  { %v2871_v9 = vld [vmem:[#allocation8 + $0x3058] sm:$0xff] }
 0x421   :  { %6510 = vmatpush1.bf16.msra.mxu1 %v6509_v25  ;;  %v6525_v25 = vpack.c.bf16 %v1582_v42, %v1572_v63  ;;  %v1652_v63 = vld [vmem:[#allocation8 + $0xa40] sm:$0xff]  ;;  %v1662_v42 = vld [vmem:[#allocation8 + $0xa90] sm:$0xff] }
 0x422   :  { %6434 = vmatpush1.bf16.msra.mxu0 %v6433_v26  ;;  %6512 = vmatprep.subr.bf16.mxu1 %v6511_v27  ;;  %v6449_v26 = vpack.c.bf16 %v2800_v18, %v2790_v15  ;;  %v6527_v27 = vpack.c.bf16 %v1603_v20, %v1593_v19  ;;  %v2870_v15 = vld [vmem:[#allocation8 + $0x3050] sm:$0xff]  ;;  %v2880_v18 = vld [vmem:[#allocation8 + $0x30a0] sm:$0xff]  ;;  %v1673_v19 = vld [vmem:[#allocation8 + $0xae8] sm:$0xff] }
 0x423   :  { %6436 = vmatprep.subr.bf16.mxu0 %v6435_v33  ;;  %v6451_v33 = vpack.c.bf16 %v2821_v21, %v2811_v4  ;;  %v1683_v20 = vld [vmem:[#allocation8 + $0xb38] sm:$0xff]  ;;  %v2901_v21 = vld [vmem:[#allocation8 + $0x3148] sm:$0xff] }
 0x424   :  { %v2891_v4 = vld [vmem:[#allocation8 + $0x30f8] sm:$0xff] }
 0x425   :  { %6514 = vmatpush1.bf16.msra.mxu1 %v6513_v59  ;;  %v6529_v59 = vpack.c.bf16 %v1602_v29, %v1592_v28  ;;  %v1672_v28 = vld [vmem:[#allocation8 + $0xae0] sm:$0xff]  ;;  %v1682_v29 = vld [vmem:[#allocation8 + $0xb30] sm:$0xff] }
 0x426   :  { %6438 = vmatpush1.bf16.msra.mxu0 %v6437_v39  ;;  %6516 = vmatprep.subr.bf16.mxu1 %v6515_v40  ;;  %v6453_v39 = vpack.c.bf16 %v2820_v32, %v2810_v31  ;;  %v6531_v40 = vpack.c.bf16 %v1623_v36, %v1613_v34  ;;  %v2890_v31 = vld [vmem:[#allocation8 + $0x30f0] sm:$0xff]  ;;  %v2900_v32 = vld [vmem:[#allocation8 + $0x3140] sm:$0xff]  ;;  %v1693_v34 = vld [vmem:[#allocation8 + $0xb88] sm:$0xff] }
 0x427   :  { %6440 = vmatprep.subr.bf16.mxu0 %v6439_v48  ;;  %v6455_v48 = vpack.c.bf16 %v2841_v37, %v2831_v38  ;;  %v1703_v36 = vld [vmem:[#allocation8 + $0xbd8] sm:$0xff]  ;;  %v2921_v37 = vld [vmem:[#allocation8 + $0x31e8] sm:$0xff] }
 0x428   :  { %v2911_v38 = vld [vmem:[#allocation8 + $0x3198] sm:$0xff] }
 0x429   :  { %6518 = vmatpush1.bf16.msra.mxu1 %v6517_v58  ;;  %v6533_v58 = vpack.c.bf16 %v1622_v44, %v1612_v41  ;;  %v1692_v41 = vld [vmem:[#allocation8 + $0xb80] sm:$0xff]  ;;  %v1702_v44 = vld [vmem:[#allocation8 + $0xbd0] sm:$0xff] }
 0x42a   :  { %6442 = vmatpush1.bf16.msra.mxu0 %v6441_v1  ;;  %6520 = vmatprep.subr.bf16.mxu1 %v6519_v62  ;;  %v6457_v1 = vpack.c.bf16 %v2840_v49, %v2830_v54  ;;  %v6535_v62 = vpack.c.bf16 %v1643_v30, %v1633_v50  ;;  %v2910_v54 = vld [vmem:[#allocation8 + $0x3190] sm:$0xff]  ;;  %v2920_v49 = vld [vmem:[#allocation8 + $0x31e0] sm:$0xff]  ;;  %v1713_v50 = vld [vmem:[#allocation8 + $0xc28] sm:$0xff] }
 0x42b   :  { %6444 = vmatprep.subr.bf16.mxu0 %v6443_v17  ;;  %v6459_v17 = vpack.c.bf16 %v2861_v57, %v2851_v56  ;;  %v1723_v30 = vld [vmem:[#allocation8 + $0xc78] sm:$0xff]  ;;  %v6473_v56 = vpack.c.bf16 %v2920_v49, %v2910_v54  ;;  %v1852_v54 = vld [vmem:[#allocation8 + $0x1080] sm:$0xff]  ;;  %v1873_v49 = vld [vmem:[#allocation8 + $0x1128] sm:$0xff] }
 0x42c   :  { %v6551_v57 = vpack.c.bf16 %v1723_v30, %v1713_v50  ;;  %v1883_v50 = vld [vmem:[#allocation8 + $0x1178] sm:$0xff] }
 0x42d   :  { %6522 = vmatpush1.bf16.msra.mxu1 %v6521_v11  ;;  %v6537_v11 = vpack.c.bf16 %v1642_v6, %v1632_v3 }
 0x42e   :  { %6446 = vmatpush1.bf16.msra.mxu0 %v6445_v13  ;;  %6524 = vmatprep.subr.bf16.mxu1 %v6523_v51  ;;  %v6461_v13 = vpack.c.bf16 %v2860_v8, %v2850_v12  ;;  %v6539_v51 = vpack.c.bf16 %v1663_v5, %v1653_v10  ;;  %v1732_v12 = vld [vmem:[#allocation8 + $0xcc0] sm:$0xff]  ;;  %v1753_v8 = vld [vmem:[#allocation8 + $0xd68] sm:$0xff]  ;;  %v1763_v10 = vld [vmem:[#allocation8 + $0xdb8] sm:$0xff] }
 0x42f   :  { %6448 = vmatprep.subr.bf16.mxu0 %v6447_v16  ;;  %v6463_v16 = vpack.c.bf16 %v2881_v0, %v2871_v9  ;;  %v6559_v9 = vpack.c.bf16 %v1763_v10, %v1753_v8  ;;  %v1752_v0 = vld [vmem:[#allocation8 + $0xd60] sm:$0xff] }
 0x431   :  { %6526 = vmatpush1.bf16.msra.mxu1 %v6525_v25  ;;  %v6541_v25 = vpack.c.bf16 %v1662_v42, %v1652_v63 }
 0x432   :  { %6450 = vmatpush1.bf16.msra.mxu0 %v6449_v26  ;;  %6528 = vmatprep.subr.bf16.mxu1 %v6527_v27  ;;  %v6465_v26 = vpack.c.bf16 %v2880_v18, %v2870_v15  ;;  %v6543_v27 = vpack.c.bf16 %v1683_v20, %v1673_v19  ;;  %v1772_v15 = vld [vmem:[#allocation8 + $0xe00] sm:$0xff]  ;;  %v1793_v18 = vld [vmem:[#allocation8 + $0xea8] sm:$0xff]  ;;  %v1803_v19 = vld [vmem:[#allocation8 + $0xef8] sm:$0xff] }
 0x433   :  { %6452 = vmatprep.subr.bf16.mxu0 %v6451_v33  ;;  %v6467_v33 = vpack.c.bf16 %v2901_v21, %v2891_v4  ;;  %v6567_v4 = vpack.c.bf16 %v1803_v19, %v1793_v18  ;;  %v1792_v21 = vld [vmem:[#allocation8 + $0xea0] sm:$0xff] }
 0x435   :  { %6530 = vmatpush1.bf16.msra.mxu1 %v6529_v59  ;;  %v6545_v59 = vpack.c.bf16 %v1682_v29, %v1672_v28 }
 0x436   :  { %6454 = vmatpush1.bf16.msra.mxu0 %v6453_v39  ;;  %6532 = vmatprep.subr.bf16.mxu1 %v6531_v40  ;;  %v6469_v39 = vpack.c.bf16 %v2900_v32, %v2890_v31  ;;  %v6547_v40 = vpack.c.bf16 %v1703_v36, %v1693_v34  ;;  %v1812_v31 = vld [vmem:[#allocation8 + $0xf40] sm:$0xff]  ;;  %v1833_v32 = vld [vmem:[#allocation8 + $0xfe8] sm:$0xff]  ;;  %v1843_v34 = vld [vmem:[#allocation8 + $0x1038] sm:$0xff] }
 0x437   :  { %6456 = vmatprep.subr.bf16.mxu0 %v6455_v48  ;;  %v6471_v48 = vpack.c.bf16 %v2921_v37, %v2911_v38  ;;  %v6575_v38 = vpack.c.bf16 %v1843_v34, %v1833_v32  ;;  %v1832_v37 = vld [vmem:[#allocation8 + $0xfe0] sm:$0xff] }
 0x439   :  { %6534 = vmatpush1.bf16.msra.mxu1 %v6533_v58  ;;  %v1722_v58 = vld [vmem:[#allocation8 + $0xc70] sm:$0xff] }
 0x43a   :  { %6458 = vmatpush1.bf16.msra.mxu0 %v6457_v1  ;;  %6536 = vmatprep.subr.bf16.mxu1 %v6535_v62  ;;  %v1733_v1 = vld [vmem:[#allocation8 + $0xcc8] sm:$0xff]  ;;  %v1743_v62 = vld [vmem:[#allocation8 + $0xd18] sm:$0xff] }
 0x43b   :  { %6460 = vmatprep.subr.bf16.mxu0 %v6459_v17  ;;  %v6555_v6 = vpack.c.bf16 %v1743_v62, %v1733_v1  ;;  %v1742_v17 = vld [vmem:[#allocation8 + $0xd10] sm:$0xff] }
 0x43c   :  { %v6557_v5 = vpack.c.bf16 %v1742_v17, %v1732_v12  ;;  %v1913_v12 = vld [vmem:[#allocation8 + $0x1268] sm:$0xff]  ;;  %v1923_v17 = vld [vmem:[#allocation8 + $0x12b8] sm:$0xff] }
 0x43d   :  { %6538 = vmatpush1.bf16.msra.mxu1 %v6537_v11  ;;  %v1762_v11 = vld [vmem:[#allocation8 + $0xdb0] sm:$0xff]  ;;  %v6591_v10 = vpack.c.bf16 %v1923_v17, %v1913_v12  ;;  %v2072_v12 = vld [vmem:[#allocation8 + $0x1760] sm:$0xff] }
 0x43e   :  { %6462 = vmatpush1.bf16.msra.mxu0 %v6461_v13  ;;  %6540 = vmatprep.subr.bf16.mxu1 %v6539_v51  ;;  %v1773_v13 = vld [vmem:[#allocation8 + $0xe08] sm:$0xff]  ;;  %v1783_v51 = vld [vmem:[#allocation8 + $0xe58] sm:$0xff]  ;;  %v6561_v63 = vpack.c.bf16 %v1762_v11, %v1752_v0  ;;  %v2082_v17 = vld [vmem:[#allocation8 + $0x17b0] sm:$0xff] }
 0x43f   :  { %6464 = vmatprep.subr.bf16.mxu0 %v6463_v16  ;;  %v6563_v42 = vpack.c.bf16 %v1783_v51, %v1773_v13  ;;  %v1782_v16 = vld [vmem:[#allocation8 + $0xe50] sm:$0xff]  ;;  %v1933_v0 = vld [vmem:[#allocation8 + $0x1308] sm:$0xff]  ;;  %v1943_v11 = vld [vmem:[#allocation8 + $0x1358] sm:$0xff] }
 0x440   :  { %4463 = vmatmul.mubr.f32.vlgmr.msra.gmra.mrb[8].mxu1 %v7217_v7  ;;  %v6549_v7 = vpack.c.bf16 %v1702_v44, %v1692_v41  ;;  %v6565_v20 = vpack.c.bf16 %v1782_v16, %v1772_v15  ;;  %v6595_v51 = vpack.c.bf16 %v1943_v11, %v1933_v0  ;;  %v1953_v15 = vld [vmem:[#allocation8 + $0x13a8] sm:$0xff]  ;;  %v1963_v16 = vld [vmem:[#allocation8 + $0x13f8] sm:$0xff]  ;;  %v2092_v0 = vld [vmem:[#allocation8 + $0x1800] sm:$0xff] }
 0x441   :  { %6542 = vmatpush1.bf16.msra.mxu1 %v6541_v25  ;;  %4533 = vmatprep.mubr.f32.mxu1 %v7246_v60  ;;  %v1712_v60 = vld [vmem:[#allocation8 + $0xc20] sm:$0xff]  ;;  %v1802_v25 = vld [vmem:[#allocation8 + $0xef0] sm:$0xff]  ;;  %v6599_v19 = vpack.c.bf16 %v1963_v16, %v1953_v15 }
 0x442   :  { %6466 = vmatpush1.bf16.msra.mxu0 %v6465_v26  ;;  %6544 = vmatprep.subr.bf16.mxu1 %v6543_v27  ;;  %v6553_v3 = vpack.c.bf16 %v1722_v58, %v1712_v60  ;;  %v1813_v26 = vld [vmem:[#allocation8 + $0xf48] sm:$0xff]  ;;  %v1823_v27 = vld [vmem:[#allocation8 + $0xf98] sm:$0xff]  ;;  %v6569_v28 = vpack.c.bf16 %v1802_v25, %v1792_v21  ;;  %v2102_v11 = vld [vmem:[#allocation8 + $0x1850] sm:$0xff] }
 0x443   :  { %6468 = vmatprep.subr.bf16.mxu0 %v6467_v33  ;;  %v6571_v29 = vpack.c.bf16 %v1823_v27, %v1813_v26  ;;  %v1822_v33 = vld [vmem:[#allocation8 + $0xf90] sm:$0xff]  ;;  %v1893_v60 = vld [vmem:[#allocation8 + $0x11c8] sm:$0xff]  ;;  %v1903_v58 = vld [vmem:[#allocation8 + $0x1218] sm:$0xff] }
 0x444   :  { %v6573_v36 = vpack.c.bf16 %v1822_v33, %v1812_v31  ;;  %v6587_v62 = vpack.c.bf16 %v1903_v58, %v1893_v60  ;;  %v1973_v21 = vld [vmem:[#allocation8 + $0x1448] sm:$0xff]  ;;  %v1983_v25 = vld [vmem:[#allocation8 + $0x1498] sm:$0xff]  ;;  %v2062_v58 = vld [vmem:[#allocation8 + $0x1710] sm:$0xff] }
 0x445   :  { %6546 = vmatpush1.bf16.msra.mxu1 %v6545_v59  ;;  %v1842_v59 = vld [vmem:[#allocation8 + $0x1030] sm:$0xff]  ;;  %v6603_v27 = vpack.c.bf16 %v1983_v25, %v1973_v21  ;;  %v1993_v31 = vld [vmem:[#allocation8 + $0x14e8] sm:$0xff]  ;;  %v2003_v33 = vld [vmem:[#allocation8 + $0x1538] sm:$0xff] }
 0x446   :  { %6470 = vmatpush1.bf16.msra.mxu0 %v6469_v39  ;;  %6548 = vmatprep.subr.bf16.mxu1 %v6547_v40  ;;  %v1853_v39 = vld [vmem:[#allocation8 + $0x1088] sm:$0xff]  ;;  %v1863_v40 = vld [vmem:[#allocation8 + $0x10d8] sm:$0xff]  ;;  %v6577_v41 = vpack.c.bf16 %v1842_v59, %v1832_v37  ;;  %v6607_v34 = vpack.c.bf16 %v2003_v33, %v1993_v31  ;;  %v2112_v15 = vld [vmem:[#allocation8 + $0x18a0] sm:$0xff] }
 0x447   :  { %6472 = vmatprep.subr.bf16.mxu0 %v6471_v48  ;;  %v6579_v44 = vpack.c.bf16 %v1863_v40, %v1853_v39  ;;  %v1862_v48 = vld [vmem:[#allocation8 + $0x10d0] sm:$0xff]  ;;  %v2013_v37 = vld [vmem:[#allocation8 + $0x1588] sm:$0xff]  ;;  %v2023_v59 = vld [vmem:[#allocation8 + $0x15d8] sm:$0xff] }
 0x448   :  { %v6581_v30 = vpack.c.bf16 %v1862_v48, %v1852_v54  ;;  %v6611_v40 = vpack.c.bf16 %v2023_v59, %v2013_v37  ;;  %v2033_v54 = vld [vmem:[#allocation8 + $0x1628] sm:$0xff]  ;;  %v2043_v48 = vld [vmem:[#allocation8 + $0x1678] sm:$0xff]  ;;  %v2122_v16 = vld [vmem:[#allocation8 + $0x18f0] sm:$0xff] }
 0x449   :  { %6550 = vmatpush1.bf16.msra.mxu1 %v6549_v7  ;;  %v6583_v7 = vpack.c.bf16 %v1883_v50, %v1873_v49  ;;  %v6615_v50 = vpack.c.bf16 %v2043_v48, %v2033_v54  ;;  %v2132_v21 = vld [vmem:[#allocation8 + $0x1940] sm:$0xff]  ;;  %v2142_v25 = vld [vmem:[#allocation8 + $0x1990] sm:$0xff] }
 0x44a   :  { %6474 = vmatpush1.bf16.msra.mxu0 %v6473_v56  ;;  %6552 = vmatprep.subr.bf16.mxu1 %v6551_v57  ;;  %v1872_v56 = vld [vmem:[#allocation8 + $0x1120] sm:$0xff]  ;;  %v1882_v57 = vld [vmem:[#allocation8 + $0x1170] sm:$0xff] }
 0x44b   :  { %v6585_v1 = vpack.c.bf16 %v1882_v57, %v1872_v56  ;;  %v2053_v56 = vld [vmem:[#allocation8 + $0x16c8] sm:$0xff]  ;;  %v2063_v57 = vld [vmem:[#allocation8 + $0x1718] sm:$0xff]  ;;  %v2152_v31 = vld [vmem:[#allocation8 + $0x19e0] sm:$0xff] }
 0x44c   :  { %v6619_v60 = vpack.c.bf16 %v2063_v57, %v2053_v56  ;;  %v2162_v33 = vld [vmem:[#allocation8 + $0x1a30] sm:$0xff]  ;;  %v2172_v37 = vld [vmem:[#allocation8 + $0x1a80] sm:$0xff] }
 0x44d   :  { %4392 = vmatmul.mubr.f32.vlgmr.msra.gmra.mrb[12].mxu0 %v7319_v53  ;;  %6554 = vmatpush1.bf16.msra.mxu1 %v6553_v3  ;;  %v1892_v3 = vld [vmem:[#allocation8 + $0x11c0] sm:$0xff]  ;;  %v2182_v59 = vld [vmem:[#allocation8 + $0x1ad0] sm:$0xff] }
 0x44e   :  { %6556 = vmatprep.subr.bf16.mxu1 %v6555_v6  ;;  %v1902_v6 = vld [vmem:[#allocation8 + $0x1210] sm:$0xff]  ;;  %v2192_v54 = vld [vmem:[#allocation8 + $0x1b20] sm:$0xff] }
 0x44f   :  { %v6589_v8 = vpack.c.bf16 %v1902_v6, %v1892_v3  ;;  %v2202_v48 = vld [vmem:[#allocation8 + $0x1b70] sm:$0xff]  ;;  %v2212_v56 = vld [vmem:[#allocation8 + $0x1bc0] sm:$0xff] }
 0x450   :  { %v2222_v57 = vld [vmem:[#allocation8 + $0x1c10] sm:$0xff] }
 0x451   :  { %6558 = vmatpush1.bf16.msra.mxu1 %v6557_v5  ;;  %v1912_v5 = vld [vmem:[#allocation8 + $0x1260] sm:$0xff] }
 0x452   :  { %6560 = vmatprep.subr.bf16.mxu1 %v6559_v9  ;;  %v1922_v9 = vld [vmem:[#allocation8 + $0x12b0] sm:$0xff] }
 0x453   :  { %v6593_v13 = vpack.c.bf16 %v1922_v9, %v1912_v5  ;;  %v6625_v5 = vpack.c.bf16 %v2082_v17, %v2072_v12 }
 0x455   :  { %6562 = vmatpush1.bf16.msra.mxu1 %v6561_v63  ;;  %v1932_v63 = vld [vmem:[#allocation8 + $0x1300] sm:$0xff] }
 0x456   :  { %6564 = vmatprep.subr.bf16.mxu1 %v6563_v42  ;;  %v1942_v42 = vld [vmem:[#allocation8 + $0x1350] sm:$0xff] }
 0x457   :  { %v6597_v18 = vpack.c.bf16 %v1942_v42, %v1932_v63  ;;  %v6629_v63 = vpack.c.bf16 %v2102_v11, %v2092_v0 }
 0x459   :  { %6566 = vmatpush1.bf16.msra.mxu1 %v6565_v20  ;;  %v1952_v20 = vld [vmem:[#allocation8 + $0x13a0] sm:$0xff] }
 0x45a   :  { %6568 = vmatprep.subr.bf16.mxu1 %v6567_v4  ;;  %v1962_v4 = vld [vmem:[#allocation8 + $0x13f0] sm:$0xff] }
 0x45b   :  { %v6601_v26 = vpack.c.bf16 %v1962_v4, %v1952_v20  ;;  %v6633_v20 = vpack.c.bf16 %v2122_v16, %v2112_v15 }
 0x45d   :  { %6570 = vmatpush1.bf16.msra.mxu1 %v6569_v28  ;;  %v1972_v28 = vld [vmem:[#allocation8 + $0x1440] sm:$0xff] }
 0x45e   :  { %6572 = vmatprep.subr.bf16.mxu1 %v6571_v29  ;;  %v1982_v29 = vld [vmem:[#allocation8 + $0x1490] sm:$0xff] }
 0x45f   :  { %v6605_v32 = vpack.c.bf16 %v1982_v29, %v1972_v28  ;;  %v6637_v28 = vpack.c.bf16 %v2142_v25, %v2132_v21 }
 0x461   :  { %6574 = vmatpush1.bf16.msra.mxu1 %v6573_v36  ;;  %v1992_v36 = vld [vmem:[#allocation8 + $0x14e0] sm:$0xff] }
 0x462   :  { %6576 = vmatprep.subr.bf16.mxu1 %v6575_v38  ;;  %v2002_v38 = vld [vmem:[#allocation8 + $0x1530] sm:$0xff] }
 0x463   :  { %v6609_v39 = vpack.c.bf16 %v2002_v38, %v1992_v36  ;;  %v6641_v36 = vpack.c.bf16 %v2162_v33, %v2152_v31 }
 0x465   :  { %6578 = vmatpush1.bf16.msra.mxu1 %v6577_v41  ;;  %v2012_v41 = vld [vmem:[#allocation8 + $0x1580] sm:$0xff] }
 0x466   :  { %6580 = vmatprep.subr.bf16.mxu1 %v6579_v44  ;;  %v2022_v44 = vld [vmem:[#allocation8 + $0x15d0] sm:$0xff] }
 0x467   :  { %v6613_v49 = vpack.c.bf16 %v2022_v44, %v2012_v41  ;;  %v6645_v41 = vpack.c.bf16 %v2182_v59, %v2172_v37 }
 0x469   :  { %6582 = vmatpush1.bf16.msra.mxu1 %v6581_v30  ;;  %v2032_v30 = vld [vmem:[#allocation8 + $0x1620] sm:$0xff] }
 0x46a   :  { %6584 = vmatprep.subr.bf16.mxu1 %v6583_v7  ;;  %v2042_v7 = vld [vmem:[#allocation8 + $0x1670] sm:$0xff] }
 0x46d   :  { %6586 = vmatpush1.bf16.msra.mxu1 %v6585_v1  ;;  %v2073_v1 = vld [vmem:[#allocation8 + $0x1768] sm:$0xff] }
 0x46e   :  { %6588 = vmatprep.subr.bf16.mxu1 %v6587_v62  ;;  %v2083_v62 = vld [vmem:[#allocation8 + $0x17b8] sm:$0xff] }
 0x46f   :  { %v6623_v6 = vpack.c.bf16 %v2083_v62, %v2073_v1  ;;  %v2232_v1 = vld [vmem:[#allocation8 + $0x1c60] sm:$0xff]  ;;  %v2242_v62 = vld [vmem:[#allocation8 + $0x1cb0] sm:$0xff] }
 0x470   :  { %v6657_v12 = vpack.c.bf16 %v2242_v62, %v2232_v1 }
 0x471   :  { %6590 = vmatpush1.bf16.msra.mxu1 %v6589_v8  ;;  %v2093_v8 = vld [vmem:[#allocation8 + $0x1808] sm:$0xff] }
 0x472   :  { %6592 = vmatprep.subr.bf16.mxu1 %v6591_v10  ;;  %v2103_v10 = vld [vmem:[#allocation8 + $0x1858] sm:$0xff] }
 0x473   :  { %v6627_v9 = vpack.c.bf16 %v2103_v10, %v2093_v8  ;;  %v2252_v8 = vld [vmem:[#allocation8 + $0x1d00] sm:$0xff]  ;;  %v2262_v10 = vld [vmem:[#allocation8 + $0x1d50] sm:$0xff] }
 0x474   :  { %v6661_v0 = vpack.c.bf16 %v2262_v10, %v2252_v8  ;;  %v2433_v8 = vld [vmem:[#allocation8 + $0x22a8] sm:$0xff]  ;;  %v2443_v10 = vld [vmem:[#allocation8 + $0x22f8] sm:$0xff] }
 0x475   :  { %6594 = vmatpush1.bf16.msra.mxu1 %v6593_v13  ;;  %v2113_v13 = vld [vmem:[#allocation8 + $0x18a8] sm:$0xff] }
 0x476   :  { %6596 = vmatprep.subr.bf16.mxu1 %v6595_v51  ;;  %v2123_v51 = vld [vmem:[#allocation8 + $0x18f8] sm:$0xff] }
 0x477   :  { %v6631_v42 = vpack.c.bf16 %v2123_v51, %v2113_v13  ;;  %v2272_v13 = vld [vmem:[#allocation8 + $0x1da0] sm:$0xff]  ;;  %v2282_v51 = vld [vmem:[#allocation8 + $0x1df0] sm:$0xff] }
 0x478   :  { %v6665_v15 = vpack.c.bf16 %v2282_v51, %v2272_v13  ;;  %v2432_v13 = vld [vmem:[#allocation8 + $0x22a0] sm:$0xff]  ;;  %v2442_v51 = vld [vmem:[#allocation8 + $0x22f0] sm:$0xff] }
 0x479   :  { %6598 = vmatpush1.bf16.msra.mxu1 %v6597_v18  ;;  %v2133_v18 = vld [vmem:[#allocation8 + $0x1948] sm:$0xff] }
 0x47a   :  { %6600 = vmatprep.subr.bf16.mxu1 %v6599_v19  ;;  %v2143_v19 = vld [vmem:[#allocation8 + $0x1998] sm:$0xff] }
 0x47b   :  { %v6635_v4 = vpack.c.bf16 %v2143_v19, %v2133_v18  ;;  %v2292_v18 = vld [vmem:[#allocation8 + $0x1e40] sm:$0xff]  ;;  %v2302_v19 = vld [vmem:[#allocation8 + $0x1e90] sm:$0xff] }
 0x47c   :  { %v6669_v21 = vpack.c.bf16 %v2302_v19, %v2292_v18  ;;  %v2462_v18 = vld [vmem:[#allocation8 + $0x2390] sm:$0xff]  ;;  %v2473_v19 = vld [vmem:[#allocation8 + $0x23e8] sm:$0xff] }
 0x47d   :  { %6602 = vmatpush1.bf16.msra.mxu1 %v6601_v26  ;;  %v2153_v26 = vld [vmem:[#allocation8 + $0x19e8] sm:$0xff] }
 0x47e   :  { %6604 = vmatprep.subr.bf16.mxu1 %v6603_v27  ;;  %v2163_v27 = vld [vmem:[#allocation8 + $0x1a38] sm:$0xff] }
 0x47f   :  { %v6639_v29 = vpack.c.bf16 %v2163_v27, %v2153_v26  ;;  %v2312_v26 = vld [vmem:[#allocation8 + $0x1ee0] sm:$0xff]  ;;  %v2322_v27 = vld [vmem:[#allocation8 + $0x1f30] sm:$0xff] }
 0x480   :  { %4534 = vmatmul.mubr.f32.vlgmr.msra.gmra.mrb[8].mxu1 %v7249_v2  ;;  %v6617_v2 = vpack.c.bf16 %v2042_v7, %v2032_v30  ;;  %v6649_v30 = vpack.c.bf16 %v2202_v48, %v2192_v54  ;;  %v6673_v31 = vpack.c.bf16 %v2322_v27, %v2312_v26  ;;  %v2382_v48 = vld [vmem:[#allocation8 + $0x2110] sm:$0xff]  ;;  %v2493_v27 = vld [vmem:[#allocation8 + $0x2488] sm:$0xff] }
 0x481   :  { %6606 = vmatpush1.bf16.msra.mxu1 %v6605_v32  ;;  %4604 = vmatprep.mubr.f32.mxu1 %v7272_v24  ;;  %v2052_v24 = vld [vmem:[#allocation8 + $0x16c0] sm:$0xff]  ;;  %v2173_v32 = vld [vmem:[#allocation8 + $0x1a88] sm:$0xff]  ;;  %v2482_v26 = vld [vmem:[#allocation8 + $0x2430] sm:$0xff] }
 0x482   :  { %6608 = vmatprep.subr.bf16.mxu1 %v6607_v34  ;;  %v6621_v3 = vpack.c.bf16 %v2062_v58, %v2052_v24  ;;  %v2183_v34 = vld [vmem:[#allocation8 + $0x1ad8] sm:$0xff]  ;;  %v6653_v24 = vpack.c.bf16 %v2222_v57, %v2212_v56  ;;  %v2392_v56 = vld [vmem:[#allocation8 + $0x2160] sm:$0xff]  ;;  %v2402_v57 = vld [vmem:[#allocation8 + $0x21b0] sm:$0xff] }
 0x483   :  { %v6643_v38 = vpack.c.bf16 %v2183_v34, %v2173_v32  ;;  %v2332_v32 = vld [vmem:[#allocation8 + $0x1f80] sm:$0xff]  ;;  %v2342_v34 = vld [vmem:[#allocation8 + $0x1fd0] sm:$0xff]  ;;  %v6689_v62 = vpack.c.bf16 %v2402_v57, %v2392_v56  ;;  %v2573_v57 = vld [vmem:[#allocation8 + $0x2708] sm:$0xff] }
 0x484   :  { %v6677_v37 = vpack.c.bf16 %v2342_v34, %v2332_v32  ;;  %v2502_v32 = vld [vmem:[#allocation8 + $0x24d0] sm:$0xff]  ;;  %v2513_v34 = vld [vmem:[#allocation8 + $0x2528] sm:$0xff] }
 0x485   :  { %6610 = vmatpush1.bf16.msra.mxu1 %v6609_v39  ;;  %v2193_v39 = vld [vmem:[#allocation8 + $0x1b28] sm:$0xff]  ;;  %v2562_v56 = vld [vmem:[#allocation8 + $0x26b0] sm:$0xff] }
 0x486   :  { %6612 = vmatprep.subr.bf16.mxu1 %v6611_v40  ;;  %v2203_v40 = vld [vmem:[#allocation8 + $0x1b78] sm:$0xff] }
 0x487   :  { %v6647_v44 = vpack.c.bf16 %v2203_v40, %v2193_v39  ;;  %v2352_v39 = vld [vmem:[#allocation8 + $0x2020] sm:$0xff]  ;;  %v2362_v40 = vld [vmem:[#allocation8 + $0x2070] sm:$0xff] }
 0x489   :  { %6614 = vmatpush1.bf16.msra.mxu1 %v6613_v49  ;;  %v2213_v49 = vld [vmem:[#allocation8 + $0x1bc8] sm:$0xff] }
 0x48a   :  { %6616 = vmatprep.subr.bf16.mxu1 %v6615_v50  ;;  %v2223_v50 = vld [vmem:[#allocation8 + $0x1c18] sm:$0xff] }
 0x48b   :  { %v6651_v7 = vpack.c.bf16 %v2223_v50, %v2213_v49  ;;  %v2393_v49 = vld [vmem:[#allocation8 + $0x2168] sm:$0xff]  ;;  %v2403_v50 = vld [vmem:[#allocation8 + $0x21b8] sm:$0xff] }
 0x48d   :  { %6618 = vmatpush1.bf16.msra.mxu1 %v6617_v2  ;;  %v2233_v2 = vld [vmem:[#allocation8 + $0x1c68] sm:$0xff] }
 0x48e   :  { %6620 = vmatprep.subr.bf16.mxu1 %v6619_v60  ;;  %v2243_v60 = vld [vmem:[#allocation8 + $0x1cb8] sm:$0xff] }
 0x48f   :  { %v6655_v58 = vpack.c.bf16 %v2243_v60, %v2233_v2  ;;  %v2413_v2 = vld [vmem:[#allocation8 + $0x2208] sm:$0xff]  ;;  %v2423_v60 = vld [vmem:[#allocation8 + $0x2258] sm:$0xff] }
 0x491   :  { %6622 = vmatpush1.bf16.msra.mxu1 %v6621_v3  ;;  %v2253_v3 = vld [vmem:[#allocation8 + $0x1d08] sm:$0xff] }
 0x492   :  { %6624 = vmatprep.subr.bf16.mxu1 %v6623_v6  ;;  %v2263_v6 = vld [vmem:[#allocation8 + $0x1d58] sm:$0xff] }
 0x493   :  { %v6659_v17 = vpack.c.bf16 %v2263_v6, %v2253_v3  ;;  %v6691_v3 = vpack.c.bf16 %v2423_v60, %v2413_v2  ;;  %v2412_v6 = vld [vmem:[#allocation8 + $0x2200] sm:$0xff]  ;;  %v2583_v2 = vld [vmem:[#allocation8 + $0x2758] sm:$0xff] }
 0x495   :  { %6626 = vmatpush1.bf16.msra.mxu1 %v6625_v5  ;;  %v2273_v5 = vld [vmem:[#allocation8 + $0x1da8] sm:$0xff] }
 0x496   :  { %6628 = vmatprep.subr.bf16.mxu1 %v6627_v9  ;;  %v2283_v9 = vld [vmem:[#allocation8 + $0x1df8] sm:$0xff] }
 0x497   :  { %v6663_v11 = vpack.c.bf16 %v2283_v9, %v2273_v5 }
 0x499   :  { %6630 = vmatpush1.bf16.msra.mxu1 %v6629_v63  ;;  %v2293_v63 = vld [vmem:[#allocation8 + $0x1e48] sm:$0xff] }
 0x49a   :  { %6632 = vmatprep.subr.bf16.mxu1 %v6631_v42  ;;  %v2303_v42 = vld [vmem:[#allocation8 + $0x1e98] sm:$0xff] }
 0x49b   :  { %v6667_v16 = vpack.c.bf16 %v2303_v42, %v2293_v63  ;;  %v2463_v63 = vld [vmem:[#allocation8 + $0x2398] sm:$0xff]  ;;  %v6697_v42 = vpack.c.bf16 %v2442_v51, %v2432_v13  ;;  %v2622_v13 = vld [vmem:[#allocation8 + $0x2890] sm:$0xff]  ;;  %v2633_v51 = vld [vmem:[#allocation8 + $0x28e8] sm:$0xff] }
 0x49d   :  { %6634 = vmatpush1.bf16.msra.mxu1 %v6633_v20  ;;  %v2313_v20 = vld [vmem:[#allocation8 + $0x1ee8] sm:$0xff] }
 0x49e   :  { %6636 = vmatprep.subr.bf16.mxu1 %v6635_v4  ;;  %v2323_v4 = vld [vmem:[#allocation8 + $0x1f38] sm:$0xff] }
 0x49f   :  { %v6671_v25 = vpack.c.bf16 %v2323_v4, %v2313_v20  ;;  %v2483_v20 = vld [vmem:[#allocation8 + $0x2438] sm:$0xff] }
 0x4a1   :  { %6638 = vmatpush1.bf16.msra.mxu1 %v6637_v28  ;;  %v2333_v28 = vld [vmem:[#allocation8 + $0x1f88] sm:$0xff] }
 0x4a2   :  { %6640 = vmatprep.subr.bf16.mxu1 %v6639_v29  ;;  %v2343_v29 = vld [vmem:[#allocation8 + $0x1fd8] sm:$0xff] }
 0x4a3   :  { %v6675_v33 = vpack.c.bf16 %v2343_v29, %v2333_v28  ;;  %v2503_v28 = vld [vmem:[#allocation8 + $0x24d8] sm:$0xff] }
 0x4a5   :  { %6642 = vmatpush1.bf16.msra.mxu1 %v6641_v36  ;;  %v2353_v36 = vld [vmem:[#allocation8 + $0x2028] sm:$0xff] }
 0x4a6   :  { %6644 = vmatprep.subr.bf16.mxu1 %v6643_v38  ;;  %v2363_v38 = vld [vmem:[#allocation8 + $0x2078] sm:$0xff] }
 0x4a7   :  { %v6679_v59 = vpack.c.bf16 %v2363_v38, %v2353_v36  ;;  %v2523_v36 = vld [vmem:[#allocation8 + $0x2578] sm:$0xff] }
 0x4a9   :  { %6646 = vmatpush1.bf16.msra.mxu1 %v6645_v41  ;;  %v2373_v41 = vld [vmem:[#allocation8 + $0x20c8] sm:$0xff] }
 0x4aa   :  { %6648 = vmatprep.subr.bf16.mxu1 %v6647_v44  ;;  %v2383_v44 = vld [vmem:[#allocation8 + $0x2118] sm:$0xff] }
 0x4ab   :  { %v6683_v54 = vpack.c.bf16 %v2383_v44, %v2373_v41  ;;  %v2543_v41 = vld [vmem:[#allocation8 + $0x2618] sm:$0xff] }
 0x4ad   :  { %6650 = vmatpush1.bf16.msra.mxu1 %v6649_v30 }
 0x4ae   :  { %6652 = vmatprep.subr.bf16.mxu1 %v6651_v7  ;;  %v6687_v7 = vpack.c.bf16 %v2403_v50, %v2393_v49  ;;  %v2563_v49 = vld [vmem:[#allocation8 + $0x26b8] sm:$0xff] }
 0x4b1   :  { %6654 = vmatpush1.bf16.msra.mxu1 %v6653_v24  ;;  %v7365_v24 = vld [vmem:[#allocation10] sm:$0xff] }
 0x4b2   :  { %6656 = vmatprep.subr.bf16.mxu1 %v6655_v58  ;;  %v2947_v58 = vrot.slane %v7365_v24, %v508_v61  ;;  %v2951_v1 = vrot.slane %v7365_v24, %v512_v23  ;;  %v6695_v61 = vpack.c.bf16 %v2443_v10, %v2433_v8  ;;  %v2453_v23 = vld [vmem:[#allocation8 + $0x2348] sm:$0xff]  ;;  %v2592_v8 = vld [vmem:[#allocation8 + $0x27a0] sm:$0xff]  ;;  %v2602_v10 = vld [vmem:[#allocation8 + $0x27f0] sm:$0xff] }
 0x4b5   :  { %6658 = vmatpush1.bf16.msra.mxu1 %v6657_v12  ;;  %v2422_v12 = vld [vmem:[#allocation8 + $0x2250] sm:$0xff] }
 0x4b6   :  { %6660 = vmatprep.subr.bf16.mxu1 %v6659_v17 }
 0x4b9   :  { %6662 = vmatpush1.bf16.msra.mxu1 %v6661_v0 }
 0x4ba   :  { %6664 = vmatprep.subr.bf16.mxu1 %v6663_v11  ;;  %v6693_v11 = vpack.c.bf16 %v2422_v12, %v2412_v6  ;;  %v2603_v6 = vld [vmem:[#allocation8 + $0x27f8] sm:$0xff] }
 0x4bd   :  { %6666 = vmatpush1.bf16.msra.mxu1 %v6665_v15  ;;  %v6699_v15 = vpack.c.bf16 %v2463_v63, %v2453_v23  ;;  %v2643_v23 = vld [vmem:[#allocation8 + $0x2938] sm:$0xff] }
 0x4be   :  { %6668 = vmatprep.subr.bf16.mxu1 %v6667_v16  ;;  %v2452_v16 = vld [vmem:[#allocation8 + $0x2340] sm:$0xff] }
 0x4bf   :  { %v6701_v4 = vpack.c.bf16 %v2462_v18, %v2452_v16  ;;  %v2642_v16 = vld [vmem:[#allocation8 + $0x2930] sm:$0xff]  ;;  %v2653_v18 = vld [vmem:[#allocation8 + $0x2988] sm:$0xff] }
 0x4c0   :  { %4605 = vmatmul.mubr.f32.vlgmr.msra.gmra.mrb[8].mxu1 %v7275_v22  ;;  %v6681_v22 = vpack.c.bf16 %v2362_v40, %v2352_v39  ;;  %v2522_v39 = vld [vmem:[#allocation8 + $0x2570] sm:$0xff]  ;;  %v2533_v40 = vld [vmem:[#allocation8 + $0x25c8] sm:$0xff] }
 0x4c1   :  { %6670 = vmatpush1.bf16.msra.mxu1 %v6669_v21  ;;  %4675 = vmatprep.mubr.f32.mxu1 %v7298_v55  ;;  %v2372_v55 = vld [vmem:[#allocation8 + $0x20c0] sm:$0xff]  ;;  %v6703_v21 = vpack.c.bf16 %v2483_v20, %v2473_v19  ;;  %v2663_v19 = vld [vmem:[#allocation8 + $0x29d8] sm:$0xff] }
 0x4c2   :  { %6672 = vmatprep.subr.bf16.mxu1 %v6671_v25  ;;  %v6685_v30 = vpack.c.bf16 %v2382_v48, %v2372_v55  ;;  %v2472_v25 = vld [vmem:[#allocation8 + $0x23e0] sm:$0xff]  ;;  %v2542_v55 = vld [vmem:[#allocation8 + $0x2610] sm:$0xff]  ;;  %v2553_v48 = vld [vmem:[#allocation8 + $0x2668] sm:$0xff] }
 0x4c3   :  { %v6705_v29 = vpack.c.bf16 %v2482_v26, %v2472_v25  ;;  %v2662_v25 = vld [vmem:[#allocation8 + $0x29d0] sm:$0xff]  ;;  %v2673_v26 = vld [vmem:[#allocation8 + $0x2a28] sm:$0xff] }
 0x4c5   :  { %6674 = vmatpush1.bf16.msra.mxu1 %v6673_v31  ;;  %v6707_v31 = vpack.c.bf16 %v2503_v28, %v2493_v27  ;;  %v2683_v27 = vld [vmem:[#allocation8 + $0x2a78] sm:$0xff] }
 0x4c6   :  { %6676 = vmatprep.subr.bf16.mxu1 %v6675_v33  ;;  %v2492_v33 = vld [vmem:[#allocation8 + $0x2480] sm:$0xff] }
 0x4c7   :  { %v6709_v38 = vpack.c.bf16 %v2502_v32, %v2492_v33  ;;  %v2682_v33 = vld [vmem:[#allocation8 + $0x2a70] sm:$0xff]  ;;  %v2693_v32 = vld [vmem:[#allocation8 + $0x2ac8] sm:$0xff] }
 0x4c9   :  { %6678 = vmatpush1.bf16.msra.mxu1 %v6677_v37  ;;  %v6711_v37 = vpack.c.bf16 %v2523_v36, %v2513_v34  ;;  %v2703_v34 = vld [vmem:[#allocation8 + $0x2b18] sm:$0xff] }
 0x4ca   :  { %6680 = vmatprep.subr.bf16.mxu1 %v6679_v59  ;;  %v2512_v59 = vld [vmem:[#allocation8 + $0x2520] sm:$0xff]  ;;  %v6747_v36 = vpack.c.bf16 %v2703_v34, %v2693_v32  ;;  %v2883_v32 = vld [vmem:[#allocation8 + $0x30b8] sm:$0xff] }
 0x4cb   :  { %v6713_v44 = vpack.c.bf16 %v2522_v39, %v2512_v59  ;;  %v2723_v59 = vld [vmem:[#allocation8 + $0x2bb8] sm:$0xff] }
 0x4cd   :  { %6682 = vmatpush1.bf16.msra.mxu1 %v6681_v22  ;;  %v6715_v22 = vpack.c.bf16 %v2543_v41, %v2533_v40  ;;  %v2712_v41 = vld [vmem:[#allocation8 + $0x2b60] sm:$0xff] }
 0x4ce   :  { %6684 = vmatprep.subr.bf16.mxu1 %v6683_v54  ;;  %v2532_v54 = vld [vmem:[#allocation8 + $0x25c0] sm:$0xff] }
 0x4cf   :  { %v6717_v50 = vpack.c.bf16 %v2542_v55, %v2532_v54  ;;  %v2743_v54 = vld [vmem:[#allocation8 + $0x2c58] sm:$0xff] }
 0x4d1   :  { %6686 = vmatpush1.bf16.msra.mxu1 %v6685_v30  ;;  %v6719_v30 = vpack.c.bf16 %v2563_v49, %v2553_v48  ;;  %v2732_v49 = vld [vmem:[#allocation8 + $0x2c00] sm:$0xff] }
 0x4d2   :  { %6688 = vmatprep.subr.bf16.mxu1 %v6687_v7  ;;  %v2552_v7 = vld [vmem:[#allocation8 + $0x2660] sm:$0xff] }
 0x4d3   :  { %v4038_v17 = vpop.f32.mrb[6].mxu1  ;;  %v6721_v60 = vpack.c.bf16 %v2562_v56, %v2552_v7  ;;  %v2763_v7 = vld [vmem:[#allocation8 + $0x2cf8] sm:$0xff] }
 0x4d4   :  { %v6813_v5 = vadd.f32 %v4038_v17, %v2947_v58  ;;  %v4040_v9 = vpop.f32.mrb[7].mxu1  ;;  %v6723_v58 = vpack.c.bf16 %v2583_v2, %v2573_v57  ;;  %v2752_v2 = vld [vmem:[#allocation8 + $0x2ca0] sm:$0xff] }
 0x4d5   :  { %v6814_v0 = vadd.f32 %v4040_v9, %v2951_v1  ;;  %6690 = vmatpush1.bf16.msra.mxu1 %v6689_v62  ;;  %v2572_v1 = vld [vmem:[#allocation8 + $0x2700] sm:$0xff]  ;;  %v2582_v62 = vld [vmem:[#allocation8 + $0x2750] sm:$0xff]  ;;  %v2623_v9 = vld [vmem:[#allocation8 + $0x2898] sm:$0xff] }
 0x4d6   :  { %4757 = vst [vmem:[#allocation11 + $0x20] sm:$0xff] %v6813_v5  ;;  %6692 = vmatprep.subr.bf16.mxu1 %v6691_v3  ;;  %v2593_v3 = vld [vmem:[#allocation8 + $0x27a8] sm:$0xff]  ;;  %v6725_v12 = vpack.c.bf16 %v2582_v62, %v2572_v1  ;;  %v2783_v1 = vld [vmem:[#allocation8 + $0x2d98] sm:$0xff] }
 0x4d7   :  { %4758 = vst [vmem:[#allocation11 + $0x28] sm:$0xff] %v6814_v0  ;;  %v6727_v17 = vpack.c.bf16 %v2603_v6, %v2593_v3  ;;  %v2613_v5 = vld [vmem:[#allocation8 + $0x2848] sm:$0xff]  ;;  %v6729_v0 = vpack.c.bf16 %v2602_v10, %v2592_v8  ;;  %v2772_v6 = vld [vmem:[#allocation8 + $0x2d40] sm:$0xff]  ;;  %v2803_v8 = vld [vmem:[#allocation8 + $0x2e38] sm:$0xff]  ;;  %v2955_v10 = vrot.slane %v7365_v24, %v516_v45 }
 0x4d8   :  { %v2812_v45 = vld [vmem:[#allocation8 + $0x2e80] sm:$0xff] }
 0x4d9   :  { %6694 = vmatpush1.bf16.msra.mxu1 %v6693_v11  ;;  %v6731_v11 = vpack.c.bf16 %v2623_v9, %v2613_v5  ;;  %v2959_v9 = vrot.slane %v7365_v24, %v520_v14 }
 0x4da   :  { %6696 = vmatprep.subr.bf16.mxu1 %v6695_v61  ;;  %v2612_v61 = vld [vmem:[#allocation8 + $0x2840] sm:$0xff] }
 0x4db   :  { %v6733_v63 = vpack.c.bf16 %v2622_v13, %v2612_v61  ;;  %v2802_v61 = vld [vmem:[#allocation8 + $0x2e30] sm:$0xff]  ;;  %v2813_v13 = vld [vmem:[#allocation8 + $0x2e88] sm:$0xff] }
 0x4dd   :  { %6698 = vmatpush1.bf16.msra.mxu1 %v6697_v42  ;;  %v6735_v42 = vpack.c.bf16 %v2643_v23, %v2633_v51  ;;  %v2823_v51 = vld [vmem:[#allocation8 + $0x2ed8] sm:$0xff] }
 0x4de   :  { %6700 = vmatprep.subr.bf16.mxu1 %v6699_v15  ;;  %v2632_v15 = vld [vmem:[#allocation8 + $0x28e0] sm:$0xff] }
 0x4df   :  { %v6737_v20 = vpack.c.bf16 %v2642_v16, %v2632_v15 }
 0x4e1   :  { %6702 = vmatpush1.bf16.msra.mxu1 %v6701_v4  ;;  %v6739_v4 = vpack.c.bf16 %v2663_v19, %v2653_v18  ;;  %v6771_v18 = vpack.c.bf16 %v2823_v51, %v2813_v13  ;;  %v2822_v19 = vld [vmem:[#allocation8 + $0x2ed0] sm:$0xff] }
 0x4e2   :  { %6704 = vmatprep.subr.bf16.mxu1 %v6703_v21  ;;  %v2652_v21 = vld [vmem:[#allocation8 + $0x2980] sm:$0xff]  ;;  %v6773_v14 = vpack.c.bf16 %v2822_v19, %v2812_v45 }
 0x4e3   :  { %v6741_v28 = vpack.c.bf16 %v2662_v25, %v2652_v21  ;;  %v2842_v21 = vld [vmem:[#allocation8 + $0x2f70] sm:$0xff]  ;;  %v2853_v25 = vld [vmem:[#allocation8 + $0x2fc8] sm:$0xff] }
 0x4e5   :  { %6706 = vmatpush1.bf16.msra.mxu1 %v6705_v29  ;;  %v6743_v29 = vpack.c.bf16 %v2683_v27, %v2673_v26  ;;  %v2863_v26 = vld [vmem:[#allocation8 + $0x3018] sm:$0xff] }
 0x4e6   :  { %6708 = vmatprep.subr.bf16.mxu1 %v6707_v31  ;;  %v2672_v31 = vld [vmem:[#allocation8 + $0x2a20] sm:$0xff] }
 0x4e9   :  { %6710 = vmatpush1.bf16.msra.mxu1 %v6709_v38  ;;  %v2702_v38 = vld [vmem:[#allocation8 + $0x2b10] sm:$0xff] }
 0x4ea   :  { %6712 = vmatprep.subr.bf16.mxu1 %v6711_v37  ;;  %v2713_v37 = vld [vmem:[#allocation8 + $0x2b68] sm:$0xff] }
 0x4eb   :  { %v6751_v40 = vpack.c.bf16 %v2723_v59, %v2713_v37  ;;  %v2903_v37 = vld [vmem:[#allocation8 + $0x3158] sm:$0xff] }
 0x4ed   :  { %6714 = vmatpush1.bf16.msra.mxu1 %v6713_v44  ;;  %v2722_v44 = vld [vmem:[#allocation8 + $0x2bb0] sm:$0xff] }
 0x4ee   :  { %6716 = vmatprep.subr.bf16.mxu1 %v6715_v22  ;;  %v2733_v22 = vld [vmem:[#allocation8 + $0x2c08] sm:$0xff]  ;;  %v6753_v55 = vpack.c.bf16 %v2722_v44, %v2712_v41  ;;  %v2902_v41 = vld [vmem:[#allocation8 + $0x3150] sm:$0xff] }
 0x4ef   :  { %v6755_v48 = vpack.c.bf16 %v2743_v54, %v2733_v22  ;;  %v2913_v44 = vld [vmem:[#allocation8 + $0x31a8] sm:$0xff]  ;;  %v2923_v22 = vld [vmem:[#allocation8 + $0x31f8] sm:$0xff] }
 0x4f1   :  { %6718 = vmatpush1.bf16.msra.mxu1 %v6717_v50  ;;  %v2742_v50 = vld [vmem:[#allocation8 + $0x2c50] sm:$0xff] }
 0x4f2   :  { %6720 = vmatprep.subr.bf16.mxu1 %v6719_v30  ;;  %v2753_v30 = vld [vmem:[#allocation8 + $0x2ca8] sm:$0xff]  ;;  %v6757_v56 = vpack.c.bf16 %v2742_v50, %v2732_v49  ;;  %v2922_v49 = vld [vmem:[#allocation8 + $0x31f0] sm:$0xff] }
 0x4f3   :  { %v6759_v57 = vpack.c.bf16 %v2763_v7, %v2753_v30  ;;  %v2925_v30 = vld [vmem:[#allocation10 + $0x8] sm:$0x3] }
 0x4f4   :  { %v2963_v7 = vrot.slane %v2925_v30, %v7192_v43 }
 0x4f5   :  { %6722 = vmatpush1.bf16.msra.mxu1 %v6721_v60  ;;  %v2762_v60 = vld [vmem:[#allocation8 + $0x2cf0] sm:$0xff] }
 0x4f6   :  { %6724 = vmatprep.subr.bf16.mxu1 %v6723_v58  ;;  %v2773_v58 = vld [vmem:[#allocation8 + $0x2d48] sm:$0xff]  ;;  %v6761_v62 = vpack.c.bf16 %v2762_v60, %v2752_v2 }
 0x4f7   :  { %v6763_v3 = vpack.c.bf16 %v2783_v1, %v2773_v58 }
 0x4f9   :  { %6726 = vmatpush1.bf16.msra.mxu1 %v6725_v12  ;;  %v2782_v12 = vld [vmem:[#allocation8 + $0x2d90] sm:$0xff] }
 0x4fa   :  { %6728 = vmatprep.subr.bf16.mxu1 %v6727_v17  ;;  %v2793_v17 = vld [vmem:[#allocation8 + $0x2de8] sm:$0xff]  ;;  %v6765_v5 = vpack.c.bf16 %v2782_v12, %v2772_v6 }
 0x4fd   :  { %6730 = vmatpush1.bf16.msra.mxu1 %v6729_v0  ;;  %v6767_v0 = vpack.c.bf16 %v2803_v8, %v2793_v17 }
 0x4fe   :  { %6732 = vmatprep.subr.bf16.mxu1 %v6731_v11  ;;  %v2792_v11 = vld [vmem:[#allocation8 + $0x2de0] sm:$0xff] }
 0x4ff   :  { %v6769_v15 = vpack.c.bf16 %v2802_v61, %v2792_v11 }
 0x500   :  { %4676 = vmatmul.mubr.f32.vlgmr.msra.gmra.mrb[8].mxu1 %v7301_v52  ;;  %v6745_v52 = vpack.c.bf16 %v2682_v33, %v2672_v31  ;;  %v2862_v31 = vld [vmem:[#allocation8 + $0x3010] sm:$0xff]  ;;  %v2873_v33 = vld [vmem:[#allocation8 + $0x3068] sm:$0xff] }
 0x501   :  { %6734 = vmatpush1.bf16.msra.mxu1 %v6733_v63  ;;  %4746 = vmatprep.mubr.f32.mxu1 %v7316_v47  ;;  %v2692_v47 = vld [vmem:[#allocation8 + $0x2ac0] sm:$0xff] }
 0x502   :  { %6736 = vmatprep.subr.bf16.mxu1 %v6735_v42  ;;  %v6749_v39 = vpack.c.bf16 %v2702_v38, %v2692_v47  ;;  %v2882_v47 = vld [vmem:[#allocation8 + $0x30b0] sm:$0xff]  ;;  %v2893_v38 = vld [vmem:[#allocation8 + $0x3108] sm:$0xff] }
 0x505   :  { %6738 = vmatpush1.bf16.msra.mxu1 %v6737_v20  ;;  %v2833_v20 = vld [vmem:[#allocation8 + $0x2f28] sm:$0xff] }
 0x506   :  { %6740 = vmatprep.subr.bf16.mxu1 %v6739_v4  ;;  %v6775_v24 = vpack.c.bf16 %v2843_v35, %v2833_v20  ;;  %v2832_v4 = vld [vmem:[#allocation8 + $0x2f20] sm:$0xff] }
 0x507   :  { %v6777_v27 = vpack.c.bf16 %v2842_v21, %v2832_v4 }
 0x509   :  { %6742 = vmatpush1.bf16.msra.mxu1 %v6741_v28  ;;  %v6779_v28 = vpack.c.bf16 %v2863_v26, %v2853_v25 }
 0x50a   :  { %6744 = vmatprep.subr.bf16.mxu1 %v6743_v29  ;;  %v2852_v29 = vld [vmem:[#allocation8 + $0x2fc0] sm:$0xff] }
 0x50b   :  { %v6781_v34 = vpack.c.bf16 %v2862_v31, %v2852_v29 }
 0x50d   :  { %6746 = vmatpush1.bf16.msra.mxu1 %v6745_v52  ;;  %v6783_v52 = vpack.c.bf16 %v2883_v32, %v2873_v33 }
 0x50e   :  { %6748 = vmatprep.subr.bf16.mxu1 %v6747_v36  ;;  %v2872_v36 = vld [vmem:[#allocation8 + $0x3060] sm:$0xff] }
 0x50f   :  { %v6785_v59 = vpack.c.bf16 %v2882_v47, %v2872_v36 }
 0x511   :  { %6750 = vmatpush1.bf16.msra.mxu1 %v6749_v39  ;;  %v6787_v39 = vpack.c.bf16 %v2903_v37, %v2893_v38 }
 0x512   :  { %6752 = vmatprep.subr.bf16.mxu1 %v6751_v40  ;;  %v2892_v40 = vld [vmem:[#allocation8 + $0x3100] sm:$0xff] }
 0x513   :  { %v6789_v54 = vpack.c.bf16 %v2902_v41, %v2892_v40 }
 0x515   :  { %6754 = vmatpush1.bf16.msra.mxu1 %v6753_v55  ;;  %v6791_v55 = vpack.c.bf16 %v2923_v22, %v2913_v44 }
 0x516   :  { %6756 = vmatprep.subr.bf16.mxu1 %v6755_v48  ;;  %v2912_v48 = vld [vmem:[#allocation8 + $0x31a0] sm:$0xff] }
 0x517   :  { %v6793_v50 = vpack.c.bf16 %v2922_v49, %v2912_v48 }
 0x519   :  { %6758 = vmatpush1.bf16.msra.mxu1 %v6757_v56  ;;  %v2967_v56 = vrot.slane %v2925_v30, %v7197_v46 }
 0x51a   :  { %6760 = vmatprep.subr.bf16.mxu1 %v6759_v57 }
 0x51d   :  { %6762 = vmatpush1.bf16.msra.mxu1 %v6761_v62 }
 0x51e   :  { %6764 = vmatprep.subr.bf16.mxu1 %v6763_v3 }
 0x520   :  { %v4393_v23 = vpop.f32.mrb[12].mxu0 }
 0x521   :  { %v6815_v63 = vadd.f32 %v4393_v23, %v2955_v10  ;;  %v4395_v42 = vpop.f32.mrb[13].mxu0  ;;  %6766 = vmatpush1.bf16.msra.mxu1 %v6765_v5 }
 0x522   :  { %v6816_v16 = vadd.f32 %v4395_v42, %v2959_v9  ;;  %6768 = vmatprep.subr.bf16.mxu1 %v6767_v0 }
 0x523   :  { %4759 = vst [vmem:[#allocation11 + $0x30] sm:$0xff] %v6815_v63 }
 0x524   :  { %4760 = vst [vmem:[#allocation11 + $0x38] sm:$0xff] %v6816_v16 }
 0x525   :  { %6770 = vmatpush1.bf16.msra.mxu1 %v6769_v15 }
 0x526   :  { %6772 = vmatprep.subr.bf16.mxu1 %v6771_v18 }
 0x529   :  { %6774 = vmatpush1.bf16.msra.mxu1 %v6773_v14 }
 0x52a   :  { %6776 = vmatprep.subr.bf16.mxu1 %v6775_v24 }
 0x52d   :  { %6778 = vmatpush1.bf16.msra.mxu1 %v6777_v27 }
 0x52e   :  { %6780 = vmatprep.subr.bf16.mxu1 %v6779_v28 }
 0x531   :  { %6782 = vmatpush1.bf16.msra.mxu1 %v6781_v34 }
 0x532   :  { %6784 = vmatprep.subr.bf16.mxu1 %v6783_v52 }
 0x535   :  { %6786 = vmatpush1.bf16.msra.mxu1 %v6785_v59 }
 0x536   :  { %6788 = vmatprep.subr.bf16.mxu1 %v6787_v39 }
 0x539   :  { %6790 = vmatpush1.bf16.msra.mxu1 %v6789_v54 }
 0x53a   :  { %6792 = vmatprep.subr.bf16.mxu1 %v6791_v55 }
 0x53d   :  { %6794 = vmatpush1.bf16.msra.mxu1 %v6793_v50 }
 0x540   :  { %4747 = vmatmul.mubr.f32.vlgmr.msra.gmra.mrb[8].mxu1 %v7319_v53 }
 0x613   :  { %v4748_v57 = vpop.f32.mrb[8].mxu1 }
 0x614   :  { %v6817_v2 = vadd.f32 %v4748_v57, %v2963_v7  ;;  %v4750_v60 = vpop.f32.mrb[9].mxu1 }
 0x615   :  { %v6818_v58 = vadd.f32 %v4750_v60, %v2967_v56 }
 0x616   :  { %4761 = vst [vmem:[#allocation11 + $0x40] sm:$0xff] %v6817_v2 }
 0x617   :  { %4762 = vst [vmem:[#allocation11 + $0x48] sm:$0xff] %v6818_v58 }
 0x618   :  { %7040 = shalt.err (!%p7037_p2)
}
 0x619   :  { %s7041_s28 = scalar_lea.hbm %s7401_s5, 1280 }
 0x61a   :  { %p7042_p3 = scmp.ne.s32.totalorder %s7401_s5, %s7041_s28  ;;  %p7045_p4 = scmp.lt.u32.totalorder %s7041_s28, %s7401_s5 }
 0x61c   :  { %p7047_p5 = pnand %p7045_p4, %p7042_p3 }
 0x61e   :  { %7050 = shalt.err (!%p7047_p5)
}
 0x61f   :  { %4772 = dma.vmem_to_hbm [thread:$0]  %s4770_s25, 1280, %s7401_s5, [#allocation4]  }
 0x620   :  { %7057 = dma.done.wait [#allocation4], 1280  }
 0x621   :  { %7058 = vsyncadd [#allocation4], 4294966016 }
 0x622   :  { %4776 = vsyncpa [#allocation3], 1 }
 0x623   :  { %4777 = vsyncpa [#allocation6], 1 }
 0x624   :  { %4778 = vsyncpa [#allocation9], 1 }
 0x625   :  { %4779 = vsyncpa [#allocation4], 1 }

</bundles_post_ra>
